<compile_context>
chip_gen: v5e
topology: v5e:2x2
jax: 0.10.0
libtpu: 0.0.40
codegen_flags: <defaults>
</compile_context>

<pallas_src>
import jax
import jax.numpy as jnp
import numpy as np
from jax.experimental import pallas as pl
from jax.experimental.pallas import tpu as pltpu


def _basic_block_kernel(x_ref, w1_ref, w2_ref, b1_ref, b2_ref, out_ref,
                        patch_ref):
    """One batch image per grid step.

    x_ref    : (1, H, W, Cp)    bf16 NHWC input (identity read from same block)
    w1/w2    : (3, 3*Cp, Cp)    bf16 conv weights (BN scale pre-folded),
                                rows ordered kw-major / Cin-minor
    b1/b2    : (1, Cp)          f32 folded BN bias
    out_ref  : (1, H, W, Cp)    bf16 NHWC output
    patch_ref: ((H+2)*W, 3*Cp)  bf16 VMEM scratch: row-padded im2col patch,
                                reused by both convs
    """
    H = out_ref.shape[1]
    W = out_ref.shape[2]
    Cp = out_ref.shape[3]

    # Column (kw halo) masks, hoisted once per step; only (1, W, Cp).
    col = jax.lax.broadcasted_iota(jnp.int32, (1, W, Cp), 1)
    first_col = col == 0
    last_col = col == W - 1

    # Zero the two kh-halo row blocks of the patch scratch.  Done every grid
    # step (cheap: 2*W rows) so it stays correct under megacore grid sharding
    # where program_id(0)==0 may not run on every core.
    zero_rows = jnp.zeros((W, 3 * Cp), jnp.bfloat16)
    patch_ref[0:W, :] = zero_rows
    patch_ref[(H + 1) * W:(H + 2) * W, :] = zero_rows

    def conv3x3(src32, src16, w_ref):
        """3x3 'same' conv.  src32 / src16 are (H, W, Cp) f32 / bf16 views of
        the same tensor.  Returns the (H*W, Cp) f32 accumulator."""
        # kw halo taps via XLU sublane rotation + masking (hoisted out of the
        # kh loop).  left[h,w] = x[h,w-1], right[h,w] = x[h,w+1], edges zeroed.
        left = jnp.where(first_col, 0.0, pltpu.roll(src32, shift=1, axis=1))
        right = jnp.where(last_col, 0.0, pltpu.roll(src32, shift=W - 1, axis=1))

        # Write the bf16 [left | center | right] patch once into the interior
        # rows of the persistent scratch (halo rows already zero).
        patch_ref[W:(H + 1) * W, 0 * Cp:1 * Cp] = (
            left.astype(jnp.bfloat16).reshape(H * W, Cp))
        patch_ref[W:(H + 1) * W, 1 * Cp:2 * Cp] = src16.reshape(H * W, Cp)
        patch_ref[W:(H + 1) * W, 2 * Cp:3 * Cp] = (
            right.astype(jnp.bfloat16).reshape(H * W, Cp))

        # Three fat-K (K = 3*Cp) matmuls, one per kh tap; each LHS is a
        # zero-cost static row-offset view of the scratch.
        acc = None
        for kh in range(3):
            lhs = patch_ref[kh * W:(kh + H) * W, :]
            part = jnp.dot(lhs, w_ref[kh], preferred_element_type=jnp.float32)
            acc = part if acc is None else acc + part
        return acc

    x16 = x_ref[0]                                   # (H, W, Cp) bf16
    x32 = x16.astype(jnp.float32)

    # ---- conv1 (BN scale folded into w1) -> +bias -> relu ----
    acc1 = conv3x3(x32, x16, w1_ref)
    y1 = jnp.maximum(acc1 + b1_ref[...], 0.0)        # (H*W, Cp) f32

    # ---- conv2 (BN scale folded into w2) -> +bias -> +identity -> relu ----
    y1_hw = y1.reshape(H, W, Cp)
    acc2 = conv3x3(y1_hw, y1_hw.astype(jnp.bfloat16), w2_ref)
    out = acc2 + b2_ref[...] + x32.reshape(H * W, Cp)
    out_ref[...] = jnp.maximum(out, 0.0).astype(out_ref.dtype).reshape(
        1, H, W, Cp)


def basic_block_forward(x_nchw, w1, w2, bn1, bn2, eps=1e-5):
    """Pallas-backed BasicBlock forward.  Input/output are NCHW f32."""
    B, C, H, W = x_nchw.shape
    assert w1.shape == (3, 3, C, C) and w2.shape == (3, 3, C, C), (
        "only the stride=1, no-downsample BasicBlock path (Cin == Cout) is "
        "implemented")

    Cp = ((C + 127) // 128) * 128          # lane-dense channel padding

    # NCHW -> bf16 NHWC, channel pad.
    x = jnp.transpose(x_nchw, (0, 2, 3, 1)).astype(jnp.bfloat16)
    x = jnp.pad(x, ((0, 0), (0, 0), (0, 0), (0, Cp - C)))

    def fold(bn):
        gamma, beta, mean, var = (jnp.asarray(a, jnp.float32) for a in bn)
        scale = gamma / jnp.sqrt(var + eps)
        bias = beta - mean * scale
        return scale, bias

    def prep_w(w, scale):
        # Fold the BN scale into the Cout axis in f32 (before the bf16 cast),
        # pad channels, reorder (kh, kw, Cin, Cout) -> (kh, kw*Cin, Cout):
        # kw-major / Cin-minor rows match the [left|center|right] lane layout.
        wf = w.astype(jnp.float32) * scale[None, None, None, :]
        wp = jnp.pad(wf, ((0, 0), (0, 0), (0, Cp - C), (0, Cp - C)))
        return wp.reshape(3, 3 * Cp, Cp).astype(jnp.bfloat16)

    s1, b1 = fold(bn1)
    s2, b2 = fold(bn2)
    w1r = prep_w(w1, s1)
    w2r = prep_w(w2, s2)
    b1p = jnp.pad(b1, (0, Cp - C)).reshape(1, Cp)
    b2p = jnp.pad(b2, (0, Cp - C)).reshape(1, Cp)

    def run(single_buffer):
        # VMEM budget: double-buffered bf16 x/out blocks, weight slabs (x1 or
        # x2), biases, plus the bf16 patch scratch.
        act_blk = H * W * Cp * 2
        patch_blk = (H + 2) * W * 3 * Cp * 2
        w_blk = 2 * 3 * 3 * Cp * Cp * 2
        bias_blk = 2 * Cp * 4
        w_bufs = 1 if single_buffer else 2
        need = 2 * 2 * act_blk + patch_blk + w_bufs * w_blk + 2 * bias_blk
        vmem_limit = int(min(64 << 20, max(32 << 20, 2 * need + (8 << 20))))

        def const_spec(shape):
            # Batch-invariant operands: a second pipeline buffer is waste.
            imap = lambda b, _n=len(shape): (0,) * _n
            if single_buffer:
                return pl.BlockSpec(shape, imap, pipeline_mode=pl.Buffered(1))
            return pl.BlockSpec(shape, imap)

        return pl.pallas_call(
            _basic_block_kernel,
            out_shape=jax.ShapeDtypeStruct((B, H, W, Cp), jnp.bfloat16),
            grid_spec=pltpu.PrefetchScalarGridSpec(
                num_scalar_prefetch=0,
                grid=(B,),
                in_specs=[
                    pl.BlockSpec((1, H, W, Cp), lambda b: (b, 0, 0, 0)),
                    const_spec((3, 3 * Cp, Cp)),
                    const_spec((3, 3 * Cp, Cp)),
                    const_spec((1, Cp)),
                    const_spec((1, Cp)),
                ],
                out_specs=pl.BlockSpec((1, H, W, Cp), lambda b: (b, 0, 0, 0)),
                scratch_shapes=[
                    pltpu.VMEM(((H + 2) * W, 3 * Cp), jnp.bfloat16)],
            ),
            compiler_params=pltpu.CompilerParams(
                dimension_semantics=("parallel",),
                vmem_limit_bytes=vmem_limit),
        )(x, w1r, w2r, b1p, b2p)

    try:
        out_nhwc = jax.block_until_ready(run(single_buffer=True))
    except Exception:
        # Fallback if pipeline_mode=pl.Buffered(1) is unsupported on this
        # jax/Mosaic version: identical kernel, default double-buffering.
        out_nhwc = jax.block_until_ready(run(single_buffer=False))

    out_nhwc = out_nhwc[..., :C].astype(jnp.float32)   # strip channel padding
    return jnp.transpose(out_nhwc, (0, 3, 1, 2))        # NHWC -> NCHW


def _reference_forward(x_nchw, w1, w2, bn1, bn2, eps=1e-5):
    """Pure-JAX reference (lax conv, f32) for correctness check."""
    x = jnp.transpose(x_nchw, (0, 2, 3, 1)).astype(jnp.float32)
    dn = jax.lax.conv_dimension_numbers(x.shape, w1.shape,
                                        ("NHWC", "HWIO", "NHWC"))

    def conv(inp, w):
        return jax.lax.conv_general_dilated(inp, w, (1, 1), ((1, 1), (1, 1)),
                                            dimension_numbers=dn)

    def bn(inp, p):
        gamma, beta, mean, var = p
        return (inp - mean) / jnp.sqrt(var + eps) * gamma + beta

    out = jax.nn.relu(bn(conv(x, w1), bn1))
    out = bn(conv(out, w2), bn2)
    out = jax.nn.relu(out + x)
    return jnp.transpose(out, (0, 3, 1, 2))


if __name__ == "__main__":
    key = jax.random.PRNGKey(0)
    B, C, H, W = 2, 4, 16, 16          # inplanes = planes = 4, stride = 1
    k_x, k_w1, k_w2, k_g1, k_b1, k_m1, k_v1, k_g2, k_b2, k_m2, k_v2 = \
        jax.random.split(key, 11)

    x = jax.random.normal(k_x, (B, C, H, W), dtype=jnp.float32)

    # Conv weights in HWIO, deterministic init.
    w1 = jax.random.normal(k_w1, (3, 3, C, C), dtype=jnp.float32) * 0.1
    w2 = jax.random.normal(k_w2, (3, 3, C, C), dtype=jnp.float32) * 0.1

    # BatchNorm params: (gamma, beta, running_mean, running_var)
    bn1 = (jax.random.normal(k_g1, (C,)) * 0.1 + 1.0,
           jax.random.normal(k_b1, (C,)) * 0.1,
           jax.random.normal(k_m1, (C,)) * 0.1,
           jax.nn.softplus(jax.random.normal(k_v1, (C,))) + 0.5)
    bn2 = (jax.random.normal(k_g2, (C,)) * 0.1 + 1.0,
           jax.random.normal(k_b2, (C,)) * 0.1,
           jax.random.normal(k_m2, (C,)) * 0.1,
           jax.nn.softplus(jax.random.normal(k_v2, (C,))) + 0.5)

    out = basic_block_forward(x, w1, w2, bn1, bn2)
    out = jax.block_until_ready(out)

    ref = jax.block_until_ready(_reference_forward(x, w1, w2, bn1, bn2))
    # bf16 activations + bf16 weights on the MXU with f32 accumulation:
    # tolerance loosened accordingly.
    np.testing.assert_allclose(np.asarray(out), np.asarray(ref),
                               rtol=4e-2, atol=2e-2)

    print("KERNEL_OK")
</pallas_src>

<mosaic_0001>
module attributes {stable_mosaic.version = 11 : i64} {
  func.func @_basic_block_kernel(%arg0: i32, %arg1: memref<1x16x16x128xbf16, #tpu.memory_space<vmem>>, %arg2: memref<3x384x128xbf16, #tpu.memory_space<vmem>>, %arg3: memref<3x384x128xbf16, #tpu.memory_space<vmem>>, %arg4: memref<1x128xf32, #tpu.memory_space<vmem>>, %arg5: memref<1x128xf32, #tpu.memory_space<vmem>>, %arg6: memref<1x16x16x128xbf16, #tpu.memory_space<vmem>>, %arg7: memref<288x384xbf16, #tpu.memory_space<vmem>>) attributes {dimension_semantics = [#tpu.dimension_semantics<parallel>], iteration_bounds = array<i64: 2>, scalar_prefetch = 0 : i64, scratch_operands = 1 : i64, tpu.core_type = #tpu.core_type<tc>, window_params = [{transform_indices = @transform_0, window_bounds = array<i64: 1, 16, 16, 128>}, {pipeline_mode = #tpu.pipeline_mode<synchronous>, transform_indices = @transform_1, window_bounds = array<i64: 3, 384, 128>}, {pipeline_mode = #tpu.pipeline_mode<synchronous>, transform_indices = @transform_2, window_bounds = array<i64: 3, 384, 128>}, {pipeline_mode = #tpu.pipeline_mode<synchronous>, transform_indices = @transform_3, window_bounds = array<i64: 1, 128>}, {pipeline_mode = #tpu.pipeline_mode<synchronous>, transform_indices = @transform_4, window_bounds = array<i64: 1, 128>}, {transform_indices = @transform_5, window_bounds = array<i64: 1, 16, 16, 128>}]} {
    %0 = tpu.iota {dimensions = array<i32: 1>} : vector<1x16x128xi32>
    %c0_i32 = arith.constant 0 : i32
    %1 = vector.broadcast %c0_i32 : i32 to vector<1x16x128xi32>
    %2 = arith.cmpi eq, %0, %1 : vector<1x16x128xi32>
    %c15_i32 = arith.constant 15 : i32
    %3 = vector.broadcast %c15_i32 : i32 to vector<1x16x128xi32>
    %4 = arith.cmpi eq, %0, %3 : vector<1x16x128xi32>
    %cst = arith.constant 0.000000e+00 : bf16
    %5 = vector.broadcast %cst : bf16 to vector<16x384xbf16>
    %c0 = arith.constant 0 : index
    %c0_0 = arith.constant 0 : index
    %6 = vector.load %arg7[%c0, %c0_0] : memref<288x384xbf16, #tpu.memory_space<vmem>>, vector<16x384xbf16>
    tpu.vector_store %arg7[%c0, %c0_0], %5 {strides = array<i32>} : memref<288x384xbf16, #tpu.memory_space<vmem>>, vector<16x384xbf16>,
    %c272 = arith.constant 272 : index
    %c0_1 = arith.constant 0 : index
    %7 = vector.load %arg7[%c272, %c0_1] : memref<288x384xbf16, #tpu.memory_space<vmem>>, vector<16x384xbf16>
    tpu.vector_store %arg7[%c272, %c0_1], %5 {strides = array<i32>} : memref<288x384xbf16, #tpu.memory_space<vmem>>, vector<16x384xbf16>,
    %c0_2 = arith.constant 0 : index
    %c0_3 = arith.constant 0 : index
    %c0_4 = arith.constant 0 : index
    %c0_5 = arith.constant 0 : index
    %8 = vector.load %arg1[%c0_2, %c0_3, %c0_4, %c0_5] : memref<1x16x16x128xbf16, #tpu.memory_space<vmem>>, vector<1x16x16x128xbf16>
    %9 = vector.shape_cast %8 : vector<1x16x16x128xbf16> to vector<16x16x128xbf16>
    %10 = arith.extf %9 : vector<16x16x128xbf16> to vector<16x16x128xf32>
    %c1_i32 = arith.constant 1 : i32
    %11 = tpu.dynamic_rotate %10 by %c1_i32 dim 1 : vector<16x16x128xf32>, i32 -> vector<16x16x128xf32>
    %cst_6 = arith.constant 0.000000e+00 : f32
    %12 = vector.shape_cast %2 : vector<1x16x128xi1> to vector<1x16x128xi1>
    %13 = vector.broadcast %12 : vector<1x16x128xi1> to vector<16x16x128xi1>
    %14 = vector.broadcast %cst_6 : f32 to vector<16x16x128xf32>
    %15 = arith.select %13, %14, %11 : vector<16x16x128xi1>, vector<16x16x128xf32>
    %c15_i32_7 = arith.constant 15 : i32
    %16 = tpu.dynamic_rotate %10 by %c15_i32_7 dim 1 : vector<16x16x128xf32>, i32 -> vector<16x16x128xf32>
    %cst_8 = arith.constant 0.000000e+00 : f32
    %17 = vector.shape_cast %4 : vector<1x16x128xi1> to vector<1x16x128xi1>
    %18 = vector.broadcast %17 : vector<1x16x128xi1> to vector<16x16x128xi1>
    %19 = vector.broadcast %cst_8 : f32 to vector<16x16x128xf32>
    %20 = arith.select %18, %19, %16 : vector<16x16x128xi1>, vector<16x16x128xf32>
    %21 = arith.truncf %15 : vector<16x16x128xf32> to vector<16x16x128xbf16>
    %22 = vector.shape_cast %21 : vector<16x16x128xbf16> to vector<256x128xbf16>
    %c16 = arith.constant 16 : index
    %c0_9 = arith.constant 0 : index
    %23 = vector.load %arg7[%c16, %c0_9] : memref<288x384xbf16, #tpu.memory_space<vmem>>, vector<256x128xbf16>
    tpu.vector_store %arg7[%c16, %c0_9], %22 {strides = array<i32>} : memref<288x384xbf16, #tpu.memory_space<vmem>>, vector<256x128xbf16>,
    %24 = vector.shape_cast %9 : vector<16x16x128xbf16> to vector<256x128xbf16>
    %c16_10 = arith.constant 16 : index
    %c128 = arith.constant 128 : index
    %25 = vector.load %arg7[%c16_10, %c128] : memref<288x384xbf16, #tpu.memory_space<vmem>>, vector<256x128xbf16>
    tpu.vector_store %arg7[%c16_10, %c128], %24 {strides = array<i32>} : memref<288x384xbf16, #tpu.memory_space<vmem>>, vector<256x128xbf16>,
    %26 = arith.truncf %20 : vector<16x16x128xf32> to vector<16x16x128xbf16>
    %27 = vector.shape_cast %26 : vector<16x16x128xbf16> to vector<256x128xbf16>
    %c16_11 = arith.constant 16 : index
    %c256 = arith.constant 256 : index
    %28 = vector.load %arg7[%c16_11, %c256] : memref<288x384xbf16, #tpu.memory_space<vmem>>, vector<256x128xbf16>
    tpu.vector_store %arg7[%c16_11, %c256], %27 {strides = array<i32>} : memref<288x384xbf16, #tpu.memory_space<vmem>>, vector<256x128xbf16>,
    %c0_12 = arith.constant 0 : index
    %c0_13 = arith.constant 0 : index
    %29 = vector.load %arg7[%c0_12, %c0_13] : memref<288x384xbf16, #tpu.memory_space<vmem>>, vector<256x384xbf16>
    %c0_14 = arith.constant 0 : index
    %c0_15 = arith.constant 0 : index
    %c0_16 = arith.constant 0 : index
    %30 = vector.load %arg2[%c0_14, %c0_15, %c0_16] : memref<3x384x128xbf16, #tpu.memory_space<vmem>>, vector<1x384x128xbf16>
    %31 = vector.shape_cast %30 : vector<1x384x128xbf16> to vector<384x128xbf16>
    %cst_17 = arith.constant dense<0.000000e+00> : vector<256x128xf32>
    %32 = tpu.matmul %29, %31, %cst_17 {dimension_numbers = #tpu.dot_dimension_numbers<[1], [0], [0], [1], [0, 0, 1, 1], [], []>} : vector<256x384xbf16>, vector<384x128xbf16>, vector<256x128xf32> -> vector<256x128xf32>
    %c16_18 = arith.constant 16 : index
    %c0_19 = arith.constant 0 : index
    %33 = vector.load %arg7[%c16_18, %c0_19] : memref<288x384xbf16, #tpu.memory_space<vmem>>, vector<256x384xbf16>
    %c1 = arith.constant 1 : index
    %c0_20 = arith.constant 0 : index
    %c0_21 = arith.constant 0 : index
    %34 = vector.load %arg2[%c1, %c0_20, %c0_21] : memref<3x384x128xbf16, #tpu.memory_space<vmem>>, vector<1x384x128xbf16>
    %35 = vector.shape_cast %34 : vector<1x384x128xbf16> to vector<384x128xbf16>
    %cst_22 = arith.constant dense<0.000000e+00> : vector<256x128xf32>
    %36 = tpu.matmul %33, %35, %cst_22 {dimension_numbers = #tpu.dot_dimension_numbers<[1], [0], [0], [1], [0, 0, 1, 1], [], []>} : vector<256x384xbf16>, vector<384x128xbf16>, vector<256x128xf32> -> vector<256x128xf32>
    %37 = arith.addf %32, %36 : vector<256x128xf32>
    %c32 = arith.constant 32 : index
    %c0_23 = arith.constant 0 : index
    %38 = vector.load %arg7[%c32, %c0_23] : memref<288x384xbf16, #tpu.memory_space<vmem>>, vector<256x384xbf16>
    %c2 = arith.constant 2 : index
    %c0_24 = arith.constant 0 : index
    %c0_25 = arith.constant 0 : index
    %39 = vector.load %arg2[%c2, %c0_24, %c0_25] : memref<3x384x128xbf16, #tpu.memory_space<vmem>>, vector<1x384x128xbf16>
    %40 = vector.shape_cast %39 : vector<1x384x128xbf16> to vector<384x128xbf16>
    %cst_26 = arith.constant dense<0.000000e+00> : vector<256x128xf32>
    %41 = tpu.matmul %38, %40, %cst_26 {dimension_numbers = #tpu.dot_dimension_numbers<[1], [0], [0], [1], [0, 0, 1, 1], [], []>} : vector<256x384xbf16>, vector<384x128xbf16>, vector<256x128xf32> -> vector<256x128xf32>
    %42 = arith.addf %37, %41 : vector<256x128xf32>
    %c0_27 = arith.constant 0 : index
    %c0_28 = arith.constant 0 : index
    %43 = vector.load %arg4[%c0_27, %c0_28] : memref<1x128xf32, #tpu.memory_space<vmem>>, vector<1x128xf32>
    %44 = vector.broadcast %43 : vector<1x128xf32> to vector<256x128xf32>
    %45 = arith.addf %42, %44 : vector<256x128xf32>
    %cst_29 = arith.constant 0.000000e+00 : f32
    %46 = vector.broadcast %cst_29 : f32 to vector<256x128xf32>
    %47 = arith.maximumf %45, %46 : vector<256x128xf32>
    %48 = vector.shape_cast %47 : vector<256x128xf32> to vector<16x16x128xf32>
    %49 = arith.truncf %48 : vector<16x16x128xf32> to vector<16x16x128xbf16>
    %c1_i32_30 = arith.constant 1 : i32
    %50 = tpu.dynamic_rotate %48 by %c1_i32_30 dim 1 : vector<16x16x128xf32>, i32 -> vector<16x16x128xf32>
    %cst_31 = arith.constant 0.000000e+00 : f32
    %51 = vector.shape_cast %2 : vector<1x16x128xi1> to vector<1x16x128xi1>
    %52 = vector.broadcast %51 : vector<1x16x128xi1> to vector<16x16x128xi1>
    %53 = vector.broadcast %cst_31 : f32 to vector<16x16x128xf32>
    %54 = arith.select %52, %53, %50 : vector<16x16x128xi1>, vector<16x16x128xf32>
    %c15_i32_32 = arith.constant 15 : i32
    %55 = tpu.dynamic_rotate %48 by %c15_i32_32 dim 1 : vector<16x16x128xf32>, i32 -> vector<16x16x128xf32>
    %cst_33 = arith.constant 0.000000e+00 : f32
    %56 = vector.shape_cast %4 : vector<1x16x128xi1> to vector<1x16x128xi1>
    %57 = vector.broadcast %56 : vector<1x16x128xi1> to vector<16x16x128xi1>
    %58 = vector.broadcast %cst_33 : f32 to vector<16x16x128xf32>
    %59 = arith.select %57, %58, %55 : vector<16x16x128xi1>, vector<16x16x128xf32>
    %60 = arith.truncf %54 : vector<16x16x128xf32> to vector<16x16x128xbf16>
    %61 = vector.shape_cast %60 : vector<16x16x128xbf16> to vector<256x128xbf16>
    %c16_34 = arith.constant 16 : index
    %c0_35 = arith.constant 0 : index
    %62 = vector.load %arg7[%c16_34, %c0_35] : memref<288x384xbf16, #tpu.memory_space<vmem>>, vector<256x128xbf16>
    tpu.vector_store %arg7[%c16_34, %c0_35], %61 {strides = array<i32>} : memref<288x384xbf16, #tpu.memory_space<vmem>>, vector<256x128xbf16>,
    %63 = vector.shape_cast %49 : vector<16x16x128xbf16> to vector<256x128xbf16>
    %c16_36 = arith.constant 16 : index
    %c128_37 = arith.constant 128 : index
    %64 = vector.load %arg7[%c16_36, %c128_37] : memref<288x384xbf16, #tpu.memory_space<vmem>>, vector<256x128xbf16>
    tpu.vector_store %arg7[%c16_36, %c128_37], %63 {strides = array<i32>} : memref<288x384xbf16, #tpu.memory_space<vmem>>, vector<256x128xbf16>,
    %65 = arith.truncf %59 : vector<16x16x128xf32> to vector<16x16x128xbf16>
    %66 = vector.shape_cast %65 : vector<16x16x128xbf16> to vector<256x128xbf16>
    %c16_38 = arith.constant 16 : index
    %c256_39 = arith.constant 256 : index
    %67 = vector.load %arg7[%c16_38, %c256_39] : memref<288x384xbf16, #tpu.memory_space<vmem>>, vector<256x128xbf16>
    tpu.vector_store %arg7[%c16_38, %c256_39], %66 {strides = array<i32>} : memref<288x384xbf16, #tpu.memory_space<vmem>>, vector<256x128xbf16>,
    %c0_40 = arith.constant 0 : index
    %c0_41 = arith.constant 0 : index
    %68 = vector.load %arg7[%c0_40, %c0_41] : memref<288x384xbf16, #tpu.memory_space<vmem>>, vector<256x384xbf16>
    %c0_42 = arith.constant 0 : index
    %c0_43 = arith.constant 0 : index
    %c0_44 = arith.constant 0 : index
    %69 = vector.load %arg3[%c0_42, %c0_43, %c0_44] : memref<3x384x128xbf16, #tpu.memory_space<vmem>>, vector<1x384x128xbf16>
    %70 = vector.shape_cast %69 : vector<1x384x128xbf16> to vector<384x128xbf16>
    %cst_45 = arith.constant dense<0.000000e+00> : vector<256x128xf32>
    %71 = tpu.matmul %68, %70, %cst_45 {dimension_numbers = #tpu.dot_dimension_numbers<[1], [0], [0], [1], [0, 0, 1, 1], [], []>} : vector<256x384xbf16>, vector<384x128xbf16>, vector<256x128xf32> -> vector<256x128xf32>
    %c16_46 = arith.constant 16 : index
    %c0_47 = arith.constant 0 : index
    %72 = vector.load %arg7[%c16_46, %c0_47] : memref<288x384xbf16, #tpu.memory_space<vmem>>, vector<256x384xbf16>
    %c1_48 = arith.constant 1 : index
    %c0_49 = arith.constant 0 : index
    %c0_50 = arith.constant 0 : index
    %73 = vector.load %arg3[%c1_48, %c0_49, %c0_50] : memref<3x384x128xbf16, #tpu.memory_space<vmem>>, vector<1x384x128xbf16>
    %74 = vector.shape_cast %73 : vector<1x384x128xbf16> to vector<384x128xbf16>
    %cst_51 = arith.constant dense<0.000000e+00> : vector<256x128xf32>
    %75 = tpu.matmul %72, %74, %cst_51 {dimension_numbers = #tpu.dot_dimension_numbers<[1], [0], [0], [1], [0, 0, 1, 1], [], []>} : vector<256x384xbf16>, vector<384x128xbf16>, vector<256x128xf32> -> vector<256x128xf32>
    %76 = arith.addf %71, %75 : vector<256x128xf32>
    %c32_52 = arith.constant 32 : index
    %c0_53 = arith.constant 0 : index
    %77 = vector.load %arg7[%c32_52, %c0_53] : memref<288x384xbf16, #tpu.memory_space<vmem>>, vector<256x384xbf16>
    %c2_54 = arith.constant 2 : index
    %c0_55 = arith.constant 0 : index
    %c0_56 = arith.constant 0 : index
    %78 = vector.load %arg3[%c2_54, %c0_55, %c0_56] : memref<3x384x128xbf16, #tpu.memory_space<vmem>>, vector<1x384x128xbf16>
    %79 = vector.shape_cast %78 : vector<1x384x128xbf16> to vector<384x128xbf16>
    %cst_57 = arith.constant dense<0.000000e+00> : vector<256x128xf32>
    %80 = tpu.matmul %77, %79, %cst_57 {dimension_numbers = #tpu.dot_dimension_numbers<[1], [0], [0], [1], [0, 0, 1, 1], [], []>} : vector<256x384xbf16>, vector<384x128xbf16>, vector<256x128xf32> -> vector<256x128xf32>
    %81 = arith.addf %76, %80 : vector<256x128xf32>
    %c0_58 = arith.constant 0 : index
    %c0_59 = arith.constant 0 : index
    %82 = vector.load %arg5[%c0_58, %c0_59] : memref<1x128xf32, #tpu.memory_space<vmem>>, vector<1x128xf32>
    %83 = vector.broadcast %82 : vector<1x128xf32> to vector<256x128xf32>
    %84 = arith.addf %81, %83 : vector<256x128xf32>
    %85 = vector.shape_cast %10 : vector<16x16x128xf32> to vector<256x128xf32>
    %86 = arith.addf %84, %85 : vector<256x128xf32>
    %cst_60 = arith.constant 0.000000e+00 : f32
    %87 = vector.broadcast %cst_60 : f32 to vector<256x128xf32>
    %88 = arith.maximumf %86, %87 : vector<256x128xf32>
    %89 = arith.truncf %88 : vector<256x128xf32> to vector<256x128xbf16>
    %90 = vector.shape_cast %89 : vector<256x128xbf16> to vector<1x16x16x128xbf16>
    %c0_61 = arith.constant 0 : index
    %c0_62 = arith.constant 0 : index
    %c0_63 = arith.constant 0 : index
    %c0_64 = arith.constant 0 : index
    %91 = vector.load %arg6[%c0_61, %c0_62, %c0_63, %c0_64] : memref<1x16x16x128xbf16, #tpu.memory_space<vmem>>, vector<1x16x16x128xbf16>
    tpu.vector_store %arg6[%c0_61, %c0_62, %c0_63, %c0_64], %90 {strides = array<i32>} : memref<1x16x16x128xbf16, #tpu.memory_space<vmem>>, vector<1x16x16x128xbf16>,
    return
  }
  func.func @transform_0(%arg0: i32) -> (i32, i32, i32, i32) {
    %c0_i32 = arith.constant 0 : i32
    %c0_i32_0 = arith.constant 0 : i32
    %c0_i32_1 = arith.constant 0 : i32
    %c0_i32_2 = arith.constant 0 : i32
    return %arg0, %c0_i32, %c0_i32_0, %c0_i32_1 : i32, i32, i32, i32
  }
  func.func @transform_1(%arg0: i32) -> (i32, i32, i32) {
    %c0_i32 = arith.constant 0 : i32
    %c0_i32_0 = arith.constant 0 : i32
    %c0_i32_1 = arith.constant 0 : i32
    %c0_i32_2 = arith.constant 0 : i32
    return %c0_i32, %c0_i32_0, %c0_i32_1 : i32, i32, i32
  }
  func.func @transform_2(%arg0: i32) -> (i32, i32, i32) {
    %c0_i32 = arith.constant 0 : i32
    %c0_i32_0 = arith.constant 0 : i32
    %c0_i32_1 = arith.constant 0 : i32
    %c0_i32_2 = arith.constant 0 : i32
    return %c0_i32, %c0_i32_0, %c0_i32_1 : i32, i32, i32
  }
  func.func @transform_3(%arg0: i32) -> (i32, i32) {
    %c0_i32 = arith.constant 0 : i32
    %c0_i32_0 = arith.constant 0 : i32
    %c0_i32_1 = arith.constant 0 : i32
    return %c0_i32, %c0_i32_0 : i32, i32
  }
  func.func @transform_4(%arg0: i32) -> (i32, i32) {
    %c0_i32 = arith.constant 0 : i32
    %c0_i32_0 = arith.constant 0 : i32
    %c0_i32_1 = arith.constant 0 : i32
    return %c0_i32, %c0_i32_0 : i32, i32
  }
  func.func @transform_5(%arg0: i32) -> (i32, i32, i32, i32) {
    %c0_i32 = arith.constant 0 : i32
    %c0_i32_0 = arith.constant 0 : i32
    %c0_i32_1 = arith.constant 0 : i32
    %c0_i32_2 = arith.constant 0 : i32
    return %arg0, %c0_i32, %c0_i32_0, %c0_i32_1 : i32, i32, i32, i32
  }
}

module attributes {stable_mosaic.version = 11 : i64} {
  func.func @_basic_block_kernel(%arg0: i32, %arg1: memref<1x16x16x128xbf16, #tpu.memory_space<vmem>>, %arg2: memref<3x384x128xbf16, #tpu.memory_space<vmem>>, %arg3: memref<3x384x128xbf16, #tpu.memory_space<vmem>>, %arg4: memref<1x128xf32, #tpu.memory_space<vmem>>, %arg5: memref<1x128xf32, #tpu.memory_space<vmem>>, %arg6: memref<1x16x16x128xbf16, #tpu.memory_space<vmem>>, %arg7: memref<288x384xbf16, #tpu.memory_space<vmem>>) attributes {dimension_semantics = [#tpu.dimension_semantics<parallel>], iteration_bounds = array<i64: 2>, scalar_prefetch = 0 : i64, scratch_operands = 1 : i64, tpu.core_type = #tpu.core_type<tc>, window_params = [{transform_indices = @transform_0, window_bounds = array<i64: 1, 16, 16, 128>}, {pipeline_mode = #tpu.pipeline_mode<synchronous>, transform_indices = @transform_1, window_bounds = array<i64: 3, 384, 128>}, {pipeline_mode = #tpu.pipeline_mode<synchronous>, transform_indices = @transform_2, window_bounds = array<i64: 3, 384, 128>}, {pipeline_mode = #tpu.pipeline_mode<synchronous>, transform_indices = @transform_3, window_bounds = array<i64: 1, 128>}, {pipeline_mode = #tpu.pipeline_mode<synchronous>, transform_indices = @transform_4, window_bounds = array<i64: 1, 128>}, {transform_indices = @transform_5, window_bounds = array<i64: 1, 16, 16, 128>}]} {
    %0 = tpu.iota {dimensions = array<i32: 1>} : vector<1x16x128xi32>
    %c0_i32 = arith.constant 0 : i32
    %1 = vector.broadcast %c0_i32 : i32 to vector<1x16x128xi32>
    %2 = arith.cmpi eq, %0, %1 : vector<1x16x128xi32>
    %c15_i32 = arith.constant 15 : i32
    %3 = vector.broadcast %c15_i32 : i32 to vector<1x16x128xi32>
    %4 = arith.cmpi eq, %0, %3 : vector<1x16x128xi32>
    %cst = arith.constant 0.000000e+00 : bf16
    %5 = vector.broadcast %cst : bf16 to vector<16x384xbf16>
    %c0 = arith.constant 0 : index
    %c0_0 = arith.constant 0 : index
    %6 = vector.load %arg7[%c0, %c0_0] : memref<288x384xbf16, #tpu.memory_space<vmem>>, vector<16x384xbf16>
    tpu.vector_store %arg7[%c0, %c0_0], %5 {strides = array<i32>} : memref<288x384xbf16, #tpu.memory_space<vmem>>, vector<16x384xbf16>,
    %c272 = arith.constant 272 : index
    %c0_1 = arith.constant 0 : index
    %7 = vector.load %arg7[%c272, %c0_1] : memref<288x384xbf16, #tpu.memory_space<vmem>>, vector<16x384xbf16>
    tpu.vector_store %arg7[%c272, %c0_1], %5 {strides = array<i32>} : memref<288x384xbf16, #tpu.memory_space<vmem>>, vector<16x384xbf16>,
    %c0_2 = arith.constant 0 : index
    %c0_3 = arith.constant 0 : index
    %c0_4 = arith.constant 0 : index
    %c0_5 = arith.constant 0 : index
    %8 = vector.load %arg1[%c0_2, %c0_3, %c0_4, %c0_5] : memref<1x16x16x128xbf16, #tpu.memory_space<vmem>>, vector<1x16x16x128xbf16>
    %9 = vector.shape_cast %8 : vector<1x16x16x128xbf16> to vector<16x16x128xbf16>
    %10 = arith.extf %9 : vector<16x16x128xbf16> to vector<16x16x128xf32>
    %c1_i32 = arith.constant 1 : i32
    %11 = tpu.dynamic_rotate %10 by %c1_i32 dim 1 : vector<16x16x128xf32>, i32 -> vector<16x16x128xf32>
    %cst_6 = arith.constant 0.000000e+00 : f32
    %12 = vector.shape_cast %2 : vector<1x16x128xi1> to vector<1x16x128xi1>
    %13 = vector.broadcast %12 : vector<1x16x128xi1> to vector<16x16x128xi1>
    %14 = vector.broadcast %cst_6 : f32 to vector<16x16x128xf32>
    %15 = arith.select %13, %14, %11 : vector<16x16x128xi1>, vector<16x16x128xf32>
    %c15_i32_7 = arith.constant 15 : i32
    %16 = tpu.dynamic_rotate %10 by %c15_i32_7 dim 1 : vector<16x16x128xf32>, i32 -> vector<16x16x128xf32>
    %cst_8 = arith.constant 0.000000e+00 : f32
    %17 = vector.shape_cast %4 : vector<1x16x128xi1> to vector<1x16x128xi1>
    %18 = vector.broadcast %17 : vector<1x16x128xi1> to vector<16x16x128xi1>
    %19 = vector.broadcast %cst_8 : f32 to vector<16x16x128xf32>
    %20 = arith.select %18, %19, %16 : vector<16x16x128xi1>, vector<16x16x128xf32>
    %21 = arith.truncf %15 : vector<16x16x128xf32> to vector<16x16x128xbf16>
    %22 = vector.shape_cast %21 : vector<16x16x128xbf16> to vector<256x128xbf16>
    %c16 = arith.constant 16 : index
    %c0_9 = arith.constant 0 : index
    %23 = vector.load %arg7[%c16, %c0_9] : memref<288x384xbf16, #tpu.memory_space<vmem>>, vector<256x128xbf16>
    tpu.vector_store %arg7[%c16, %c0_9], %22 {strides = array<i32>} : memref<288x384xbf16, #tpu.memory_space<vmem>>, vector<256x128xbf16>,
    %24 = vector.shape_cast %9 : vector<16x16x128xbf16> to vector<256x128xbf16>
    %c16_10 = arith.constant 16 : index
    %c128 = arith.constant 128 : index
    %25 = vector.load %arg7[%c16_10, %c128] : memref<288x384xbf16, #tpu.memory_space<vmem>>, vector<256x128xbf16>
    tpu.vector_store %arg7[%c16_10, %c128], %24 {strides = array<i32>} : memref<288x384xbf16, #tpu.memory_space<vmem>>, vector<256x128xbf16>,
    %26 = arith.truncf %20 : vector<16x16x128xf32> to vector<16x16x128xbf16>
    %27 = vector.shape_cast %26 : vector<16x16x128xbf16> to vector<256x128xbf16>
    %c16_11 = arith.constant 16 : index
    %c256 = arith.constant 256 : index
    %28 = vector.load %arg7[%c16_11, %c256] : memref<288x384xbf16, #tpu.memory_space<vmem>>, vector<256x128xbf16>
    tpu.vector_store %arg7[%c16_11, %c256], %27 {strides = array<i32>} : memref<288x384xbf16, #tpu.memory_space<vmem>>, vector<256x128xbf16>,
    %c0_12 = arith.constant 0 : index
    %c0_13 = arith.constant 0 : index
    %29 = vector.load %arg7[%c0_12, %c0_13] : memref<288x384xbf16, #tpu.memory_space<vmem>>, vector<256x384xbf16>
    %c0_14 = arith.constant 0 : index
    %c0_15 = arith.constant 0 : index
    %c0_16 = arith.constant 0 : index
    %30 = vector.load %arg2[%c0_14, %c0_15, %c0_16] : memref<3x384x128xbf16, #tpu.memory_space<vmem>>, vector<1x384x128xbf16>
    %31 = vector.shape_cast %30 : vector<1x384x128xbf16> to vector<384x128xbf16>
    %cst_17 = arith.constant dense<0.000000e+00> : vector<256x128xf32>
    %32 = tpu.matmul %29, %31, %cst_17 {dimension_numbers = #tpu.dot_dimension_numbers<[1], [0], [0], [1], [0, 0, 1, 1], [], []>} : vector<256x384xbf16>, vector<384x128xbf16>, vector<256x128xf32> -> vector<256x128xf32>
    %c16_18 = arith.constant 16 : index
    %c0_19 = arith.constant 0 : index
    %33 = vector.load %arg7[%c16_18, %c0_19] : memref<288x384xbf16, #tpu.memory_space<vmem>>, vector<256x384xbf16>
    %c1 = arith.constant 1 : index
    %c0_20 = arith.constant 0 : index
    %c0_21 = arith.constant 0 : index
    %34 = vector.load %arg2[%c1, %c0_20, %c0_21] : memref<3x384x128xbf16, #tpu.memory_space<vmem>>, vector<1x384x128xbf16>
    %35 = vector.shape_cast %34 : vector<1x384x128xbf16> to vector<384x128xbf16>
    %cst_22 = arith.constant dense<0.000000e+00> : vector<256x128xf32>
    %36 = tpu.matmul %33, %35, %cst_22 {dimension_numbers = #tpu.dot_dimension_numbers<[1], [0], [0], [1], [0, 0, 1, 1], [], []>} : vector<256x384xbf16>, vector<384x128xbf16>, vector<256x128xf32> -> vector<256x128xf32>
    %37 = arith.addf %32, %36 : vector<256x128xf32>
    %c32 = arith.constant 32 : index
    %c0_23 = arith.constant 0 : index
    %38 = vector.load %arg7[%c32, %c0_23] : memref<288x384xbf16, #tpu.memory_space<vmem>>, vector<256x384xbf16>
    %c2 = arith.constant 2 : index
    %c0_24 = arith.constant 0 : index
    %c0_25 = arith.constant 0 : index
    %39 = vector.load %arg2[%c2, %c0_24, %c0_25] : memref<3x384x128xbf16, #tpu.memory_space<vmem>>, vector<1x384x128xbf16>
    %40 = vector.shape_cast %39 : vector<1x384x128xbf16> to vector<384x128xbf16>
    %cst_26 = arith.constant dense<0.000000e+00> : vector<256x128xf32>
    %41 = tpu.matmul %38, %40, %cst_26 {dimension_numbers = #tpu.dot_dimension_numbers<[1], [0], [0], [1], [0, 0, 1, 1], [], []>} : vector<256x384xbf16>, vector<384x128xbf16>, vector<256x128xf32> -> vector<256x128xf32>
    %42 = arith.addf %37, %41 : vector<256x128xf32>
    %c0_27 = arith.constant 0 : index
    %c0_28 = arith.constant 0 : index
    %43 = vector.load %arg4[%c0_27, %c0_28] : memref<1x128xf32, #tpu.memory_space<vmem>>, vector<1x128xf32>
    %44 = vector.broadcast %43 : vector<1x128xf32> to vector<256x128xf32>
    %45 = arith.addf %42, %44 : vector<256x128xf32>
    %cst_29 = arith.constant 0.000000e+00 : f32
    %46 = vector.broadcast %cst_29 : f32 to vector<256x128xf32>
    %47 = arith.maximumf %45, %46 : vector<256x128xf32>
    %48 = vector.shape_cast %47 : vector<256x128xf32> to vector<16x16x128xf32>
    %49 = arith.truncf %48 : vector<16x16x128xf32> to vector<16x16x128xbf16>
    %c1_i32_30 = arith.constant 1 : i32
    %50 = tpu.dynamic_rotate %48 by %c1_i32_30 dim 1 : vector<16x16x128xf32>, i32 -> vector<16x16x128xf32>
    %cst_31 = arith.constant 0.000000e+00 : f32
    %51 = vector.shape_cast %2 : vector<1x16x128xi1> to vector<1x16x128xi1>
    %52 = vector.broadcast %51 : vector<1x16x128xi1> to vector<16x16x128xi1>
    %53 = vector.broadcast %cst_31 : f32 to vector<16x16x128xf32>
    %54 = arith.select %52, %53, %50 : vector<16x16x128xi1>, vector<16x16x128xf32>
    %c15_i32_32 = arith.constant 15 : i32
    %55 = tpu.dynamic_rotate %48 by %c15_i32_32 dim 1 : vector<16x16x128xf32>, i32 -> vector<16x16x128xf32>
    %cst_33 = arith.constant 0.000000e+00 : f32
    %56 = vector.shape_cast %4 : vector<1x16x128xi1> to vector<1x16x128xi1>
    %57 = vector.broadcast %56 : vector<1x16x128xi1> to vector<16x16x128xi1>
    %58 = vector.broadcast %cst_33 : f32 to vector<16x16x128xf32>
    %59 = arith.select %57, %58, %55 : vector<16x16x128xi1>, vector<16x16x128xf32>
    %60 = arith.truncf %54 : vector<16x16x128xf32> to vector<16x16x128xbf16>
    %61 = vector.shape_cast %60 : vector<16x16x128xbf16> to vector<256x128xbf16>
    %c16_34 = arith.constant 16 : index
    %c0_35 = arith.constant 0 : index
    %62 = vector.load %arg7[%c16_34, %c0_35] : memref<288x384xbf16, #tpu.memory_space<vmem>>, vector<256x128xbf16>
    tpu.vector_store %arg7[%c16_34, %c0_35], %61 {strides = array<i32>} : memref<288x384xbf16, #tpu.memory_space<vmem>>, vector<256x128xbf16>,
    %63 = vector.shape_cast %49 : vector<16x16x128xbf16> to vector<256x128xbf16>
    %c16_36 = arith.constant 16 : index
    %c128_37 = arith.constant 128 : index
    %64 = vector.load %arg7[%c16_36, %c128_37] : memref<288x384xbf16, #tpu.memory_space<vmem>>, vector<256x128xbf16>
    tpu.vector_store %arg7[%c16_36, %c128_37], %63 {strides = array<i32>} : memref<288x384xbf16, #tpu.memory_space<vmem>>, vector<256x128xbf16>,
    %65 = arith.truncf %59 : vector<16x16x128xf32> to vector<16x16x128xbf16>
    %66 = vector.shape_cast %65 : vector<16x16x128xbf16> to vector<256x128xbf16>
    %c16_38 = arith.constant 16 : index
    %c256_39 = arith.constant 256 : index
    %67 = vector.load %arg7[%c16_38, %c256_39] : memref<288x384xbf16, #tpu.memory_space<vmem>>, vector<256x128xbf16>
    tpu.vector_store %arg7[%c16_38, %c256_39], %66 {strides = array<i32>} : memref<288x384xbf16, #tpu.memory_space<vmem>>, vector<256x128xbf16>,
    %c0_40 = arith.constant 0 : index
    %c0_41 = arith.constant 0 : index
    %68 = vector.load %arg7[%c0_40, %c0_41] : memref<288x384xbf16, #tpu.memory_space<vmem>>, vector<256x384xbf16>
    %c0_42 = arith.constant 0 : index
    %c0_43 = arith.constant 0 : index
    %c0_44 = arith.constant 0 : index
    %69 = vector.load %arg3[%c0_42, %c0_43, %c0_44] : memref<3x384x128xbf16, #tpu.memory_space<vmem>>, vector<1x384x128xbf16>
    %70 = vector.shape_cast %69 : vector<1x384x128xbf16> to vector<384x128xbf16>
    %cst_45 = arith.constant dense<0.000000e+00> : vector<256x128xf32>
    %71 = tpu.matmul %68, %70, %cst_45 {dimension_numbers = #tpu.dot_dimension_numbers<[1], [0], [0], [1], [0, 0, 1, 1], [], []>} : vector<256x384xbf16>, vector<384x128xbf16>, vector<256x128xf32> -> vector<256x128xf32>
    %c16_46 = arith.constant 16 : index
    %c0_47 = arith.constant 0 : index
    %72 = vector.load %arg7[%c16_46, %c0_47] : memref<288x384xbf16, #tpu.memory_space<vmem>>, vector<256x384xbf16>
    %c1_48 = arith.constant 1 : index
    %c0_49 = arith.constant 0 : index
    %c0_50 = arith.constant 0 : index
    %73 = vector.load %arg3[%c1_48, %c0_49, %c0_50] : memref<3x384x128xbf16, #tpu.memory_space<vmem>>, vector<1x384x128xbf16>
    %74 = vector.shape_cast %73 : vector<1x384x128xbf16> to vector<384x128xbf16>
    %cst_51 = arith.constant dense<0.000000e+00> : vector<256x128xf32>
    %75 = tpu.matmul %72, %74, %cst_51 {dimension_numbers = #tpu.dot_dimension_numbers<[1], [0], [0], [1], [0, 0, 1, 1], [], []>} : vector<256x384xbf16>, vector<384x128xbf16>, vector<256x128xf32> -> vector<256x128xf32>
    %76 = arith.addf %71, %75 : vector<256x128xf32>
    %c32_52 = arith.constant 32 : index
    %c0_53 = arith.constant 0 : index
    %77 = vector.load %arg7[%c32_52, %c0_53] : memref<288x384xbf16, #tpu.memory_space<vmem>>, vector<256x384xbf16>
    %c2_54 = arith.constant 2 : index
    %c0_55 = arith.constant 0 : index
    %c0_56 = arith.constant 0 : index
    %78 = vector.load %arg3[%c2_54, %c0_55, %c0_56] : memref<3x384x128xbf16, #tpu.memory_space<vmem>>, vector<1x384x128xbf16>
    %79 = vector.shape_cast %78 : vector<1x384x128xbf16> to vector<384x128xbf16>
    %cst_57 = arith.constant dense<0.000000e+00> : vector<256x128xf32>
    %80 = tpu.matmul %77, %79, %cst_57 {dimension_numbers = #tpu.dot_dimension_numbers<[1], [0], [0], [1], [0, 0, 1, 1], [], []>} : vector<256x384xbf16>, vector<384x128xbf16>, vector<256x128xf32> -> vector<256x128xf32>
    %81 = arith.addf %76, %80 : vector<256x128xf32>
    %c0_58 = arith.constant 0 : index
    %c0_59 = arith.constant 0 : index
    %82 = vector.load %arg5[%c0_58, %c0_59] : memref<1x128xf32, #tpu.memory_space<vmem>>, vector<1x128xf32>
    %83 = vector.broadcast %82 : vector<1x128xf32> to vector<256x128xf32>
    %84 = arith.addf %81, %83 : vector<256x128xf32>
    %85 = vector.shape_cast %10 : vector<16x16x128xf32> to vector<256x128xf32>
    %86 = arith.addf %84, %85 : vector<256x128xf32>
    %cst_60 = arith.constant 0.000000e+00 : f32
    %87 = vector.broadcast %cst_60 : f32 to vector<256x128xf32>
    %88 = arith.maximumf %86, %87 : vector<256x128xf32>
    %89 = arith.truncf %88 : vector<256x128xf32> to vector<256x128xbf16>
    %90 = vector.shape_cast %89 : vector<256x128xbf16> to vector<1x16x16x128xbf16>
    %c0_61 = arith.constant 0 : index
    %c0_62 = arith.constant 0 : index
    %c0_63 = arith.constant 0 : index
    %c0_64 = arith.constant 0 : index
    %91 = vector.load %arg6[%c0_61, %c0_62, %c0_63, %c0_64] : memref<1x16x16x128xbf16, #tpu.memory_space<vmem>>, vector<1x16x16x128xbf16>
    tpu.vector_store %arg6[%c0_61, %c0_62, %c0_63, %c0_64], %90 {strides = array<i32>} : memref<1x16x16x128xbf16, #tpu.memory_space<vmem>>, vector<1x16x16x128xbf16>,
    return
  }
  func.func @transform_0(%arg0: i32) -> (i32, i32, i32, i32) {
    %c0_i32 = arith.constant 0 : i32
    %c0_i32_0 = arith.constant 0 : i32
    %c0_i32_1 = arith.constant 0 : i32
    %c0_i32_2 = arith.constant 0 : i32
    return %arg0, %c0_i32, %c0_i32_0, %c0_i32_1 : i32, i32, i32, i32
  }
  func.func @transform_1(%arg0: i32) -> (i32, i32, i32) {
    %c0_i32 = arith.constant 0 : i32
    %c0_i32_0 = arith.constant 0 : i32
    %c0_i32_1 = arith.constant 0 : i32
    %c0_i32_2 = arith.constant 0 : i32
    return %c0_i32, %c0_i32_0, %c0_i32_1 : i32, i32, i32
  }
  func.func @transform_2(%arg0: i32) -> (i32, i32, i32) {
    %c0_i32 = arith.constant 0 : i32
    %c0_i32_0 = arith.constant 0 : i32
    %c0_i32_1 = arith.constant 0 : i32
    %c0_i32_2 = arith.constant 0 : i32
    return %c0_i32, %c0_i32_0, %c0_i32_1 : i32, i32, i32
  }
  func.func @transform_3(%arg0: i32) -> (i32, i32) {
    %c0_i32 = arith.constant 0 : i32
    %c0_i32_0 = arith.constant 0 : i32
    %c0_i32_1 = arith.constant 0 : i32
    return %c0_i32, %c0_i32_0 : i32, i32
  }
  func.func @transform_4(%arg0: i32) -> (i32, i32) {
    %c0_i32 = arith.constant 0 : i32
    %c0_i32_0 = arith.constant 0 : i32
    %c0_i32_1 = arith.constant 0 : i32
    return %c0_i32, %c0_i32_0 : i32, i32
  }
  func.func @transform_5(%arg0: i32) -> (i32, i32, i32, i32) {
    %c0_i32 = arith.constant 0 : i32
    %c0_i32_0 = arith.constant 0 : i32
    %c0_i32_1 = arith.constant 0 : i32
    %c0_i32_2 = arith.constant 0 : i32
    return %arg0, %c0_i32, %c0_i32_0, %c0_i32_1 : i32, i32, i32, i32
  }
}

</mosaic_0001>

<bundles_post_ra>
// kernel: tpu_custom_call.1
= control target key start
LH: loop header
LB: loop body
LE: loop exit
PB: predicated region body
PF: predicated region fallthrough
CT: control target
= control target key end

     0   :  { %10 = vsyncpa [#allocation4], 0  ;;  %s9470_s0 = inlined_call_operand.hbm [shape: bf16[2,16,16,128], index: 0, kind: input, shape index: {}]   ;;  %s9471_s1 = inlined_call_operand.hbm [shape: bf16[3,384,128], index: 1, kind: input, shape index: {}]   ;;  %s9472_s2 = inlined_call_operand.hbm [shape: bf16[3,384,128], index: 2, kind: input, shape index: {}]   ;;  %s9473_s3 = inlined_call_operand.vmem [shape: f32[1,128], index: 3, kind: input, shape index: {}]   ;;  %s9474_s4 = inlined_call_operand.vmem [shape: f32[1,128], index: 4, kind: input, shape index: {}]   ;;  %s9475_s5 = inlined_call_operand.hbm [shape: bf16[2,16,16,128], index: 5, kind: output, shape index: {}]  }
   0x1   :  { %12 = vsyncpa [#allocation4 + $0x1], 0 }
   0x2   :  { %13 = vsyncpa [#allocation7], 0 }
   0x3   :  { %14 = vsyncpa [#allocation5], 0 }
   0x4   :  { %16 = vsyncpa [#allocation5 + $0x1], 0  ;;  %s7701_s18 = smov 0   ;;  %s7703_s19 = smov 0  }
   0x5   :  { %s7705_s20 = smov 0   ;;  %s7707_s21 = smov 0  }
   0x6 LB: > { %s7722_s22 = sadd.s32 4294967295, %s7662_s21   ;;  %s5586_s23 = sadd.s32 4294967294, %s7662_s21   ;;  %s7662_s21 = sphi %s7707_s21, %s9659_s21   ;;  %s7658_s20 = sphi %s7705_s20, %s9658_s20   ;;  %s7654_s19 = sphi %s7703_s19, %s9657_s19   ;;  %s7650_s18 = sphi %s7701_s18, %s9656_s18  }
   0x7   : > { %p42_p0 = scmp.ne.s32.totalorder %s7654_s19, %s7650_s18  ;;  %p43_p1 = scmp.eq.s32.totalorder %s7722_s22, 0 }
   0x8   : > { %p150_p2 = scmp.eq.s32.totalorder %s7722_s22, 1  ;;  %p156_p3 = scmp.eq.s32.totalorder %s5586_s23, 1 }
   0x9   : > { %p7731_p4 = por %p43_p1, %p42_p0  ;;  %p5587_p5 = scmp.ge.s32.totalorder %s7662_s21, 1 }
   0xa   : > { %p7736_p6 = por %p156_p3, %p42_p0  ;;  %p163_p7 = scmp.lt.s32.totalorder %s7662_s21, 3 }
   0xb   : > { %s174_s28 = sshll.u32 %s9471_s1, 4  ;;  %s7664_s30 = smov [#allocation6]   ;;  %s175_s28 = int_to_ptr.hbm [resolvable:$true] %s174_s28 }
   0xc   : > { %p7744_p8 = pnand %p5587_p5, %p163_p7  ;;  %s176_s6 = sshll.u32 %s7664_s30, 4  ;;  %s177_s6 = int_to_ptr.vmem [resolvable:$true] %s176_s6 }
   0xd   : > { %s188_s9 = sshll.u32 %s9472_s2, 4  ;;  %s9476_s10 = smov 64   ;;  %s189_s9 = int_to_ptr.hbm [resolvable:$true] %s188_s9 }
   0xe   : > { %p7439_p9 = pneg %p7744_p8  ;;  %s7666_s11 = smov 4  }
   0xf   : > { %s7667_s12 = smov [#allocation8]   ;;  %s7763_s14 = sadd.s32 1, %s7662_s21  }
  0x10   : > { %p7440_p10 = pnand %p7439_p9, %p43_p1  ;;  %s190_s13 = sshll.u32 %s7667_s12, 4  ;;  %s191_s13 = int_to_ptr.vmem [resolvable:$true] %s190_s13 }
  0x11   : > { %s29_s15 = sadd.s32 1, %s7658_s20  ;;  %s26_s16 = ssub.s32 %s7662_s21, %s7763_s14 }
  0x12   : > { %7442 = dma.hbm_to_vmem [thread:$0]  (!%p7440_p10), %s175_s28, 9216, %s177_s6, [#allocation7], %s9476_s10, %s9476_s10, %s7666_s11  }
  0x13   : > { %7445 = dma.hbm_to_vmem [thread:$0]  (!%p7440_p10), %s189_s9, 9216, %s191_s13, [#allocation7], %s9476_s10, %s9476_s10, %s7666_s11  }
  0x14   : > { %p36_p12 = scmp.ne.s32.totalorder %s7658_s20, %s7654_s19  ;;  %p27_p13 = scmp.eq.s32.totalorder %s26_s16, 0 }
  0x15   : > { %p37_p0 = scmp.eq.s32.totalorder %s7662_s21, 0  ;;  %p7456_p5 = scmp.lt.s32.totalorder %s7662_s21, 2 }
  0x16   : > { %p7773_p3 = por %p150_p2, %p36_p12  ;;  %s210_s26 = sand.u32 1, %s7658_s20  }
  0x17   : > { %s7779_s23 = scalar_select %p27_p13, %s7658_s20, %s29_s15  }
  0x18   : > { %p38_p7 = por %p37_p0, %p36_p12  ;;  %s5591_s27 = sshll.u32 %s210_s26, 7 }
  0x19   : > { %s6972_s28 = sshll.u32 %s7662_s21, 7  ;;  %s214_s8 = scalar_lea.vmem [#allocation3], %s5591_s27 }
  0x1a   : > { %s219_s7 = scalar_lea.hbm %s9470_s0, %s6972_s28  ;;  %s222_s9 = sshll.u32 %s214_s8, 4  ;;  %s223_s9 = int_to_ptr.vmem [resolvable:$true] %s222_s9 }
  0x1b   : > { %s220_s12 = sshll.u32 %s219_s7, 4  ;;  %p7786_p2 = pnand %p7456_p5, %p38_p7  ;;  %s221_s12 = int_to_ptr.hbm [resolvable:$true] %s220_s12 }
  0x1c   : > { %s211_s15 = scalar_lea.sflag [#allocation4], %s210_s26  ;;  %s7562_s16 = sshra.s32 %s221_s12, 4  ;;  %s7563_s16 = int_to_ptr.hbm [resolvable:$true] %s7562_s16 }
  0x1d   : > { %s7564_s10 = scalar_lea.hbm %s7563_s16, 128  ;;  %p7566_p10 = pneg %p7786_p2 }
  0x1e   : > { %p7565_p9 = scmp.ne.s32.totalorder %s7563_s16, %s7564_s10  ;;  %s7569_s30 = scalar_lea.hbm %s9470_s0, 256 }
  0x1f   : > { %p7570_p0 = scmp.lt.s32.totalorder %s7563_s16, %s9470_s0  ;;  %p7571_p5 = scmp.lt.s32.totalorder %s7569_s30, %s7564_s10 }
  0x20   : > { %p7567_p12 = pnand %p7566_p10, %p7565_p9 }
  0x21   : > { %p7572_p7 = por %p7571_p5, %p7570_p0 }
  0x22   : > { %p7568_p13 = pneg %p7567_p12 }
  0x24   : > { %p7573_p11 = pnand %p7572_p7, %p7568_p13 }
  0x26   : > { %7576 = shalt.err (!%p7573_p11)
}
  0x27   : > { %s9536_s26 = smov 64   ;;  %234 = sbr.rel (%p7744_p8) target bundleno = 1537 (0x601), region = 40 }
  0x28   : > { %7449 = dma.hbm_to_vmem [thread:$0]  (!%p7786_p2), %s221_s12, 2048, %s223_s9, %s211_s15, %s9536_s26, %s9536_s26, %s7666_s11  }
  0x2c   : > { %s7806_s8 = sand.u32 1, %s7654_s19  }
  0x2d   : > { %s5595_s10 = sshll.u32 %s7806_s8, 7  ;;  %s237_s16 = scalar_lea.sflag [#allocation4], %s7806_s8 }
  0x2e   : > { %s7812_s28 = scalar_lea.vmem [#allocation3], %s5595_s10 }
  0x2f   : > { %7637 = dma.done.wait (%p7731_p4), %s237_s16, 2048  }
  0x30   : > { %7639 = vsyncadd (%p7731_p4), %s237_s16, 4294965248 }
  0x31   : > { %7641 = dma.done.wait (%p43_p1), [#allocation7], 18432  }
  0x32   : > { %7643 = vsyncadd (%p43_p1), [#allocation7], 4294948864  ;;  %v279_v0 = vlaneseq  ;;  %v7055_v1 = vld [vmem:[#allocation6 + $0xf8] sm:$0xff]  ;;  %v7054_v3 = vld [vmem:[#allocation6 + $0xf0] sm:$0xff]  ;;  %s9268_s15 = scalar_lea.vmem [#allocation9], %s5595_s10  ;;  %s7315_s27 = sshll.u32 %s7722_s22, 7 }
  0x33   : > { %v7063_v2 = vld [vmem:[#allocation6 + $0x138] sm:$0xff]  ;;  %1285 = vmatpush.bf16.msra.mxu0 %v7055_v1  ;;  %7411 = vmatpush.bf16.msra.mxu2 %v7055_v1  ;;  %v7062_v4 = vld [vmem:[#allocation6 + $0x130] sm:$0xff]  ;;  %v7053_v6 = vld [vmem:[#allocation6 + $0xe8] sm:$0xff]  ;;  %s5490_s7 = scalar_lea.hbm %s9475_s5, %s7315_s27  ;;  %s5491_s26 = sshll.u32 %s9268_s15, 4  ;;  %s5492_s26 = int_to_ptr.vmem [resolvable:$true] %s5491_s26 }
  0x34   : > { %1374 = vmatpush.bf16.msra.mxu1 %v7063_v2  ;;  %7419 = vmatpush.bf16.msra.mxu3 %v7063_v2  ;;  %v7822_v5 = vshrl.u32 %v279_v0, 7  ;;  %v294_v7 = vld [vmem:[%s7812_s28] sm:$0xf]  ;;  %v295_v8 = vld [vmem:[%s7812_s28 + $0x4] sm:$0xf]  ;;  %v7061_v13 = vld [vmem:[#allocation6 + $0x128] sm:$0xff] }
  0x35   : > { %v7826_v9 = vunpack.c.l.bf16 %v294_v7  ;;  %v7828_v10 = vunpack.c.l.bf16 %v295_v8  ;;  %624 = vst [vmem:[#allocation2 + $0x1c] sm:$0xf] %v294_v7  ;;  %v310_v11 = vld [vmem:[%s7812_s28 + $0x40] sm:$0xf]  ;;  %v311_v12 = vld [vmem:[%s7812_s28 + $0x44] sm:$0xf] }
  0x36   : > { %vm282_vm0 = vcmp.eq.s32.totalorder %v7822_v5, 0  ;;  %vm390_vm1 = vcmp.lt.s32.totalorder %v7822_v5, 1  ;;  %625 = vst [vmem:[#allocation2 + $0x28] sm:$0xf] %v295_v8  ;;  %v7834_v14 = vunpack.c.l.bf16 %v310_v11  ;;  %v7836_v15 = vunpack.c.l.bf16 %v311_v12  ;;  %v7052_v16 = vld [vmem:[#allocation6 + $0xe0] sm:$0xff]  ;;  %v7051_v42 = vld [vmem:[#allocation6 + $0xd8] sm:$0xff] }
  0x37   : > { %1286 = vmatpush.bf16.msra.mxu0 %v7054_v3  ;;  %7412 = vmatpush.bf16.msra.mxu2 %v7054_v3  ;;  %9537 = vst [vmem:[#allocation13_spill] sm:$0xff] %v7826_v9  ;;  %v358_v17 = vrot.slane %v7826_v9, 7  ;;  %v374_v18 = vrot.slane %v7828_v10, 7  ;;  %v296_v19 = vld [vmem:[%s7812_s28 + $0x8] sm:$0xf]  ;;  %v7060_v29 = vld [vmem:[#allocation6 + $0x120] sm:$0xff] }
  0x38   : > { %9538 = vst [vmem:[#allocation14_spill] sm:$0xff] %v7828_v10  ;;  %1375 = vmatpush.bf16.msra.mxu1 %v7062_v4  ;;  %7420 = vmatpush.bf16.msra.mxu3 %v7062_v4  ;;  %v366_v20 = vrot.slane %v7834_v14, 7  ;;  %v382_v21 = vrot.slane %v7836_v15, 7  ;;  %v297_v22 = vld [vmem:[%s7812_s28 + $0xc] sm:$0xf]  ;;  %v7844_v23 = vunpack.c.l.bf16 %v296_v19  ;;  %v7059_v43 = vld [vmem:[#allocation6 + $0x118] sm:$0xff] }
  0x39   : > { %9539 = vst [vmem:[#allocation15_spill] sm:$0xff] %v7834_v14  ;;  %v391_v24 = vsel %vm390_vm1, %v358_v17, %v374_v18  ;;  %v407_v25 = vsel %vm390_vm1, %v374_v18, %v358_v17  ;;  %v7850_v26 = vunpack.c.l.bf16 %v297_v22  ;;  %v312_v27 = vld [vmem:[%s7812_s28 + $0x48] sm:$0xf]  ;;  %v313_v28 = vld [vmem:[%s7812_s28 + $0x4c] sm:$0xf]  ;;  %v7050_v53 = vld [vmem:[#allocation6 + $0xd0] sm:$0xff] }
  0x3a   : > { %9540 = vst [vmem:[#allocation16_spill] sm:$0xff] %v7836_v15  ;;  %v427_v30 = vsel %vm282_vm0, 0.0, %v407_v25  ;;  %v561_v31 = vpack.c.bf16 %v391_v24, %v391_v24  ;;  %v399_v32 = vsel %vm390_vm1, %v366_v20, %v382_v21  ;;  %v415_v33 = vsel %vm390_vm1, %v382_v21, %v366_v20  ;;  %v298_v46 = vld [vmem:[%s7812_s28 + $0x10] sm:$0xf]  ;;  %v299_v57 = vld [vmem:[%s7812_s28 + $0x14] sm:$0xf] }
  0x3b   : > { %640 = vst [vmem:[#allocation2 + $0xdc] sm:$0xf] %v310_v11  ;;  %1287 = vmatpush.bf16.msra.mxu0 %v7053_v6  ;;  %7413 = vmatpush.bf16.msra.mxu2 %v7053_v6  ;;  %v560_v34 = vpack.c.bf16 %v427_v30, %v427_v30  ;;  %v443_v35 = vsel %vm282_vm0, 0.0, %v415_v33  ;;  %v577_v36 = vpack.c.bf16 %v399_v32, %v399_v32  ;;  %v359_v37 = vrot.slane %v7844_v23, 7  ;;  %v7058_v54 = vld [vmem:[#allocation6 + $0x110] sm:$0xff]  ;;  %v7049_v0 = vld [vmem:[#allocation6 + $0xc8] sm:$0xff] }
  0x3c   : > { %641 = vst [vmem:[#allocation2 + $0xe8] sm:$0xf] %v311_v12  ;;  %1376 = vmatpush.bf16.msra.mxu1 %v7061_v13  ;;  %7421 = vmatpush.bf16.msra.mxu3 %v7061_v13  ;;  %v576_v38 = vpack.c.bf16 %v443_v35, %v443_v35  ;;  %v375_v39 = vrot.slane %v7850_v26, 7  ;;  %v7864_v40 = vunpack.c.l.bf16 %v312_v27  ;;  %v7866_v41 = vunpack.c.l.bf16 %v313_v28  ;;  %v314_v63 = vld [vmem:[%s7812_s28 + $0x50] sm:$0xf]  ;;  %v7057_v3 = vld [vmem:[#allocation6 + $0x108] sm:$0xff] }
  0x3d   : > { %9541 = vst [vmem:[#allocation17_spill] sm:$0xff] %v7844_v23  ;;  %v7876_v50 = vunpack.c.l.bf16 %v298_v46  ;;  %v7886_v60 = vunpack.c.l.bf16 %v299_v57  ;;  %v7891_v2 = vunpack.c.l.bf16 %v314_v63  ;;  %v315_v4 = vld [vmem:[%s7812_s28 + $0x54] sm:$0xf]  ;;  %v7048_v6 = vld [vmem:[#allocation6 + $0xc0] sm:$0xff]  ;;  %v6976_v17 = vld [vmem:[#allocation2 + $0x1c] sm:$0xf] }
  0x3e   : > { %9542 = vst [vmem:[#allocation18_spill] sm:$0xff] %v7850_v26  ;;  %v392_v44 = vsel %vm390_vm1, %v359_v37, %v375_v39  ;;  %v408_v45 = vsel %vm390_vm1, %v375_v39, %v359_v37  ;;  %v367_v49 = vrot.slane %v7864_v40, 7  ;;  %v383_v52 = vrot.slane %v7866_v41, 7  ;;  %v5603_v18 = vld [vmem:[#allocation2 + $0x24] sm:$0xf0]  ;;  %s5493_s10 = sshll.u32 %s5490_s7, 4  ;;  %s5494_s10 = int_to_ptr.hbm [resolvable:$true] %s5493_s10 }
  0x3f   : > { %626 = vst [vmem:[#allocation2 + $0x34] sm:$0xf] %v296_v19  ;;  %1288 = vmatpush.bf16.msra.mxu0 %v7052_v16  ;;  %7414 = vmatpush.bf16.msra.mxu2 %v7052_v16  ;;  %v429_v47 = vsel %vm282_vm0, 0.0, %v408_v45  ;;  %v563_v48 = vpack.c.bf16 %v392_v44, %v392_v44  ;;  %v360_v61 = vrot.slane %v7876_v50, 7  ;;  %v376_v1 = vrot.slane %v7886_v60, 7  ;;  %v7071_v30 = vld [vmem:[#allocation6 + $0x178] sm:$0xff] }
  0x40   : > { %627 = vst [vmem:[#allocation2 + $0x40] sm:$0xf] %v297_v22  ;;  %1377 = vmatpush.bf16.msra.mxu1 %v7060_v29  ;;  %7422 = vmatpush.bf16.msra.mxu3 %v7060_v29  ;;  %v562_v51 = vpack.c.bf16 %v429_v47, %v429_v47  ;;  %v400_v55 = vsel %vm390_vm1, %v367_v49, %v383_v52  ;;  %v7898_v13 = vunpack.c.l.bf16 %v315_v4  ;;  %v368_v21 = vrot.slane %v7891_v2, 7  ;;  %v7056_v22 = vld [vmem:[#allocation6 + $0x100] sm:$0xff]  ;;  %v7070_v44 = vld [vmem:[#allocation6 + $0x170] sm:$0xff]  ;;  %s5479_s22 = scalar_lea.sflag [#allocation5], %s7806_s8 }
  0x41   : > { %593 = vst [vmem:[#allocation2 + $0x24] sm:$0xf] %v561_v31  ;;  %v416_v56 = vsel %vm390_vm1, %v383_v52, %v367_v49  ;;  %v579_v59 = vpack.c.bf16 %v400_v55, %v400_v55  ;;  %v393_v11 = vsel %vm390_vm1, %v360_v61, %v376_v1  ;;  %v409_v12 = vsel %vm390_vm1, %v376_v1, %v360_v61  ;;  %v7028_v31 = vld [vmem:[#allocation6 + $0x38] sm:$0xff]  ;;  %v7027_v45 = vld [vmem:[#allocation6 + $0x30] sm:$0xff]  ;;  %v7069_v52 = vld [vmem:[#allocation6 + $0x168] sm:$0xff]  ;;  %s7606_s16 = sshra.s32 %s5494_s10, 4  ;;  %s7607_s16 = int_to_ptr.hbm [resolvable:$true] %s7606_s16 }
  0x42   : > { %9543 = vst [vmem:[#allocation19_spill] sm:$0xff] %v7864_v40  ;;  %v445_v58 = vsel %vm282_vm0, 0.0, %v416_v56  ;;  %v431_v19 = vsel %vm282_vm0, 0.0, %v409_v12  ;;  %v565_v20 = vpack.c.bf16 %v393_v11, %v393_v11  ;;  %v301_v47 = vld [vmem:[%s7812_s28 + $0x1c] sm:$0xf]  ;;  %v7026_v55 = vld [vmem:[#allocation6 + $0x28] sm:$0xff]  ;;  %p7613_p11 = scmp.lt.s32.totalorder %s7607_s16, %s9475_s5 }
  0x43   : > { %9544 = vst [vmem:[#allocation20_spill] sm:$0xff] %v7866_v41  ;;  %1289 = vmatpush.bf16.msra.mxu0 %v7051_v42  ;;  %7415 = vmatpush.bf16.msra.mxu2 %v7051_v42  ;;  %v578_v62 = vpack.c.bf16 %v445_v58, %v445_v58  ;;  %v564_v25 = vpack.c.bf16 %v431_v19, %v431_v19  ;;  %v5699_v29 = vld [vmem:[#allocation2 + $0xe4] sm:$0xf0]  ;;  %v7926_v49 = vunpack.c.l.bf16 %v301_v47  ;;  %vm491_vm2 = vcmp.lt.s32.totalorder %v7822_v5, 7  ;;  %s7612_s11 = scalar_lea.hbm %s9475_s5, 256 }
  0x44   : > { %592 = vst [vmem:[#allocation2 + $0x18] sm:$0xf] %v560_v34  ;;  %1378 = vmatpush.bf16.msra.mxu1 %v7059_v43  ;;  %7423 = vmatpush.bf16.msra.mxu3 %v7059_v43  ;;  %v7036_v43 = vld [vmem:[#allocation6 + $0x78] sm:$0xff] }
  0x45   : > { %608 = vst [vmem:[#allocation2 + $0xd8] sm:$0xf] %v576_v38  ;;  %v7914_v38 = vor.u32 %v6976_v17, %v5603_v18  ;;  %v377_v56 = vrot.slane %v7926_v49, 7 }
  0x46   : > { %609 = vst [vmem:[#allocation2 + $0xe4] sm:$0xf] %v577_v36  ;;  %v6979_v12 = vld [vmem:[#allocation2 + $0x34] sm:$0xf] }
  0x47   : > { %9545 = vst [vmem:[#allocation21_spill] sm:$0xff] %v7876_v50  ;;  %1290 = vmatpush.bf16.msra.mxu0 %v7050_v53  ;;  %7416 = vmatpush.bf16.msra.mxu2 %v7050_v53 }
  0x48   : > { %642 = vst [vmem:[#allocation2 + $0xf4] sm:$0xf] %v312_v27  ;;  %1379 = vmatpush.bf16.msra.mxu1 %v7058_v54  ;;  %7424 = vmatpush.bf16.msra.mxu3 %v7058_v54  ;;  %v6977_v8 = vld [vmem:[#allocation2 + $0x20] sm:$0xf0]  ;;  %v384_v27 = vrot.slane %v7898_v13, 7 }
  0x49   : > { %595 = vst [vmem:[#allocation2 + $0x3c] sm:$0xf] %v563_v48  ;;  %v316_v54 = vld [vmem:[%s7812_s28 + $0x58] sm:$0xf] }
  0x4a   : > { %594 = vst [vmem:[#allocation2 + $0x30] sm:$0xf] %v562_v51  ;;  %v401_v32 = vsel %vm390_vm1, %v368_v21, %v384_v27  ;;  %v417_v33 = vsel %vm390_vm1, %v384_v27, %v368_v21  ;;  %v7035_v51 = vld [vmem:[#allocation6 + $0x70] sm:$0xff]  ;;  %v7932_v58 = vunpack.c.l.bf16 %v316_v54 }
  0x4b   : > { %643 = vst [vmem:[#allocation2 + $0x100] sm:$0xf] %v313_v28  ;;  %v5601_v7 = vld [vmem:[#allocation2 + $0x18] sm:$0xf]  ;;  %1291 = vmatpush.bf16.msra.mxu0 %v7049_v0  ;;  %7417 = vmatpush.bf16.msra.mxu2 %v7049_v0  ;;  %v7000_v28 = vld [vmem:[#allocation2 + $0xdc] sm:$0xf]  ;;  %v581_v37 = vpack.c.bf16 %v401_v32, %v401_v32 }
  0x4c   : > { %9546 = vst [vmem:[#allocation22_spill] sm:$0xff] %v7886_v60  ;;  %v5697_v16 = vld [vmem:[#allocation2 + $0xd8] sm:$0xf]  ;;  %1380 = vmatpush.bf16.msra.mxu1 %v7057_v3  ;;  %7425 = vmatpush.bf16.msra.mxu3 %v7057_v3  ;;  %v7908_v34 = vor.u32 %v6977_v8, %v5601_v7  ;;  %v447_v36 = vsel %vm282_vm0, 0.0, %v417_v33  ;;  %v7916_v39 = vor.u32 %v7000_v28, %v5699_v29  ;;  %v5615_v21 = vld [vmem:[#allocation2 + $0x3c] sm:$0xf0] }
  0x4d   : > { %628 = vst [vmem:[#allocation2 + $0x4c] sm:$0xf] %v298_v46  ;;  %v7001_v24 = vld [vmem:[#allocation2 + $0xe0] sm:$0xf0]  ;;  %v580_v42 = vpack.c.bf16 %v447_v36, %v447_v36  ;;  %v300_v46 = vld [vmem:[%s7812_s28 + $0x18] sm:$0xf]  ;;  %v7954_v29 = vor.u32 %v6979_v12, %v5615_v21 }
  0x4e   : > { %611 = vst [vmem:[#allocation2 + $0xfc] sm:$0xf] %v579_v59  ;;  %v7910_v35 = vor.u32 %v7001_v24, %v5697_v16  ;;  %v7922_v48 = vunpack.c.l.bf16 %v300_v46  ;;  %v7034_v0 = vld [vmem:[#allocation6 + $0x68] sm:$0xff]  ;;  %v303_v32 = vld [vmem:[%s7812_s28 + $0x24] sm:$0xf] }
  0x4f   : > { %9547 = vst [vmem:[#allocation23_spill] sm:$0xff] %v7891_v2  ;;  %1292 = vmatpush.bf16.msra.mxu0 %v7048_v6  ;;  %7418 = vmatpush.bf16.msra.mxu2 %v7048_v6  ;;  %v7068_v36 = vld [vmem:[#allocation6 + $0x160] sm:$0xff] }
  0x50   : > { %610 = vst [vmem:[#allocation2 + $0xf0] sm:$0xf] %v578_v62  ;;  %1381 = vmatpush.bf16.msra.mxu1 %v7056_v22  ;;  %7426 = vmatpush.bf16.msra.mxu3 %v7056_v22  ;;  %v361_v53 = vrot.slane %v7922_v48, 7  ;;  %v6980_v6 = vld [vmem:[#allocation2 + $0x38] sm:$0xf0] }
  0x51   : > { %629 = vst [vmem:[#allocation2 + $0x58] sm:$0xf] %v299_v57  ;;  %v317_v57 = vld [vmem:[%s7812_s28 + $0x5c] sm:$0xf]  ;;  %v5613_v8 = vld [vmem:[#allocation2 + $0x30] sm:$0xf] }
  0x52   : > { %9548 = vst [vmem:[#allocation24_spill] sm:$0xff] %v7898_v13  ;;  %1293 = vmatmul.bf16.vlgmr.msra.gmra.mxu0 %v7908_v34  ;;  %1333 = vmatmul.bf16.vlgmr.msra.gmra.mxu2 %v7910_v35  ;;  %v7934_v59 = vunpack.c.l.bf16 %v317_v57  ;;  %v394_v61 = vsel %vm390_vm1, %v361_v53, %v377_v56  ;;  %v410_v62 = vsel %vm390_vm1, %v377_v56, %v361_v53  ;;  %v7003_v22 = vld [vmem:[#allocation2 + $0xf4] sm:$0xf]  ;;  %v5711_v24 = vld [vmem:[#allocation2 + $0xfc] sm:$0xf0] }
  0x53   : > { %644 = vst [vmem:[#allocation2 + $0x10c] sm:$0xf] %v314_v63  ;;  %1463 = vmatpush.bf16.msrb.mxu2 %v7071_v30  ;;  %1382 = vmatmul.bf16.vlgmr.msra.gmra.mxu1 %v7914_v38  ;;  %v369_v63 = vrot.slane %v7932_v58, 7  ;;  %v433_v1 = vsel %vm282_vm0, 0.0, %v410_v62  ;;  %v567_v3 = vpack.c.bf16 %v394_v61, %v394_v61  ;;  %v7950_v27 = vor.u32 %v6980_v6, %v5613_v8 }
  0x54   : > { %645 = vst [vmem:[#allocation2 + $0x118] sm:$0xf] %v315_v4  ;;  %1712 = vmatpush.bf16.msrb.mxu3 %v7028_v31  ;;  %1801 = vmatpush.bf16.msrb.mxu0 %v7036_v43  ;;  %v385_v4 = vrot.slane %v7934_v59, 7  ;;  %v566_v7 = vpack.c.bf16 %v433_v1, %v433_v1  ;;  %v7956_v30 = vor.u32 %v7003_v22, %v5711_v24  ;;  %v302_v31 = vld [vmem:[%s7812_s28 + $0x20] sm:$0xf]  ;;  %v7966_v43 = vunpack.c.l.bf16 %v303_v32 }
  0x55   : > { %597 = vst [vmem:[#allocation2 + $0x54] sm:$0xf] %v565_v20  ;;  %1422 = vmatmul.bf16.vlgmr.msra.gmra.mxu3 %v7916_v39  ;;  %v7004_v11 = vld [vmem:[#allocation2 + $0xf8] sm:$0xf0]  ;;  %v7962_v33 = vunpack.c.l.bf16 %v302_v31  ;;  %v304_v24 = vld [vmem:[%s7812_s28 + $0x28] sm:$0xf] }
  0x56   : > { %596 = vst [vmem:[#allocation2 + $0x48] sm:$0xf] %v564_v25  ;;  %v402_v16 = vsel %vm390_vm1, %v369_v63, %v385_v4  ;;  %v418_v17 = vsel %vm390_vm1, %v385_v4, %v369_v63 }
  0x57   : > { %613 = vst [vmem:[#allocation2 + $0x114] sm:$0xf] %v581_v37  ;;  %1464 = vmatpush.bf16.msrb.mxu2 %v7070_v44  ;;  %v5709_v18 = vld [vmem:[#allocation2 + $0xf0] sm:$0xf]  ;;  %v449_v19 = vsel %vm282_vm0, 0.0, %v418_v17  ;;  %v583_v20 = vpack.c.bf16 %v402_v16, %v402_v16  ;;  %v362_v44 = vrot.slane %v7962_v33, 7 }
  0x58   : > { %612 = vst [vmem:[#allocation2 + $0x108] sm:$0xf] %v580_v42  ;;  %1713 = vmatpush.bf16.msrb.mxu3 %v7027_v45  ;;  %1802 = vmatpush.bf16.msrb.mxu0 %v7035_v51  ;;  %v582_v25 = vpack.c.bf16 %v449_v19, %v449_v19  ;;  %v7952_v28 = vor.u32 %v7004_v11, %v5709_v18  ;;  %v7025_v37 = vld [vmem:[#allocation6 + $0x20] sm:$0xff]  ;;  %v5627_v12 = vld [vmem:[#allocation2 + $0x54] sm:$0xf0] }
  0x59   : > { %9549 = vst [vmem:[#allocation25_spill] sm:$0xff] %v7922_v48  ;;  %v7033_v42 = vld [vmem:[#allocation6 + $0x60] sm:$0xff] }
  0x5a   : > { %630 = vst [vmem:[#allocation2 + $0x64] sm:$0xf] %v300_v46  ;;  %v318_v45 = vld [vmem:[%s7812_s28 + $0x60] sm:$0xf]  ;;  %v378_v46 = vrot.slane %v7966_v43, 7 }
  0x5b   : > { %9550 = vst [vmem:[#allocation26_spill] sm:$0xff] %v7926_v49  ;;  %1465 = vmatpush.bf16.msrb.mxu2 %v7069_v52  ;;  %v7972_v51 = vunpack.c.l.bf16 %v318_v45  ;;  %v7006_v16 = vld [vmem:[#allocation2 + $0x10c] sm:$0xf]  ;;  %v5723_v17 = vld [vmem:[#allocation2 + $0x114] sm:$0xf0] }
  0x5c   : > { %631 = vst [vmem:[#allocation2 + $0x70] sm:$0xf] %v301_v47  ;;  %1714 = vmatpush.bf16.msrb.mxu3 %v7026_v55  ;;  %1803 = vmatpush.bf16.msrb.mxu0 %v7034_v0  ;;  %v319_v47 = vld [vmem:[%s7812_s28 + $0x64] sm:$0xf]  ;;  %v395_v53 = vsel %vm390_vm1, %v362_v44, %v378_v46  ;;  %v7996_v22 = vor.u32 %v7006_v16, %v5723_v17 }
  0x5d   : > { %9551 = vst [vmem:[#allocation27_spill] sm:$0xff] %v7932_v58  ;;  %v7974_v52 = vunpack.c.l.bf16 %v319_v47  ;;  %v370_v55 = vrot.slane %v7972_v51, 7  ;;  %v6983_v62 = vld [vmem:[#allocation2 + $0x50] sm:$0xf0]  ;;  %v5625_v0 = vld [vmem:[#allocation2 + $0x48] sm:$0xf] }
  0x5e   : > { %646 = vst [vmem:[#allocation2 + $0x124] sm:$0xf] %v316_v54  ;;  %v411_v54 = vsel %vm390_vm1, %v378_v46, %v362_v44  ;;  %v7007_v1 = vld [vmem:[#allocation2 + $0x110] sm:$0xf0]  ;;  %v7990_v19 = vor.u32 %v6983_v62, %v5625_v0 }
  0x5f   : > { %9552 = vst [vmem:[#allocation28_spill] sm:$0xff] %v7934_v59  ;;  %1466 = vmatpush.bf16.msrb.mxu2 %v7068_v36  ;;  %v435_v56 = vsel %vm282_vm0, 0.0, %v411_v54  ;;  %v386_v61 = vrot.slane %v7974_v52, 7  ;;  %v7024_v36 = vld [vmem:[#allocation6 + $0x18] sm:$0xff] }
  0x60   : > { %647 = vst [vmem:[#allocation2 + $0x130] sm:$0xf] %v317_v57  ;;  %1715 = vmatpush.bf16.msrb.mxu3 %v7025_v37  ;;  %1804 = vmatpush.bf16.msrb.mxu0 %v7033_v42  ;;  %v569_v57 = vpack.c.bf16 %v395_v53, %v395_v53  ;;  %v568_v63 = vpack.c.bf16 %v435_v56, %v435_v56  ;;  %v7032_v37 = vld [vmem:[#allocation6 + $0x58] sm:$0xff] }
  0x61   : > { %599 = vst [vmem:[#allocation2 + $0x6c] sm:$0xf] %v567_v3  ;;  %v6982_v3 = vld [vmem:[#allocation2 + $0x4c] sm:$0xf]  ;;  %v403_v4 = vsel %vm390_vm1, %v370_v55, %v386_v61  ;;  %v419_v6 = vsel %vm390_vm1, %v386_v61, %v370_v55 }
  0x62   : > { %598 = vst [vmem:[#allocation2 + $0x60] sm:$0xf] %v566_v7  ;;  %1298 = vmatmul.bf16.gmra.mxu0 %v7950_v27  ;;  %1338 = vmatmul.bf16.gmra.mxu2 %v7952_v28  ;;  %v5721_v7 = vld [vmem:[#allocation2 + $0x108] sm:$0xf]  ;;  %v451_v8 = vsel %vm282_vm0, 0.0, %v419_v6  ;;  %v585_v11 = vpack.c.bf16 %v403_v4, %v403_v4  ;;  %v7994_v21 = vor.u32 %v6982_v3, %v5627_v12 }
  0x63   : > { %615 = vst [vmem:[#allocation2 + $0x12c] sm:$0xf] %v583_v20  ;;  %1387 = vmatmul.bf16.gmra.mxu1 %v7954_v29  ;;  %v584_v18 = vpack.c.bf16 %v451_v8, %v451_v8  ;;  %v7992_v20 = vor.u32 %v7007_v1, %v5721_v7  ;;  %v6985_v6 = vld [vmem:[#allocation2 + $0x64] sm:$0xf]  ;;  %v5639_v17 = vld [vmem:[#allocation2 + $0x6c] sm:$0xf0] }
  0x64   : > { %614 = vst [vmem:[#allocation2 + $0x120] sm:$0xf] %v582_v25  ;;  %v305_v25 = vld [vmem:[%s7812_s28 + $0x2c] sm:$0xf]  ;;  %1716 = vmatpush.bf16.msrb.mxu3 %v7024_v36  ;;  %1805 = vmatpush.bf16.msrb.mxu0 %v7032_v37  ;;  %v8034_v37 = vor.u32 %v6985_v6, %v5639_v17 }
  0x65   : > { %9553 = vst [vmem:[#allocation29_spill] sm:$0xff] %v7962_v33  ;;  %1427 = vmatmul.bf16.gmra.mxu3 %v7956_v30  ;;  %v8006_v42 = vunpack.c.l.bf16 %v305_v25 }
  0x66   : > { %632 = vst [vmem:[#allocation2 + $0x7c] sm:$0xf] %v302_v31  ;;  %v8002_v31 = vunpack.c.l.bf16 %v304_v24 }
  0x67   : > { %9554 = vst [vmem:[#allocation30_spill] sm:$0xff] %v7966_v43  ;;  %v379_v46 = vrot.slane %v8006_v42, 7 }
  0x68   : > { %633 = vst [vmem:[#allocation2 + $0x88] sm:$0xf] %v303_v32  ;;  %v7067_v32 = vld [vmem:[#allocation6 + $0x158] sm:$0xff]  ;;  %v363_v44 = vrot.slane %v8002_v31, 7 }
  0x69   : > { %9555 = vst [vmem:[#allocation31_spill] sm:$0xff] %v7972_v51  ;;  %1467 = vmatpush.bf16.msrb.mxu2 %v7067_v32  ;;  %v6986_v0 = vld [vmem:[#allocation2 + $0x68] sm:$0xf0]  ;;  %v5637_v3 = vld [vmem:[#allocation2 + $0x60] sm:$0xf] }
  0x6a   : > { %9556 = vst [vmem:[#allocation32_spill] sm:$0xff] %v7974_v52  ;;  %v396_v55 = vsel %vm390_vm1, %v363_v44, %v379_v46  ;;  %v412_v56 = vsel %vm390_vm1, %v379_v46, %v363_v44  ;;  %v7010_v4 = vld [vmem:[#allocation2 + $0x128] sm:$0xf0]  ;;  %v8030_v32 = vor.u32 %v6986_v0, %v5637_v3  ;;  %v307_v46 = vld [vmem:[%s7812_s28 + $0x34] sm:$0xf] }
  0x6b   : > { %648 = vst [vmem:[#allocation2 + $0x13c] sm:$0xf] %v318_v45  ;;  %v320_v45 = vld [vmem:[%s7812_s28 + $0x68] sm:$0xf]  ;;  %v437_v61 = vsel %vm282_vm0, 0.0, %v412_v56  ;;  %v571_v62 = vpack.c.bf16 %v396_v55, %v396_v55  ;;  %v7066_v55 = vld [vmem:[#allocation6 + $0x150] sm:$0xff] }
  0x6c   : > { %649 = vst [vmem:[#allocation2 + $0x148] sm:$0xf] %v319_v47  ;;  %v321_v47 = vld [vmem:[%s7812_s28 + $0x6c] sm:$0xf]  ;;  %v8012_v53 = vunpack.c.l.bf16 %v320_v45  ;;  %v570_v1 = vpack.c.bf16 %v437_v61, %v437_v61  ;;  %v7023_v56 = vld [vmem:[#allocation6 + $0x10] sm:$0xff]  ;;  %v8046_v61 = vunpack.c.l.bf16 %v307_v46 }
  0x6d   : > { %601 = vst [vmem:[#allocation2 + $0x84] sm:$0xf] %v569_v57  ;;  %v8014_v54 = vunpack.c.l.bf16 %v321_v47  ;;  %1468 = vmatpush.bf16.msrb.mxu2 %v7066_v55  ;;  %1717 = vmatpush.bf16.msrb.mxu3 %v7023_v56 }
  0x6e   : > { %600 = vst [vmem:[#allocation2 + $0x78] sm:$0xf] %v568_v63  ;;  %v371_v57 = vrot.slane %v8012_v53, 7  ;;  %v380_v0 = vrot.slane %v8046_v61, 7 }
  0x6f   : > { %617 = vst [vmem:[#allocation2 + $0x144] sm:$0xf] %v585_v11  ;;  %v387_v63 = vrot.slane %v8014_v54, 7  ;;  %v5733_v11 = vld [vmem:[#allocation2 + $0x120] sm:$0xf] }
  0x70   : > { %9557 = vst [vmem:[#allocation33_spill] sm:$0xff] %v7992_v20  ;;  %v8032_v36 = vor.u32 %v7010_v4, %v5733_v11 }
  0x71   : > { %616 = vst [vmem:[#allocation2 + $0x138] sm:$0xf] %v584_v18  ;;  %v404_v7 = vsel %vm390_vm1, %v371_v57, %v387_v63  ;;  %v420_v8 = vsel %vm390_vm1, %v387_v63, %v371_v57  ;;  %v7009_v18 = vld [vmem:[#allocation2 + $0x124] sm:$0xf]  ;;  %v322_v63 = vld [vmem:[%s7812_s28 + $0x70] sm:$0xf] }
  0x72   : > { %9558 = vst [vmem:[#allocation34_spill] sm:$0xff] %v7996_v22  ;;  %1303 = vmatmul.bf16.gmra.mxu0 %v7990_v19  ;;  %1343 = vmatmul.bf16.gmra.mxu2 %v7992_v20  ;;  %v453_v12 = vsel %vm282_vm0, 0.0, %v420_v8  ;;  %v587_v16 = vpack.c.bf16 %v404_v7, %v404_v7  ;;  %v7031_v57 = vld [vmem:[#allocation6 + $0x50] sm:$0xff]  ;;  %v8052_v3 = vunpack.c.l.bf16 %v322_v63 }
  0x73   : > { %9559 = vst [vmem:[#allocation35_spill] sm:$0xff] %v8002_v31  ;;  %1392 = vmatmul.bf16.gmra.mxu1 %v7994_v21  ;;  %1806 = vmatpush.bf16.msrb.mxu0 %v7031_v57 }
  0x74   : > { %634 = vst [vmem:[#allocation2 + $0x94] sm:$0xf] %v304_v24  ;;  %v5735_v24 = vld [vmem:[#allocation2 + $0x12c] sm:$0xf0]  ;;  %v372_v8 = vrot.slane %v8052_v3, 7 }
  0x75   : > { %1432 = vmatmul.bf16.gmra.mxu3 %v7996_v22  ;;  %9560 = vst [vmem:[#allocation36_spill] sm:$0xff] %v8006_v42  ;;  %v8036_v44 = vor.u32 %v7009_v18, %v5735_v24  ;;  %v6989_v17 = vld [vmem:[#allocation2 + $0x80] sm:$0xf0]  ;;  %v5649_v24 = vld [vmem:[#allocation2 + $0x78] sm:$0xf] }
  0x76   : > { %635 = vst [vmem:[#allocation2 + $0xa0] sm:$0xf] %v305_v25  ;;  %v586_v25 = vpack.c.bf16 %v453_v12, %v453_v12 }
  0x77   : > { %9561 = vst [vmem:[#allocation37_spill] sm:$0xff] %v8012_v53 }
  0x78   : > { %9562 = vst [vmem:[#allocation38_spill] sm:$0xff] %v8014_v54  ;;  %v5745_v56 = vld [vmem:[#allocation2 + $0x138] sm:$0xf] }
  0x79   : > { %650 = vst [vmem:[#allocation2 + $0x154] sm:$0xf] %v320_v45  ;;  %v306_v45 = vld [vmem:[%s7812_s28 + $0x30] sm:$0xf] }
  0x7a   : > { %651 = vst [vmem:[#allocation2 + $0x160] sm:$0xf] %v321_v47  ;;  %v8042_v47 = vunpack.c.l.bf16 %v306_v45 }
  0x7b   : > { %603 = vst [vmem:[#allocation2 + $0x9c] sm:$0xf] %v571_v62 }
  0x7c   : > { %602 = vst [vmem:[#allocation2 + $0x90] sm:$0xf] %v570_v1  ;;  %v364_v62 = vrot.slane %v8042_v47, 7  ;;  %v323_v1 = vld [vmem:[%s7812_s28 + $0x74] sm:$0xf] }
  0x7d   : > { %619 = vst [vmem:[#allocation2 + $0x15c] sm:$0xf] %v587_v16  ;;  %v8054_v4 = vunpack.c.l.bf16 %v323_v1 }
  0x7e   : > { %9563 = vst [vmem:[#allocation39_spill] sm:$0xff] %v8032_v36  ;;  %v397_v6 = vsel %vm390_vm1, %v364_v62, %v380_v0  ;;  %v413_v7 = vsel %vm390_vm1, %v380_v0, %v364_v62  ;;  %v7012_v0 = vld [vmem:[#allocation2 + $0x13c] sm:$0xf] }
  0x7f   : > { %618 = vst [vmem:[#allocation2 + $0x150] sm:$0xf] %v586_v25  ;;  %v439_v11 = vsel %vm282_vm0, 0.0, %v413_v7  ;;  %v573_v12 = vpack.c.bf16 %v397_v6, %v397_v6  ;;  %v388_v16 = vrot.slane %v8054_v4, 7  ;;  %v7013_v25 = vld [vmem:[#allocation2 + $0x140] sm:$0xf0]  ;;  %v8070_v7 = vor.u32 %v6989_v17, %v5649_v24 }
  0x80   : > { %9564 = vst [vmem:[#allocation40_spill] sm:$0xff] %v8036_v44  ;;  %v572_v18 = vpack.c.bf16 %v439_v11, %v439_v11  ;;  %v8072_v11 = vor.u32 %v7013_v25, %v5745_v56  ;;  %v7065_v17 = vld [vmem:[#allocation6 + $0x148] sm:$0xff] }
  0x81   : > { %9565 = vst [vmem:[#allocation41_spill] sm:$0xff] %v8042_v47  ;;  %v421_v55 = vsel %vm390_vm1, %v388_v16, %v372_v8  ;;  %v7022_v24 = vld [vmem:[#allocation6 + $0x8] sm:$0xff]  ;;  %1469 = vmatpush.bf16.msrb.mxu2 %v7065_v17 }
  0x82   : > { %1308 = vmatmul.bf16.gmra.mxu0 %v8030_v32  ;;  %1348 = vmatmul.bf16.gmra.mxu2 %v8032_v36  ;;  %636 = vst [vmem:[#allocation2 + $0xac] sm:$0xf] %v306_v45  ;;  %v6988_v45 = vld [vmem:[#allocation2 + $0x7c] sm:$0xf]  ;;  %v455_v57 = vsel %vm282_vm0, 0.0, %v421_v55  ;;  %v7044_v55 = vld [vmem:[#allocation6 + $0xb8] sm:$0xff] }
  0x83   : > { %1397 = vmatmul.bf16.gmra.mxu1 %v8034_v37  ;;  %9566 = vst [vmem:[#allocation42_spill] sm:$0xff] %v8046_v61  ;;  %v588_v6 = vpack.c.bf16 %v455_v57, %v455_v57  ;;  %v7030_v25 = vld [vmem:[#allocation6 + $0x48] sm:$0xff]  ;;  %v324_v57 = vld [vmem:[%s7812_s28 + $0x78] sm:$0xf]  ;;  %1718 = vmatpush.bf16.msrb.mxu3 %v7022_v24 }
  0x84   : > { %637 = vst [vmem:[#allocation2 + $0xb8] sm:$0xf] %v307_v46  ;;  %v405_v46 = vsel %vm390_vm1, %v372_v8, %v388_v16  ;;  %v308_v16 = vld [vmem:[%s7812_s28 + $0x38] sm:$0xf]  ;;  %1807 = vmatpush.bf16.msrb.mxu0 %v7030_v25  ;;  %1890 = vmatpush.bf16.msrb.mxu1 %v7044_v55  ;;  %v6992_v25 = vld [vmem:[#allocation2 + $0x98] sm:$0xf0] }
  0x85   : > { %1437 = vmatmul.bf16.gmra.mxu3 %v8036_v44  ;;  %9567 = vst [vmem:[#allocation43_spill] sm:$0xff] %v8052_v3  ;;  %v589_v62 = vpack.c.bf16 %v405_v46, %v405_v46  ;;  %v8082_v46 = vunpack.c.l.bf16 %v308_v16  ;;  %v7016_v36 = vld [vmem:[#allocation2 + $0x158] sm:$0xf0] }
  0x86   : > { %9568 = vst [vmem:[#allocation44_spill] sm:$0xff] %v8054_v4 }
  0x87   : > { %652 = vst [vmem:[#allocation2 + $0x16c] sm:$0xf] %v322_v63  ;;  %v5651_v63 = vld [vmem:[#allocation2 + $0x84] sm:$0xf0]  ;;  %v365_v56 = vrot.slane %v8082_v46, 7 }
  0x88   : > { %653 = vst [vmem:[#allocation2 + $0x178] sm:$0xf] %v323_v1  ;;  %v5747_v1 = vld [vmem:[#allocation2 + $0x144] sm:$0xf0] }
  0x89   : > { %605 = vst [vmem:[#allocation2 + $0xb4] sm:$0xf] %v573_v12  ;;  %v8074_v12 = vor.u32 %v6988_v45, %v5651_v63  ;;  %v8076_v8 = vor.u32 %v7012_v0, %v5747_v1  ;;  %v325_v63 = vld [vmem:[%s7812_s28 + $0x7c] sm:$0xf]  ;;  %v8092_v0 = vunpack.c.l.bf16 %v324_v57 }
  0x8a   : > { %604 = vst [vmem:[#allocation2 + $0xa8] sm:$0xf] %v572_v18  ;;  %v309_v18 = vld [vmem:[%s7812_s28 + $0x3c] sm:$0xf]  ;;  %v8094_v1 = vunpack.c.l.bf16 %v325_v63  ;;  %s7608_s28 = scalar_lea.hbm %s7607_s16, 128 }
  0x8b   : > { %621 = vst [vmem:[#allocation2 + $0x174] sm:$0xf] %v589_v62  ;;  %v8086_v45 = vunpack.c.l.bf16 %v309_v18  ;;  %p7609_p1 = scmp.ne.s32.totalorder %s7607_s16, %s7608_s28  ;;  %p7614_p2 = scmp.lt.s32.totalorder %s7612_s11, %s7608_s28 }
  0x8c   : > { %9569 = vst [vmem:[#allocation45_spill] sm:$0xff] %v8072_v11 }
  0x8d   : > { %620 = vst [vmem:[#allocation2 + $0x168] sm:$0xf] %v588_v6  ;;  %v381_v62 = vrot.slane %v8086_v45, 7  ;;  %p7610_p4 = pnand %p7609_p1, %p7773_p3  ;;  %p7615_p9 = por %p7614_p2, %p7613_p11 }
  0x8e   : > { %9570 = vst [vmem:[#allocation46_spill] sm:$0xff] %v8076_v8 }
  0x8f   : > { %9571 = vst [vmem:[#allocation47_spill] sm:$0xff] %v8082_v46  ;;  %v398_v6 = vsel %vm390_vm1, %v365_v56, %v381_v62  ;;  %p7611_p8 = pneg %p7610_p4 }
  0x90   : > { %638 = vst [vmem:[#allocation2 + $0xc4] sm:$0xf] %v308_v16  ;;  %v414_v16 = vsel %vm390_vm1, %v381_v62, %v365_v56  ;;  %v575_v24 = vpack.c.bf16 %v398_v6, %v398_v6  ;;  %v5757_v62 = vld [vmem:[#allocation2 + $0x150] sm:$0xf] }
  0x91   : > { %9572 = vst [vmem:[#allocation48_spill] sm:$0xff] %v8086_v45  ;;  %v441_v17 = vsel %vm282_vm0, 0.0, %v414_v16  ;;  %v5663_v16 = vld [vmem:[#allocation2 + $0x9c] sm:$0xf0]  ;;  %p7616_p10 = pnand %p7615_p9, %p7611_p8 }
  0x92   : > { %1313 = vmatmul.bf16.gmra.mxu0 %v8070_v7  ;;  %1353 = vmatmul.bf16.gmra.mxu2 %v8072_v11  ;;  %639 = vst [vmem:[#allocation2 + $0xd0] sm:$0xf] %v309_v18  ;;  %v373_v18 = vrot.slane %v8092_v0, 7  ;;  %v389_v11 = vrot.slane %v8094_v1, 7  ;;  %v574_v55 = vpack.c.bf16 %v441_v17, %v441_v17 }
  0x93   : > { %1402 = vmatmul.bf16.gmra.mxu1 %v8074_v12  ;;  %9573 = vst [vmem:[#allocation49_spill] sm:$0xff] %v8092_v0  ;;  %v5759_v0 = vld [vmem:[#allocation2 + $0x15c] sm:$0xf0] }
  0x94   : > { %9574 = vst [vmem:[#allocation50_spill] sm:$0xff] %v8094_v1  ;;  %v406_v44 = vsel %vm390_vm1, %v373_v18, %v389_v11  ;;  %v422_v56 = vsel %vm390_vm1, %v389_v11, %v373_v18  ;;  %v7015_v1 = vld [vmem:[#allocation2 + $0x154] sm:$0xf]  ;;  %v459_v18 = vrot.slane %v7826_v9, 1  ;;  %v7668_v9 = vmov 0  }
  0x95   : > { %1442 = vmatmul.bf16.gmra.mxu3 %v8076_v8  ;;  %654 = vst [vmem:[#allocation2 + $0x184] sm:$0xf] %v324_v57  ;;  %v5661_v8 = vld [vmem:[#allocation2 + $0x90] sm:$0xf]  ;;  %v6991_v57 = vld [vmem:[#allocation2 + $0x94] sm:$0xf]  ;;  %v591_v6 = vpack.c.bf16 %v406_v44, %v406_v44  ;;  %v8116_v20 = vor.u32 %v7015_v1, %v5759_v0 }
  0x96   : > { %655 = vst [vmem:[#allocation2 + $0x190] sm:$0xf] %v325_v63  ;;  %v457_v63 = vsel %vm282_vm0, 0.0, %v422_v56  ;;  %v8110_v4 = vor.u32 %v6992_v25, %v5661_v8  ;;  %v8114_v3 = vor.u32 %v6991_v57, %v5663_v16  ;;  %v7043_v44 = vld [vmem:[#allocation6 + $0xb0] sm:$0xff]  ;;  %v7064_v11 = vld [vmem:[#allocation6 + $0x140] sm:$0xff]  ;;  %v475_v0 = vrot.slane %v7828_v10, 1 }
  0x97   : > { %607 = vst [vmem:[#allocation2 + $0xcc] sm:$0xf] %v575_v24  ;;  %v590_v17 = vpack.c.bf16 %v457_v63, %v457_v63  ;;  %v8112_v24 = vor.u32 %v7016_v36, %v5757_v62  ;;  %v7021_v8 = vld [vmem:[#allocation6] sm:$0xff]  ;;  %v8124_v36 = vadd.s32 8, %v7822_v5  ;;  %1891 = vmatpush.bf16.msrb.mxu1 %v7043_v44  ;;  %v7042_v1 = vld [vmem:[#allocation6 + $0xa8] sm:$0xff]  ;;  %1470 = vmatpush.bf16.msrb.mxu2 %v7064_v11 }
  0x98   : > { %606 = vst [vmem:[#allocation2 + $0xc0] sm:$0xf] %v574_v55  ;;  %v7029_v25 = vld [vmem:[#allocation6 + $0x40] sm:$0xff]  ;;  %1719 = vmatpush.bf16.msrb.mxu3 %v7021_v8  ;;  %v508_v55 = vsel %vm491_vm2, %v475_v0, %v459_v18  ;;  %v492_v57 = vsel %vm491_vm2, %v459_v18, %v475_v0  ;;  %v5673_v16 = vld [vmem:[#allocation2 + $0xa8] sm:$0xf] }
  0x99   : > { %623 = vst [vmem:[#allocation2 + $0x18c] sm:$0xf] %v591_v6  ;;  %vm285_vm3 = vcmp.eq.s32.totalorder %v8124_v36, 15  ;;  %1808 = vmatpush.bf16.msrb.mxu0 %v7029_v25  ;;  %v656_v62 = vpack.c.bf16 %v492_v57, %v492_v57  ;;  %v7041_v6 = vld [vmem:[#allocation6 + $0xa0] sm:$0xff]  ;;  %v6994_v44 = vld [vmem:[#allocation2 + $0xac] sm:$0xf] }
  0x9a   : > { %9575 = vst [vmem:[#allocation51_spill] sm:$0xff] %v8112_v24  ;;  %v529_v56 = vsel %vm285_vm3, 0.0, %v508_v55  ;;  %v5675_v11 = vld [vmem:[#allocation2 + $0xb4] sm:$0xf0]  ;;  %v5769_v8 = vld [vmem:[#allocation2 + $0x168] sm:$0xf] }
  0x9b   : > { %622 = vst [vmem:[#allocation2 + $0x180] sm:$0xf] %v590_v17  ;;  %v657_v63 = vpack.c.bf16 %v529_v56, %v529_v56  ;;  %1892 = vmatpush.bf16.msrb.mxu1 %v7042_v1  ;;  %v6995_v17 = vld [vmem:[#allocation2 + $0xb0] sm:$0xf0]  ;;  %v7018_v25 = vld [vmem:[#allocation2 + $0x16c] sm:$0xf]  ;;  %v8139_v55 = vor.u32 %v6994_v44, %v5675_v11 }
  0x9c   : > { %9576 = vst [vmem:[#allocation52_spill] sm:$0xff] %v8116_v20  ;;  %v7019_v10 = vld [vmem:[#allocation2 + $0x170] sm:$0xf0]  ;;  %v8135_v18 = vor.u32 %v6995_v17, %v5673_v16  ;;  %v7040_v1 = vld [vmem:[#allocation6 + $0x98] sm:$0xff]  ;;  %v460_v56 = vrot.slane %v7844_v23, 1 }
  0x9d   : > { %688 = vst [vmem:[#allocation2 + $0x20] sm:$0xf] %v656_v62  ;;  %v8137_v0 = vor.u32 %v7019_v10, %v5769_v8  ;;  %v7127_v10 = vld [vmem:[#allocation6 + $0x1b8] sm:$0xff]  ;;  %v5687_v23 = vld [vmem:[#allocation2 + $0xcc] sm:$0xf0] }
  0x9e   : > { %689 = vst [vmem:[#allocation2 + $0x2c] sm:$0xf] %v657_v63  ;;  %v7135_v62 = vld [vmem:[#allocation6 + $0x1f8] sm:$0xff]  ;;  %v7039_v63 = vld [vmem:[#allocation6 + $0x90] sm:$0xff]  ;;  %2492 = vmatpush.bf16.msra.mxu2 %v7127_v10  ;;  %v7037_v10 = vld [vmem:[#allocation6 + $0x80] sm:$0xff] }
  0x9f   : > { %286 = vst [vmem:[#allocation2] sm:$0xff] %v7668_v9  ;;  %1893 = vmatpush.bf16.msrb.mxu1 %v7041_v6  ;;  %2581 = vmatpush.bf16.msra.mxu3 %v7135_v62  ;;  %v7038_v6 = vld [vmem:[#allocation6 + $0x88] sm:$0xff]  ;;  %v7143_v8 = vld [vmem:[#allocation6 + $0x238] sm:$0xff]  ;;  %v5685_v62 = vld [vmem:[#allocation2 + $0xc0] sm:$0xf] }
  0xa0   : > { %288 = vst [vmem:[#allocation2 + $0xc] sm:$0xff] %v7668_v9  ;;  %2670 = vmatpush.bf16.msra.mxu0 %v7143_v8 }
  0xa1   : > { %287 = vst [vmem:[#allocation2 + $0x8] sm:$0xf] %v7668_v9 }
  0xa2   : > { %1318 = vmatmul.bf16.gmra.mxu0 %v8110_v4  ;;  %1358 = vmatmul.bf16.gmra.mxu2 %v8112_v24  ;;  %v5771_v24 = vld [vmem:[#allocation2 + $0x174] sm:$0xf0]  ;;  %9577 = vst [vmem:[#allocation53_spill] sm:$0xff] %v8137_v0 }
  0xa3   : > { %1407 = vmatmul.bf16.gmra.mxu1 %v8114_v3  ;;  %289 = vst [vmem:[#allocation2 + $0x14] sm:$0xf] %v7668_v9  ;;  %v8141_v57 = vor.u32 %v7018_v25, %v5771_v24  ;;  %v476_v24 = vrot.slane %v7850_v26, 1  ;;  %v6998_v25 = vld [vmem:[#allocation2 + $0xc8] sm:$0xf0] }
  0xa4   : > { %290 = vst [vmem:[#allocation2 + $0x198] sm:$0xff] %v7668_v9  ;;  %1894 = vmatpush.bf16.msrb.mxu1 %v7040_v1  ;;  %v6997_v1 = vld [vmem:[#allocation2 + $0xc4] sm:$0xf]  ;;  %v7046_v26 = vld [vmem:[#allocation2 + $0x188] sm:$0xf0] }
  0xa5   : > { %1447 = vmatmul.bf16.gmra.mxu3 %v8116_v20  ;;  %9578 = vst [vmem:[#allocation54_spill] sm:$0xff] %v8141_v57  ;;  %v493_v16 = vsel %vm491_vm2, %v460_v56, %v476_v24  ;;  %v6978_v8 = vld [vmem:[#allocation2 + $0x28] sm:$0xf0] }
  0xa6   : > { %291 = vst [vmem:[#allocation2 + $0x1a0] sm:$0xf] %v7668_v9  ;;  %v658_v44 = vpack.c.bf16 %v493_v16, %v493_v16  ;;  %v8157_v16 = vor.u32 %v6997_v1, %v5687_v23  ;;  %v6973_v1 = vld [vmem:[#allocation2 + $0x4] sm:$0xf] }
  0xa7   : > { %292 = vst [vmem:[#allocation2 + $0x1a4] sm:$0xff] %v7668_v9 }
  0xa8   : > { %293 = vst [vmem:[#allocation2 + $0x1ac] sm:$0xf] %v7668_v9  ;;  %1895 = vmatpush.bf16.msrb.mxu1 %v7039_v63  ;;  %v509_v9 = vsel %vm491_vm2, %v476_v24, %v460_v56  ;;  %v5781_v63 = vld [vmem:[#allocation2 + $0x180] sm:$0xf]  ;;  %v8155_v56 = vor.u32 %v6998_v25, %v5685_v62  ;;  %v6974_v62 = vld [vmem:[#allocation2 + $0x8] sm:$0xf0] }
  0xa9   : > { %v531_v17 = vsel %vm285_vm3, 0.0, %v509_v9  ;;  %690 = vst [vmem:[#allocation2 + $0x38] sm:$0xf] %v658_v44  ;;  %v5782_v24 = vor.u32 %v7046_v26, %v5781_v63  ;;  %v5889_v25 = vld [vmem:[#allocation2] sm:$0xf] }
  0xaa   : > { %v659_v11 = vpack.c.bf16 %v531_v17, %v531_v17  ;;  %v477_v17 = vrot.slane %v7886_v60, 1  ;;  %v5897_v63 = vld [vmem:[#allocation2 + $0x8] sm:$0xf]  ;;  %v5890_v20 = vor.u32 %v6974_v62, %v5889_v25 }
  0xac   : > { %1896 = vmatpush.bf16.msrb.mxu1 %v7038_v6  ;;  %691 = vst [vmem:[#allocation2 + $0x44] sm:$0xf] %v659_v11  ;;  %v461_v6 = vrot.slane %v7876_v50, 1  ;;  %v5609_v11 = vld [vmem:[#allocation2 + $0x20] sm:$0xf] }
  0xae   : > { %v510_v44 = vsel %vm491_vm2, %v477_v17, %v461_v6  ;;  %v494_v26 = vsel %vm491_vm2, %v461_v6, %v477_v17 }
  0xaf   : > { %v533_v23 = vsel %vm285_vm3, 0.0, %v510_v44  ;;  %v7126_v44 = vld [vmem:[#allocation6 + $0x1b0] sm:$0xff] }
  0xb0   : > { %1897 = vmatpush.bf16.msrb.mxu1 %v7037_v10  ;;  %v5891_v10 = vld [vmem:[#allocation2 + $0xc] sm:$0xf0]  ;;  %2493 = vmatpush.bf16.msra.mxu2 %v7126_v44 }
  0xb1   : > { %v5894_v60 = vor.u32 %v6973_v1, %v5891_v10 }
  0xb2   : > { %1323 = vmatmul.bf16.gmra.mxu0 %v8135_v18  ;;  %1363 = vmatmul.bf16.gmra.mxu2 %v8137_v0  ;;  %v7045_v0 = vld [vmem:[#allocation2 + $0x184] sm:$0xf] }
  0xb3   : > { %1412 = vmatmul.bf16.gmra.mxu1 %v8139_v55 }
  0xb5   : > { %1452 = vmatmul.bf16.gmra.mxu3 %v8141_v57  ;;  %v5783_v57 = vld [vmem:[#allocation2 + $0x18c] sm:$0xf0] }
  0xb6   : > { %v5786_v9 = vor.u32 %v7045_v0, %v5783_v57  ;;  %v660_v0 = vpack.c.bf16 %v494_v26, %v494_v26  ;;  %v661_v57 = vpack.c.bf16 %v533_v23, %v533_v23  ;;  %v7134_v26 = vld [vmem:[#allocation6 + $0x1f0] sm:$0xff]  ;;  %v462_v23 = vrot.slane %v7922_v48, 1 }
  0xb7   : > { %2582 = vmatpush.bf16.msra.mxu3 %v7134_v26 }
  0xb8   : > { %692 = vst [vmem:[#allocation2 + $0x50] sm:$0xf] %v660_v0  ;;  %v478_v0 = vrot.slane %v7926_v49, 1 }
  0xb9   : > { %693 = vst [vmem:[#allocation2 + $0x5c] sm:$0xf] %v661_v57 }
  0xc2   : > { %1328 = vmatmul.bf16.gmra.mxu0 %v8155_v56  ;;  %1368 = vmatmul.bf16.gmra.mxu2 %v5782_v24  ;;  %v6975_v24 = vld [vmem:[#allocation2 + $0x10] sm:$0xf0] }
  0xc3   : > { %1417 = vmatmul.bf16.gmra.mxu1 %v8157_v16  ;;  %v5898_v6 = vor.u32 %v6975_v24, %v5897_v63  ;;  %v7142_v24 = vld [vmem:[#allocation6 + $0x230] sm:$0xff] }
  0xc4   : > { %2671 = vmatpush.bf16.msra.mxu0 %v7142_v24 }
  0xc5   : > { %1457 = vmatmul.bf16.gmra.mxu3 %v5786_v9  ;;  %v5610_v9 = vor.u32 %v6978_v8, %v5609_v11  ;;  %v511_v11 = vsel %vm491_vm2, %v478_v0, %v462_v23 }
  0xcf   : > { %v1294_v50 = vpop.f32.mrf.mxu0 }
  0xd0   : > { %v1383_v17 = vpop.f32.mrf.mxu1 }
  0xd1   : > { %v8169_v22 = vadd.f32 %v1383_v17, %v1294_v50  ;;  %v495_v50 = vsel %vm491_vm2, %v462_v23, %v478_v0  ;;  %v6981_v17 = vld [vmem:[#allocation2 + $0x40] sm:$0xf0] }
  0xd2   : > { %1471 = vmatmul.bf16.vlgmr.msrb.gmra.mxu2 %v5610_v9  ;;  %1809 = vmatmul.bf16.vlgmr.msrb.gmra.mxu0 %v5894_v60  ;;  %v535_v60 = vsel %vm285_vm3, 0.0, %v511_v11  ;;  %v662_v1 = vpack.c.bf16 %v495_v50, %v495_v50  ;;  %v463_v50 = vrot.slane %v7962_v33, 1 }
  0xd3   : > { %1898 = vmatmul.bf16.vlgmr.msrb.gmra.mxu1 %v5898_v6  ;;  %v663_v10 = vpack.c.bf16 %v535_v60, %v535_v60  ;;  %v5621_v6 = vld [vmem:[#allocation2 + $0x38] sm:$0xf]  ;;  %v479_v60 = vrot.slane %v7966_v43, 1 }
  0xd4   : > { %694 = vst [vmem:[#allocation2 + $0x68] sm:$0xf] %v662_v1  ;;  %v5622_v23 = vor.u32 %v6981_v17, %v5621_v6 }
  0xd5   : > { %1720 = vmatmul.bf16.vlgmr.msrb.gmra.mxu3 %v5890_v20  ;;  %v1334_v57 = vpop.f32.mrf.mxu2  ;;  %695 = vst [vmem:[#allocation2 + $0x74] sm:$0xf] %v663_v10  ;;  %v512_v1 = vsel %vm491_vm2, %v479_v60, %v463_v50 }
  0xd6   : > { %v537_v24 = vsel %vm285_vm3, 0.0, %v512_v1 }
  0xd7   : > { %v1296_v25 = vpop.f32.mrf.mxu0 }
  0xd8   : > { %v1423_v8 = vpop.f32.mrf.mxu3  ;;  %v1385_v62 = vpop.f32.mrf.mxu1 }
  0xd9   : > { %v8179_v20 = vadd.f32 %v1423_v8, %v1334_v57  ;;  %v8181_v63 = vadd.f32 %v1385_v62, %v1296_v25  ;;  %v496_v62 = vsel %vm491_vm2, %v463_v50, %v479_v60 }
  0xdd   : > { %v1336_v44 = vpop.f32.mrf.mxu2 }
  0xdf   : > { %v1299_v11 = vpop.f32.mrf.mxu0 }
  0xe0   : > { %v1425_v26 = vpop.f32.mrf.mxu3  ;;  %v1388_v57 = vpop.f32.mrf.mxu1 }
  0xe1   : > { %v8183_v0 = vadd.f32 %v1425_v26, %v1336_v44  ;;  %v8185_v8 = vadd.f32 %v1388_v57, %v1299_v11  ;;  %v5633_v26 = vld [vmem:[#allocation2 + $0x50] sm:$0xf]  ;;  %v6984_v11 = vld [vmem:[#allocation2 + $0x58] sm:$0xf0] }
  0xe2   : > { %1476 = vmatmul.bf16.gmra.mxu2 %v5622_v23  ;;  %1814 = vmatmul.bf16.gmra.mxu0 %v7914_v38  ;;  %v5634_v33 = vor.u32 %v6984_v11, %v5633_v26 }
  0xe3   : > { %1903 = vmatmul.bf16.gmra.mxu1 %v5610_v9  ;;  %v665_v9 = vpack.c.bf16 %v537_v24, %v537_v24  ;;  %v480_v24 = vrot.slane %v8006_v42, 1 }
  0xe5   : > { %1725 = vmatmul.bf16.gmra.mxu3 %v7908_v34  ;;  %v1339_v25 = vpop.f32.mrf.mxu2  ;;  %v664_v34 = vpack.c.bf16 %v496_v62, %v496_v62  ;;  %697 = vst [vmem:[#allocation2 + $0x8c] sm:$0xf] %v665_v9  ;;  %v464_v62 = vrot.slane %v8002_v31, 1 }
  0xe7   : > { %v1301_v38 = vpop.f32.mrf.mxu0  ;;  %696 = vst [vmem:[#allocation2 + $0x80] sm:$0xf] %v664_v34  ;;  %v497_v9 = vsel %vm491_vm2, %v464_v62, %v480_v24 }
  0xe8   : > { %v1428_v10 = vpop.f32.mrf.mxu3  ;;  %v1390_v17 = vpop.f32.mrf.mxu1 }
  0xe9   : > { %v8197_v6 = vadd.f32 %v1428_v10, %v1339_v25  ;;  %v8199_v44 = vadd.f32 %v1390_v17, %v1301_v38  ;;  %v7125_v25 = vld [vmem:[#allocation6 + $0x1a8] sm:$0xff]  ;;  %v666_v17 = vpack.c.bf16 %v497_v9, %v497_v9  ;;  %v465_v9 = vrot.slane %v8042_v47, 1 }
  0xea   : > { %v7133_v10 = vld [vmem:[#allocation6 + $0x1e8] sm:$0xff]  ;;  %2494 = vmatpush.bf16.msra.mxu2 %v7125_v25  ;;  %v6987_v25 = vld [vmem:[#allocation2 + $0x70] sm:$0xf0] }
  0xeb   : > { %2583 = vmatpush.bf16.msra.mxu3 %v7133_v10  ;;  %698 = vst [vmem:[#allocation2 + $0x98] sm:$0xf] %v666_v17 }
  0xed   : > { %v1341_v57 = vpop.f32.mrf.mxu2 }
  0xef   : > { %v1304_v50 = vpop.f32.mrf.mxu0 }
  0xf0   : > { %v1430_v43 = vpop.f32.mrf.mxu3  ;;  %v1393_v60 = vpop.f32.mrf.mxu1 }
  0xf1   : > { %v8201_v49 = vadd.f32 %v1430_v43, %v1341_v57  ;;  %v8203_v1 = vadd.f32 %v1393_v60, %v1304_v50  ;;  %v513_v43 = vsel %vm491_vm2, %v480_v24, %v464_v62  ;;  %v7141_v50 = vld [vmem:[#allocation6 + $0x228] sm:$0xff]  ;;  %v5645_v60 = vld [vmem:[#allocation2 + $0x68] sm:$0xf] }
  0xf2   : > { %1481 = vmatmul.bf16.gmra.mxu2 %v5634_v33  ;;  %1819 = vmatmul.bf16.gmra.mxu0 %v7954_v29  ;;  %v5646_v62 = vor.u32 %v6987_v25, %v5645_v60 }
  0xf3   : > { %1908 = vmatmul.bf16.gmra.mxu1 %v5622_v23  ;;  %2672 = vmatpush.bf16.msra.mxu0 %v7141_v50 }
  0xf5   : > { %1730 = vmatmul.bf16.gmra.mxu3 %v7950_v27  ;;  %v1344_v38 = vpop.f32.mrf.mxu2  ;;  %v539_v27 = vsel %vm285_vm3, 0.0, %v513_v43 }
  0xf6   : > { %v667_v26 = vpack.c.bf16 %v539_v27, %v539_v27  ;;  %v481_v27 = vrot.slane %v8046_v61, 1 }
  0xf7   : > { %v1306_v23 = vpop.f32.mrf.mxu0 }
  0xf8   : > { %v1433_v34 = vpop.f32.mrf.mxu3  ;;  %v1395_v11 = vpop.f32.mrf.mxu1  ;;  %699 = vst [vmem:[#allocation2 + $0xa4] sm:$0xf] %v667_v26  ;;  %v514_v17 = vsel %vm491_vm2, %v481_v27, %v465_v9  ;;  %v498_v26 = vsel %vm491_vm2, %v465_v9, %v481_v27 }
  0xf9   : > { %v8215_v29 = vadd.f32 %v1433_v34, %v1344_v38  ;;  %v8217_v57 = vadd.f32 %v1395_v11, %v1306_v23  ;;  %v541_v11 = vsel %vm285_vm3, 0.0, %v514_v17 }
  0xfd   : > { %v1346_v10 = vpop.f32.mrf.mxu2 }
  0xff   : > { %v1309_v43 = vpop.f32.mrf.mxu0 }
 0x100   : > { %v1435_v42 = vpop.f32.mrf.mxu3  ;;  %v1398_v38 = vpop.f32.mrf.mxu1 }
 0x101   : > { %v8219_v24 = vadd.f32 %v1435_v42, %v1346_v10  ;;  %v8221_v34 = vadd.f32 %v1398_v38, %v1309_v43  ;;  %v5657_v10 = vld [vmem:[#allocation2 + $0x80] sm:$0xf]  ;;  %v6990_v43 = vld [vmem:[#allocation2 + $0x88] sm:$0xf0] }
 0x102   : > { %1486 = vmatmul.bf16.gmra.mxu2 %v5646_v62  ;;  %1824 = vmatmul.bf16.gmra.mxu0 %v7994_v21  ;;  %v5658_v47 = vor.u32 %v6990_v43, %v5657_v10 }
 0x103   : > { %1913 = vmatmul.bf16.gmra.mxu1 %v5634_v33  ;;  %v669_v33 = vpack.c.bf16 %v541_v11, %v541_v11  ;;  %v482_v11 = vrot.slane %v8086_v45, 1 }
 0x105   : > { %1735 = vmatmul.bf16.gmra.mxu3 %v7990_v19  ;;  %v1349_v23 = vpop.f32.mrf.mxu2  ;;  %v668_v19 = vpack.c.bf16 %v498_v26, %v498_v26  ;;  %701 = vst [vmem:[#allocation2 + $0xbc] sm:$0xf] %v669_v33  ;;  %v466_v26 = vrot.slane %v8082_v46, 1 }
 0x107   : > { %v1311_v21 = vpop.f32.mrf.mxu0  ;;  %700 = vst [vmem:[#allocation2 + $0xb0] sm:$0xf] %v668_v19  ;;  %v499_v33 = vsel %vm491_vm2, %v466_v26, %v482_v11 }
 0x108   : > { %v1438_v42 = vpop.f32.mrf.mxu3  ;;  %v1400_v60 = vpop.f32.mrf.mxu1 }
 0x109   : > { %v8233_v50 = vadd.f32 %v1438_v42, %v1349_v23  ;;  %v8235_v25 = vadd.f32 %v1400_v60, %v1311_v21  ;;  %v7124_v23 = vld [vmem:[#allocation6 + $0x1a0] sm:$0xff]  ;;  %v670_v60 = vpack.c.bf16 %v499_v33, %v499_v33  ;;  %v467_v33 = vrot.slane %v7834_v14, 1 }
 0x10a   : > { %v7132_v42 = vld [vmem:[#allocation6 + $0x1e0] sm:$0xff]  ;;  %2495 = vmatpush.bf16.msra.mxu2 %v7124_v23  ;;  %v6993_v23 = vld [vmem:[#allocation2 + $0xa0] sm:$0xf0] }
 0x10b   : > { %2584 = vmatpush.bf16.msra.mxu3 %v7132_v42  ;;  %702 = vst [vmem:[#allocation2 + $0xc8] sm:$0xf] %v670_v60 }
 0x10d   : > { %v1351_v38 = vpop.f32.mrf.mxu2 }
 0x10f   : > { %v1314_v9 = vpop.f32.mrf.mxu0 }
 0x110   : > { %v1440_v61 = vpop.f32.mrf.mxu3  ;;  %v1403_v27 = vpop.f32.mrf.mxu1 }
 0x111   : > { %v8237_v31 = vadd.f32 %v1440_v61, %v1351_v38  ;;  %v8239_v17 = vadd.f32 %v1403_v27, %v1314_v9  ;;  %v515_v61 = vsel %vm491_vm2, %v482_v11, %v466_v26  ;;  %v7140_v9 = vld [vmem:[#allocation6 + $0x220] sm:$0xff]  ;;  %v5669_v27 = vld [vmem:[#allocation2 + $0x98] sm:$0xf] }
 0x112   : > { %1491 = vmatmul.bf16.gmra.mxu2 %v5658_v47  ;;  %1829 = vmatmul.bf16.gmra.mxu0 %v8034_v37  ;;  %v5670_v26 = vor.u32 %v6993_v23, %v5669_v27 }
 0x113   : > { %1918 = vmatmul.bf16.gmra.mxu1 %v5646_v62  ;;  %2673 = vmatpush.bf16.msra.mxu0 %v7140_v9 }
 0x115   : > { %1740 = vmatmul.bf16.gmra.mxu3 %v8030_v32  ;;  %v1354_v21 = vpop.f32.mrf.mxu2  ;;  %v543_v32 = vsel %vm285_vm3, 0.0, %v515_v61 }
 0x116   : > { %v671_v10 = vpack.c.bf16 %v543_v32, %v543_v32  ;;  %v483_v32 = vrot.slane %v7836_v15, 1 }
 0x117   : > { %v1316_v62 = vpop.f32.mrf.mxu0 }
 0x118   : > { %v1443_v19 = vpop.f32.mrf.mxu3  ;;  %v1405_v43 = vpop.f32.mrf.mxu1  ;;  %703 = vst [vmem:[#allocation2 + $0xd4] sm:$0xf] %v671_v10  ;;  %v516_v60 = vsel %vm491_vm2, %v483_v32, %v467_v33  ;;  %v500_v10 = vsel %vm491_vm2, %v467_v33, %v483_v32 }
 0x119   : > { %v8251_v37 = vadd.f32 %v1443_v19, %v1354_v21  ;;  %v8253_v38 = vadd.f32 %v1405_v43, %v1316_v62  ;;  %v545_v43 = vsel %vm285_vm3, 0.0, %v516_v60 }
 0x11d   : > { %v1356_v42 = vpop.f32.mrf.mxu2 }
 0x11f   : > { %v1319_v61 = vpop.f32.mrf.mxu0 }
 0x120   : > { %v1445_v45 = vpop.f32.mrf.mxu3  ;;  %v1408_v21 = vpop.f32.mrf.mxu1 }
 0x121   : > { %v8255_v11 = vadd.f32 %v1445_v45, %v1356_v42  ;;  %v8257_v19 = vadd.f32 %v1408_v21, %v1319_v61  ;;  %v5681_v42 = vld [vmem:[#allocation2 + $0xb0] sm:$0xf]  ;;  %v6996_v61 = vld [vmem:[#allocation2 + $0xb8] sm:$0xf0] }
 0x122   : > { %1496 = vmatmul.bf16.gmra.mxu2 %v5670_v26  ;;  %1834 = vmatmul.bf16.gmra.mxu0 %v8074_v12  ;;  %v5682_v14 = vor.u32 %v6996_v61, %v5681_v42 }
 0x123   : > { %1923 = vmatmul.bf16.gmra.mxu1 %v5658_v47  ;;  %v673_v47 = vpack.c.bf16 %v545_v43, %v545_v43  ;;  %v484_v43 = vrot.slane %v7866_v41, 1 }
 0x125   : > { %1745 = vmatmul.bf16.gmra.mxu3 %v8070_v7  ;;  %v1359_v62 = vpop.f32.mrf.mxu2  ;;  %v672_v7 = vpack.c.bf16 %v500_v10, %v500_v10  ;;  %705 = vst [vmem:[#allocation2 + $0xec] sm:$0xf] %v673_v47  ;;  %v468_v10 = vrot.slane %v7864_v40, 1 }
 0x127   : > { %v1321_v12 = vpop.f32.mrf.mxu0  ;;  %704 = vst [vmem:[#allocation2 + $0xe0] sm:$0xf] %v672_v7  ;;  %v501_v47 = vsel %vm491_vm2, %v468_v10, %v484_v43 }
 0x128   : > { %v1448_v45 = vpop.f32.mrf.mxu3  ;;  %v1410_v27 = vpop.f32.mrf.mxu1 }
 0x129   : > { %v8269_v9 = vadd.f32 %v1448_v45, %v1359_v62  ;;  %v8271_v23 = vadd.f32 %v1410_v27, %v1321_v12  ;;  %v7123_v62 = vld [vmem:[#allocation6 + $0x198] sm:$0xff]  ;;  %v674_v27 = vpack.c.bf16 %v501_v47, %v501_v47  ;;  %v469_v47 = vrot.slane %v7891_v2, 1 }
 0x12a   : > { %v7131_v45 = vld [vmem:[#allocation6 + $0x1d8] sm:$0xff]  ;;  %2496 = vmatpush.bf16.msra.mxu2 %v7123_v62  ;;  %v6999_v62 = vld [vmem:[#allocation2 + $0xd0] sm:$0xf0] }
 0x12b   : > { %2585 = vmatpush.bf16.msra.mxu3 %v7131_v45  ;;  %706 = vst [vmem:[#allocation2 + $0xf8] sm:$0xf] %v674_v27 }
 0x12d   : > { %v1361_v21 = vpop.f32.mrf.mxu2 }
 0x12f   : > { %v1324_v33 = vpop.f32.mrf.mxu0 }
 0x130   : > { %v1450_v15 = vpop.f32.mrf.mxu3  ;;  %v1413_v32 = vpop.f32.mrf.mxu1 }
 0x131   : > { %v8273_v46 = vadd.f32 %v1450_v15, %v1361_v21  ;;  %v8275_v60 = vadd.f32 %v1413_v32, %v1324_v33  ;;  %v517_v15 = vsel %vm491_vm2, %v484_v43, %v468_v10  ;;  %v7139_v21 = vld [vmem:[#allocation6 + $0x218] sm:$0xff] }
 0x132   : > { %1501 = vmatmul.bf16.gmra.mxu2 %v5682_v14  ;;  %1839 = vmatmul.bf16.gmra.mxu0 %v8114_v3  ;;  %v547_v3 = vsel %vm285_vm3, 0.0, %v517_v15  ;;  %v5693_v32 = vld [vmem:[#allocation2 + $0xc8] sm:$0xf] }
 0x133   : > { %1928 = vmatmul.bf16.gmra.mxu1 %v5670_v26  ;;  %v675_v42 = vpack.c.bf16 %v547_v3, %v547_v3  ;;  %2674 = vmatpush.bf16.msra.mxu0 %v7139_v21  ;;  %v5694_v10 = vor.u32 %v6999_v62, %v5693_v32  ;;  %v485_v3 = vrot.slane %v7898_v13, 1 }
 0x135   : > { %1750 = vmatmul.bf16.gmra.mxu3 %v8110_v4  ;;  %v1364_v12 = vpop.f32.mrf.mxu2  ;;  %707 = vst [vmem:[#allocation2 + $0x104] sm:$0xf] %v675_v42  ;;  %v518_v27 = vsel %vm491_vm2, %v485_v3, %v469_v47  ;;  %v502_v42 = vsel %vm491_vm2, %v469_v47, %v485_v3 }
 0x137   : > { %v1326_v26 = vpop.f32.mrf.mxu0 }
 0x138   : > { %v1453_v7 = vpop.f32.mrf.mxu3  ;;  %v1415_v61 = vpop.f32.mrf.mxu1 }
 0x139   : > { %v8287_v4 = vadd.f32 %v1453_v7, %v1364_v12  ;;  %v8289_v33 = vadd.f32 %v1415_v61, %v1326_v26  ;;  %v549_v61 = vsel %vm285_vm3, 0.0, %v518_v27  ;;  %v7130_v27 = vld [vmem:[#allocation6 + $0x1d0] sm:$0xff] }
 0x13a   : > { %2586 = vmatpush.bf16.msra.mxu3 %v7130_v27 }
 0x13d   : > { %v1366_v45 = vpop.f32.mrf.mxu2 }
 0x13f   : > { %v1329_v15 = vpop.f32.mrf.mxu0 }
 0x140   : > { %v1455_v41 = vpop.f32.mrf.mxu3  ;;  %v1418_v12 = vpop.f32.mrf.mxu1 }
 0x141   : > { %v8291_v43 = vadd.f32 %v1455_v41, %v1366_v45  ;;  %v8293_v7 = vadd.f32 %v1418_v12, %v1329_v15  ;;  %v5705_v45 = vld [vmem:[#allocation2 + $0xe0] sm:$0xf]  ;;  %v7002_v15 = vld [vmem:[#allocation2 + $0xe8] sm:$0xf0] }
 0x142   : > { %1506 = vmatmul.bf16.gmra.mxu2 %v5694_v10  ;;  %1844 = vmatmul.bf16.gmra.mxu0 %v8139_v55  ;;  %v5706_v2 = vor.u32 %v7002_v15, %v5705_v45 }
 0x143   : > { %1933 = vmatmul.bf16.gmra.mxu1 %v5682_v14  ;;  %v677_v14 = vpack.c.bf16 %v549_v61, %v549_v61 }
 0x145   : > { %1755 = vmatmul.bf16.gmra.mxu3 %v8135_v18  ;;  %v1369_v26 = vpop.f32.mrf.mxu2  ;;  %v676_v18 = vpack.c.bf16 %v502_v42, %v502_v42  ;;  %709 = vst [vmem:[#allocation2 + $0x11c] sm:$0xf] %v677_v14  ;;  %v486_v42 = vrot.slane %v7934_v59, 1 }
 0x147   : > { %v1331_v55 = vpop.f32.mrf.mxu0  ;;  %708 = vst [vmem:[#allocation2 + $0x110] sm:$0xf] %v676_v18 }
 0x148   : > { %v1458_v41 = vpop.f32.mrf.mxu3  ;;  %v1420_v32 = vpop.f32.mrf.mxu1 }
 0x149   : > { %v8305_v21 = vadd.f32 %v1458_v41, %v1369_v26  ;;  %v8307_v62 = vadd.f32 %v1420_v32, %v1331_v55  ;;  %v7122_v26 = vld [vmem:[#allocation6 + $0x190] sm:$0xff]  ;;  %v470_v41 = vrot.slane %v7932_v58, 1 }
 0x14a   : > { %2497 = vmatpush.bf16.msra.mxu2 %v7122_v26  ;;  %v7138_v26 = vld [vmem:[#allocation6 + $0x210] sm:$0xff] }
 0x14b   : > { %2675 = vmatpush.bf16.msra.mxu0 %v7138_v26 }
 0x14d   : > { %v1371_v12 = vpop.f32.mrf.mxu2 }
 0x14f   : > { %v1810_v47 = vpop.f32.mrf.mxu0 }
 0x150   : > { %v1460_v13 = vpop.f32.mrf.mxu3  ;;  %v1899_v3 = vpop.f32.mrf.mxu1 }
 0x151   : > { %v8309_v40 = vadd.f32 %v1460_v13, %v1371_v12  ;;  %v519_v13 = vsel %vm491_vm2, %v486_v42, %v470_v41  ;;  %v7226_v12 = vld [vmem:[#allocation8 + $0xf8] sm:$0xff] }
 0x152   : > { %1511 = vmatmul.bf16.gmra.mxu2 %v5706_v2  ;;  %1849 = vmatmul.bf16.gmra.mxu0 %v8157_v16  ;;  %v503_v16 = vsel %vm491_vm2, %v470_v41, %v486_v42 }
 0x153   : > { %1938 = vmatmul.bf16.gmra.mxu1 %v5694_v10  ;;  %v678_v14 = vpack.c.bf16 %v503_v16, %v503_v16 }
 0x154   : > { %3808 = vmatpush.bf16.msra.mxu1 %v7226_v12 }
 0x155   : > { %1760 = vmatmul.bf16.gmra.mxu3 %v8155_v56  ;;  %v1472_v61 = vpop.f32.mrf.mxu2  ;;  %v551_v56 = vsel %vm285_vm3, 0.0, %v519_v13  ;;  %710 = vst [vmem:[#allocation2 + $0x128] sm:$0xf] %v678_v14 }
 0x156   : > { %v1473_v55 = vadd.f32 %v1472_v61, %v8169_v22  ;;  %v679_v32 = vpack.c.bf16 %v551_v56, %v551_v56  ;;  %v5717_v22 = vld [vmem:[#allocation2 + $0xf8] sm:$0xf]  ;;  %v7005_v61 = vld [vmem:[#allocation2 + $0x100] sm:$0xf0] }
 0x157   : > { %v1812_v10 = vpop.f32.mrf.mxu0  ;;  %v5718_v58 = vor.u32 %v7005_v61, %v5717_v22  ;;  %v5729_v61 = vld [vmem:[#allocation2 + $0x110] sm:$0xf] }
 0x158   : > { %v1721_v18 = vpop.f32.mrf.mxu3  ;;  %v1901_v15 = vpop.f32.mrf.mxu1  ;;  %711 = vst [vmem:[#allocation2 + $0x134] sm:$0xf] %v679_v32 }
 0x159   : > { %v1722_v45 = vadd.f32 %v1721_v18, %v1473_v55 }
 0x15b   : > { %v1811_v27 = vadd.f32 %v1810_v47, %v1722_v45  ;;  %v471_v47 = vrot.slane %v7972_v51, 1 }
 0x15d   : > { %v8322_v59 = vadd.f32 %v1899_v3, %v1811_v27  ;;  %v1474_v41 = vpop.f32.mrf.mxu2  ;;  %v487_v3 = vrot.slane %v7974_v52, 1 }
 0x15e   : > { %v1475_v42 = vadd.f32 %v1474_v41, %v8181_v63  ;;  %v7008_v41 = vld [vmem:[#allocation2 + $0x118] sm:$0xf0] }
 0x15f   : > { %v1815_v16 = vpop.f32.mrf.mxu0  ;;  %v520_v63 = vsel %vm491_vm2, %v487_v3, %v471_v47 }
 0x160   : > { %v1723_v13 = vpop.f32.mrf.mxu3  ;;  %v1904_v55 = vpop.f32.mrf.mxu1 }
 0x161   : > { %v1724_v56 = vadd.f32 %v1723_v13, %v1475_v42 }
 0x162   : > { %1516 = vmatmul.bf16.gmra.mxu2 %v5718_v58  ;;  %1854 = vmatmul.bf16.gmra.mxu0 %v7916_v39  ;;  %v504_v39 = vsel %vm491_vm2, %v471_v47, %v487_v3 }
 0x163   : > { %v1813_v18 = vadd.f32 %v1812_v10, %v1724_v56  ;;  %1943 = vmatmul.bf16.gmra.mxu1 %v5706_v2  ;;  %v680_v10 = vpack.c.bf16 %v504_v39, %v504_v39 }
 0x165   : > { %1765 = vmatmul.bf16.gmra.mxu3 %v7910_v35  ;;  %v8329_v14 = vadd.f32 %v1901_v15, %v1813_v18  ;;  %v1477_v32 = vpop.f32.mrf.mxu2  ;;  %v553_v35 = vsel %vm285_vm3, 0.0, %v520_v63  ;;  %712 = vst [vmem:[#allocation2 + $0x140] sm:$0xf] %v680_v10  ;;  %v5730_v18 = vor.u32 %v7008_v41, %v5729_v61  ;;  %v7225_v61 = vld [vmem:[#allocation8 + $0xf0] sm:$0xff]  ;;  %v7137_v41 = vld [vmem:[#allocation6 + $0x208] sm:$0xff] }
 0x166   : > { %v1478_v45 = vadd.f32 %v1477_v32, %v8185_v8  ;;  %v681_v26 = vpack.c.bf16 %v553_v35, %v553_v35  ;;  %3809 = vmatpush.bf16.msra.mxu1 %v7225_v61  ;;  %2676 = vmatpush.bf16.msra.mxu0 %v7137_v41 }
 0x167   : > { %v1817_v2 = vpop.f32.mrf.mxu0 }
 0x168   : > { %v1726_v12 = vpop.f32.mrf.mxu3  ;;  %v1906_v22 = vpop.f32.mrf.mxu1  ;;  %713 = vst [vmem:[#allocation2 + $0x14c] sm:$0xf] %v681_v26 }
 0x169   : > { %v1727_v27 = vadd.f32 %v1726_v12, %v1478_v45  ;;  %v7129_v45 = vld [vmem:[#allocation6 + $0x1c8] sm:$0xff]  ;;  %v488_v12 = vrot.slane %v8014_v54, 1 }
 0x16a   : > { %2587 = vmatpush.bf16.msra.mxu3 %v7129_v45 }
 0x16b   : > { %v1816_v15 = vadd.f32 %v1815_v16, %v1727_v27  ;;  %v7121_v16 = vld [vmem:[#allocation6 + $0x188] sm:$0xff] }
 0x16c   : > { %2498 = vmatpush.bf16.msra.mxu2 %v7121_v16 }
 0x16d   : > { %v8338_v42 = vadd.f32 %v1904_v55, %v1816_v15  ;;  %v1479_v8 = vpop.f32.mrf.mxu2  ;;  %v472_v55 = vrot.slane %v8012_v53, 1 }
 0x16e   : > { %v1480_v13 = vadd.f32 %v1479_v8, %v8199_v44 }
 0x16f   : > { %v1820_v47 = vpop.f32.mrf.mxu0  ;;  %v521_v35 = vsel %vm491_vm2, %v488_v12, %v472_v55 }
 0x170   : > { %v1728_v56 = vpop.f32.mrf.mxu3  ;;  %v1909_v32 = vpop.f32.mrf.mxu1 }
 0x171   : > { %v1729_v3 = vadd.f32 %v1728_v56, %v1480_v13  ;;  %v7011_v13 = vld [vmem:[#allocation2 + $0x130] sm:$0xf0] }
 0x172   : > { %1521 = vmatmul.bf16.gmra.mxu2 %v5730_v18  ;;  %1859 = vmatmul.bf16.gmra.mxu0 %v7956_v30 }
 0x173   : > { %v1818_v63 = vadd.f32 %v1817_v2, %v1729_v3  ;;  %1948 = vmatmul.bf16.gmra.mxu1 %v5718_v58  ;;  %v505_v58 = vsel %vm491_vm2, %v472_v55, %v488_v12 }
 0x174   : > { %v682_v26 = vpack.c.bf16 %v505_v58, %v505_v58 }
 0x175   : > { %1770 = vmatmul.bf16.gmra.mxu3 %v7952_v28  ;;  %v8345_v39 = vadd.f32 %v1906_v22, %v1818_v63  ;;  %v1482_v44 = vpop.f32.mrf.mxu2  ;;  %v555_v28 = vsel %vm285_vm3, 0.0, %v521_v35  ;;  %v9579_v35 = vld [vmem:[#allocation34_spill] sm:$0xff] }
 0x176   : > { %v1483_v30 = vadd.f32 %v1482_v44, %v8203_v1  ;;  %v683_v27 = vpack.c.bf16 %v555_v28, %v555_v28  ;;  %714 = vst [vmem:[#allocation2 + $0x158] sm:$0xf] %v682_v26  ;;  %v5741_v1 = vld [vmem:[#allocation2 + $0x128] sm:$0xf] }
 0x177   : > { %v1822_v10 = vpop.f32.mrf.mxu0  ;;  %v5742_v45 = vor.u32 %v7011_v13, %v5741_v1  ;;  %v9582_v28 = vld [vmem:[#allocation44_spill] sm:$0xff] }
 0x178   : > { %v1731_v2 = vpop.f32.mrf.mxu3  ;;  %v1911_v15 = vpop.f32.mrf.mxu1  ;;  %715 = vst [vmem:[#allocation2 + $0x164] sm:$0xf] %v683_v27 }
 0x179   : > { %v1732_v22 = vadd.f32 %v1731_v2, %v1483_v30  ;;  %v9581_v2 = vld [vmem:[#allocation43_spill] sm:$0xff] }
 0x17a   : > { %v473_v58 = vrot.slane %v9581_v2, 1 }
 0x17b   : > { %v1821_v8 = vadd.f32 %v1820_v47, %v1732_v22  ;;  %v9580_v47 = vld [vmem:[#allocation33_spill] sm:$0xff] }
 0x17d   : > { %v8354_v56 = vadd.f32 %v1909_v32, %v1821_v8  ;;  %v1484_v3 = vpop.f32.mrf.mxu2  ;;  %v489_v32 = vrot.slane %v9582_v28, 1 }
 0x17e   : > { %v1485_v63 = vadd.f32 %v1484_v3, %v8217_v57 }
 0x17f   : > { %v1825_v55 = vpop.f32.mrf.mxu0  ;;  %v522_v57 = vsel %vm491_vm2, %v489_v32, %v473_v58  ;;  %v506_v41 = vsel %vm491_vm2, %v473_v58, %v489_v32 }
 0x180   : > { %v1733_v16 = vpop.f32.mrf.mxu3  ;;  %v1914_v44 = vpop.f32.mrf.mxu1  ;;  %v684_v8 = vpack.c.bf16 %v506_v41, %v506_v41  ;;  %v7128_v41 = vld [vmem:[#allocation6 + $0x1c0] sm:$0xff] }
 0x181   : > { %v1734_v12 = vadd.f32 %v1733_v16, %v1485_v63  ;;  %v5753_v63 = vld [vmem:[#allocation2 + $0x140] sm:$0xf]  ;;  %v7014_v16 = vld [vmem:[#allocation2 + $0x148] sm:$0xf0]  ;;  %2588 = vmatpush.bf16.msra.mxu3 %v7128_v41 }
 0x182   : > { %1526 = vmatmul.bf16.gmra.mxu2 %v5742_v45  ;;  %1864 = vmatmul.bf16.gmra.mxu0 %v9579_v35  ;;  %716 = vst [vmem:[#allocation2 + $0x170] sm:$0xf] %v684_v8  ;;  %v9586_v8 = vld [vmem:[#allocation50_spill] sm:$0xff] }
 0x183   : > { %v1823_v30 = vadd.f32 %v1822_v10, %v1734_v12  ;;  %1953 = vmatmul.bf16.gmra.mxu1 %v5730_v18  ;;  %v557_v10 = vsel %vm285_vm3, 0.0, %v522_v57  ;;  %v9583_v57 = vld [vmem:[#allocation40_spill] sm:$0xff] }
 0x184   : > { %v685_v1 = vpack.c.bf16 %v557_v10, %v557_v10  ;;  %v9585_v10 = vld [vmem:[#allocation49_spill] sm:$0xff] }
 0x185   : > { %1775 = vmatmul.bf16.gmra.mxu3 %v9580_v47  ;;  %v8361_v26 = vadd.f32 %v1911_v15, %v1823_v30  ;;  %v1487_v27 = vpop.f32.mrf.mxu2  ;;  %v5754_v47 = vor.u32 %v7014_v16, %v5753_v63 }
 0x186   : > { %v1488_v22 = vadd.f32 %v1487_v27, %v8221_v34  ;;  %717 = vst [vmem:[#allocation2 + $0x17c] sm:$0xf] %v685_v1  ;;  %v490_v1 = vrot.slane %v9586_v8, 1 }
 0x187   : > { %v1827_v18 = vpop.f32.mrf.mxu0 }
 0x188   : > { %v1736_v61 = vpop.f32.mrf.mxu3  ;;  %v1916_v3 = vpop.f32.mrf.mxu1 }
 0x189   : > { %v1737_v13 = vadd.f32 %v1736_v61, %v1488_v22  ;;  %v9584_v61 = vld [vmem:[#allocation39_spill] sm:$0xff] }
 0x18b   : > { %v1826_v15 = vadd.f32 %v1825_v55, %v1737_v13  ;;  %v7120_v55 = vld [vmem:[#allocation6 + $0x180] sm:$0xff] }
 0x18c   : > { %2499 = vmatpush.bf16.msra.mxu2 %v7120_v55  ;;  %v7017_v55 = vld [vmem:[#allocation2 + $0x160] sm:$0xf0] }
 0x18d   : > { %v8370_v12 = vadd.f32 %v1914_v44, %v1826_v15  ;;  %v1489_v34 = vpop.f32.mrf.mxu2  ;;  %v474_v44 = vrot.slane %v9585_v10, 1 }
 0x18e   : > { %v1490_v35 = vadd.f32 %v1489_v34, %v8235_v25 }
 0x18f   : > { %v1830_v58 = vpop.f32.mrf.mxu0  ;;  %v523_v15 = vsel %vm491_vm2, %v490_v1, %v474_v44 }
 0x190   : > { %v1738_v30 = vpop.f32.mrf.mxu3  ;;  %v1919_v27 = vpop.f32.mrf.mxu1  ;;  %v559_v16 = vsel %vm285_vm3, 0.0, %v523_v15 }
 0x191   : > { %v1739_v32 = vadd.f32 %v1738_v30, %v1490_v35  ;;  %v687_v30 = vpack.c.bf16 %v559_v16, %v559_v16  ;;  %v9587_v16 = vld [vmem:[#allocation46_spill] sm:$0xff] }
 0x192   : > { %1531 = vmatmul.bf16.gmra.mxu2 %v5754_v47  ;;  %1869 = vmatmul.bf16.gmra.mxu0 %v9583_v57  ;;  %v7224_v57 = vld [vmem:[#allocation8 + $0xe8] sm:$0xff] }
 0x193   : > { %v1828_v22 = vadd.f32 %v1827_v18, %v1739_v32  ;;  %1958 = vmatmul.bf16.gmra.mxu1 %v5742_v45  ;;  %v507_v45 = vsel %vm491_vm2, %v474_v44, %v490_v1  ;;  %719 = vst [vmem:[#allocation2 + $0x194] sm:$0xf] %v687_v30 }
 0x194   : > { %v686_v35 = vpack.c.bf16 %v507_v45, %v507_v45  ;;  %3810 = vmatpush.bf16.msra.mxu1 %v7224_v57 }
 0x195   : > { %1780 = vmatmul.bf16.gmra.mxu3 %v9584_v61  ;;  %v8377_v13 = vadd.f32 %v1916_v3, %v1828_v22  ;;  %v1492_v25 = vpop.f32.mrf.mxu2  ;;  %v7136_v22 = vld [vmem:[#allocation6 + $0x200] sm:$0xff] }
 0x196   : > { %v1493_v63 = vadd.f32 %v1492_v25, %v8239_v17  ;;  %718 = vst [vmem:[#allocation2 + $0x188] sm:$0xf] %v686_v35  ;;  %2677 = vmatpush.bf16.msra.mxu0 %v7136_v22  ;;  %v5765_v17 = vld [vmem:[#allocation2 + $0x158] sm:$0xf] }
 0x197   : > { %v1832_v34 = vpop.f32.mrf.mxu0  ;;  %v5766_v15 = vor.u32 %v7017_v55, %v5765_v17  ;;  %v5777_v17 = vld [vmem:[#allocation2 + $0x170] sm:$0xf]  ;;  %v7020_v55 = vld [vmem:[#allocation2 + $0x178] sm:$0xf0] }
 0x198   : > { %v1741_v18 = vpop.f32.mrf.mxu3  ;;  %v8386_v32 = vpop.f32.mrf.mxu1 }
 0x199   : > { %v1742_v3 = vadd.f32 %v1741_v18, %v1493_v63 }
 0x19b   : > { %v1831_v61 = vadd.f32 %v1830_v58, %v1742_v3  ;;  %v9588_v58 = vld [vmem:[#allocation45_spill] sm:$0xff] }
 0x19d   : > { %v8388_v41 = vadd.f32 %v1919_v27, %v1831_v61  ;;  %v1494_v44 = vpop.f32.mrf.mxu2 }
 0x19e   : > { %v1495_v1 = vadd.f32 %v1494_v44, %v8253_v38 }
 0x19f   : > { %v1835_v45 = vpop.f32.mrf.mxu0 }
 0x1a0   : > { %v1743_v25 = vpop.f32.mrf.mxu3  ;;  %v1924_v18 = vpop.f32.mrf.mxu1 }
 0x1a1   : > { %v1744_v63 = vadd.f32 %v1743_v25, %v1495_v1 }
 0x1a2   : > { %1536 = vmatmul.bf16.gmra.mxu2 %v5766_v15  ;;  %1874 = vmatmul.bf16.gmra.mxu0 %v9587_v16 }
 0x1a3   : > { %v8392_v35 = vadd.f32 %v1832_v34, %v1744_v63  ;;  %1963 = vmatmul.bf16.gmra.mxu1 %v5754_v47  ;;  %v5778_v63 = vor.u32 %v7020_v55, %v5777_v17  ;;  %v7223_v17 = vld [vmem:[#allocation8 + $0xe0] sm:$0xff] }
 0x1a4   : > { %3811 = vmatpush.bf16.msra.mxu1 %v7223_v17 }
 0x1a5   : > { %1785 = vmatmul.bf16.gmra.mxu3 %v9588_v58  ;;  %v1497_v30 = vpop.f32.mrf.mxu2 }
 0x1a6   : > { %v1498_v27 = vadd.f32 %v1497_v30, %v8257_v19  ;;  %v9589_v19 = vld [vmem:[#allocation52_spill] sm:$0xff] }
 0x1a7   : > { %v1837_v57 = vpop.f32.mrf.mxu0 }
 0x1a8   : > { %v1746_v3 = vpop.f32.mrf.mxu3  ;;  %v8396_v38 = vpop.f32.mrf.mxu1 }
 0x1a9   : > { %v1747_v22 = vadd.f32 %v1746_v3, %v1498_v27  ;;  %v9590_v27 = vld [vmem:[#allocation51_spill] sm:$0xff] }
 0x1ab   : > { %v1836_v61 = vadd.f32 %v1835_v45, %v1747_v22 }
 0x1ad   : > { %v8398_v44 = vadd.f32 %v1924_v18, %v1836_v61  ;;  %v1499_v1 = vpop.f32.mrf.mxu2 }
 0x1ae   : > { %v1500_v34 = vadd.f32 %v1499_v1, %v8271_v23  ;;  %v5789_v1 = vld [vmem:[#allocation2 + $0x188] sm:$0xf] }
 0x1af   : > { %v1840_v16 = vpop.f32.mrf.mxu0 }
 0x1b0   : > { %v1748_v25 = vpop.f32.mrf.mxu3  ;;  %v1929_v58 = vpop.f32.mrf.mxu1 }
 0x1b1   : > { %v1749_v47 = vadd.f32 %v1748_v25, %v1500_v34  ;;  %v7047_v34 = vld [vmem:[#allocation2 + $0x190] sm:$0xf0] }
 0x1b2   : > { %1541 = vmatmul.bf16.gmra.mxu2 %v5778_v63  ;;  %1879 = vmatmul.bf16.gmra.mxu0 %v9589_v19 }
 0x1b3   : > { %v8402_v30 = vadd.f32 %v1837_v57, %v1749_v47  ;;  %1968 = vmatmul.bf16.gmra.mxu1 %v5766_v15  ;;  %v5790_v15 = vor.u32 %v7047_v34, %v5789_v1  ;;  %v5997_v34 = vld [vmem:[#allocation2 + $0x30] sm:$0xf] }
 0x1b5   : > { %1790 = vmatmul.bf16.gmra.mxu3 %v9590_v27  ;;  %v1502_v45 = vpop.f32.mrf.mxu2 }
 0x1b6   : > { %v1503_v18 = vadd.f32 %v1502_v45, %v8275_v60  ;;  %v9591_v45 = vld [vmem:[#allocation54_spill] sm:$0xff] }
 0x1b7   : > { %v1842_v22 = vpop.f32.mrf.mxu0 }
 0x1b8   : > { %v1751_v3 = vpop.f32.mrf.mxu3  ;;  %v8406_v23 = vpop.f32.mrf.mxu1 }
 0x1b9   : > { %v1752_v61 = vadd.f32 %v1751_v3, %v1503_v18  ;;  %v9592_v3 = vld [vmem:[#allocation53_spill] sm:$0xff] }
 0x1bb   : > { %v1841_v55 = vadd.f32 %v1840_v16, %v1752_v61 }
 0x1bd   : > { %v8408_v25 = vadd.f32 %v1929_v58, %v1841_v55  ;;  %v1504_v57 = vpop.f32.mrf.mxu2 }
 0x1be   : > { %v1505_v47 = vadd.f32 %v1504_v57, %v8289_v33  ;;  %v7073_v57 = vld [vmem:[#allocation2 + $0x38] sm:$0xf0] }
 0x1bf   : > { %v1845_v27 = vpop.f32.mrf.mxu0  ;;  %v5998_v10 = vor.u32 %v7073_v57, %v5997_v34  ;;  %v6009_v57 = vld [vmem:[#allocation2 + $0x48] sm:$0xf] }
 0x1c0   : > { %v1753_v19 = vpop.f32.mrf.mxu3  ;;  %v1934_v60 = vpop.f32.mrf.mxu1 }
 0x1c1   : > { %v1754_v8 = vadd.f32 %v1753_v19, %v1505_v47  ;;  %v6005_v47 = vld [vmem:[#allocation2 + $0x38] sm:$0xf]  ;;  %v7074_v19 = vld [vmem:[#allocation2 + $0x40] sm:$0xf0] }
 0x1c2   : > { %1546 = vmatmul.bf16.gmra.mxu2 %v5790_v15  ;;  %1884 = vmatmul.bf16.gmra.mxu0 %v9591_v45 }
 0x1c3   : > { %v8412_v18 = vadd.f32 %v1842_v22, %v1754_v8  ;;  %1973 = vmatmul.bf16.gmra.mxu1 %v5778_v63  ;;  %v7072_v8 = vld [vmem:[#allocation2 + $0x34] sm:$0xf]  ;;  %v5999_v22 = vld [vmem:[#allocation2 + $0x3c] sm:$0xf0] }
 0x1c4   : > { %v6002_v28 = vor.u32 %v7072_v8, %v5999_v22  ;;  %v7077_v8 = vld [vmem:[#allocation2 + $0x58] sm:$0xf0]  ;;  %v6011_v22 = vld [vmem:[#allocation2 + $0x54] sm:$0xf0] }
 0x1c5   : > { %1795 = vmatmul.bf16.gmra.mxu3 %v9592_v3  ;;  %v1507_v16 = vpop.f32.mrf.mxu2 }
 0x1c6   : > { %v1508_v58 = vadd.f32 %v1507_v16, %v8293_v7  ;;  %v6006_v7 = vor.u32 %v7074_v19, %v6005_v47  ;;  %v7076_v47 = vld [vmem:[#allocation2 + $0x50] sm:$0xf0]  ;;  %v6017_v19 = vld [vmem:[#allocation2 + $0x50] sm:$0xf] }
 0x1c7   : > { %v1847_v17 = vpop.f32.mrf.mxu0 }
 0x1c8   : > { %v1756_v61 = vpop.f32.mrf.mxu3  ;;  %v8416_v33 = vpop.f32.mrf.mxu1 }
 0x1c9   : > { %v1757_v55 = vadd.f32 %v1756_v61, %v1508_v58 }
 0x1cb   : > { %v1846_v1 = vadd.f32 %v1845_v27, %v1757_v55 }
 0x1cd   : > { %v8418_v15 = vadd.f32 %v1934_v60, %v1846_v1  ;;  %v1509_v45 = vpop.f32.mrf.mxu2 }
 0x1ce   : > { %v1510_v63 = vadd.f32 %v1509_v45, %v8307_v62  ;;  %v7222_v62 = vld [vmem:[#allocation8 + $0xd8] sm:$0xff] }
 0x1cf   : > { %v1850_v16 = vpop.f32.mrf.mxu0  ;;  %3812 = vmatpush.bf16.msra.mxu1 %v7222_v62 }
 0x1d0   : > { %v1758_v3 = vpop.f32.mrf.mxu3  ;;  %v1939_v61 = vpop.f32.mrf.mxu1 }
 0x1d1   : > { %v1759_v58 = vadd.f32 %v1758_v3, %v1510_v63  ;;  %v6010_v63 = vor.u32 %v7076_v47, %v6009_v57  ;;  %v6018_v3 = vor.u32 %v7077_v8, %v6017_v19  ;;  %v6021_v57 = vld [vmem:[#allocation2 + $0x60] sm:$0xf]  ;;  %v7079_v47 = vld [vmem:[#allocation2 + $0x68] sm:$0xf0]  ;;  %v6029_v19 = vld [vmem:[#allocation2 + $0x68] sm:$0xf] }
 0x1d2   : > { %2500 = vmatmul.bf16.vlgmr.msra.gmra.mxu2 %v5998_v10  ;;  %2678 = vmatmul.bf16.vlgmr.msra.gmra.mxu0 %v6006_v7  ;;  %v7080_v8 = vld [vmem:[#allocation2 + $0x70] sm:$0xf0] }
 0x1d3   : > { %v8421_v27 = vadd.f32 %v1847_v17, %v1759_v58  ;;  %v7075_v17 = vld [vmem:[#allocation2 + $0x4c] sm:$0xf] }
 0x1d4   : > { %v6014_v58 = vor.u32 %v7075_v17, %v6011_v22  ;;  %v7078_v22 = vld [vmem:[#allocation2 + $0x64] sm:$0xf] }
 0x1d5   : > { %2589 = vmatmul.bf16.vlgmr.msra.gmra.mxu3 %v6002_v28  ;;  %v1512_v55 = vpop.f32.mrf.mxu2 }
 0x1d6   : > { %v1513_v60 = vadd.f32 %v1512_v55, %v8179_v20 }
 0x1d7   : > { %v1852_v2 = vpop.f32.mrf.mxu0 }
 0x1d8   : > { %v1761_v1 = vpop.f32.mrf.mxu3  ;;  %v8424_v53 = vpop.f32.mrf.mxu1 }
 0x1d9   : > { %v1762_v54 = vadd.f32 %v1761_v1, %v1513_v60 }
 0x1db   : > { %v1851_v34 = vadd.f32 %v1850_v16, %v1762_v54 }
 0x1dd   : > { %v8426_v10 = vadd.f32 %v1939_v61, %v1851_v34  ;;  %v1514_v28 = vpop.f32.mrf.mxu2 }
 0x1de   : > { %v1515_v45 = vadd.f32 %v1514_v28, %v8183_v0  ;;  %v6023_v28 = vld [vmem:[#allocation2 + $0x6c] sm:$0xf0] }
 0x1df   : > { %v1855_v7 = vpop.f32.mrf.mxu0 }
 0x1e0   : > { %v1763_v20 = vpop.f32.mrf.mxu3  ;;  %v1944_v60 = vpop.f32.mrf.mxu1 }
 0x1e1   : > { %v1764_v55 = vadd.f32 %v1763_v20, %v1515_v45 }
 0x1e2   : > { %2505 = vmatmul.bf16.gmra.mxu2 %v6010_v63  ;;  %2683 = vmatmul.bf16.gmra.mxu0 %v6018_v3  ;;  %v6022_v63 = vor.u32 %v7079_v47, %v6021_v57  ;;  %v6033_v47 = vld [vmem:[#allocation2 + $0x78] sm:$0xf] }
 0x1e3   : > { %v8429_v54 = vadd.f32 %v1852_v2, %v1764_v55 }
 0x1e5   : > { %2594 = vmatmul.bf16.gmra.mxu3 %v6014_v58  ;;  %v1517_v16 = vpop.f32.mrf.mxu2  ;;  %v6026_v58 = vor.u32 %v7078_v22, %v6023_v28  ;;  %v7083_v22 = vld [vmem:[#allocation2 + $0x88] sm:$0xf0] }
 0x1e6   : > { %v1518_v61 = vadd.f32 %v1517_v16, %v8197_v6  ;;  %v6030_v6 = vor.u32 %v7080_v8, %v6029_v19  ;;  %v7082_v19 = vld [vmem:[#allocation2 + $0x80] sm:$0xf0]  ;;  %v6041_v8 = vld [vmem:[#allocation2 + $0x80] sm:$0xf] }
 0x1e7   : > { %v1857_v62 = vpop.f32.mrf.mxu0 }
 0x1e8   : > { %v1766_v1 = vpop.f32.mrf.mxu3  ;;  %v8432_v52 = vpop.f32.mrf.mxu1 }
 0x1e9   : > { %v1767_v34 = vadd.f32 %v1766_v1, %v1518_v61 }
 0x1eb   : > { %v1856_v0 = vadd.f32 %v1855_v7, %v1767_v34 }
 0x1ed   : > { %v8434_v17 = vadd.f32 %v1944_v60, %v1856_v0  ;;  %v1519_v2 = vpop.f32.mrf.mxu2 }
 0x1ee   : > { %v1520_v45 = vadd.f32 %v1519_v2, %v8201_v49  ;;  %v7221_v49 = vld [vmem:[#allocation8 + $0xd0] sm:$0xff]  ;;  %v6035_v2 = vld [vmem:[#allocation2 + $0x84] sm:$0xf0] }
 0x1ef   : > { %v1860_v3 = vpop.f32.mrf.mxu0  ;;  %3813 = vmatpush.bf16.msra.mxu1 %v7221_v49 }
 0x1f0   : > { %v1768_v20 = vpop.f32.mrf.mxu3  ;;  %v1949_v16 = vpop.f32.mrf.mxu1 }
 0x1f1   : > { %v1769_v55 = vadd.f32 %v1768_v20, %v1520_v45 }
 0x1f2   : > { %2510 = vmatmul.bf16.gmra.mxu2 %v6022_v63  ;;  %2688 = vmatmul.bf16.gmra.mxu0 %v6030_v6  ;;  %v6034_v63 = vor.u32 %v7082_v19, %v6033_v47  ;;  %v6042_v6 = vor.u32 %v7083_v22, %v6041_v8  ;;  %v6045_v47 = vld [vmem:[#allocation2 + $0x90] sm:$0xf]  ;;  %v7085_v19 = vld [vmem:[#allocation2 + $0x98] sm:$0xf0]  ;;  %v6053_v8 = vld [vmem:[#allocation2 + $0x98] sm:$0xf] }
 0x1f3   : > { %v8437_v7 = vadd.f32 %v1857_v62, %v1769_v55  ;;  %v7081_v62 = vld [vmem:[#allocation2 + $0x7c] sm:$0xf]  ;;  %v7086_v22 = vld [vmem:[#allocation2 + $0xa0] sm:$0xf0] }
 0x1f4   : > { %v6038_v55 = vor.u32 %v7081_v62, %v6035_v2  ;;  %v7084_v2 = vld [vmem:[#allocation2 + $0x94] sm:$0xf] }
 0x1f5   : > { %2599 = vmatmul.bf16.gmra.mxu3 %v6026_v58  ;;  %v1522_v61 = vpop.f32.mrf.mxu2 }
 0x1f6   : > { %v1523_v60 = vadd.f32 %v1522_v61, %v8215_v29 }
 0x1f7   : > { %v1862_v34 = vpop.f32.mrf.mxu0 }
 0x1f8   : > { %v1771_v1 = vpop.f32.mrf.mxu3  ;;  %v8440_v51 = vpop.f32.mrf.mxu1 }
 0x1f9   : > { %v1772_v0 = vadd.f32 %v1771_v1, %v1523_v60 }
 0x1fb   : > { %v1861_v57 = vadd.f32 %v1860_v3, %v1772_v0 }
 0x1fd   : > { %v8442_v28 = vadd.f32 %v1949_v16, %v1861_v57  ;;  %v1524_v45 = vpop.f32.mrf.mxu2 }
 0x1fe   : > { %v1525_v20 = vadd.f32 %v1524_v45, %v8219_v24  ;;  %v6047_v45 = vld [vmem:[#allocation2 + $0x9c] sm:$0xf0] }
 0x1ff   : > { %v1865_v58 = vpop.f32.mrf.mxu0 }
 0x200   : > { %v1773_v29 = vpop.f32.mrf.mxu3  ;;  %v1954_v60 = vpop.f32.mrf.mxu1 }
 0x201   : > { %v1774_v61 = vadd.f32 %v1773_v29, %v1525_v20 }
 0x202   : > { %2515 = vmatmul.bf16.gmra.mxu2 %v6034_v63  ;;  %2693 = vmatmul.bf16.gmra.mxu0 %v6042_v6  ;;  %v6046_v63 = vor.u32 %v7085_v19, %v6045_v47  ;;  %v6057_v19 = vld [vmem:[#allocation2 + $0xa8] sm:$0xf] }
 0x203   : > { %v8445_v3 = vadd.f32 %v1862_v34, %v1774_v61 }
 0x205   : > { %2604 = vmatmul.bf16.gmra.mxu3 %v6038_v55  ;;  %v1527_v1 = vpop.f32.mrf.mxu2  ;;  %v6050_v55 = vor.u32 %v7084_v2, %v6047_v45  ;;  %v7089_v2 = vld [vmem:[#allocation2 + $0xb8] sm:$0xf0] }
 0x206   : > { %v1528_v16 = vadd.f32 %v1527_v1, %v8233_v50  ;;  %v6054_v50 = vor.u32 %v7086_v22, %v6053_v8  ;;  %v7088_v8 = vld [vmem:[#allocation2 + $0xb0] sm:$0xf0]  ;;  %v6065_v22 = vld [vmem:[#allocation2 + $0xb0] sm:$0xf] }
 0x207   : > { %v1867_v49 = vpop.f32.mrf.mxu0 }
 0x208   : > { %v1776_v0 = vpop.f32.mrf.mxu3  ;;  %v8448_v48 = vpop.f32.mrf.mxu1 }
 0x209   : > { %v1777_v57 = vadd.f32 %v1776_v0, %v1528_v16  ;;  %9593 = vst [vmem:[#allocation34_spill] sm:$0xff] %v8448_v48 }
 0x20b   : > { %v1866_v24 = vadd.f32 %v1865_v58, %v1777_v57 }
 0x20d   : > { %v8450_v62 = vadd.f32 %v1954_v60, %v1866_v24  ;;  %v1529_v34 = vpop.f32.mrf.mxu2 }
 0x20e   : > { %v1530_v20 = vadd.f32 %v1529_v34, %v8237_v31  ;;  %v7220_v31 = vld [vmem:[#allocation8 + $0xc8] sm:$0xff] }
 0x20f   : > { %v1870_v6 = vpop.f32.mrf.mxu0  ;;  %3814 = vmatpush.bf16.msra.mxu1 %v7220_v31  ;;  %v6059_v34 = vld [vmem:[#allocation2 + $0xb4] sm:$0xf0] }
 0x210   : > { %v1778_v29 = vpop.f32.mrf.mxu3  ;;  %v1959_v1 = vpop.f32.mrf.mxu1 }
 0x211   : > { %v1779_v61 = vadd.f32 %v1778_v29, %v1530_v20 }
 0x212   : > { %2520 = vmatmul.bf16.gmra.mxu2 %v6046_v63  ;;  %2698 = vmatmul.bf16.gmra.mxu0 %v6054_v50  ;;  %v6058_v63 = vor.u32 %v7088_v8, %v6057_v19  ;;  %v6066_v50 = vor.u32 %v7089_v2, %v6065_v22  ;;  %v6077_v19 = vld [vmem:[#allocation2 + $0xc8] sm:$0xf]  ;;  %v7092_v8 = vld [vmem:[#allocation2 + $0xd0] sm:$0xf0] }
 0x213   : > { %v8453_v58 = vadd.f32 %v1867_v49, %v1779_v61  ;;  %v7087_v49 = vld [vmem:[#allocation2 + $0xac] sm:$0xf] }
 0x214   : > { %v6062_v61 = vor.u32 %v7087_v49, %v6059_v34  ;;  %v7090_v49 = vld [vmem:[#allocation2 + $0xc4] sm:$0xf]  ;;  %v6071_v34 = vld [vmem:[#allocation2 + $0xcc] sm:$0xf0] }
 0x215   : > { %2609 = vmatmul.bf16.gmra.mxu3 %v6050_v55  ;;  %v1532_v16 = vpop.f32.mrf.mxu2 }
 0x216   : > { %v1533_v60 = vadd.f32 %v1532_v16, %v8251_v37 }
 0x217   : > { %v1872_v57 = vpop.f32.mrf.mxu0 }
 0x218   : > { %v1781_v0 = vpop.f32.mrf.mxu3  ;;  %v8456_v48 = vpop.f32.mrf.mxu1 }
 0x219   : > { %v1782_v24 = vadd.f32 %v1781_v0, %v1533_v60  ;;  %9594 = vst [vmem:[#allocation33_spill] sm:$0xff] %v8456_v48 }
 0x21b   : > { %v1871_v47 = vadd.f32 %v1870_v6, %v1782_v24 }
 0x21d   : > { %v8458_v45 = vadd.f32 %v1959_v1, %v1871_v47  ;;  %v1534_v20 = vpop.f32.mrf.mxu2 }
 0x21e   : > { %v1535_v29 = vadd.f32 %v1534_v20, %v8255_v11  ;;  %v6069_v11 = vld [vmem:[#allocation2 + $0xc0] sm:$0xf]  ;;  %v7091_v20 = vld [vmem:[#allocation2 + $0xc8] sm:$0xf0] }
 0x21f   : > { %v1875_v55 = vpop.f32.mrf.mxu0 }
 0x220   : > { %v1783_v37 = vpop.f32.mrf.mxu3  ;;  %v1964_v60 = vpop.f32.mrf.mxu1 }
 0x221   : > { %v1784_v16 = vadd.f32 %v1783_v37, %v1535_v29 }
 0x222   : > { %2525 = vmatmul.bf16.gmra.mxu2 %v6058_v63  ;;  %2703 = vmatmul.bf16.gmra.mxu0 %v6066_v50  ;;  %v6070_v63 = vor.u32 %v7091_v20, %v6069_v11  ;;  %v6089_v11 = vld [vmem:[#allocation2 + $0xe0] sm:$0xf]  ;;  %v7095_v20 = vld [vmem:[#allocation2 + $0xe8] sm:$0xf0] }
 0x223   : > { %v8461_v6 = vadd.f32 %v1872_v57, %v1784_v16 }
 0x225   : > { %2614 = vmatmul.bf16.gmra.mxu3 %v6062_v61  ;;  %v1537_v0 = vpop.f32.mrf.mxu2  ;;  %v6074_v61 = vor.u32 %v7090_v49, %v6071_v34  ;;  %v6083_v49 = vld [vmem:[#allocation2 + $0xe4] sm:$0xf0] }
 0x226   : > { %v1538_v1 = vadd.f32 %v1537_v0, %v8269_v9  ;;  %v6078_v9 = vor.u32 %v7092_v8, %v6077_v19  ;;  %v7093_v8 = vld [vmem:[#allocation2 + $0xdc] sm:$0xf] }
 0x227   : > { %v1877_v31 = vpop.f32.mrf.mxu0 }
 0x228   : > { %v1786_v24 = vpop.f32.mrf.mxu3  ;;  %v8464_v22 = vpop.f32.mrf.mxu1 }
 0x229   : > { %v1787_v47 = vadd.f32 %v1786_v24, %v1538_v1  ;;  %9595 = vst [vmem:[#allocation40_spill] sm:$0xff] %v8464_v22 }
 0x22b   : > { %v1876_v48 = vadd.f32 %v1875_v55, %v1787_v47 }
 0x22d   : > { %v8466_v2 = vadd.f32 %v1964_v60, %v1876_v48  ;;  %v1539_v57 = vpop.f32.mrf.mxu2 }
 0x22e   : > { %v1540_v29 = vadd.f32 %v1539_v57, %v8273_v46  ;;  %v6081_v46 = vld [vmem:[#allocation2 + $0xd8] sm:$0xf]  ;;  %v7094_v57 = vld [vmem:[#allocation2 + $0xe0] sm:$0xf0] }
 0x22f   : > { %v1880_v50 = vpop.f32.mrf.mxu0 }
 0x230   : > { %v1788_v37 = vpop.f32.mrf.mxu3  ;;  %v1969_v1 = vpop.f32.mrf.mxu1 }
 0x231   : > { %v1789_v16 = vadd.f32 %v1788_v37, %v1540_v29  ;;  %v6082_v37 = vor.u32 %v7094_v57, %v6081_v46  ;;  %v6093_v57 = vld [vmem:[#allocation2 + $0xf0] sm:$0xf] }
 0x232   : > { %2530 = vmatmul.bf16.gmra.mxu2 %v6070_v63  ;;  %2708 = vmatmul.bf16.gmra.mxu0 %v6078_v9  ;;  %v6090_v63 = vor.u32 %v7095_v20, %v6089_v11  ;;  %v7097_v11 = vld [vmem:[#allocation2 + $0xf8] sm:$0xf0]  ;;  %v6101_v20 = vld [vmem:[#allocation2 + $0xf8] sm:$0xf] }
 0x233   : > { %v8469_v55 = vadd.f32 %v1877_v31, %v1789_v16 }
 0x235   : > { %2619 = vmatmul.bf16.gmra.mxu3 %v6074_v61  ;;  %v1542_v0 = vpop.f32.mrf.mxu2 }
 0x236   : > { %v1543_v48 = vadd.f32 %v1542_v0, %v8287_v4  ;;  %v6086_v4 = vor.u32 %v7093_v8, %v6083_v49  ;;  %v7098_v8 = vld [vmem:[#allocation2 + $0x100] sm:$0xf0] }
 0x237   : > { %v1882_v24 = vpop.f32.mrf.mxu0 }
 0x238   : > { %v1791_v60 = vpop.f32.mrf.mxu3  ;;  %v8475_v61 = vpop.f32.mrf.mxu1 }
 0x239   : > { %v1792_v47 = vadd.f32 %v1791_v60, %v1543_v48  ;;  %9596 = vst [vmem:[#allocation39_spill] sm:$0xff] %v8475_v61 }
 0x23b   : > { %v1881_v22 = vadd.f32 %v1880_v50, %v1792_v47 }
 0x23d   : > { %v8472_v19 = vadd.f32 %v1969_v1, %v1881_v22  ;;  %v1544_v34 = vpop.f32.mrf.mxu2  ;;  %v7219_v22 = vld [vmem:[#allocation8 + $0xc0] sm:$0xff] }
 0x23e   : > { %v1545_v31 = vadd.f32 %v1544_v34, %v8291_v43  ;;  %3815 = vmatpush.bf16.msra.mxu1 %v7219_v22  ;;  %v7096_v34 = vld [vmem:[#allocation2 + $0xf4] sm:$0xf] }
 0x23f   : > { %v1885_v9 = vpop.f32.mrf.mxu0 }
 0x240   : > { %v1793_v29 = vpop.f32.mrf.mxu3  ;;  %v1974_v47 = vpop.f32.mrf.mxu1 }
 0x241   : > { %v1794_v16 = vadd.f32 %v1793_v29, %v1545_v31 }
 0x242   : > { %2535 = vmatmul.bf16.gmra.mxu2 %v6082_v37  ;;  %2713 = vmatmul.bf16.gmra.mxu0 %v6090_v63  ;;  %v6094_v63 = vor.u32 %v7097_v11, %v6093_v57  ;;  %v7100_v11 = vld [vmem:[#allocation2 + $0x110] sm:$0xf0] }
 0x243   : > { %v8477_v50 = vadd.f32 %v1882_v24, %v1794_v16  ;;  %v6095_v24 = vld [vmem:[#allocation2 + $0xfc] sm:$0xf0] }
 0x244   : > { %v6098_v16 = vor.u32 %v7096_v34, %v6095_v24  ;;  %v7099_v34 = vld [vmem:[#allocation2 + $0x10c] sm:$0xf] }
 0x245   : > { %2624 = vmatmul.bf16.gmra.mxu3 %v6086_v4  ;;  %v1547_v0 = vpop.f32.mrf.mxu2  ;;  %v6102_v4 = vor.u32 %v7098_v8, %v6101_v20  ;;  %v6113_v20 = vld [vmem:[#allocation2 + $0x110] sm:$0xf]  ;;  %v7101_v8 = vld [vmem:[#allocation2 + $0x118] sm:$0xf0] }
 0x246   : > { %v1548_v1 = vadd.f32 %v1547_v0, %v8305_v21 }
 0x247   : > { %v1887_v43 = vpop.f32.mrf.mxu0 }
 0x248   : > { %v1796_v48 = vpop.f32.mrf.mxu3 }
 0x249   : > { %v1797_v60 = vadd.f32 %v1796_v48, %v1548_v1 }
 0x24b   : > { %v1886_v46 = vadd.f32 %v1885_v9, %v1797_v60 }
 0x24d   : > { %v8480_v49 = vadd.f32 %v1974_v47, %v1886_v46  ;;  %v1549_v31 = vpop.f32.mrf.mxu2  ;;  %v6105_v46 = vld [vmem:[#allocation2 + $0x108] sm:$0xf] }
 0x24e   : > { %v1550_v29 = vadd.f32 %v1549_v31, %v8309_v40  ;;  %v8488_v40 = vld [vmem:[%s9473_s3] ss:$0 sm:$0xff] }
 0x24f   : > { %9597 = vst [vmem:[#allocation46_spill] sm:$0xff] %v8480_v49  ;;  %v2679_v21 = vpop.f32.mrf.mxu0 }
 0x250   : > { %v1798_v37 = vpop.f32.mrf.mxu3 }
 0x251   : > { %v1799_v22 = vadd.f32 %v1798_v37, %v1550_v29  ;;  %v6106_v37 = vor.u32 %v7100_v11, %v6105_v46  ;;  %v7207_v11 = vld [vmem:[#allocation8 + $0x78] sm:$0xff] }
 0x252   : > { %2540 = vmatmul.bf16.gmra.mxu2 %v6094_v63  ;;  %2718 = vmatmul.bf16.gmra.mxu0 %v6102_v4  ;;  %v6114_v63 = vor.u32 %v7101_v8, %v6113_v20 }
 0x253   : > { %v8483_v9 = vadd.f32 %v1887_v43, %v1799_v22  ;;  %v6107_v43 = vld [vmem:[#allocation2 + $0x114] sm:$0xf0]  ;;  %4324 = vmatpush.bf16.msrb.mxu1 %v7207_v11  ;;  %v6119_v11 = vld [vmem:[#allocation2 + $0x12c] sm:$0xf0] }
 0x254   : > { %v6110_v22 = vor.u32 %v7099_v34, %v6107_v43 }
 0x255   : > { %9598 = vst [vmem:[#allocation45_spill] sm:$0xff] %v8483_v9  ;;  %2629 = vmatmul.bf16.gmra.mxu3 %v6098_v16  ;;  %v2501_v0 = vpop.f32.mrf.mxu2  ;;  %v7234_v9 = vld [vmem:[#allocation8 + $0x138] sm:$0xff] }
 0x256   : > { %3897 = vmatpush.bf16.msrb.mxu2 %v7234_v9  ;;  %v7103_v9 = vld [vmem:[#allocation2 + $0x128] sm:$0xf0] }
 0x257   : > { %v2681_v60 = vpop.f32.mrf.mxu0 }
 0x258   : > { %v2590_v1 = vpop.f32.mrf.mxu3 }
 0x259   : > { %v2591_v48 = vadd.f32 %v2590_v1, %v2501_v0 }
 0x25b   : > { %v2680_v47 = vadd.f32 %v2679_v21, %v2591_v48  ;;  %v7242_v48 = vld [vmem:[#allocation8 + $0x178] sm:$0xff] }
 0x25c   : > { %3986 = vmatpush.bf16.msrb.mxu3 %v7242_v48  ;;  %v7104_v48 = vld [vmem:[#allocation2 + $0x130] sm:$0xf0] }
 0x25d   : > { %v2759_v57 = vadd.f32 %v2680_v47, %v8322_v59  ;;  %v2503_v31 = vpop.f32.mrf.mxu2 }
 0x25f   : > { %v2795_v24 = vadd.f32 %v8488_v40, %v2759_v57  ;;  %v2684_v16 = vpop.f32.mrf.mxu0  ;;  %v7199_v57 = vld [vmem:[#allocation8 + $0x38] sm:$0xff] }
 0x260   : > { %v2592_v29 = vpop.f32.mrf.mxu3  ;;  %4235 = vmatpush.bf16.msrb.mxu0 %v7199_v57  ;;  %v7102_v57 = vld [vmem:[#allocation2 + $0x124] sm:$0xf] }
 0x261   : > { %v2827_v4 = vmax.f32 %v2795_v24, 0.0  ;;  %v2593_v21 = vadd.f32 %v2592_v29, %v2503_v31  ;;  %v6122_v61 = vor.u32 %v7102_v57, %v6119_v11 }
 0x262   : > { %2545 = vmatmul.bf16.gmra.mxu2 %v6106_v37  ;;  %2723 = vmatmul.bf16.gmra.mxu0 %v6114_v63  ;;  %v6117_v63 = vld [vmem:[#allocation2 + $0x120] sm:$0xf] }
 0x263   : > { %v2859_v0 = vpack.c.bf16 %v2827_v4, %v2827_v4  ;;  %v2682_v1 = vadd.f32 %v2681_v60, %v2593_v21  ;;  %v2891_v60 = vrot.slane %v2827_v4, 7  ;;  %v2987_v24 = vrot.slane %v2827_v4, 1  ;;  %v6125_v4 = vld [vmem:[#allocation2 + $0x128] sm:$0xf] }
 0x265   : > { %3147 = vst [vmem:[#allocation2 + $0x1c] sm:$0xf] %v2859_v0  ;;  %v2760_v59 = vadd.f32 %v2682_v1, %v8329_v14  ;;  %2634 = vmatmul.bf16.gmra.mxu3 %v6110_v22  ;;  %v2506_v46 = vpop.f32.mrf.mxu2 }
 0x267   : > { %v2796_v47 = vadd.f32 %v8488_v40, %v2760_v59  ;;  %v2686_v43 = vpop.f32.mrf.mxu0 }
 0x268   : > { %v2595_v20 = vpop.f32.mrf.mxu3 }
 0x269   : > { %v2828_v8 = vmax.f32 %v2796_v47, 0.0  ;;  %v2596_v34 = vadd.f32 %v2595_v20, %v2506_v46 }
 0x26b   : > { %v2860_v31 = vpack.c.bf16 %v2828_v8, %v2828_v8  ;;  %v2907_v29 = vrot.slane %v2828_v8, 7  ;;  %v3003_v37 = vrot.slane %v2828_v8, 1  ;;  %v2685_v14 = vadd.f32 %v2684_v16, %v2596_v34 }
 0x26d   : > { %v2923_v21 = vsel %vm390_vm1, %v2891_v60, %v2907_v29  ;;  %v2939_v22 = vsel %vm390_vm1, %v2907_v29, %v2891_v60  ;;  %v3019_v0 = vsel %vm491_vm2, %v2987_v24, %v3003_v37  ;;  %v3035_v1 = vsel %vm491_vm2, %v3003_v37, %v2987_v24  ;;  %3148 = vst [vmem:[#allocation2 + $0x28] sm:$0xf] %v2860_v31  ;;  %v2508_v60 = vpop.f32.mrf.mxu2 }
 0x26e   : > { %v2955_v16 = vsel %vm282_vm0, 0.0, %v2939_v22  ;;  %v3052_v59 = vsel %vm285_vm3, 0.0, %v3035_v1  ;;  %v3084_v47 = vpack.c.bf16 %v2923_v21, %v2923_v21  ;;  %v3179_v46 = vpack.c.bf16 %v3019_v0, %v3019_v0 }
 0x26f   : > { %v3083_v20 = vpack.c.bf16 %v2955_v16, %v2955_v16  ;;  %v3180_v8 = vpack.c.bf16 %v3052_v59, %v3052_v59  ;;  %v2761_v34 = vadd.f32 %v2685_v14, %v8338_v42  ;;  %v6118_v31 = vor.u32 %v7103_v9, %v6117_v63  ;;  %v2689_v49 = vpop.f32.mrf.mxu0 }
 0x270   : > { %3116 = vst [vmem:[#allocation2 + $0x24] sm:$0xf] %v3084_v47  ;;  %v2597_v24 = vpop.f32.mrf.mxu3  ;;  %v6126_v29 = vor.u32 %v7104_v48, %v6125_v4 }
 0x271   : > { %3115 = vst [vmem:[#allocation2 + $0x18] sm:$0xf] %v3083_v20  ;;  %v2797_v37 = vadd.f32 %v8488_v40, %v2761_v34  ;;  %v2598_v22 = vadd.f32 %v2597_v24, %v2508_v60 }
 0x272   : > { %3211 = vst [vmem:[#allocation2 + $0x20] sm:$0xf] %v3179_v46  ;;  %2550 = vmatmul.bf16.gmra.mxu2 %v6118_v31  ;;  %2728 = vmatmul.bf16.gmra.mxu0 %v6126_v29 }
 0x273   : > { %3212 = vst [vmem:[#allocation2 + $0x2c] sm:$0xf] %v3180_v8  ;;  %v2829_v21 = vmax.f32 %v2797_v37, 0.0  ;;  %v2687_v0 = vadd.f32 %v2686_v43, %v2598_v22  ;;  %v6137_v37 = vld [vmem:[#allocation2 + $0x140] sm:$0xf] }
 0x274   : > { %v7107_v22 = vld [vmem:[#allocation2 + $0x148] sm:$0xf0] }
 0x275   : > { %v2861_v1 = vpack.c.bf16 %v2829_v21, %v2829_v21  ;;  %v2762_v42 = vadd.f32 %v2687_v0, %v8345_v39  ;;  %2639 = vmatmul.bf16.gmra.mxu3 %v6122_v61  ;;  %v2511_v63 = vpop.f32.mrf.mxu2  ;;  %v2892_v57 = vrot.slane %v2829_v21, 7  ;;  %v2988_v43 = vrot.slane %v2829_v21, 1  ;;  %v6129_v39 = vld [vmem:[#allocation2 + $0x138] sm:$0xf]  ;;  %v7106_v61 = vld [vmem:[#allocation2 + $0x140] sm:$0xf0] }
 0x277   : > { %3149 = vst [vmem:[#allocation2 + $0x34] sm:$0xf] %v2861_v1  ;;  %v2798_v14 = vadd.f32 %v8488_v40, %v2762_v42  ;;  %v7148_v9 = vld [vmem:[#allocation2 + $0x20] sm:$0xf0]  ;;  %v2691_v47 = vpop.f32.mrf.mxu0  ;;  %v7105_v42 = vld [vmem:[#allocation2 + $0x13c] sm:$0xf] }
 0x278   : > { %v2600_v4 = vpop.f32.mrf.mxu3  ;;  %v6285_v48 = vld [vmem:[#allocation2 + $0x18] sm:$0xf] }
 0x279   : > { %v2830_v16 = vmax.f32 %v2798_v14, 0.0  ;;  %v2601_v59 = vadd.f32 %v2600_v4, %v2511_v63  ;;  %v8510_v46 = vor.u32 %v7148_v9, %v6285_v48  ;;  %v6131_v14 = vld [vmem:[#allocation2 + $0x144] sm:$0xf0] }
 0x27b   : > { %v2862_v11 = vpack.c.bf16 %v2830_v16, %v2830_v16  ;;  %v2908_v20 = vrot.slane %v2830_v16, 7  ;;  %v3004_v8 = vrot.slane %v2830_v16, 1  ;;  %v2690_v34 = vadd.f32 %v2689_v49, %v2601_v59  ;;  %3816 = vmatmul.bf16.vlgmr.msra.gmra.mxu1 %v8510_v46 }
 0x27c   : > { %v6130_v59 = vor.u32 %v7106_v61, %v6129_v39 }
 0x27d   : > { %v2924_v60 = vsel %vm390_vm1, %v2892_v57, %v2908_v20  ;;  %v2940_v24 = vsel %vm390_vm1, %v2908_v20, %v2892_v57  ;;  %v3020_v31 = vsel %vm491_vm2, %v2988_v43, %v3004_v8  ;;  %v3036_v29 = vsel %vm491_vm2, %v3004_v8, %v2988_v43  ;;  %3150 = vst [vmem:[#allocation2 + $0x40] sm:$0xf] %v2862_v11  ;;  %v2513_v48 = vpop.f32.mrf.mxu2 }
 0x27e   : > { %v2957_v49 = vsel %vm282_vm0, 0.0, %v2940_v24  ;;  %v3054_v21 = vsel %vm285_vm3, 0.0, %v3036_v29  ;;  %v3086_v0 = vpack.c.bf16 %v2924_v60, %v2924_v60  ;;  %v3181_v1 = vpack.c.bf16 %v3020_v31, %v3020_v31  ;;  %v7241_v31 = vld [vmem:[#allocation8 + $0x170] sm:$0xff] }
 0x27f   : > { %v3085_v63 = vpack.c.bf16 %v2957_v49, %v2957_v49  ;;  %v3182_v9 = vpack.c.bf16 %v3054_v21, %v3054_v21  ;;  %v2763_v4 = vadd.f32 %v2690_v34, %v8354_v56  ;;  %v6138_v57 = vor.u32 %v7107_v22, %v6137_v37  ;;  %v2694_v20 = vpop.f32.mrf.mxu0  ;;  %v7233_v29 = vld [vmem:[#allocation8 + $0x130] sm:$0xff]  ;;  %3987 = vmatpush.bf16.msrb.mxu3 %v7241_v31 }
 0x280   : > { %3118 = vst [vmem:[#allocation2 + $0x3c] sm:$0xf] %v3086_v0  ;;  %v2602_v16 = vpop.f32.mrf.mxu3  ;;  %v6134_v8 = vor.u32 %v7105_v42, %v6131_v14  ;;  %3898 = vmatpush.bf16.msrb.mxu2 %v7233_v29  ;;  %v7198_v22 = vld [vmem:[#allocation8 + $0x30] sm:$0xff] }
 0x281   : > { %3117 = vst [vmem:[#allocation2 + $0x30] sm:$0xf] %v3085_v63  ;;  %v2799_v43 = vadd.f32 %v8488_v40, %v2763_v4  ;;  %v2603_v11 = vadd.f32 %v2602_v16, %v2513_v48  ;;  %v7206_v49 = vld [vmem:[#allocation8 + $0x70] sm:$0xff]  ;;  %4236 = vmatpush.bf16.msrb.mxu0 %v7198_v22 }
 0x282   : > { %3213 = vst [vmem:[#allocation2 + $0x38] sm:$0xf] %v3181_v1  ;;  %2555 = vmatmul.bf16.gmra.mxu2 %v6130_v59  ;;  %2733 = vmatmul.bf16.gmra.mxu0 %v6138_v57  ;;  %v6141_v59 = vld [vmem:[#allocation2 + $0x150] sm:$0xf]  ;;  %v7109_v57 = vld [vmem:[#allocation2 + $0x158] sm:$0xf0] }
 0x283   : > { %3214 = vst [vmem:[#allocation2 + $0x44] sm:$0xf] %v3182_v9  ;;  %v2831_v60 = vmax.f32 %v2799_v43, 0.0  ;;  %v2692_v24 = vadd.f32 %v2691_v47, %v2603_v11  ;;  %4325 = vmatpush.bf16.msrb.mxu1 %v7206_v49  ;;  %v7110_v31 = vld [vmem:[#allocation2 + $0x160] sm:$0xf0] }
 0x285   : > { %v2863_v56 = vpack.c.bf16 %v2831_v60, %v2831_v60  ;;  %v2764_v34 = vadd.f32 %v2692_v24, %v8361_v26  ;;  %2644 = vmatmul.bf16.gmra.mxu3 %v6134_v8  ;;  %v2516_v61 = vpop.f32.mrf.mxu2  ;;  %v2893_v26 = vrot.slane %v2831_v60, 7  ;;  %v2989_v63 = vrot.slane %v2831_v60, 1  ;;  %v6149_v24 = vld [vmem:[#allocation2 + $0x158] sm:$0xf] }
 0x287   : > { %3151 = vst [vmem:[#allocation2 + $0x4c] sm:$0xf] %v2863_v56  ;;  %v2800_v39 = vadd.f32 %v8488_v40, %v2764_v34  ;;  %v7151_v37 = vld [vmem:[#allocation2 + $0x38] sm:$0xf0]  ;;  %v2696_v42 = vpop.f32.mrf.mxu0 }
 0x288   : > { %v2605_v21 = vpop.f32.mrf.mxu3  ;;  %v6297_v0 = vld [vmem:[#allocation2 + $0x30] sm:$0xf] }
 0x289   : > { %v2832_v47 = vmax.f32 %v2800_v39, 0.0  ;;  %v2606_v1 = vadd.f32 %v2605_v21, %v2516_v61  ;;  %v8529_v14 = vor.u32 %v7151_v37, %v6297_v0  ;;  %v7108_v39 = vld [vmem:[#allocation2 + $0x154] sm:$0xf]  ;;  %v6143_v61 = vld [vmem:[#allocation2 + $0x15c] sm:$0xf0] }
 0x28b   : > { %v2864_v9 = vpack.c.bf16 %v2832_v47, %v2832_v47  ;;  %v2909_v4 = vrot.slane %v2832_v47, 7  ;;  %v3005_v48 = vrot.slane %v2832_v47, 1  ;;  %v2695_v16 = vadd.f32 %v2694_v20, %v2606_v1  ;;  %3821 = vmatmul.bf16.gmra.mxu1 %v8529_v14 }
 0x28c   : > { %v6142_v47 = vor.u32 %v7109_v57, %v6141_v59  ;;  %v6150_v1 = vor.u32 %v7110_v31, %v6149_v24 }
 0x28d   : > { %v2925_v43 = vsel %vm390_vm1, %v2893_v26, %v2909_v4  ;;  %v2941_v11 = vsel %vm390_vm1, %v2909_v4, %v2893_v26  ;;  %v3021_v8 = vsel %vm491_vm2, %v2989_v63, %v3005_v48  ;;  %v3037_v60 = vsel %vm491_vm2, %v3005_v48, %v2989_v63  ;;  %3152 = vst [vmem:[#allocation2 + $0x58] sm:$0xf] %v2864_v9  ;;  %v2518_v21 = vpop.f32.mrf.mxu2 }
 0x28e   : > { %v2959_v20 = vsel %vm282_vm0, 0.0, %v2941_v11  ;;  %v3056_v29 = vsel %vm285_vm3, 0.0, %v3037_v60  ;;  %v3088_v56 = vpack.c.bf16 %v2925_v43, %v2925_v43  ;;  %v3183_v34 = vpack.c.bf16 %v3021_v8, %v3021_v8 }
 0x28f   : > { %v3087_v37 = vpack.c.bf16 %v2959_v20, %v2959_v20  ;;  %v3184_v22 = vpack.c.bf16 %v3056_v29, %v3056_v29  ;;  %v2765_v49 = vadd.f32 %v2695_v16, %v8370_v12  ;;  %v2699_v9 = vpop.f32.mrf.mxu0  ;;  %v6146_v4 = vor.u32 %v7108_v39, %v6143_v61 }
 0x290   : > { %3120 = vst [vmem:[#allocation2 + $0x54] sm:$0xf] %v3088_v56  ;;  %v2607_v0 = vpop.f32.mrf.mxu3 }
 0x291   : > { %3119 = vst [vmem:[#allocation2 + $0x48] sm:$0xf] %v3087_v37  ;;  %v2801_v26 = vadd.f32 %v8488_v40, %v2765_v49  ;;  %v2608_v63 = vadd.f32 %v2607_v0, %v2518_v21  ;;  %v7111_v49 = vld [vmem:[#allocation2 + $0x16c] sm:$0xf]  ;;  %v6155_v21 = vld [vmem:[#allocation2 + $0x174] sm:$0xf0] }
 0x292   : > { %3215 = vst [vmem:[#allocation2 + $0x50] sm:$0xf] %v3183_v34  ;;  %2560 = vmatmul.bf16.gmra.mxu2 %v6142_v47  ;;  %2738 = vmatmul.bf16.gmra.mxu0 %v6150_v1 }
 0x293   : > { %3216 = vst [vmem:[#allocation2 + $0x5c] sm:$0xf] %v3184_v22  ;;  %v2833_v48 = vmax.f32 %v2801_v26, 0.0  ;;  %v2697_v43 = vadd.f32 %v2696_v42, %v2608_v63  ;;  %v7112_v22 = vld [vmem:[#allocation2 + $0x170] sm:$0xf0] }
 0x294   : > { %v6161_v63 = vld [vmem:[#allocation2 + $0x170] sm:$0xf] }
 0x295   : > { %v2865_v11 = vpack.c.bf16 %v2833_v48, %v2833_v48  ;;  %v2766_v12 = vadd.f32 %v2697_v43, %v8377_v13  ;;  %2649 = vmatmul.bf16.gmra.mxu3 %v6146_v4  ;;  %v2521_v59 = vpop.f32.mrf.mxu2  ;;  %v2894_v56 = vrot.slane %v2833_v48, 7  ;;  %v2990_v42 = vrot.slane %v2833_v48, 1  ;;  %v6153_v13 = vld [vmem:[#allocation2 + $0x168] sm:$0xf] }
 0x297   : > { %3153 = vst [vmem:[#allocation2 + $0x64] sm:$0xf] %v2865_v11  ;;  %v2802_v16 = vadd.f32 %v8488_v40, %v2766_v12  ;;  %v7154_v57 = vld [vmem:[#allocation2 + $0x50] sm:$0xf0]  ;;  %v2701_v20 = vpop.f32.mrf.mxu0  ;;  %v7240_v12 = vld [vmem:[#allocation8 + $0x168] sm:$0xff] }
 0x298   : > { %v2610_v8 = vpop.f32.mrf.mxu3  ;;  %v6309_v60 = vld [vmem:[#allocation2 + $0x48] sm:$0xf]  ;;  %3988 = vmatpush.bf16.msrb.mxu3 %v7240_v12 }
 0x299   : > { %v2834_v24 = vmax.f32 %v2802_v16, 0.0  ;;  %v2611_v31 = vadd.f32 %v2610_v8, %v2521_v59  ;;  %v8548_v29 = vor.u32 %v7154_v57, %v6309_v60  ;;  %v7232_v16 = vld [vmem:[#allocation8 + $0x128] sm:$0xff] }
 0x29a   : > { %v7197_v59 = vld [vmem:[#allocation8 + $0x28] sm:$0xff]  ;;  %3899 = vmatpush.bf16.msrb.mxu2 %v7232_v16 }
 0x29b   : > { %v2866_v34 = vpack.c.bf16 %v2834_v24, %v2834_v24  ;;  %v2910_v39 = vrot.slane %v2834_v24, 7  ;;  %v3006_v61 = vrot.slane %v2834_v24, 1  ;;  %v2700_v37 = vadd.f32 %v2699_v9, %v2611_v31  ;;  %3826 = vmatmul.bf16.gmra.mxu1 %v8548_v29  ;;  %v7113_v9 = vld [vmem:[#allocation2 + $0x178] sm:$0xf0]  ;;  %4237 = vmatpush.bf16.msrb.mxu0 %v7197_v59 }
 0x29d   : > { %v2926_v0 = vsel %vm390_vm1, %v2894_v56, %v2910_v39  ;;  %v2942_v47 = vsel %vm390_vm1, %v2910_v39, %v2894_v56  ;;  %v3022_v1 = vsel %vm491_vm2, %v2990_v42, %v3006_v61  ;;  %v3038_v26 = vsel %vm491_vm2, %v3006_v61, %v2990_v42  ;;  %3154 = vst [vmem:[#allocation2 + $0x70] sm:$0xf] %v2866_v34  ;;  %v2523_v24 = vpop.f32.mrf.mxu2 }
 0x29e   : > { %v2961_v4 = vsel %vm282_vm0, 0.0, %v2942_v47  ;;  %v3058_v48 = vsel %vm285_vm3, 0.0, %v3038_v26  ;;  %v3090_v43 = vpack.c.bf16 %v2926_v0, %v2926_v0  ;;  %v3185_v11 = vpack.c.bf16 %v3022_v1, %v3022_v1  ;;  %v7231_v47 = vld [vmem:[#allocation8 + $0x120] sm:$0xff] }
 0x29f   : > { %v3089_v57 = vpack.c.bf16 %v2961_v4, %v2961_v4  ;;  %v3186_v8 = vpack.c.bf16 %v3058_v48, %v3058_v48  ;;  %v2767_v60 = vadd.f32 %v2700_v37, %v8388_v41  ;;  %v6154_v56 = vor.u32 %v7112_v22, %v6153_v13  ;;  %v2704_v61 = vpop.f32.mrf.mxu0  ;;  %v7239_v1 = vld [vmem:[#allocation8 + $0x160] sm:$0xff]  ;;  %3900 = vmatpush.bf16.msrb.mxu2 %v7231_v47  ;;  %v7115_v47 = vld [vmem:[#allocation2 + $0x188] sm:$0xf0] }
 0x2a0   : > { %3122 = vst [vmem:[#allocation2 + $0x6c] sm:$0xf] %v3090_v43  ;;  %v2612_v31 = vpop.f32.mrf.mxu3  ;;  %v6162_v42 = vor.u32 %v7113_v9, %v6161_v63  ;;  %v6158_v0 = vor.u32 %v7111_v49, %v6155_v21  ;;  %v7196_v26 = vld [vmem:[#allocation8 + $0x20] sm:$0xff]  ;;  %v1922_v41 = vadd.f32 %v8386_v32, %v8392_v35  ;;  %3989 = vmatpush.bf16.msrb.mxu3 %v7239_v1  ;;  %v7230_v49 = vld [vmem:[#allocation8 + $0x118] sm:$0xff]  ;;  %v7205_v43 = vld [vmem:[#allocation8 + $0x68] sm:$0xff] }
 0x2a1   : > { %3121 = vst [vmem:[#allocation2 + $0x60] sm:$0xf] %v3089_v57  ;;  %v2803_v34 = vadd.f32 %v8488_v40, %v2767_v60  ;;  %v2613_v39 = vadd.f32 %v2612_v31, %v2523_v24  ;;  %4238 = vmatpush.bf16.msrb.mxu0 %v7196_v26  ;;  %v7238_v21 = vld [vmem:[#allocation8 + $0x158] sm:$0xff]  ;;  %4326 = vmatpush.bf16.msrb.mxu1 %v7205_v43  ;;  %v7229_v60 = vld [vmem:[#allocation8 + $0x110] sm:$0xff]  ;;  %v7236_v43 = vld [vmem:[#allocation8 + $0x148] sm:$0xff] }
 0x2a2   : > { %3217 = vst [vmem:[#allocation2 + $0x68] sm:$0xf] %v3185_v11  ;;  %2565 = vmatmul.bf16.gmra.mxu2 %v6154_v56  ;;  %2743 = vmatmul.bf16.gmra.mxu0 %v6162_v42  ;;  %v7195_v32 = vld [vmem:[#allocation8 + $0x18] sm:$0xff]  ;;  %v7237_v24 = vld [vmem:[#allocation8 + $0x150] sm:$0xff] }
 0x2a3   : > { %3218 = vst [vmem:[#allocation2 + $0x74] sm:$0xf] %v3186_v8  ;;  %v2835_v37 = vmax.f32 %v2803_v34, 0.0  ;;  %v2702_v13 = vadd.f32 %v2701_v20, %v2613_v39  ;;  %3901 = vmatpush.bf16.msrb.mxu2 %v7230_v49  ;;  %v7194_v39 = vld [vmem:[#allocation8 + $0x10] sm:$0xff] }
 0x2a4   : > { %3990 = vmatpush.bf16.msrb.mxu3 %v7238_v21  ;;  %v7114_v1 = vld [vmem:[#allocation2 + $0x184] sm:$0xf] }
 0x2a5   : > { %v2867_v22 = vpack.c.bf16 %v2835_v37, %v2835_v37  ;;  %v2768_v63 = vadd.f32 %v2702_v13, %v1922_v41  ;;  %2654 = vmatmul.bf16.gmra.mxu3 %v6158_v0  ;;  %v2526_v4 = vpop.f32.mrf.mxu2  ;;  %v2895_v57 = vrot.slane %v2835_v37, 7  ;;  %v2991_v8 = vrot.slane %v2835_v37, 1  ;;  %4239 = vmatpush.bf16.msrb.mxu0 %v7195_v32  ;;  %v6165_v0 = vld [vmem:[#allocation2 + $0x180] sm:$0xf] }
 0x2a7   : > { %3155 = vst [vmem:[#allocation2 + $0x7c] sm:$0xf] %v2867_v22  ;;  %v2804_v9 = vadd.f32 %v8488_v40, %v2768_v63  ;;  %v7157_v48 = vld [vmem:[#allocation2 + $0x68] sm:$0xf0]  ;;  %v2706_v16 = vpop.f32.mrf.mxu0  ;;  %v7116_v22 = vld [vmem:[#allocation2 + $0x190] sm:$0xf0]  ;;  %3902 = vmatpush.bf16.msrb.mxu2 %v7229_v60 }
 0x2a8   : > { %v2615_v35 = vpop.f32.mrf.mxu3  ;;  %v6321_v11 = vld [vmem:[#allocation2 + $0x60] sm:$0xf]  ;;  %3991 = vmatpush.bf16.msrb.mxu3 %v7237_v24  ;;  %v7227_v24 = vld [vmem:[#allocation8 + $0x100] sm:$0xff] }
 0x2a9   : > { %v2836_v20 = vmax.f32 %v2804_v9, 0.0  ;;  %v2616_v12 = vadd.f32 %v2615_v35, %v2526_v4  ;;  %v8568_v59 = vor.u32 %v7157_v48, %v6321_v11  ;;  %v6167_v4 = vld [vmem:[#allocation2 + $0x18c] sm:$0xf0]  ;;  %v7228_v48 = vld [vmem:[#allocation8 + $0x108] sm:$0xff]  ;;  %4240 = vmatpush.bf16.msrb.mxu0 %v7194_v39 }
 0x2aa   : > { %v6170_v60 = vor.u32 %v7114_v1, %v6167_v4 }
 0x2ab   : > { %v2868_v31 = vpack.c.bf16 %v2836_v20, %v2836_v20  ;;  %v2911_v56 = vrot.slane %v2836_v20, 7  ;;  %v3007_v42 = vrot.slane %v2836_v20, 1  ;;  %v2705_v34 = vadd.f32 %v2704_v61, %v2616_v12  ;;  %3831 = vmatmul.bf16.gmra.mxu1 %v8568_v59  ;;  %v6173_v61 = vld [vmem:[#allocation2 + $0x188] sm:$0xf]  ;;  %v7193_v12 = vld [vmem:[#allocation8 + $0x8] sm:$0xff]  ;;  %3903 = vmatpush.bf16.msrb.mxu2 %v7228_v48 }
 0x2ac   : > { %3992 = vmatpush.bf16.msrb.mxu3 %v7236_v43 }
 0x2ad   : > { %v2927_v26 = vsel %vm390_vm1, %v2895_v57, %v2911_v56  ;;  %v2943_v41 = vsel %vm390_vm1, %v2911_v56, %v2895_v57  ;;  %v3023_v37 = vsel %vm491_vm2, %v2991_v8, %v3007_v42  ;;  %v3039_v13 = vsel %vm491_vm2, %v3007_v42, %v2991_v8  ;;  %3156 = vst [vmem:[#allocation2 + $0x88] sm:$0xf] %v2868_v31  ;;  %v2528_v20 = vpop.f32.mrf.mxu2 }
 0x2ae   : > { %v2963_v63 = vsel %vm282_vm0, 0.0, %v2943_v41  ;;  %v3060_v49 = vsel %vm285_vm3, 0.0, %v3039_v13  ;;  %v3092_v21 = vpack.c.bf16 %v2927_v26, %v2927_v26  ;;  %v3187_v9 = vpack.c.bf16 %v3023_v37, %v3023_v37  ;;  %v7235_v41 = vld [vmem:[#allocation8 + $0x140] sm:$0xff]  ;;  %4241 = vmatpush.bf16.msrb.mxu0 %v7193_v12 }
 0x2af   : > { %v3091_v32 = vpack.c.bf16 %v2963_v63, %v2963_v63  ;;  %v3188_v35 = vpack.c.bf16 %v3060_v49, %v3060_v49  ;;  %v2769_v11 = vadd.f32 %v2705_v34, %v8398_v44  ;;  %v6166_v8 = vor.u32 %v7115_v47, %v6165_v0  ;;  %v2709_v26 = vpop.f32.mrf.mxu0  ;;  %v7192_v0 = vld [vmem:[#allocation8] sm:$0xff]  ;;  %3904 = vmatpush.bf16.msrb.mxu2 %v7227_v24 }
 0x2b0   : > { %3124 = vst [vmem:[#allocation2 + $0x84] sm:$0xf] %v3092_v21  ;;  %v2617_v57 = vpop.f32.mrf.mxu3  ;;  %v6174_v31 = vor.u32 %v7116_v22, %v6173_v61  ;;  %v1927_v44 = vadd.f32 %v8396_v38, %v8402_v30  ;;  %3993 = vmatpush.bf16.msrb.mxu3 %v7235_v41  ;;  %v7117_v41 = vld [vmem:[#allocation2 + $0x19c] sm:$0xf] }
 0x2b1   : > { %3123 = vst [vmem:[#allocation2 + $0x78] sm:$0xf] %v3091_v32  ;;  %v2805_v56 = vadd.f32 %v8488_v40, %v2769_v11  ;;  %v2618_v42 = vadd.f32 %v2617_v57, %v2528_v20  ;;  %v7118_v11 = vld [vmem:[#allocation2 + $0x1a0] sm:$0xf0] }
 0x2b2   : > { %3219 = vst [vmem:[#allocation2 + $0x80] sm:$0xf] %v3187_v9  ;;  %2570 = vmatmul.bf16.gmra.mxu2 %v6166_v8  ;;  %2748 = vmatmul.bf16.gmra.mxu0 %v6174_v31  ;;  %v6185_v31 = vld [vmem:[#allocation2 + $0x1a0] sm:$0xf] }
 0x2b3   : > { %3220 = vst [vmem:[#allocation2 + $0x8c] sm:$0xf] %v3188_v35  ;;  %v2837_v34 = vmax.f32 %v2805_v56, 0.0  ;;  %v2707_v39 = vadd.f32 %v2706_v16, %v2618_v42  ;;  %4242 = vmatpush.bf16.msrb.mxu0 %v7192_v0  ;;  %v6177_v35 = vld [vmem:[#allocation2 + $0x198] sm:$0xf] }
 0x2b4   : > { %v7119_v56 = vld [vmem:[#allocation2 + $0x1a8] sm:$0xf0] }
 0x2b5   : > { %v2869_v47 = vpack.c.bf16 %v2837_v34, %v2837_v34  ;;  %v2770_v37 = vadd.f32 %v2707_v39, %v1927_v44  ;;  %2659 = vmatmul.bf16.gmra.mxu3 %v6170_v60  ;;  %v2531_v13 = vpop.f32.mrf.mxu2  ;;  %v2896_v21 = vrot.slane %v2837_v34, 7  ;;  %v2992_v9 = vrot.slane %v2837_v34, 1  ;;  %v6179_v44 = vld [vmem:[#allocation2 + $0x1a4] sm:$0xf0] }
 0x2b7   : > { %3157 = vst [vmem:[#allocation2 + $0x94] sm:$0xf] %v2869_v47  ;;  %v2806_v1 = vadd.f32 %v8488_v40, %v2770_v37  ;;  %v7160_v61 = vld [vmem:[#allocation2 + $0x80] sm:$0xf0]  ;;  %v2711_v16 = vpop.f32.mrf.mxu0 }
 0x2b8   : > { %v2620_v22 = vpop.f32.mrf.mxu3  ;;  %v6333_v38 = vld [vmem:[#allocation2 + $0x78] sm:$0xf] }
 0x2b9   : > { %v2838_v30 = vmax.f32 %v2806_v1, 0.0  ;;  %v2621_v63 = vadd.f32 %v2620_v22, %v2531_v13  ;;  %v8588_v49 = vor.u32 %v7160_v61, %v6333_v38  ;;  %v6178_v1 = vor.u32 %v7118_v11, %v6177_v35  ;;  %v7204_v35 = vld [vmem:[#allocation8 + $0x60] sm:$0xff] }
 0x2ba   : > { %v6186_v13 = vor.u32 %v7119_v56, %v6185_v31  ;;  %4327 = vmatpush.bf16.msrb.mxu1 %v7204_v35 }
 0x2bb   : > { %v2870_v4 = vpack.c.bf16 %v2838_v30, %v2838_v30  ;;  %v2912_v48 = vrot.slane %v2838_v30, 7  ;;  %v3008_v43 = vrot.slane %v2838_v30, 1  ;;  %v2710_v32 = vadd.f32 %v2709_v26, %v2621_v63  ;;  %3836 = vmatmul.bf16.gmra.mxu1 %v8588_v49 }
 0x2bc   : > { %v6182_v30 = vor.u32 %v7117_v41, %v6179_v44  ;;  %v1932_v63 = vadd.f32 %v8406_v23, %v8412_v18 }
 0x2bd   : > { %v2928_v20 = vsel %vm390_vm1, %v2896_v21, %v2912_v48  ;;  %v2944_v12 = vsel %vm390_vm1, %v2912_v48, %v2896_v21  ;;  %v3024_v57 = vsel %vm491_vm2, %v2992_v9, %v3008_v43  ;;  %v3040_v8 = vsel %vm491_vm2, %v3008_v43, %v2992_v9  ;;  %3158 = vst [vmem:[#allocation2 + $0xa0] sm:$0xf] %v2870_v4  ;;  %v2533_v47 = vpop.f32.mrf.mxu2 }
 0x2be   : > { %v2965_v42 = vsel %vm282_vm0, 0.0, %v2944_v12  ;;  %v3062_v26 = vsel %vm285_vm3, 0.0, %v3040_v8  ;;  %v3094_v60 = vpack.c.bf16 %v2928_v20, %v2928_v20  ;;  %v3189_v24 = vpack.c.bf16 %v3024_v57, %v3024_v57 }
 0x2bf   : > { %v3093_v34 = vpack.c.bf16 %v2965_v42, %v2965_v42  ;;  %v3190_v39 = vpack.c.bf16 %v3062_v26, %v3062_v26  ;;  %v2771_v0 = vadd.f32 %v2710_v32, %v8408_v25  ;;  %v2714_v38 = vpop.f32.mrf.mxu0 }
 0x2c0   : > { %3126 = vst [vmem:[#allocation2 + $0x9c] sm:$0xf] %v3094_v60  ;;  %v2622_v37 = vpop.f32.mrf.mxu3 }
 0x2c1   : > { %3125 = vst [vmem:[#allocation2 + $0x90] sm:$0xf] %v3093_v34  ;;  %v2807_v61 = vadd.f32 %v8488_v40, %v2771_v0  ;;  %v2623_v22 = vadd.f32 %v2622_v37, %v2533_v47  ;;  %v6573_v34 = vld [vmem:[#allocation2] sm:$0xf] }
 0x2c2   : > { %3221 = vst [vmem:[#allocation2 + $0x98] sm:$0xf] %v3189_v24  ;;  %2575 = vmatmul.bf16.gmra.mxu2 %v6178_v1  ;;  %2753 = vmatmul.bf16.gmra.mxu0 %v6186_v13 }
 0x2c3   : > { %3222 = vst [vmem:[#allocation2 + $0xa4] sm:$0xf] %v3190_v39  ;;  %v2839_v21 = vmax.f32 %v2807_v61, 0.0  ;;  %v2712_v9 = vadd.f32 %v2711_v16, %v2623_v22  ;;  %v7145_v39 = vld [vmem:[#allocation2 + $0x8] sm:$0xf0] }
 0x2c5   : > { %v2871_v25 = vpack.c.bf16 %v2839_v21, %v2839_v21  ;;  %v2772_v4 = vadd.f32 %v2712_v9, %v1932_v63  ;;  %2664 = vmatmul.bf16.gmra.mxu3 %v6182_v30  ;;  %v2536_v43 = vpop.f32.mrf.mxu2  ;;  %v2897_v18 = vrot.slane %v2839_v21, 7  ;;  %v2993_v16 = vrot.slane %v2839_v21, 1  ;;  %v6287_v30 = vld [vmem:[#allocation2 + $0x24] sm:$0xf0]  ;;  %v6293_v21 = vld [vmem:[#allocation2 + $0x20] sm:$0xf] }
 0x2c6   : > { %v7149_v9 = vld [vmem:[#allocation2 + $0x28] sm:$0xf0] }
 0x2c7   : > { %3159 = vst [vmem:[#allocation2 + $0xac] sm:$0xf] %v2871_v25  ;;  %v2808_v48 = vadd.f32 %v8488_v40, %v2772_v4  ;;  %v7163_v32 = vld [vmem:[#allocation2 + $0x98] sm:$0xf0]  ;;  %v2716_v8 = vpop.f32.mrf.mxu0  ;;  %v6574_v25 = vor.u32 %v7145_v39, %v6573_v34 }
 0x2c8   : > { %v2625_v11 = vpop.f32.mrf.mxu3  ;;  %v6345_v20 = vld [vmem:[#allocation2 + $0x90] sm:$0xf] }
 0x2c9   : > { %v2840_v12 = vmax.f32 %v2808_v48, 0.0  ;;  %v2626_v57 = vadd.f32 %v2625_v11, %v2536_v43  ;;  %v8608_v23 = vor.u32 %v7163_v32, %v6345_v20  ;;  %v7147_v32 = vld [vmem:[#allocation2 + $0x1c] sm:$0xf]  ;;  %v1937_v11 = vadd.f32 %v8416_v33, %v8421_v27 }
 0x2ca   : > { %v8625_v35 = vor.u32 %v7147_v32, %v6287_v30  ;;  %v7152_v32 = vld [vmem:[#allocation2 + $0x40] sm:$0xf0] }
 0x2cb   : > { %v2872_v31 = vpack.c.bf16 %v2840_v12, %v2840_v12  ;;  %v2913_v56 = vrot.slane %v2840_v12, 7  ;;  %v3009_v42 = vrot.slane %v2840_v12, 1  ;;  %v2715_v26 = vadd.f32 %v2714_v38, %v2626_v57  ;;  %3841 = vmatmul.bf16.gmra.mxu1 %v8608_v23 }
 0x2cc   : > { %v8629_v12 = vor.u32 %v7149_v9, %v6293_v21 }
 0x2cd   : > { %v2929_v60 = vsel %vm390_vm1, %v2897_v18, %v2913_v56  ;;  %v2945_v24 = vsel %vm390_vm1, %v2913_v56, %v2897_v18  ;;  %v3025_v41 = vsel %vm491_vm2, %v2993_v16, %v3009_v42  ;;  %v3041_v44 = vsel %vm491_vm2, %v3009_v42, %v2993_v16  ;;  %3160 = vst [vmem:[#allocation2 + $0xb8] sm:$0xf] %v2872_v31  ;;  %v2538_v38 = vpop.f32.mrf.mxu2 }
 0x2ce   : > { %v2967_v0 = vsel %vm282_vm0, 0.0, %v2945_v24  ;;  %v3064_v47 = vsel %vm285_vm3, 0.0, %v3041_v44  ;;  %v3096_v37 = vpack.c.bf16 %v2929_v60, %v2929_v60  ;;  %v3191_v1 = vpack.c.bf16 %v3025_v41, %v3025_v41 }
 0x2cf   : > { %v3095_v13 = vpack.c.bf16 %v2967_v0, %v2967_v0  ;;  %v3192_v61 = vpack.c.bf16 %v3064_v47, %v3064_v47  ;;  %v2773_v22 = vadd.f32 %v2715_v26, %v8418_v15  ;;  %v2719_v43 = vpop.f32.mrf.mxu0 }
 0x2d0   : > { %3128 = vst [vmem:[#allocation2 + $0xb4] sm:$0xf] %v3096_v37  ;;  %v2627_v63 = vpop.f32.mrf.mxu3 }
 0x2d1   : > { %3127 = vst [vmem:[#allocation2 + $0xa8] sm:$0xf] %v3095_v13  ;;  %v2809_v4 = vadd.f32 %v8488_v40, %v2773_v22  ;;  %v2628_v48 = vadd.f32 %v2627_v63, %v2538_v38 }
 0x2d2   : > { %3223 = vst [vmem:[#allocation2 + $0xb0] sm:$0xf] %v3191_v1  ;;  %3905 = vmatmul.bf16.vlgmr.msrb.gmra.mxu2 %v8625_v35  ;;  %4243 = vmatmul.bf16.vlgmr.msrb.gmra.mxu0 %v6574_v25 }
 0x2d3   : > { %3224 = vst [vmem:[#allocation2 + $0xbc] sm:$0xf] %v3192_v61  ;;  %v2841_v15 = vmax.f32 %v2809_v4, 0.0  ;;  %v2717_v20 = vadd.f32 %v2716_v8, %v2628_v48  ;;  %v6299_v4 = vld [vmem:[#allocation2 + $0x3c] sm:$0xf0] }
 0x2d5   : > { %v2873_v57 = vpack.c.bf16 %v2841_v15, %v2841_v15  ;;  %v2774_v18 = vadd.f32 %v2717_v20, %v1937_v11  ;;  %3994 = vmatmul.bf16.vlgmr.msrb.gmra.mxu3 %v8629_v12  ;;  %v2541_v31 = vpop.f32.mrf.mxu2  ;;  %v2898_v24 = vrot.slane %v2841_v15, 7  ;;  %v2994_v41 = vrot.slane %v2841_v15, 1 }
 0x2d7   : > { %3161 = vst [vmem:[#allocation2 + $0xc4] sm:$0xf] %v2873_v57  ;;  %v2810_v16 = vadd.f32 %v8488_v40, %v2774_v18  ;;  %v7166_v56 = vld [vmem:[#allocation2 + $0xb0] sm:$0xf0]  ;;  %v2721_v60 = vpop.f32.mrf.mxu0 }
 0x2d8   : > { %v2630_v42 = vpop.f32.mrf.mxu3  ;;  %v6357_v26 = vld [vmem:[#allocation2 + $0xa8] sm:$0xf]  ;;  %v7150_v57 = vld [vmem:[#allocation2 + $0x34] sm:$0xf] }
 0x2d9   : > { %v2842_v33 = vmax.f32 %v2810_v16, 0.0  ;;  %v2631_v27 = vadd.f32 %v2630_v42, %v2541_v31  ;;  %v8634_v8 = vor.u32 %v7166_v56, %v6357_v26  ;;  %v8651_v18 = vor.u32 %v7150_v57, %v6299_v4  ;;  %v7155_v57 = vld [vmem:[#allocation2 + $0x58] sm:$0xf0] }
 0x2da   : > { %v1942_v16 = vadd.f32 %v8424_v53, %v8429_v54 }
 0x2db   : > { %v2874_v44 = vpack.c.bf16 %v2842_v33, %v2842_v33  ;;  %v2914_v34 = vrot.slane %v2842_v33, 7  ;;  %v3010_v39 = vrot.slane %v2842_v33, 1  ;;  %v2720_v0 = vadd.f32 %v2719_v43, %v2631_v27  ;;  %3846 = vmatmul.bf16.gmra.mxu1 %v8634_v8  ;;  %v6305_v43 = vld [vmem:[#allocation2 + $0x38] sm:$0xf] }
 0x2dc   : > { %v8655_v56 = vor.u32 %v7152_v32, %v6305_v43  ;;  %v6311_v32 = vld [vmem:[#allocation2 + $0x54] sm:$0xf0] }
 0x2dd   : > { %v2930_v47 = vsel %vm390_vm1, %v2898_v24, %v2914_v34  ;;  %v2946_v37 = vsel %vm390_vm1, %v2914_v34, %v2898_v24  ;;  %v3026_v1 = vsel %vm491_vm2, %v2994_v41, %v3010_v39  ;;  %v3042_v13 = vsel %vm491_vm2, %v3010_v39, %v2994_v41  ;;  %3162 = vst [vmem:[#allocation2 + $0xd0] sm:$0xf] %v2874_v44  ;;  %v2543_v25 = vpop.f32.mrf.mxu2  ;;  %v7203_v41 = vld [vmem:[#allocation8 + $0x58] sm:$0xff] }
 0x2de   : > { %v2969_v61 = vsel %vm282_vm0, 0.0, %v2946_v37  ;;  %v3066_v22 = vsel %vm285_vm3, 0.0, %v3042_v13  ;;  %v3098_v38 = vpack.c.bf16 %v2930_v47, %v2930_v47  ;;  %v3193_v30 = vpack.c.bf16 %v3026_v1, %v3026_v1  ;;  %4328 = vmatpush.bf16.msrb.mxu1 %v7203_v41 }
 0x2df   : > { %v3097_v63 = vpack.c.bf16 %v2969_v61, %v2969_v61  ;;  %v3194_v21 = vpack.c.bf16 %v3066_v22, %v3066_v22  ;;  %v2775_v9 = vadd.f32 %v2720_v0, %v8426_v10  ;;  %v2724_v20 = vpop.f32.mrf.mxu0 }
 0x2e0   : > { %3130 = vst [vmem:[#allocation2 + $0xcc] sm:$0xf] %v3098_v38  ;;  %v2632_v48 = vpop.f32.mrf.mxu3 }
 0x2e1   : > { %3129 = vst [vmem:[#allocation2 + $0xc0] sm:$0xf] %v3097_v63  ;;  %v2811_v11 = vadd.f32 %v8488_v40, %v2775_v9  ;;  %v2633_v15 = vadd.f32 %v2632_v48, %v2543_v25 }
 0x2e2   : > { %3225 = vst [vmem:[#allocation2 + $0xc8] sm:$0xf] %v3193_v30  ;;  %3910 = vmatmul.bf16.gmra.mxu2 %v8651_v18  ;;  %4248 = vmatmul.bf16.gmra.mxu0 %v8510_v46 }
 0x2e3   : > { %3226 = vst [vmem:[#allocation2 + $0xd4] sm:$0xf] %v3194_v21  ;;  %v2843_v10 = vmax.f32 %v2811_v11, 0.0  ;;  %v2722_v31 = vadd.f32 %v2721_v60, %v2633_v15  ;;  %v8677_v11 = vpop.f32.mrf.mxu1 }
 0x2e5   : > { %v2875_v42 = vpack.c.bf16 %v2843_v10, %v2843_v10  ;;  %v2776_v26 = vadd.f32 %v2722_v31, %v1942_v16  ;;  %3999 = vmatmul.bf16.gmra.mxu3 %v8655_v56  ;;  %v2546_v27 = vpop.f32.mrf.mxu2  ;;  %v2899_v0 = vrot.slane %v2843_v10, 7  ;;  %v2995_v46 = vrot.slane %v2843_v10, 1  ;;  %v8682_v16 = vld [vmem:[%s9473_s3] ss:$0 sm:$0xff] }
 0x2e7   : > { %3163 = vst [vmem:[#allocation2 + $0xdc] sm:$0xf] %v2875_v42  ;;  %v2812_v33 = vadd.f32 %v8488_v40, %v2776_v26  ;;  %v7169_v24 = vld [vmem:[#allocation2 + $0xc8] sm:$0xf0]  ;;  %v2726_v34 = vpop.f32.mrf.mxu0 }
 0x2e8   : > { %v2635_v53 = vpop.f32.mrf.mxu3  ;;  %v6369_v54 = vld [vmem:[#allocation2 + $0xc0] sm:$0xf]  ;;  %v7153_v26 = vld [vmem:[#allocation2 + $0x4c] sm:$0xf] }
 0x2e9   : > { %v2844_v44 = vmax.f32 %v2812_v33, 0.0  ;;  %v2636_v60 = vadd.f32 %v2635_v53, %v2546_v27  ;;  %v8661_v39 = vor.u32 %v7169_v24, %v6369_v54  ;;  %v1947_v33 = vadd.f32 %v8432_v52, %v8437_v7 }
 0x2eb   : > { %v2876_v47 = vpack.c.bf16 %v2844_v44, %v2844_v44  ;;  %v2915_v37 = vrot.slane %v2844_v44, 7  ;;  %v3011_v1 = vrot.slane %v2844_v44, 1  ;;  %v2725_v13 = vadd.f32 %v2724_v20, %v2636_v60  ;;  %3851 = vmatmul.bf16.gmra.mxu1 %v8661_v39  ;;  %v6317_v20 = vld [vmem:[#allocation2 + $0x50] sm:$0xf] }
 0x2ec   : > { %v8689_v41 = vor.u32 %v7155_v57, %v6317_v20 }
 0x2ed   : > { %v2931_v40 = vsel %vm390_vm1, %v2899_v0, %v2915_v37  ;;  %v2947_v61 = vsel %vm390_vm1, %v2915_v37, %v2899_v0  ;;  %v3027_v22 = vsel %vm491_vm2, %v2995_v46, %v3011_v1  ;;  %v3043_v38 = vsel %vm491_vm2, %v3011_v1, %v2995_v46  ;;  %3164 = vst [vmem:[#allocation2 + $0xe8] sm:$0xf] %v2876_v47  ;;  %v2548_v43 = vpop.f32.mrf.mxu2 }
 0x2ee   : > { %v2971_v30 = vsel %vm282_vm0, 0.0, %v2947_v61  ;;  %v3068_v63 = vsel %vm285_vm3, 0.0, %v3043_v38  ;;  %v3100_v21 = vpack.c.bf16 %v2931_v40, %v2931_v40  ;;  %v3195_v9 = vpack.c.bf16 %v3027_v22, %v3027_v22 }
 0x2ef   : > { %v3099_v25 = vpack.c.bf16 %v2971_v30, %v2971_v30  ;;  %v3196_v4 = vpack.c.bf16 %v3068_v63, %v3068_v63  ;;  %v2777_v48 = vadd.f32 %v2725_v13, %v8434_v17  ;;  %v2729_v42 = vpop.f32.mrf.mxu0  ;;  %v8685_v17 = vor.u32 %v7153_v26, %v6311_v32  ;;  %v6329_v26 = vld [vmem:[#allocation2 + $0x68] sm:$0xf] }
 0x2f0   : > { %3132 = vst [vmem:[#allocation2 + $0xe4] sm:$0xf] %v3100_v21  ;;  %v2637_v15 = vpop.f32.mrf.mxu3 }
 0x2f1   : > { %3131 = vst [vmem:[#allocation2 + $0xd8] sm:$0xf] %v3099_v25  ;;  %v2813_v10 = vadd.f32 %v8682_v16, %v2777_v48  ;;  %v2638_v31 = vadd.f32 %v2637_v15, %v2548_v43 }
 0x2f2   : > { %3227 = vst [vmem:[#allocation2 + $0xe0] sm:$0xf] %v3195_v9  ;;  %3915 = vmatmul.bf16.gmra.mxu2 %v8685_v17  ;;  %4253 = vmatmul.bf16.gmra.mxu0 %v8529_v14 }
 0x2f3   : > { %3228 = vst [vmem:[#allocation2 + $0xec] sm:$0xf] %v3196_v4  ;;  %v2845_v27 = vmax.f32 %v2813_v10, 0.0  ;;  %v2727_v24 = vadd.f32 %v2726_v34, %v2638_v31  ;;  %v6323_v10 = vld [vmem:[#allocation2 + $0x6c] sm:$0xf0] }
 0x2f5   : > { %v2877_v53 = vpack.c.bf16 %v2845_v27, %v2845_v27  ;;  %v2778_v54 = vadd.f32 %v2727_v24, %v1947_v33  ;;  %4004 = vmatmul.bf16.gmra.mxu3 %v8689_v41  ;;  %v2551_v60 = vpop.f32.mrf.mxu2  ;;  %v2900_v13 = vrot.slane %v2845_v27, 7  ;;  %v2996_v14 = vrot.slane %v2845_v27, 1  ;;  %v7158_v33 = vld [vmem:[#allocation2 + $0x70] sm:$0xf0] }
 0x2f7   : > { %3165 = vst [vmem:[#allocation2 + $0xf4] sm:$0xf] %v2877_v53  ;;  %v2814_v44 = vadd.f32 %v8682_v16, %v2778_v54  ;;  %v7172_v0 = vld [vmem:[#allocation2 + $0xe0] sm:$0xf0]  ;;  %v2731_v37 = vpop.f32.mrf.mxu0 }
 0x2f8   : > { %v2640_v46 = vpop.f32.mrf.mxu3  ;;  %v8695_v52 = vpop.f32.mrf.mxu1  ;;  %v6381_v7 = vld [vmem:[#allocation2 + $0xd8] sm:$0xf]  ;;  %v7156_v54 = vld [vmem:[#allocation2 + $0x64] sm:$0xf] }
 0x2f9   : > { %v2846_v34 = vmax.f32 %v2814_v44, 0.0  ;;  %v2641_v47 = vadd.f32 %v2640_v46, %v2551_v60  ;;  %v8697_v1 = vor.u32 %v7172_v0, %v6381_v7  ;;  %v8716_v44 = vor.u32 %v7156_v54, %v6323_v10 }
 0x2fa   : > { %v8720_v46 = vor.u32 %v7158_v33, %v6329_v26 }
 0x2fb   : > { %v2878_v40 = vpack.c.bf16 %v2846_v34, %v2846_v34  ;;  %v2916_v61 = vrot.slane %v2846_v34, 7  ;;  %v3012_v22 = vrot.slane %v2846_v34, 1  ;;  %v2730_v38 = vadd.f32 %v2729_v42, %v2641_v47  ;;  %3856 = vmatmul.bf16.gmra.mxu1 %v8697_v1 }
 0x2fd   : > { %v2932_v30 = vsel %vm390_vm1, %v2900_v13, %v2916_v61  ;;  %v2948_v63 = vsel %vm390_vm1, %v2916_v61, %v2900_v13  ;;  %v3028_v21 = vsel %vm491_vm2, %v2996_v14, %v3012_v22  ;;  %v3044_v9 = vsel %vm491_vm2, %v3012_v22, %v2996_v14  ;;  %3166 = vst [vmem:[#allocation2 + $0x100] sm:$0xf] %v2878_v40  ;;  %v2553_v57 = vpop.f32.mrf.mxu2  ;;  %v7202_v40 = vld [vmem:[#allocation8 + $0x50] sm:$0xff] }
 0x2fe   : > { %v2973_v25 = vsel %vm282_vm0, 0.0, %v2948_v63  ;;  %v3070_v4 = vsel %vm285_vm3, 0.0, %v3044_v9  ;;  %v3102_v48 = vpack.c.bf16 %v2932_v30, %v2932_v30  ;;  %v3197_v43 = vpack.c.bf16 %v3028_v21, %v3028_v21  ;;  %4329 = vmatpush.bf16.msrb.mxu1 %v7202_v40  ;;  %v9599_v40 = vld [vmem:[#allocation34_spill] sm:$0xff] }
 0x2ff   : > { %v3101_v32 = vpack.c.bf16 %v2973_v25, %v2973_v25  ;;  %v3198_v15 = vpack.c.bf16 %v3070_v4, %v3070_v4  ;;  %v2779_v20 = vadd.f32 %v2730_v38, %v8442_v28  ;;  %v2734_v53 = vpop.f32.mrf.mxu0  ;;  %v1952_v28 = vadd.f32 %v8440_v51, %v8445_v3 }
 0x300   : > { %3134 = vst [vmem:[#allocation2 + $0xfc] sm:$0xf] %v3102_v48  ;;  %v2642_v31 = vpop.f32.mrf.mxu3  ;;  %v8713_v42 = vpop.f32.mrf.mxu1 }
 0x301   : > { %3133 = vst [vmem:[#allocation2 + $0xf0] sm:$0xf] %v3101_v32  ;;  %v2815_v27 = vadd.f32 %v8682_v16, %v2779_v20  ;;  %v2643_v24 = vadd.f32 %v2642_v31, %v2553_v57 }
 0x302   : > { %3229 = vst [vmem:[#allocation2 + $0xf8] sm:$0xf] %v3197_v43  ;;  %3920 = vmatmul.bf16.gmra.mxu2 %v8716_v44  ;;  %4258 = vmatmul.bf16.gmra.mxu0 %v8548_v29 }
 0x303   : > { %3230 = vst [vmem:[#allocation2 + $0x104] sm:$0xf] %v3198_v15  ;;  %v2847_v60 = vmax.f32 %v2815_v27, 0.0  ;;  %v2732_v0 = vadd.f32 %v2731_v37, %v2643_v24 }
 0x305   : > { %v2879_v7 = vpack.c.bf16 %v2847_v60, %v2847_v60  ;;  %v2780_v34 = vadd.f32 %v2732_v0, %v1952_v28  ;;  %4009 = vmatmul.bf16.gmra.mxu3 %v8720_v46  ;;  %v2556_v13 = vpop.f32.mrf.mxu2  ;;  %v2901_v29 = vrot.slane %v2847_v60, 7  ;;  %v2997_v63 = vrot.slane %v2847_v60, 1  ;;  %v6341_v60 = vld [vmem:[#allocation2 + $0x80] sm:$0xf]  ;;  %v7161_v0 = vld [vmem:[#allocation2 + $0x88] sm:$0xf0] }
 0x307   : > { %3167 = vst [vmem:[#allocation2 + $0x10c] sm:$0xf] %v2879_v7  ;;  %v2816_v47 = vadd.f32 %v8682_v16, %v2780_v34  ;;  %v7175_v14 = vld [vmem:[#allocation2 + $0xf8] sm:$0xf0]  ;;  %v2736_v38 = vpop.f32.mrf.mxu0 }
 0x308   : > { %v2645_v51 = vpop.f32.mrf.mxu3  ;;  %v8726_v3 = vpop.f32.mrf.mxu1  ;;  %v6393_v37 = vld [vmem:[#allocation2 + $0xf0] sm:$0xf] }
 0x309   : > { %v2848_v61 = vmax.f32 %v2816_v47, 0.0  ;;  %v2646_v22 = vadd.f32 %v2645_v51, %v2556_v13  ;;  %v8728_v30 = vor.u32 %v7175_v14, %v6393_v37  ;;  %v7159_v13 = vld [vmem:[#allocation2 + $0x7c] sm:$0xf] }
 0x30b   : > { %v2880_v21 = vpack.c.bf16 %v2848_v61, %v2848_v61  ;;  %v2917_v9 = vrot.slane %v2848_v61, 7  ;;  %v3013_v25 = vrot.slane %v2848_v61, 1  ;;  %v2735_v4 = vadd.f32 %v2734_v53, %v2646_v22  ;;  %3861 = vmatmul.bf16.gmra.mxu1 %v8728_v30  ;;  %v6335_v53 = vld [vmem:[#allocation2 + $0x84] sm:$0xf0] }
 0x30c   : > { %v8747_v14 = vor.u32 %v7159_v13, %v6335_v53  ;;  %v8751_v61 = vor.u32 %v7161_v0, %v6341_v60 }
 0x30d   : > { %v2933_v48 = vsel %vm390_vm1, %v2901_v29, %v2917_v9  ;;  %v2949_v43 = vsel %vm390_vm1, %v2917_v9, %v2901_v29  ;;  %v3029_v32 = vsel %vm491_vm2, %v2997_v63, %v3013_v25  ;;  %v3045_v15 = vsel %vm491_vm2, %v3013_v25, %v2997_v63  ;;  %3168 = vst [vmem:[#allocation2 + $0x118] sm:$0xf] %v2880_v21  ;;  %v2558_v24 = vpop.f32.mrf.mxu2 }
 0x30e   : > { %v2975_v20 = vsel %vm282_vm0, 0.0, %v2949_v43  ;;  %v3072_v57 = vsel %vm285_vm3, 0.0, %v3045_v15  ;;  %v3104_v10 = vpack.c.bf16 %v2933_v48, %v2933_v48  ;;  %v3199_v31 = vpack.c.bf16 %v3029_v32, %v3029_v32 }
 0x30f   : > { %v3103_v26 = vpack.c.bf16 %v2975_v20, %v2975_v20  ;;  %v3200_v33 = vpack.c.bf16 %v3072_v57, %v3072_v57  ;;  %v2781_v27 = vadd.f32 %v2735_v4, %v8450_v62  ;;  %v2739_v47 = vpop.f32.mrf.mxu0  ;;  %v1957_v62 = vadd.f32 %v9599_v40, %v8453_v58  ;;  %v6347_v40 = vld [vmem:[#allocation2 + $0x9c] sm:$0xf0] }
 0x310   : > { %3136 = vst [vmem:[#allocation2 + $0x114] sm:$0xf] %v3104_v10  ;;  %v2647_v54 = vpop.f32.mrf.mxu3  ;;  %v8744_v28 = vpop.f32.mrf.mxu1 }
 0x311   : > { %3135 = vst [vmem:[#allocation2 + $0x108] sm:$0xf] %v3103_v26  ;;  %v2817_v7 = vadd.f32 %v8682_v16, %v2781_v27  ;;  %v2648_v34 = vadd.f32 %v2647_v54, %v2558_v24 }
 0x312   : > { %3231 = vst [vmem:[#allocation2 + $0x110] sm:$0xf] %v3199_v31  ;;  %3925 = vmatmul.bf16.gmra.mxu2 %v8747_v14  ;;  %4263 = vmatmul.bf16.gmra.mxu0 %v8568_v59 }
 0x313   : > { %3232 = vst [vmem:[#allocation2 + $0x11c] sm:$0xf] %v3200_v33  ;;  %v2849_v51 = vmax.f32 %v2817_v7, 0.0  ;;  %v2737_v37 = vadd.f32 %v2736_v38, %v2648_v34 }
 0x315   : > { %v2881_v22 = vpack.c.bf16 %v2849_v51, %v2849_v51  ;;  %v2782_v29 = vadd.f32 %v2737_v37, %v1957_v62  ;;  %4014 = vmatmul.bf16.gmra.mxu3 %v8751_v61  ;;  %v2561_v21 = vpop.f32.mrf.mxu2  ;;  %v2902_v15 = vrot.slane %v2849_v51, 7  ;;  %v2998_v59 = vrot.slane %v2849_v51, 1  ;;  %v6353_v37 = vld [vmem:[#allocation2 + $0x98] sm:$0xf] }
 0x317   : > { %3169 = vst [vmem:[#allocation2 + $0x124] sm:$0xf] %v2881_v22  ;;  %v2818_v63 = vadd.f32 %v8682_v16, %v2782_v29  ;;  %v7178_v9 = vld [vmem:[#allocation2 + $0x110] sm:$0xf0]  ;;  %v2741_v43 = vpop.f32.mrf.mxu0  ;;  %v7164_v22 = vld [vmem:[#allocation2 + $0xa0] sm:$0xf0] }
 0x318   : > { %v2650_v25 = vpop.f32.mrf.mxu3  ;;  %v8757_v58 = vpop.f32.mrf.mxu1  ;;  %v6405_v4 = vld [vmem:[#allocation2 + $0x108] sm:$0xf] }
 0x319   : > { %v2850_v38 = vmax.f32 %v2818_v63, 0.0  ;;  %v2651_v48 = vadd.f32 %v2650_v25, %v2561_v21  ;;  %v8759_v32 = vor.u32 %v7178_v9, %v6405_v4  ;;  %v7162_v9 = vld [vmem:[#allocation2 + $0x94] sm:$0xf] }
 0x31a   : > { %v8778_v25 = vor.u32 %v7162_v9, %v6347_v40  ;;  %v9600_v4 = vld [vmem:[#allocation33_spill] sm:$0xff] }
 0x31b   : > { %v2882_v20 = vpack.c.bf16 %v2850_v38, %v2850_v38  ;;  %v2918_v57 = vrot.slane %v2850_v38, 7  ;;  %v3014_v10 = vrot.slane %v2850_v38, 1  ;;  %v2740_v31 = vadd.f32 %v2739_v47, %v2651_v48  ;;  %3866 = vmatmul.bf16.gmra.mxu1 %v8759_v32 }
 0x31d   : > { %v2934_v26 = vsel %vm390_vm1, %v2902_v15, %v2918_v57  ;;  %v2950_v33 = vsel %vm390_vm1, %v2918_v57, %v2902_v15  ;;  %v3030_v27 = vsel %vm491_vm2, %v2998_v59, %v3014_v10  ;;  %v3046_v24 = vsel %vm491_vm2, %v3014_v10, %v2998_v59  ;;  %3170 = vst [vmem:[#allocation2 + $0x130] sm:$0xf] %v2882_v20  ;;  %v2563_v13 = vpop.f32.mrf.mxu2 }
 0x31e   : > { %v2977_v53 = vsel %vm282_vm0, 0.0, %v2950_v33  ;;  %v3074_v54 = vsel %vm285_vm3, 0.0, %v3046_v24  ;;  %v3106_v60 = vpack.c.bf16 %v2934_v26, %v2934_v26  ;;  %v3201_v0 = vpack.c.bf16 %v3030_v27, %v3030_v27  ;;  %v7201_v26 = vld [vmem:[#allocation8 + $0x48] sm:$0xff] }
 0x31f   : > { %v3105_v7 = vpack.c.bf16 %v2977_v53, %v2977_v53  ;;  %v3202_v34 = vpack.c.bf16 %v3074_v54, %v3074_v54  ;;  %v2783_v47 = vadd.f32 %v2740_v31, %v8458_v45  ;;  %v2744_v21 = vpop.f32.mrf.mxu0  ;;  %v1962_v45 = vadd.f32 %v9600_v4, %v8461_v6  ;;  %4330 = vmatpush.bf16.msrb.mxu1 %v7201_v26 }
 0x320   : > { %3138 = vst [vmem:[#allocation2 + $0x12c] sm:$0xf] %v3106_v60  ;;  %v2652_v62 = vpop.f32.mrf.mxu3  ;;  %v8775_v51 = vpop.f32.mrf.mxu1  ;;  %v8782_v15 = vor.u32 %v7164_v22, %v6353_v37 }
 0x321   : > { %3137 = vst [vmem:[#allocation2 + $0x120] sm:$0xf] %v3105_v7  ;;  %v2819_v29 = vadd.f32 %v8682_v16, %v2783_v47  ;;  %v2653_v63 = vadd.f32 %v2652_v62, %v2563_v13 }
 0x322   : > { %3233 = vst [vmem:[#allocation2 + $0x128] sm:$0xf] %v3201_v0  ;;  %3930 = vmatmul.bf16.gmra.mxu2 %v8778_v25  ;;  %4268 = vmatmul.bf16.gmra.mxu0 %v8588_v49 }
 0x323   : > { %3234 = vst [vmem:[#allocation2 + $0x134] sm:$0xf] %v3202_v34  ;;  %v2851_v38 = vmax.f32 %v2819_v29, 0.0  ;;  %v2742_v48 = vadd.f32 %v2741_v43, %v2653_v63 }
 0x325   : > { %v2883_v59 = vpack.c.bf16 %v2851_v38, %v2851_v38  ;;  %v2784_v20 = vadd.f32 %v2742_v48, %v1962_v45  ;;  %4019 = vmatmul.bf16.gmra.mxu3 %v8782_v15  ;;  %v2566_v10 = vpop.f32.mrf.mxu2  ;;  %v2903_v49 = vrot.slane %v2851_v38, 7  ;;  %v2999_v60 = vrot.slane %v2851_v38, 1  ;;  %v6359_v48 = vld [vmem:[#allocation2 + $0xb4] sm:$0xf0] }
 0x327   : > { %3171 = vst [vmem:[#allocation2 + $0x13c] sm:$0xf] %v2883_v59  ;;  %v2820_v57 = vadd.f32 %v8682_v16, %v2784_v20  ;;  %v7181_v31 = vld [vmem:[#allocation2 + $0x128] sm:$0xf0]  ;;  %v2746_v53 = vpop.f32.mrf.mxu0 }
 0x328   : > { %v2655_v6 = vpop.f32.mrf.mxu3  ;;  %v8788_v33 = vpop.f32.mrf.mxu1  ;;  %v6417_v43 = vld [vmem:[#allocation2 + $0x120] sm:$0xf] }
 0x329   : > { %v2852_v27 = vmax.f32 %v2820_v57, 0.0  ;;  %v2656_v24 = vadd.f32 %v2655_v6, %v2566_v10  ;;  %v8790_v54 = vor.u32 %v7181_v31, %v6417_v43  ;;  %v6365_v57 = vld [vmem:[#allocation2 + $0xb0] sm:$0xf]  ;;  %v7167_v10 = vld [vmem:[#allocation2 + $0xb8] sm:$0xf0] }
 0x32a   : > { %v7165_v43 = vld [vmem:[#allocation2 + $0xac] sm:$0xf] }
 0x32b   : > { %v2884_v0 = vpack.c.bf16 %v2852_v27, %v2852_v27  ;;  %v2919_v7 = vrot.slane %v2852_v27, 7  ;;  %v3015_v34 = vrot.slane %v2852_v27, 1  ;;  %v2745_v47 = vadd.f32 %v2744_v21, %v2656_v24  ;;  %3871 = vmatmul.bf16.gmra.mxu1 %v8790_v54  ;;  %v9601_v24 = vld [vmem:[#allocation40_spill] sm:$0xff] }
 0x32c   : > { %v8809_v27 = vor.u32 %v7165_v43, %v6359_v48 }
 0x32d   : > { %v2935_v13 = vsel %vm390_vm1, %v2903_v49, %v2919_v7  ;;  %v2951_v40 = vsel %vm390_vm1, %v2919_v7, %v2903_v49  ;;  %v3031_v62 = vsel %vm491_vm2, %v2999_v60, %v3015_v34  ;;  %v3047_v37 = vsel %vm491_vm2, %v3015_v34, %v2999_v60  ;;  %3172 = vst [vmem:[#allocation2 + $0x148] sm:$0xf] %v2884_v0  ;;  %v2568_v38 = vpop.f32.mrf.mxu2 }
 0x32e   : > { %v2979_v22 = vsel %vm282_vm0, 0.0, %v2951_v40  ;;  %v3076_v29 = vsel %vm285_vm3, 0.0, %v3047_v37  ;;  %v3108_v63 = vpack.c.bf16 %v2935_v13, %v2935_v13  ;;  %v3203_v21 = vpack.c.bf16 %v3031_v62, %v3031_v62 }
 0x32f   : > { %v3107_v9 = vpack.c.bf16 %v2979_v22, %v2979_v22  ;;  %v3204_v4 = vpack.c.bf16 %v3076_v29, %v3076_v29  ;;  %v2785_v45 = vadd.f32 %v2745_v47, %v8466_v2  ;;  %v2749_v6 = vpop.f32.mrf.mxu0  ;;  %v1967_v2 = vadd.f32 %v9601_v24, %v8469_v55 }
 0x330   : > { %3140 = vst [vmem:[#allocation2 + $0x144] sm:$0xf] %v3108_v63  ;;  %v2657_v59 = vpop.f32.mrf.mxu3  ;;  %v8806_v20 = vpop.f32.mrf.mxu1  ;;  %v8813_v0 = vor.u32 %v7167_v10, %v6365_v57 }
 0x331   : > { %3139 = vst [vmem:[#allocation2 + $0x138] sm:$0xf] %v3107_v9  ;;  %v2821_v31 = vadd.f32 %v8682_v16, %v2785_v45  ;;  %v2658_v26 = vadd.f32 %v2657_v59, %v2568_v38 }
 0x332   : > { %3235 = vst [vmem:[#allocation2 + $0x140] sm:$0xf] %v3203_v21  ;;  %3935 = vmatmul.bf16.gmra.mxu2 %v8809_v27  ;;  %4273 = vmatmul.bf16.gmra.mxu0 %v8608_v23 }
 0x333   : > { %3236 = vst [vmem:[#allocation2 + $0x14c] sm:$0xf] %v3204_v4  ;;  %v2853_v49 = vmax.f32 %v2821_v31, 0.0  ;;  %v2747_v60 = vadd.f32 %v2746_v53, %v2658_v26 }
 0x335   : > { %v2885_v7 = vpack.c.bf16 %v2853_v49, %v2853_v49  ;;  %v2786_v34 = vadd.f32 %v2747_v60, %v1967_v2  ;;  %4024 = vmatmul.bf16.gmra.mxu3 %v8813_v0  ;;  %v2571_v13 = vpop.f32.mrf.mxu2  ;;  %v2904_v21 = vrot.slane %v2853_v49, 7  ;;  %v3000_v23 = vrot.slane %v2853_v49, 1 }
 0x337   : > { %3173 = vst [vmem:[#allocation2 + $0x154] sm:$0xf] %v2885_v7  ;;  %v2822_v47 = vadd.f32 %v8682_v16, %v2786_v34  ;;  %v7184_v40 = vld [vmem:[#allocation2 + $0x140] sm:$0xf0]  ;;  %v2751_v29 = vpop.f32.mrf.mxu0  ;;  %v6371_v7 = vld [vmem:[#allocation2 + $0xcc] sm:$0xf0] }
 0x338   : > { %v2660_v62 = vpop.f32.mrf.mxu3  ;;  %v8819_v55 = vpop.f32.mrf.mxu1  ;;  %v6429_v37 = vld [vmem:[#allocation2 + $0x138] sm:$0xf] }
 0x339   : > { %v2854_v53 = vmax.f32 %v2822_v47, 0.0  ;;  %v2661_v22 = vadd.f32 %v2660_v62, %v2571_v13  ;;  %v8821_v63 = vor.u32 %v7184_v40, %v6429_v37  ;;  %v6377_v13 = vld [vmem:[#allocation2 + $0xc8] sm:$0xf]  ;;  %v7170_v40 = vld [vmem:[#allocation2 + $0xd0] sm:$0xf0] }
 0x33b   : > { %v2886_v9 = vpack.c.bf16 %v2854_v53, %v2854_v53  ;;  %v2920_v4 = vrot.slane %v2854_v53, 7  ;;  %v3016_v45 = vrot.slane %v2854_v53, 1  ;;  %v2750_v38 = vadd.f32 %v2749_v6, %v2661_v22  ;;  %3876 = vmatmul.bf16.gmra.mxu1 %v8821_v63  ;;  %v7168_v22 = vld [vmem:[#allocation2 + $0xc4] sm:$0xf] }
 0x33d   : > { %v2936_v48 = vsel %vm390_vm1, %v2904_v21, %v2920_v4  ;;  %v2952_v59 = vsel %vm390_vm1, %v2920_v4, %v2904_v21  ;;  %v3032_v57 = vsel %vm491_vm2, %v3000_v23, %v3016_v45  ;;  %v3048_v10 = vsel %vm491_vm2, %v3016_v45, %v3000_v23  ;;  %3174 = vst [vmem:[#allocation2 + $0x160] sm:$0xf] %v2886_v9  ;;  %v2573_v60 = vpop.f32.mrf.mxu2  ;;  %v9602_v23 = vld [vmem:[#allocation39_spill] sm:$0xff] }
 0x33e   : > { %v2981_v31 = vsel %vm282_vm0, 0.0, %v2952_v59  ;;  %v3078_v26 = vsel %vm285_vm3, 0.0, %v3048_v10  ;;  %v3110_v6 = vpack.c.bf16 %v2936_v48, %v2936_v48  ;;  %v3205_v43 = vpack.c.bf16 %v3032_v57, %v3032_v57 }
 0x33f   : > { %v3109_v24 = vpack.c.bf16 %v2981_v31, %v2981_v31  ;;  %v3206_v2 = vpack.c.bf16 %v3078_v26, %v3078_v26  ;;  %v2787_v49 = vadd.f32 %v2750_v38, %v8472_v19  ;;  %v2754_v53 = vpop.f32.mrf.mxu0  ;;  %v8840_v21 = vor.u32 %v7168_v22, %v6371_v7  ;;  %v7200_v38 = vld [vmem:[#allocation8 + $0x40] sm:$0xff] }
 0x340   : > { %3142 = vst [vmem:[#allocation2 + $0x15c] sm:$0xf] %v3110_v6  ;;  %v2662_v34 = vpop.f32.mrf.mxu3  ;;  %v8837_v47 = vpop.f32.mrf.mxu1  ;;  %v1972_v19 = vadd.f32 %v9602_v23, %v8477_v50  ;;  %v8844_v45 = vor.u32 %v7170_v40, %v6377_v13  ;;  %4331 = vmatpush.bf16.msrb.mxu1 %v7200_v38 }
 0x341   : > { %3141 = vst [vmem:[#allocation2 + $0x150] sm:$0xf] %v3109_v24  ;;  %v2823_v62 = vadd.f32 %v8682_v16, %v2787_v49  ;;  %v2663_v37 = vadd.f32 %v2662_v34, %v2573_v60 }
 0x342   : > { %3237 = vst [vmem:[#allocation2 + $0x158] sm:$0xf] %v3205_v43  ;;  %3940 = vmatmul.bf16.gmra.mxu2 %v8840_v21  ;;  %4278 = vmatmul.bf16.gmra.mxu0 %v8634_v8 }
 0x343   : > { %3238 = vst [vmem:[#allocation2 + $0x164] sm:$0xf] %v3206_v2  ;;  %v2855_v9 = vmax.f32 %v2823_v62, 0.0  ;;  %v2752_v4 = vadd.f32 %v2751_v29, %v2663_v37 }
 0x345   : > { %v2887_v48 = vpack.c.bf16 %v2855_v9, %v2855_v9  ;;  %v2788_v59 = vadd.f32 %v2752_v4, %v1972_v19  ;;  %4029 = vmatmul.bf16.gmra.mxu3 %v8844_v45  ;;  %v2576_v10 = vpop.f32.mrf.mxu2  ;;  %v2905_v8 = vrot.slane %v2855_v9, 7  ;;  %v3001_v49 = vrot.slane %v2855_v9, 1 }
 0x347   : > { %3175 = vst [vmem:[#allocation2 + $0x16c] sm:$0xf] %v2887_v48  ;;  %v2824_v57 = vadd.f32 %v8682_v16, %v2788_v59  ;;  %v7187_v50 = vld [vmem:[#allocation2 + $0x158] sm:$0xf0]  ;;  %v2756_v24 = vpop.f32.mrf.mxu0 }
 0x348   : > { %v2665_v31 = vpop.f32.mrf.mxu3  ;;  %v8850_v26 = vpop.f32.mrf.mxu1  ;;  %v6441_v29 = vld [vmem:[#allocation2 + $0x150] sm:$0xf]  ;;  %v9603_v48 = vld [vmem:[#allocation46_spill] sm:$0xff] }
 0x349   : > { %v2856_v6 = vmax.f32 %v2824_v57, 0.0  ;;  %v2666_v43 = vadd.f32 %v2665_v31, %v2576_v10  ;;  %v8852_v2 = vor.u32 %v7187_v50, %v6441_v29  ;;  %v6383_v10 = vld [vmem:[#allocation2 + $0xe4] sm:$0xf0]  ;;  %v6389_v29 = vld [vmem:[#allocation2 + $0xe0] sm:$0xf] }
 0x34b   : > { %v2888_v60 = vpack.c.bf16 %v2856_v6, %v2856_v6  ;;  %v2921_v7 = vrot.slane %v2856_v6, 7  ;;  %v3017_v34 = vrot.slane %v2856_v6, 1  ;;  %v2755_v13 = vadd.f32 %v2754_v53, %v2666_v43  ;;  %3881 = vmatmul.bf16.gmra.mxu1 %v8852_v2  ;;  %v7173_v6 = vld [vmem:[#allocation2 + $0xe8] sm:$0xf0] }
 0x34d   : > { %v2937_v40 = vsel %vm390_vm1, %v2905_v8, %v2921_v7  ;;  %v2953_v62 = vsel %vm390_vm1, %v2921_v7, %v2905_v8  ;;  %v3033_v37 = vsel %vm491_vm2, %v3001_v49, %v3017_v34  ;;  %v3049_v22 = vsel %vm491_vm2, %v3017_v34, %v3001_v49  ;;  %3176 = vst [vmem:[#allocation2 + $0x178] sm:$0xf] %v2888_v60  ;;  %v2578_v57 = vpop.f32.mrf.mxu2  ;;  %v7171_v60 = vld [vmem:[#allocation2 + $0xdc] sm:$0xf]  ;;  %v7298_v34 = vld [vmem:[#allocation8 + $0x1b8] sm:$0xff] }
 0x34e   : > { %v2983_v23 = vsel %vm282_vm0, 0.0, %v2953_v62  ;;  %v3080_v53 = vsel %vm285_vm3, 0.0, %v3049_v22  ;;  %v3112_v19 = vpack.c.bf16 %v2937_v40, %v2937_v40  ;;  %v3207_v9 = vpack.c.bf16 %v3033_v37, %v3033_v37  ;;  %v9604_v40 = vld [vmem:[#allocation45_spill] sm:$0xff]  ;;  %5015 = vmatpush.bf16.msra.mxu3 %v7298_v34  ;;  %v7314_v34 = vld [vmem:[#allocation8 + $0x238] sm:$0xff] }
 0x34f   : > { %v3111_v4 = vpack.c.bf16 %v2983_v23, %v2983_v23  ;;  %v3208_v38 = vpack.c.bf16 %v3080_v53, %v3080_v53  ;;  %v2789_v59 = vadd.f32 %v2755_v13, %v9603_v48  ;;  %v4244_v49 = vpop.f32.mrf.mxu0  ;;  %v8871_v7 = vor.u32 %v7171_v60, %v6383_v10  ;;  %5193 = vmatpush.bf16.msra.mxu1 %v7314_v34 }
 0x350   : > { %3144 = vst [vmem:[#allocation2 + $0x174] sm:$0xf] %v3112_v19  ;;  %v2667_v50 = vpop.f32.mrf.mxu3  ;;  %v8868_v31 = vpop.f32.mrf.mxu1  ;;  %v1977_v13 = vadd.f32 %v8677_v11, %v9604_v40  ;;  %v8875_v22 = vor.u32 %v7173_v6, %v6389_v29  ;;  %v7215_v19 = vld [vmem:[#allocation8 + $0xb8] sm:$0xff] }
 0x351   : > { %3143 = vst [vmem:[#allocation2 + $0x168] sm:$0xf] %v3111_v4  ;;  %v2825_v43 = vadd.f32 %v8682_v16, %v2789_v59  ;;  %v2668_v8 = vadd.f32 %v2667_v50, %v2578_v57  ;;  %4413 = vmatpush.bf16.msra.mxu2 %v7215_v19  ;;  %v7306_v6 = vld [vmem:[#allocation8 + $0x1f8] sm:$0xff] }
 0x352   : > { %3239 = vst [vmem:[#allocation2 + $0x170] sm:$0xf] %v3207_v9  ;;  %3945 = vmatmul.bf16.gmra.mxu2 %v8871_v7  ;;  %4283 = vmatmul.bf16.gmra.mxu0 %v8661_v39 }
 0x353   : > { %3240 = vst [vmem:[#allocation2 + $0x17c] sm:$0xf] %v3208_v38  ;;  %v2857_v62 = vmax.f32 %v2825_v43, 0.0  ;;  %v2757_v37 = vadd.f32 %v2756_v24, %v2668_v8  ;;  %5104 = vmatpush.bf16.msra.mxu0 %v7306_v6  ;;  %v7174_v6 = vld [vmem:[#allocation2 + $0xf4] sm:$0xf] }
 0x354   : > { %9605 = vst [vmem:[#allocation52_spill] sm:$0xff] %v8875_v22 }
 0x355   : > { %v2889_v23 = vpack.c.bf16 %v2857_v62, %v2857_v62  ;;  %v2790_v53 = vadd.f32 %v2757_v37, %v1977_v13  ;;  %4034 = vmatmul.bf16.gmra.mxu3 %v8875_v22  ;;  %v3906_v4 = vpop.f32.mrf.mxu2  ;;  %v2906_v50 = vrot.slane %v2857_v62, 7  ;;  %v3002_v43 = vrot.slane %v2857_v62, 1 }
 0x356   : > { %v3907_v24 = vadd.f32 %v3906_v4, %v8695_v52 }
 0x357   : > { %3177 = vst [vmem:[#allocation2 + $0x184] sm:$0xf] %v2889_v23  ;;  %v2826_v9 = vadd.f32 %v8682_v16, %v2790_v53  ;;  %v7190_v11 = vld [vmem:[#allocation2 + $0x170] sm:$0xf0]  ;;  %v4246_v39 = vpop.f32.mrf.mxu0 }
 0x358   : > { %v8881_v38 = vpop.f32.mrf.mxu1  ;;  %v3995_v48 = vpop.f32.mrf.mxu3  ;;  %v6453_v59 = vld [vmem:[#allocation2 + $0x168] sm:$0xf] }
 0x359   : > { %v2858_v57 = vmax.f32 %v2826_v9, 0.0  ;;  %v8884_v10 = vor.u32 %v7190_v11, %v6453_v59  ;;  %v3996_v29 = vadd.f32 %v3995_v48, %v3907_v24  ;;  %v6395_v24 = vld [vmem:[#allocation2 + $0xfc] sm:$0xf0] }
 0x35b   : > { %v2890_v8 = vpack.c.bf16 %v2858_v57, %v2858_v57  ;;  %v2922_v60 = vrot.slane %v2858_v57, 7  ;;  %v3018_v16 = vrot.slane %v2858_v57, 1  ;;  %3886 = vmatmul.bf16.gmra.mxu1 %v8884_v10  ;;  %v8887_v40 = vadd.f32 %v4244_v49, %v3996_v29  ;;  %v7176_v29 = vld [vmem:[#allocation2 + $0x100] sm:$0xf0] }
 0x35d   : > { %v2938_v52 = vsel %vm390_vm1, %v2906_v50, %v2922_v60  ;;  %v2954_v13 = vsel %vm390_vm1, %v2922_v60, %v2906_v50  ;;  %v3034_v37 = vsel %vm491_vm2, %v3002_v43, %v3018_v16  ;;  %v3050_v62 = vsel %vm491_vm2, %v3018_v16, %v3002_v43  ;;  %3178 = vst [vmem:[#allocation2 + $0x190] sm:$0xf] %v2890_v8  ;;  %v3908_v11 = vpop.f32.mrf.mxu2  ;;  %v6401_v50 = vld [vmem:[#allocation2 + $0xf8] sm:$0xf] }
 0x35e   : > { %v2985_v23 = vsel %vm282_vm0, 0.0, %v2954_v13  ;;  %v3082_v49 = vsel %vm285_vm3, 0.0, %v3050_v62  ;;  %v3114_v53 = vpack.c.bf16 %v2938_v52, %v2938_v52  ;;  %v3209_v19 = vpack.c.bf16 %v3034_v37, %v3034_v37 }
 0x35f   : > { %v3113_v9 = vpack.c.bf16 %v2985_v23, %v2985_v23  ;;  %v3210_v4 = vpack.c.bf16 %v3082_v49, %v3082_v49  ;;  %v3909_v59 = vadd.f32 %v3908_v11, %v8713_v42  ;;  %v4249_v5 = vpop.f32.mrf.mxu0  ;;  %v8904_v43 = vor.u32 %v7174_v6, %v6395_v24  ;;  %v6413_v11 = vld [vmem:[#allocation2 + $0x110] sm:$0xf]  ;;  %v7179_v24 = vld [vmem:[#allocation2 + $0x118] sm:$0xf0] }
 0x360   : > { %3146 = vst [vmem:[#allocation2 + $0x18c] sm:$0xf] %v3114_v53  ;;  %v8901_v48 = vpop.f32.mrf.mxu1  ;;  %v3997_v57 = vpop.f32.mrf.mxu3  ;;  %v8906_v8 = vor.u32 %v7176_v29, %v6401_v50  ;;  %v7297_v29 = vld [vmem:[#allocation8 + $0x1b0] sm:$0xff]  ;;  %v8923_v6 = vor.u32 %v7179_v24, %v6413_v11 }
 0x361   : > { %3145 = vst [vmem:[#allocation2 + $0x180] sm:$0xf] %v3113_v9  ;;  %v3998_v36 = vadd.f32 %v3997_v57, %v3909_v59  ;;  %v7177_v57 = vld [vmem:[#allocation2 + $0x10c] sm:$0xf]  ;;  %5016 = vmatpush.bf16.msra.mxu3 %v7297_v29  ;;  %v7182_v29 = vld [vmem:[#allocation2 + $0x130] sm:$0xf0] }
 0x362   : > { %3241 = vst [vmem:[#allocation2 + $0x188] sm:$0xf] %v3209_v19  ;;  %3950 = vmatmul.bf16.gmra.mxu2 %v8904_v43  ;;  %4288 = vmatmul.bf16.gmra.mxu0 %v8697_v1  ;;  %v6407_v1 = vld [vmem:[#allocation2 + $0x114] sm:$0xf0] }
 0x363   : > { %3242 = vst [vmem:[#allocation2 + $0x194] sm:$0xf] %v3210_v4  ;;  %v8910_v60 = vadd.f32 %v4246_v39, %v3998_v36  ;;  %v8921_v50 = vor.u32 %v7177_v57, %v6407_v1  ;;  %v6575_v36 = vld [vmem:[#allocation2 + $0xc] sm:$0xf0]  ;;  %v7305_v1 = vld [vmem:[#allocation8 + $0x1f0] sm:$0xff] }
 0x364   : > { %9606 = vst [vmem:[#allocation51_spill] sm:$0xff] %v8906_v8  ;;  %5105 = vmatpush.bf16.msra.mxu0 %v7305_v1 }
 0x365   : > { %4039 = vmatmul.bf16.gmra.mxu3 %v8906_v8  ;;  %v3911_v42 = vpop.f32.mrf.mxu2  ;;  %9607 = vst [vmem:[#allocation54_spill] sm:$0xff] %v8923_v6  ;;  %v7189_v8 = vld [vmem:[#allocation2 + $0x16c] sm:$0xf] }
 0x366   : > { %v3912_v52 = vadd.f32 %v3911_v42, %v8726_v3 }
 0x367   : > { %v7217_v16 = vld [vmem:[#allocation2 + $0x188] sm:$0xf0]  ;;  %v4251_v62 = vpop.f32.mrf.mxu0 }
 0x368   : > { %v8913_v34 = vpop.f32.mrf.mxu1  ;;  %v4000_v13 = vpop.f32.mrf.mxu3  ;;  %v6465_v37 = vld [vmem:[#allocation2 + $0x180] sm:$0xf] }
 0x369   : > { %v6466_v23 = vor.u32 %v7217_v16, %v6465_v37  ;;  %v4001_v49 = vadd.f32 %v4000_v13, %v3912_v52 }
 0x36b   : > { %3891 = vmatmul.bf16.gmra.mxu1 %v6466_v23  ;;  %v8916_v53 = vadd.f32 %v4249_v5, %v4001_v49  ;;  %v7144_v5 = vld [vmem:[#allocation2 + $0x4] sm:$0xf] }
 0x36c   : > { %v6578_v52 = vor.u32 %v7144_v5, %v6575_v36  ;;  %v7180_v5 = vld [vmem:[#allocation2 + $0x124] sm:$0xf] }
 0x36d   : > { %v3913_v19 = vpop.f32.mrf.mxu2 }
 0x36e   : > { %v3914_v9 = vadd.f32 %v3913_v19, %v8744_v28  ;;  %v7214_v28 = vld [vmem:[#allocation8 + $0xb0] sm:$0xff] }
 0x36f   : > { %v4254_v59 = vpop.f32.mrf.mxu0  ;;  %4414 = vmatpush.bf16.msra.mxu2 %v7214_v28 }
 0x370   : > { %v8918_v39 = vpop.f32.mrf.mxu1  ;;  %v4002_v4 = vpop.f32.mrf.mxu3 }
 0x371   : > { %v4003_v3 = vadd.f32 %v4002_v4, %v3914_v9  ;;  %v6419_v4 = vld [vmem:[#allocation2 + $0x12c] sm:$0xf0] }
 0x372   : > { %3955 = vmatmul.bf16.gmra.mxu2 %v8921_v50  ;;  %4293 = vmatmul.bf16.gmra.mxu0 %v8728_v30  ;;  %v7313_v30 = vld [vmem:[#allocation8 + $0x230] sm:$0xff]  ;;  %v8938_v28 = vor.u32 %v7180_v5, %v6419_v4  ;;  %v6431_v4 = vld [vmem:[#allocation2 + $0x144] sm:$0xf0]  ;;  %v7183_v5 = vld [vmem:[#allocation2 + $0x13c] sm:$0xf] }
 0x373   : > { %v8927_v42 = vadd.f32 %v4251_v62, %v4003_v3  ;;  %5194 = vmatpush.bf16.msra.mxu1 %v7313_v30  ;;  %v6425_v3 = vld [vmem:[#allocation2 + $0x128] sm:$0xf] }
 0x375   : > { %4044 = vmatmul.bf16.gmra.mxu3 %v8923_v6  ;;  %v3916_v16 = vpop.f32.mrf.mxu2 }
 0x376   : > { %v3917_v37 = vadd.f32 %v3916_v16, %v8757_v58  ;;  %v8940_v16 = vor.u32 %v7182_v29, %v6425_v3  ;;  %v7185_v3 = vld [vmem:[#allocation2 + $0x148] sm:$0xf0] }
 0x377   : > { %v4256_v49 = vpop.f32.mrf.mxu0 }
 0x378   : > { %v8930_v13 = vpop.f32.mrf.mxu1  ;;  %v4005_v23 = vpop.f32.mrf.mxu3  ;;  %9608 = vst [vmem:[#allocation53_spill] sm:$0xff] %v8940_v16 }
 0x379   : > { %v4006_v19 = vadd.f32 %v4005_v23, %v3917_v37 }
 0x37b   : > { %4332 = vmatmul.bf16.vlgmr.msrb.gmra.mxu1 %v6578_v52  ;;  %v8933_v62 = vadd.f32 %v4254_v59, %v4006_v19 }
 0x37d   : > { %v3918_v9 = vpop.f32.mrf.mxu2 }
 0x37e   : > { %v3919_v24 = vadd.f32 %v3918_v9, %v8775_v51 }
 0x37f   : > { %v4259_v58 = vpop.f32.mrf.mxu0 }
 0x380   : > { %v8935_v11 = vpop.f32.mrf.mxu1  ;;  %v4007_v57 = vpop.f32.mrf.mxu3 }
 0x381   : > { %v4008_v36 = vadd.f32 %v4007_v57, %v3919_v24  ;;  %v6437_v57 = vld [vmem:[#allocation2 + $0x140] sm:$0xf] }
 0x382   : > { %3960 = vmatmul.bf16.gmra.mxu2 %v8938_v28  ;;  %4298 = vmatmul.bf16.gmra.mxu0 %v8759_v32 }
 0x383   : > { %v8944_v59 = vadd.f32 %v4256_v49, %v4008_v36 }
 0x385   : > { %4049 = vmatmul.bf16.gmra.mxu3 %v8940_v16  ;;  %v3921_v52 = vpop.f32.mrf.mxu2  ;;  %v7295_v16 = vld [vmem:[#allocation8 + $0x1a0] sm:$0xff] }
 0x386   : > { %v3922_v37 = vadd.f32 %v3921_v52, %v8788_v33  ;;  %v8956_v33 = vor.u32 %v7183_v5, %v6431_v4  ;;  %v7296_v52 = vld [vmem:[#allocation8 + $0x1a8] sm:$0xff] }
 0x387   : > { %v4261_v19 = vpop.f32.mrf.mxu0  ;;  %5017 = vmatpush.bf16.msra.mxu3 %v7296_v52 }
 0x388   : > { %v8947_v51 = vpop.f32.mrf.mxu1  ;;  %v4010_v23 = vpop.f32.mrf.mxu3 }
 0x389   : > { %v4011_v1 = vadd.f32 %v4010_v23, %v3922_v37  ;;  %v8958_v37 = vor.u32 %v7185_v3, %v6437_v57  ;;  %v7312_v57 = vld [vmem:[#allocation8 + $0x228] sm:$0xff]  ;;  %v6443_v3 = vld [vmem:[#allocation2 + $0x15c] sm:$0xf0] }
 0x38a   : > { %5195 = vmatpush.bf16.msra.mxu1 %v7312_v57  ;;  %v7294_v57 = vld [vmem:[#allocation8 + $0x198] sm:$0xff] }
 0x38b   : > { %4337 = vmatmul.bf16.gmra.mxu1 %v8625_v35  ;;  %v8951_v30 = vadd.f32 %v4259_v58, %v4011_v1  ;;  %9609 = vst [vmem:[#allocation34_spill] sm:$0xff] %v8958_v37  ;;  %5018 = vmatpush.bf16.msra.mxu3 %v7295_v16 }
 0x38d   : > { %v3923_v9 = vpop.f32.mrf.mxu2 }
 0x38e   : > { %v3924_v32 = vadd.f32 %v3923_v9, %v8806_v20  ;;  %v7213_v20 = vld [vmem:[#allocation8 + $0xa8] sm:$0xff] }
 0x38f   : > { %v4264_v29 = vpop.f32.mrf.mxu0  ;;  %4415 = vmatpush.bf16.msra.mxu2 %v7213_v20  ;;  %v6449_v20 = vld [vmem:[#allocation2 + $0x158] sm:$0xf]  ;;  %5019 = vmatpush.bf16.msra.mxu3 %v7294_v57 }
 0x390   : > { %v8953_v24 = vpop.f32.mrf.mxu1  ;;  %v4012_v49 = vpop.f32.mrf.mxu3 }
 0x391   : > { %v4013_v36 = vadd.f32 %v4012_v49, %v3924_v32  ;;  %v7304_v49 = vld [vmem:[#allocation8 + $0x1e8] sm:$0xff] }
 0x392   : > { %3965 = vmatmul.bf16.gmra.mxu2 %v8956_v33  ;;  %4303 = vmatmul.bf16.gmra.mxu0 %v8790_v54 }
 0x393   : > { %v8962_v35 = vadd.f32 %v4261_v19, %v4013_v36  ;;  %5106 = vmatpush.bf16.msra.mxu0 %v7304_v49  ;;  %v7303_v49 = vld [vmem:[#allocation8 + $0x1e0] sm:$0xff] }
 0x395   : > { %4054 = vmatmul.bf16.gmra.mxu3 %v8958_v37  ;;  %v3926_v58 = vpop.f32.mrf.mxu2  ;;  %v7186_v37 = vld [vmem:[#allocation2 + $0x154] sm:$0xf] }
 0x396   : > { %v3927_v1 = vadd.f32 %v3926_v58, %v8819_v55  ;;  %v7188_v55 = vld [vmem:[#allocation2 + $0x160] sm:$0xf0] }
 0x397   : > { %v4266_v4 = vpop.f32.mrf.mxu0  ;;  %5107 = vmatpush.bf16.msra.mxu0 %v7303_v49  ;;  %v7292_v49 = vld [vmem:[#allocation8 + $0x188] sm:$0xff] }
 0x398   : > { %v8965_v23 = vpop.f32.mrf.mxu1  ;;  %v4015_v9 = vpop.f32.mrf.mxu3 }
 0x399   : > { %v4016_v32 = vadd.f32 %v4015_v9, %v3927_v1  ;;  %v8974_v9 = vor.u32 %v7186_v37, %v6443_v3  ;;  %v7302_v37 = vld [vmem:[#allocation8 + $0x1d8] sm:$0xff] }
 0x39b   : > { %4342 = vmatmul.bf16.gmra.mxu1 %v8651_v18  ;;  %v8969_v54 = vadd.f32 %v4264_v29, %v4016_v32  ;;  %v7212_v18 = vld [vmem:[#allocation8 + $0xa0] sm:$0xff]  ;;  %v8976_v29 = vor.u32 %v7188_v55, %v6449_v20  ;;  %5108 = vmatpush.bf16.msra.mxu0 %v7302_v37 }
 0x39c   : > { %4416 = vmatpush.bf16.msra.mxu2 %v7212_v18  ;;  %v7209_v18 = vld [vmem:[#allocation8 + $0x88] sm:$0xff]  ;;  %v6461_v37 = vld [vmem:[#allocation2 + $0x170] sm:$0xf] }
 0x39d   : > { %v3928_v19 = vpop.f32.mrf.mxu2  ;;  %9610 = vst [vmem:[#allocation33_spill] sm:$0xff] %v8976_v29 }
 0x39e   : > { %v3929_v36 = vadd.f32 %v3928_v19, %v8837_v47  ;;  %v7211_v47 = vld [vmem:[#allocation8 + $0x98] sm:$0xff] }
 0x39f   : > { %v4269_v58 = vpop.f32.mrf.mxu0 }
 0x3a0   : > { %v8971_v5 = vpop.f32.mrf.mxu1  ;;  %v4017_v52 = vpop.f32.mrf.mxu3  ;;  %4417 = vmatpush.bf16.msra.mxu2 %v7211_v47 }
 0x3a1   : > { %v4018_v1 = vadd.f32 %v4017_v52, %v3929_v36 }
 0x3a2   : > { %3970 = vmatmul.bf16.gmra.mxu2 %v8974_v9  ;;  %4308 = vmatmul.bf16.gmra.mxu0 %v8821_v63  ;;  %v7210_v63 = vld [vmem:[#allocation8 + $0x90] sm:$0xff] }
 0x3a3   : > { %v8980_v32 = vadd.f32 %v4266_v4, %v4018_v1  ;;  %v7293_v4 = vld [vmem:[#allocation8 + $0x190] sm:$0xff] }
 0x3a4   : > { %v7301_v1 = vld [vmem:[#allocation8 + $0x1d0] sm:$0xff]  ;;  %4418 = vmatpush.bf16.msra.mxu2 %v7210_v63  ;;  %5020 = vmatpush.bf16.msra.mxu3 %v7293_v4  ;;  %v7291_v63 = vld [vmem:[#allocation8 + $0x180] sm:$0xff] }
 0x3a5   : > { %4059 = vmatmul.bf16.gmra.mxu3 %v8976_v29  ;;  %v3931_v19 = vpop.f32.mrf.mxu2  ;;  %5109 = vmatpush.bf16.msra.mxu0 %v7301_v1  ;;  %v7300_v29 = vld [vmem:[#allocation8 + $0x1c8] sm:$0xff]  ;;  %v7299_v4 = vld [vmem:[#allocation8 + $0x1c0] sm:$0xff] }
 0x3a6   : > { %v3932_v36 = vadd.f32 %v3931_v19, %v8850_v26  ;;  %v6455_v19 = vld [vmem:[#allocation2 + $0x174] sm:$0xf0] }
 0x3a7   : > { %v4271_v20 = vpop.f32.mrf.mxu0 }
 0x3a8   : > { %v8983_v3 = vpop.f32.mrf.mxu1  ;;  %v4020_v52 = vpop.f32.mrf.mxu3  ;;  %4419 = vmatpush.bf16.msra.mxu2 %v7209_v18  ;;  %5021 = vmatpush.bf16.msra.mxu3 %v7292_v49 }
 0x3a9   : > { %v4021_v55 = vadd.f32 %v4020_v52, %v3932_v36  ;;  %v7191_v36 = vld [vmem:[#allocation2 + $0x178] sm:$0xf0]  ;;  %5110 = vmatpush.bf16.msra.mxu0 %v7300_v29 }
 0x3aa   : > { %v8994_v1 = vor.u32 %v7191_v36, %v6461_v37 }
 0x3ab   : > { %4347 = vmatmul.bf16.gmra.mxu1 %v8685_v17  ;;  %v8987_v16 = vadd.f32 %v4269_v58, %v4021_v55  ;;  %v8992_v58 = vor.u32 %v7189_v8, %v6455_v19  ;;  %v7208_v55 = vld [vmem:[#allocation8 + $0x80] sm:$0xff] }
 0x3ac   : > { %9612 = vst [vmem:[#allocation39_spill] sm:$0xff] %v8994_v1  ;;  %4420 = vmatpush.bf16.msra.mxu2 %v7208_v55  ;;  %5022 = vmatpush.bf16.msra.mxu3 %v7291_v63  ;;  %v6473_v55 = vld [vmem:[#allocation2 + $0x188] sm:$0xf]  ;;  %v7218_v63 = vld [vmem:[#allocation2 + $0x190] sm:$0xf0] }
 0x3ad   : > { %v3933_v26 = vpop.f32.mrf.mxu2  ;;  %9611 = vst [vmem:[#allocation40_spill] sm:$0xff] %v8992_v58  ;;  %5111 = vmatpush.bf16.msra.mxu0 %v7299_v4 }
 0x3ae   : > { %v3934_v47 = vadd.f32 %v3933_v26, %v8868_v31 }
 0x3af   : > { %v4274_v52 = vpop.f32.mrf.mxu0 }
 0x3b0   : > { %v8989_v6 = vpop.f32.mrf.mxu1  ;;  %v4022_v57 = vpop.f32.mrf.mxu3 }
 0x3b1   : > { %v4023_v17 = vadd.f32 %v4022_v57, %v3934_v47  ;;  %v7311_v47 = vld [vmem:[#allocation8 + $0x220] sm:$0xff] }
 0x3b2   : > { %3975 = vmatmul.bf16.gmra.mxu2 %v8992_v58  ;;  %4313 = vmatmul.bf16.gmra.mxu0 %v8852_v2 }
 0x3b3   : > { %v8998_v31 = vadd.f32 %v4271_v20, %v4023_v17  ;;  %5196 = vmatpush.bf16.msra.mxu1 %v7311_v47  ;;  %v6467_v20 = vld [vmem:[#allocation2 + $0x18c] sm:$0xf0] }
 0x3b5   : > { %4064 = vmatmul.bf16.gmra.mxu3 %v8994_v1  ;;  %v3936_v8 = vpop.f32.mrf.mxu2 }
 0x3b6   : > { %v3937_v29 = vadd.f32 %v3936_v8, %v8881_v38  ;;  %v7216_v38 = vld [vmem:[#allocation2 + $0x184] sm:$0xf] }
 0x3b7   : > { %v4276_v26 = vpop.f32.mrf.mxu0  ;;  %v6470_v1 = vor.u32 %v7216_v38, %v6467_v20  ;;  %v6581_v20 = vld [vmem:[#allocation2 + $0x8] sm:$0xf]  ;;  %v6681_v38 = vld [vmem:[#allocation2 + $0x30] sm:$0xf] }
 0x3b8   : > { %v9001_v18 = vpop.f32.mrf.mxu1  ;;  %v4025_v49 = vpop.f32.mrf.mxu3 }
 0x3b9   : > { %v4026_v19 = vadd.f32 %v4025_v49, %v3937_v29  ;;  %v6474_v29 = vor.u32 %v7218_v63, %v6473_v55 }
 0x3bb   : > { %4352 = vmatmul.bf16.gmra.mxu1 %v8716_v44  ;;  %v9005_v57 = vadd.f32 %v4274_v52, %v4026_v19 }
 0x3bd   : > { %v3938_v2 = vpop.f32.mrf.mxu2 }
 0x3be   : > { %v3939_v36 = vadd.f32 %v3938_v2, %v8901_v48 }
 0x3bf   : > { %v4279_v4 = vpop.f32.mrf.mxu0 }
 0x3c0   : > { %v9007_v37 = vpop.f32.mrf.mxu1  ;;  %v4027_v17 = vpop.f32.mrf.mxu3 }
 0x3c1   : > { %v4028_v8 = vadd.f32 %v4027_v17, %v3939_v36  ;;  %v7146_v36 = vld [vmem:[#allocation2 + $0x10] sm:$0xf0]  ;;  %v6683_v17 = vld [vmem:[#allocation2 + $0x3c] sm:$0xf0] }
 0x3c2   : > { %3980 = vmatmul.bf16.gmra.mxu2 %v6470_v1  ;;  %4318 = vmatmul.bf16.gmra.mxu0 %v8884_v10  ;;  %v6582_v63 = vor.u32 %v7146_v36, %v6581_v20  ;;  %v7310_v36 = vld [vmem:[#allocation8 + $0x218] sm:$0xff] }
 0x3c3   : > { %v9011_v44 = vadd.f32 %v4276_v26, %v4028_v8  ;;  %v7244_v8 = vld [vmem:[#allocation2 + $0x38] sm:$0xf0]  ;;  %5197 = vmatpush.bf16.msra.mxu1 %v7310_v36 }
 0x3c5   : > { %4069 = vmatmul.bf16.gmra.mxu3 %v6474_v29  ;;  %v3941_v52 = vpop.f32.mrf.mxu2  ;;  %v7243_v29 = vld [vmem:[#allocation2 + $0x34] sm:$0xf] }
 0x3c6   : > { %v3942_v19 = vadd.f32 %v3941_v52, %v8913_v34 }
 0x3c7   : > { %v4281_v47 = vpop.f32.mrf.mxu0 }
 0x3c8   : > { %v9013_v49 = vpop.f32.mrf.mxu1  ;;  %v4030_v48 = vpop.f32.mrf.mxu3 }
 0x3c9   : > { %v4031_v2 = vadd.f32 %v4030_v48, %v3942_v19  ;;  %v6686_v19 = vor.u32 %v7243_v29, %v6683_v17  ;;  %v6682_v48 = vor.u32 %v7244_v8, %v6681_v38  ;;  %v6693_v38 = vld [vmem:[#allocation2 + $0x48] sm:$0xf]  ;;  %v7247_v8 = vld [vmem:[#allocation2 + $0x50] sm:$0xf0] }
 0x3cb   : > { %4357 = vmatmul.bf16.gmra.mxu1 %v8747_v14  ;;  %v9017_v58 = vadd.f32 %v4279_v4, %v4031_v2 }
 0x3cd   : > { %9613 = vst [vmem:[#allocation46_spill] sm:$0xff] %v9017_v58  ;;  %v3943_v1 = vpop.f32.mrf.mxu2 }
 0x3ce   : > { %v3944_v26 = vadd.f32 %v3943_v1, %v8918_v39 }
 0x3cf   : > { %v4284_v34 = vpop.f32.mrf.mxu0 }
 0x3d0   : > { %v9019_v10 = vpop.f32.mrf.mxu1  ;;  %v4032_v55 = vpop.f32.mrf.mxu3 }
 0x3d1   : > { %v4033_v52 = vadd.f32 %v4032_v55, %v3944_v26  ;;  %v6695_v26 = vld [vmem:[#allocation2 + $0x54] sm:$0xf0] }
 0x3d2   : > { %4421 = vmatmul.bf16.vlgmr.msra.gmra.mxu2 %v6582_v63  ;;  %5112 = vmatmul.bf16.vlgmr.msra.gmra.mxu0 %v6686_v19 }
 0x3d3   : > { %v9022_v14 = vadd.f32 %v4281_v47, %v4033_v52 }
 0x3d5   : > { %5023 = vmatmul.bf16.vlgmr.msra.gmra.mxu3 %v6682_v48  ;;  %v3946_v4 = vpop.f32.mrf.mxu2 }
 0x3d6   : > { %v3947_v58 = vadd.f32 %v3946_v4, %v8930_v13  ;;  %v7246_v13 = vld [vmem:[#allocation2 + $0x4c] sm:$0xf] }
 0x3d7   : > { %v4286_v1 = vpop.f32.mrf.mxu0  ;;  %v6698_v19 = vor.u32 %v7246_v13, %v6695_v26  ;;  %v6707_v26 = vld [vmem:[#allocation2 + $0x6c] sm:$0xf0]  ;;  %v7249_v13 = vld [vmem:[#allocation2 + $0x64] sm:$0xf] }
 0x3d8   : > { %v9024_v2 = vpop.f32.mrf.mxu1  ;;  %v4035_v39 = vpop.f32.mrf.mxu3 }
 0x3d9   : > { %v4036_v20 = vadd.f32 %v4035_v39, %v3947_v58  ;;  %v6694_v58 = vor.u32 %v7247_v8, %v6693_v38  ;;  %v7250_v38 = vld [vmem:[#allocation2 + $0x68] sm:$0xf0] }
 0x3db   : > { %4362 = vmatmul.bf16.gmra.mxu1 %v8778_v25  ;;  %v9028_v22 = vadd.f32 %v4284_v34, %v4036_v20 }
 0x3dd   : > { %v3948_v17 = vpop.f32.mrf.mxu2 }
 0x3de   : > { %v3949_v47 = vadd.f32 %v3948_v17, %v8935_v11 }
 0x3df   : > { %v4289_v29 = vpop.f32.mrf.mxu0 }
 0x3e0   : > { %v9030_v55 = vpop.f32.mrf.mxu1  ;;  %v4037_v63 = vpop.f32.mrf.mxu3 }
 0x3e1   : > { %v4038_v52 = vadd.f32 %v4037_v63, %v3949_v47  ;;  %v6705_v63 = vld [vmem:[#allocation2 + $0x60] sm:$0xf] }
 0x3e2   : > { %4426 = vmatmul.bf16.gmra.mxu2 %v8629_v12  ;;  %5117 = vmatmul.bf16.gmra.mxu0 %v6698_v19  ;;  %v6706_v19 = vor.u32 %v7250_v38, %v6705_v63  ;;  %v7253_v38 = vld [vmem:[#allocation2 + $0x80] sm:$0xf0] }
 0x3e3   : > { %v9034_v25 = vadd.f32 %v4286_v1, %v4038_v52 }
 0x3e5   : > { %5028 = vmatmul.bf16.gmra.mxu3 %v6694_v58  ;;  %v3951_v34 = vpop.f32.mrf.mxu2 }
 0x3e6   : > { %v3952_v4 = vadd.f32 %v3951_v34, %v8947_v51  ;;  %v6710_v51 = vor.u32 %v7249_v13, %v6707_v26 }
 0x3e7   : > { %v4291_v39 = vpop.f32.mrf.mxu0 }
 0x3e8   : > { %v9036_v48 = vpop.f32.mrf.mxu1  ;;  %v4040_v11 = vpop.f32.mrf.mxu3 }
 0x3e9   : > { %v4041_v20 = vadd.f32 %v4040_v11, %v3952_v4 }
 0x3eb   : > { %4367 = vmatmul.bf16.gmra.mxu1 %v8809_v27  ;;  %v9040_v36 = vadd.f32 %v4289_v29, %v4041_v20 }
 0x3ed   : > { %v3953_v17 = vpop.f32.mrf.mxu2 }
 0x3ee   : > { %v3954_v12 = vadd.f32 %v3953_v17, %v8953_v24  ;;  %v7309_v17 = vld [vmem:[#allocation8 + $0x210] sm:$0xff] }
 0x3ef   : > { %v4294_v8 = vpop.f32.mrf.mxu0  ;;  %5198 = vmatpush.bf16.msra.mxu1 %v7309_v17 }
 0x3f0   : > { %v9042_v47 = vpop.f32.mrf.mxu1  ;;  %v4042_v1 = vpop.f32.mrf.mxu3 }
 0x3f1   : > { %v4043_v52 = vadd.f32 %v4042_v1, %v3954_v12 }
 0x3f2   : > { %4431 = vmatmul.bf16.gmra.mxu2 %v8655_v56  ;;  %5122 = vmatmul.bf16.gmra.mxu0 %v6710_v51 }
 0x3f3   : > { %v9046_v27 = vadd.f32 %v4291_v39, %v4043_v52  ;;  %v6719_v39 = vld [vmem:[#allocation2 + $0x84] sm:$0xf0]  ;;  %v7252_v52 = vld [vmem:[#allocation2 + $0x7c] sm:$0xf] }
 0x3f5   : > { %5033 = vmatmul.bf16.gmra.mxu3 %v6706_v19  ;;  %v3956_v29 = vpop.f32.mrf.mxu2  ;;  %v6722_v19 = vor.u32 %v7252_v52, %v6719_v39 }
 0x3f6   : > { %v3957_v58 = vadd.f32 %v3956_v29, %v8965_v23  ;;  %v6717_v23 = vld [vmem:[#allocation2 + $0x78] sm:$0xf] }
 0x3f7   : > { %v4296_v11 = vpop.f32.mrf.mxu0 }
 0x3f8   : > { %v4045_v34 = vpop.f32.mrf.mxu3  ;;  %v4333_v4 = vpop.f32.mrf.mxu1 }
 0x3f9   : > { %v9050_v24 = vadd.f32 %v4333_v4, %v8887_v40  ;;  %v4046_v20 = vadd.f32 %v4045_v34, %v3957_v58 }
 0x3fb   : > { %4372 = vmatmul.bf16.gmra.mxu1 %v8840_v21  ;;  %v9053_v26 = vadd.f32 %v4294_v8, %v4046_v20  ;;  %v6718_v21 = vor.u32 %v7253_v38, %v6717_v23 }
 0x3fd   : > { %v3958_v56 = vpop.f32.mrf.mxu2 }
 0x3fe   : > { %v3959_v12 = vadd.f32 %v3958_v56, %v8971_v5 }
 0x3ff   : > { %v4299_v40 = vpop.f32.mrf.mxu0 }
 0x400   : > { %v4047_v1 = vpop.f32.mrf.mxu3  ;;  %v4335_v63 = vpop.f32.mrf.mxu1 }
 0x401   : > { %v9057_v13 = vadd.f32 %v4335_v63, %v8910_v60  ;;  %v4048_v51 = vadd.f32 %v4047_v1, %v3959_v12  ;;  %v6729_v1 = vld [vmem:[#allocation2 + $0x90] sm:$0xf]  ;;  %v7256_v63 = vld [vmem:[#allocation2 + $0x98] sm:$0xf0] }
 0x402   : > { %4436 = vmatmul.bf16.gmra.mxu2 %v8689_v41  ;;  %5127 = vmatmul.bf16.gmra.mxu0 %v6722_v19  ;;  %v6731_v41 = vld [vmem:[#allocation2 + $0x9c] sm:$0xf0] }
 0x403   : > { %v9060_v8 = vadd.f32 %v4296_v11, %v4048_v51  ;;  %v6730_v51 = vor.u32 %v7256_v63, %v6729_v1 }
 0x405   : > { %5038 = vmatmul.bf16.gmra.mxu3 %v6718_v21  ;;  %v3961_v29 = vpop.f32.mrf.mxu2 }
 0x406   : > { %v3962_v5 = vadd.f32 %v3961_v29, %v8983_v3 }
 0x407   : > { %v4301_v60 = vpop.f32.mrf.mxu0 }
 0x408   : > { %v4050_v58 = vpop.f32.mrf.mxu3  ;;  %v4338_v34 = vpop.f32.mrf.mxu1 }
 0x409   : > { %v9064_v4 = vadd.f32 %v4338_v34, %v8916_v53  ;;  %v4051_v20 = vadd.f32 %v4050_v58, %v3962_v5  ;;  %v7255_v53 = vld [vmem:[#allocation2 + $0x94] sm:$0xf]  ;;  %v7308_v58 = vld [vmem:[#allocation8 + $0x208] sm:$0xff] }
 0x40a   : > { %v6734_v52 = vor.u32 %v7255_v53, %v6731_v41  ;;  %5199 = vmatpush.bf16.msra.mxu1 %v7308_v58  ;;  %v6753_v58 = vld [vmem:[#allocation2 + $0xc0] sm:$0xf] }
 0x40b   : > { %4377 = vmatmul.bf16.gmra.mxu1 %v8871_v7  ;;  %v9067_v17 = vadd.f32 %v4299_v40, %v4051_v20 }
 0x40d   : > { %v3963_v56 = vpop.f32.mrf.mxu2 }
 0x40e   : > { %v3964_v11 = vadd.f32 %v3963_v56, %v8989_v6 }
 0x40f   : > { %v4304_v23 = vpop.f32.mrf.mxu0 }
 0x410   : > { %v4052_v39 = vpop.f32.mrf.mxu3  ;;  %v4340_v12 = vpop.f32.mrf.mxu1 }
 0x411   : > { %v9071_v3 = vadd.f32 %v4340_v12, %v8927_v42  ;;  %v4053_v38 = vadd.f32 %v4052_v39, %v3964_v11  ;;  %v7259_v11 = vld [vmem:[#allocation2 + $0xb0] sm:$0xf0]  ;;  %v7258_v12 = vld [vmem:[#allocation2 + $0xac] sm:$0xf] }
 0x412   : > { %4441 = vmatmul.bf16.gmra.mxu2 %v8720_v46  ;;  %5132 = vmatmul.bf16.gmra.mxu0 %v6734_v52 }
 0x413   : > { %v9074_v7 = vadd.f32 %v4301_v60, %v4053_v38  ;;  %v6743_v60 = vld [vmem:[#allocation2 + $0xb4] sm:$0xf0] }
 0x414   : > { %v6746_v63 = vor.u32 %v7258_v12, %v6743_v60 }
 0x415   : > { %5043 = vmatmul.bf16.gmra.mxu3 %v6730_v51  ;;  %v3966_v40 = vpop.f32.mrf.mxu2 }
 0x416   : > { %v3967_v6 = vadd.f32 %v3966_v40, %v9001_v18  ;;  %v6741_v18 = vld [vmem:[#allocation2 + $0xa8] sm:$0xf] }
 0x417   : > { %v4306_v42 = vpop.f32.mrf.mxu0 }
 0x418   : > { %v4055_v19 = vpop.f32.mrf.mxu3  ;;  %v4343_v21 = vpop.f32.mrf.mxu1 }
 0x419   : > { %v9078_v29 = vadd.f32 %v4343_v21, %v8933_v62  ;;  %v4056_v5 = vadd.f32 %v4055_v19, %v3967_v6 }
 0x41b   : > { %4382 = vmatmul.bf16.gmra.mxu1 %v8904_v43  ;;  %v9081_v34 = vadd.f32 %v4304_v23, %v4056_v5  ;;  %v6742_v43 = vor.u32 %v7259_v11, %v6741_v18 }
 0x41d   : > { %v3968_v46 = vpop.f32.mrf.mxu2 }
 0x41e   : > { %v3969_v20 = vadd.f32 %v3968_v46, %v9007_v37  ;;  %v7262_v46 = vld [vmem:[#allocation2 + $0xc8] sm:$0xf0] }
 0x41f   : > { %v4309_v62 = vpop.f32.mrf.mxu0 }
 0x420   : > { %v4057_v56 = vpop.f32.mrf.mxu3  ;;  %v4345_v41 = vpop.f32.mrf.mxu1 }
 0x421   : > { %v9085_v39 = vadd.f32 %v4345_v41, %v8944_v59  ;;  %v4058_v1 = vadd.f32 %v4057_v56, %v3969_v20  ;;  %v6754_v41 = vor.u32 %v7262_v46, %v6753_v58 }
 0x422   : > { %4446 = vmatmul.bf16.gmra.mxu2 %v8751_v61  ;;  %5137 = vmatmul.bf16.gmra.mxu0 %v6746_v63  ;;  %v6755_v61 = vld [vmem:[#allocation2 + $0xcc] sm:$0xf0] }
 0x423   : > { %v9088_v23 = vadd.f32 %v4306_v42, %v4058_v1  ;;  %v7307_v63 = vld [vmem:[#allocation8 + $0x200] sm:$0xff] }
 0x424   : > { %5200 = vmatpush.bf16.msra.mxu1 %v7307_v63 }
 0x425   : > { %5048 = vmatmul.bf16.gmra.mxu3 %v6742_v43  ;;  %v3971_v53 = vpop.f32.mrf.mxu2 }
 0x426   : > { %v3972_v37 = vadd.f32 %v3971_v53, %v9013_v49  ;;  %v6767_v53 = vld [vmem:[#allocation2 + $0xe4] sm:$0xf0] }
 0x427   : > { %v4311_v59 = vpop.f32.mrf.mxu0 }
 0x428   : > { %v4060_v38 = vpop.f32.mrf.mxu3  ;;  %v4348_v52 = vpop.f32.mrf.mxu1 }
 0x429   : > { %v9092_v51 = vadd.f32 %v4348_v52, %v8951_v30  ;;  %v4061_v40 = vadd.f32 %v4060_v38, %v3972_v37  ;;  %v7261_v30 = vld [vmem:[#allocation2 + $0xc4] sm:$0xf] }
 0x42a   : > { %v6758_v56 = vor.u32 %v7261_v30, %v6755_v61 }
 0x42b   : > { %4387 = vmatmul.bf16.gmra.mxu1 %v8921_v50  ;;  %v9095_v6 = vadd.f32 %v4309_v62, %v4061_v40 }
 0x42d   : > { %v3973_v19 = vpop.f32.mrf.mxu2 }
 0x42e   : > { %v3974_v21 = vadd.f32 %v3973_v19, %v9019_v10  ;;  %v7264_v19 = vld [vmem:[#allocation2 + $0xdc] sm:$0xf] }
 0x42f   : > { %v4314_v60 = vpop.f32.mrf.mxu0 }
 0x430   : > { %v4062_v42 = vpop.f32.mrf.mxu3  ;;  %v4350_v5 = vpop.f32.mrf.mxu1 }
 0x431   : > { %v9099_v49 = vadd.f32 %v4350_v5, %v8962_v35  ;;  %v4063_v20 = vadd.f32 %v4062_v42, %v3974_v21  ;;  %v6770_v21 = vor.u32 %v7264_v19, %v6767_v53 }
 0x432   : > { %4451 = vmatmul.bf16.gmra.mxu2 %v8782_v15  ;;  %5142 = vmatmul.bf16.gmra.mxu0 %v6758_v56 }
 0x433   : > { %v9102_v50 = vadd.f32 %v4311_v59, %v4063_v20  ;;  %v7265_v59 = vld [vmem:[#allocation2 + $0xe0] sm:$0xf0] }
 0x435   : > { %5053 = vmatmul.bf16.gmra.mxu3 %v6754_v41  ;;  %v3976_v18 = vpop.f32.mrf.mxu2 }
 0x436   : > { %v3977_v10 = vadd.f32 %v3976_v18, %v9024_v2  ;;  %v6765_v2 = vld [vmem:[#allocation2 + $0xd8] sm:$0xf] }
 0x437   : > { %v4316_v35 = vpop.f32.mrf.mxu0 }
 0x438   : > { %v4065_v11 = vpop.f32.mrf.mxu3  ;;  %v4353_v62 = vpop.f32.mrf.mxu1 }
 0x439   : > { %v9106_v12 = vadd.f32 %v4353_v62, %v8969_v54  ;;  %v4066_v1 = vadd.f32 %v4065_v11, %v3977_v10  ;;  %v6777_v11 = vld [vmem:[#allocation2 + $0xf0] sm:$0xf]  ;;  %v7268_v62 = vld [vmem:[#allocation2 + $0xf8] sm:$0xf0] }
 0x43b   : > { %4392 = vmatmul.bf16.gmra.mxu1 %v8938_v28  ;;  %v9109_v43 = vadd.f32 %v4314_v60, %v4066_v1  ;;  %v6766_v28 = vor.u32 %v7265_v59, %v6765_v2 }
 0x43d   : > { %v3978_v15 = vpop.f32.mrf.mxu2 }
 0x43e   : > { %v3979_v37 = vadd.f32 %v3978_v15, %v9030_v55  ;;  %v6778_v15 = vor.u32 %v7268_v62, %v6777_v11  ;;  %v6803_v62 = vld [vmem:[#allocation2 + $0x12c] sm:$0xf0] }
 0x43f   : > { %v4319_v54 = vpop.f32.mrf.mxu0 }
 0x440   : > { %v4067_v38 = vpop.f32.mrf.mxu3  ;;  %v4355_v52 = vpop.f32.mrf.mxu1 }
 0x441   : > { %v9113_v40 = vadd.f32 %v4355_v52, %v8980_v32  ;;  %v4068_v61 = vadd.f32 %v4067_v38, %v3979_v37 }
 0x442   : > { %4456 = vmatmul.bf16.gmra.mxu2 %v8813_v0  ;;  %5147 = vmatmul.bf16.gmra.mxu0 %v6770_v21  ;;  %v6779_v0 = vld [vmem:[#allocation2 + $0xfc] sm:$0xf0]  ;;  %v6789_v21 = vld [vmem:[#allocation2 + $0x108] sm:$0xf] }
 0x443   : > { %v9116_v42 = vadd.f32 %v4316_v35, %v4068_v61 }
 0x445   : > { %5058 = vmatmul.bf16.gmra.mxu3 %v6766_v28  ;;  %v3981_v5 = vpop.f32.mrf.mxu2  ;;  %v7271_v28 = vld [vmem:[#allocation2 + $0x110] sm:$0xf0] }
 0x446   : > { %v3982_v55 = vadd.f32 %v3981_v5, %v9036_v48 }
 0x447   : > { %v4321_v32 = vpop.f32.mrf.mxu0 }
 0x448   : > { %v4070_v58 = vpop.f32.mrf.mxu3  ;;  %v4358_v46 = vpop.f32.mrf.mxu1 }
 0x449   : > { %v9120_v60 = vadd.f32 %v4358_v46, %v8987_v16  ;;  %v4071_v30 = vadd.f32 %v4070_v58, %v3982_v55  ;;  %v7267_v16 = vld [vmem:[#allocation2 + $0xf4] sm:$0xf]  ;;  %v7270_v55 = vld [vmem:[#allocation2 + $0x10c] sm:$0xf]  ;;  %v6790_v46 = vor.u32 %v7271_v28, %v6789_v21 }
 0x44a   : > { %v6782_v63 = vor.u32 %v7267_v16, %v6779_v0  ;;  %v9615_v0 = vld [vmem:[#allocation46_spill] sm:$0xff] }
 0x44b   : > { %4397 = vmatmul.bf16.gmra.mxu1 %v8956_v33  ;;  %v9123_v20 = vadd.f32 %v4319_v54, %v4071_v30 }
 0x44d   : > { %v3983_v56 = vpop.f32.mrf.mxu2 }
 0x44e   : > { %v3984_v41 = vadd.f32 %v3983_v56, %v9042_v47 }
 0x44f   : > { %v5113_v35 = vpop.f32.mrf.mxu0 }
 0x450   : > { %v4072_v18 = vpop.f32.mrf.mxu3  ;;  %v4360_v10 = vpop.f32.mrf.mxu1 }
 0x451   : > { %v9127_v48 = vadd.f32 %v4360_v10, %v8998_v31  ;;  %v4073_v1 = vadd.f32 %v4072_v18, %v3984_v41  ;;  %v9616_v10 = vld [vmem:[#allocation40_spill] sm:$0xff] }
 0x452   : > { %4461 = vmatmul.bf16.gmra.mxu2 %v8844_v45  ;;  %5152 = vmatmul.bf16.gmra.mxu0 %v6782_v63  ;;  %v6791_v45 = vld [vmem:[#allocation2 + $0x114] sm:$0xf0]  ;;  %v6801_v63 = vld [vmem:[#allocation2 + $0x120] sm:$0xf] }
 0x453   : > { %v9130_v33 = vadd.f32 %v4321_v32, %v4073_v1  ;;  %v6794_v58 = vor.u32 %v7270_v55, %v6791_v45  ;;  %v9614_v32 = vld [vmem:[#allocation52_spill] sm:$0xff] }
 0x455   : > { %5063 = vmatmul.bf16.gmra.mxu3 %v6778_v15  ;;  %v4422_v53 = vpop.f32.mrf.mxu2  ;;  %v7274_v15 = vld [vmem:[#allocation2 + $0x128] sm:$0xf0] }
 0x456   : > { %v9133_v37 = vadd.f32 %v4422_v53, %v9050_v24 }
 0x457   : > { %v5115_v2 = vpop.f32.mrf.mxu0 }
 0x458   : > { %v4363_v47 = vpop.f32.mrf.mxu1  ;;  %v5024_v38 = vpop.f32.mrf.mxu3 }
 0x459   : > { %v9136_v31 = vadd.f32 %v4363_v47, %v9005_v57  ;;  %v9138_v52 = vadd.f32 %v5113_v35, %v5024_v38  ;;  %v7273_v47 = vld [vmem:[#allocation2 + $0x124] sm:$0xf] }
 0x45a   : > { %v6806_v38 = vor.u32 %v7273_v47, %v6803_v62 }
 0x45b   : > { %4402 = vmatmul.bf16.gmra.mxu1 %v8974_v9 }
 0x45d   : > { %v4424_v59 = vpop.f32.mrf.mxu2 }
 0x45e   : > { %v9142_v19 = vadd.f32 %v4424_v59, %v9057_v13  ;;  %v9617_v59 = vld [vmem:[#allocation51_spill] sm:$0xff] }
 0x45f   : > { %v5118_v57 = vpop.f32.mrf.mxu0 }
 0x460   : > { %v4365_v54 = vpop.f32.mrf.mxu1  ;;  %v5026_v61 = vpop.f32.mrf.mxu3 }
 0x461   : > { %v9145_v24 = vadd.f32 %v4365_v54, %v9011_v44  ;;  %v9147_v5 = vadd.f32 %v5115_v2, %v5026_v61  ;;  %v6802_v2 = vor.u32 %v7274_v15, %v6801_v63  ;;  %v6689_v54 = vld [vmem:[#allocation2 + $0x38] sm:$0xf]  ;;  %v7245_v61 = vld [vmem:[#allocation2 + $0x40] sm:$0xf0]  ;;  %v6701_v63 = vld [vmem:[#allocation2 + $0x50] sm:$0xf] }
 0x462   : > { %4466 = vmatmul.bf16.gmra.mxu2 %v9614_v32  ;;  %5157 = vmatmul.bf16.gmra.mxu0 %v6794_v58  ;;  %v6690_v58 = vor.u32 %v7245_v61, %v6689_v54  ;;  %v7248_v15 = vld [vmem:[#allocation2 + $0x58] sm:$0xf0] }
 0x465   : > { %5068 = vmatmul.bf16.gmra.mxu3 %v6790_v46  ;;  %v4427_v9 = vpop.f32.mrf.mxu2 }
 0x466   : > { %v9151_v13 = vadd.f32 %v4427_v9, %v9064_v4  ;;  %v6815_v9 = vld [vmem:[#allocation2 + $0x144] sm:$0xf0] }
 0x467   : > { %v5120_v18 = vpop.f32.mrf.mxu0 }
 0x468   : > { %v4368_v30 = vpop.f32.mrf.mxu1  ;;  %v5029_v56 = vpop.f32.mrf.mxu3 }
 0x469   : > { %v9154_v41 = vadd.f32 %v4368_v30, %v9615_v0  ;;  %v9156_v44 = vadd.f32 %v5118_v57, %v5029_v56 }
 0x46b   : > { %4407 = vmatmul.bf16.gmra.mxu1 %v9616_v10  ;;  %v7277_v10 = vld [vmem:[#allocation2 + $0x140] sm:$0xf0] }
 0x46d   : > { %v4429_v11 = vpop.f32.mrf.mxu2 }
 0x46e   : > { %v9160_v16 = vadd.f32 %v4429_v11, %v9071_v3 }
 0x46f   : > { %v5123_v45 = vpop.f32.mrf.mxu0 }
 0x470   : > { %v4370_v35 = vpop.f32.mrf.mxu1  ;;  %v5031_v1 = vpop.f32.mrf.mxu3 }
 0x471   : > { %v9163_v4 = vadd.f32 %v4370_v35, %v9022_v14  ;;  %v9165_v53 = vadd.f32 %v5120_v18, %v5031_v1  ;;  %v6813_v18 = vld [vmem:[#allocation2 + $0x138] sm:$0xf] }
 0x472   : > { %4471 = vmatmul.bf16.gmra.mxu2 %v9617_v59  ;;  %5162 = vmatmul.bf16.gmra.mxu0 %v6806_v38  ;;  %v6814_v35 = vor.u32 %v7277_v10, %v6813_v18  ;;  %v9618_v1 = vld [vmem:[#allocation54_spill] sm:$0xff] }
 0x473   : > { %v6839_v18 = vld [vmem:[#allocation2 + $0x174] sm:$0xf0] }
 0x475   : > { %5073 = vmatmul.bf16.gmra.mxu3 %v6802_v2  ;;  %v4432_v3 = vpop.f32.mrf.mxu2 }
 0x476   : > { %v9169_v28 = vadd.f32 %v4432_v3, %v9078_v29  ;;  %v6825_v3 = vld [vmem:[#allocation2 + $0x150] sm:$0xf] }
 0x477   : > { %v5125_v46 = vpop.f32.mrf.mxu0 }
 0x478   : > { %v4373_v21 = vpop.f32.mrf.mxu1  ;;  %v5034_v57 = vpop.f32.mrf.mxu3 }
 0x479   : > { %v9172_v14 = vadd.f32 %v4373_v21, %v9028_v22  ;;  %v9174_v55 = vadd.f32 %v5123_v45, %v5034_v57  ;;  %v7276_v22 = vld [vmem:[#allocation2 + $0x13c] sm:$0xf]  ;;  %v6827_v45 = vld [vmem:[#allocation2 + $0x15c] sm:$0xf0] }
 0x47a   : > { %v6818_v62 = vor.u32 %v7276_v22, %v6815_v9  ;;  %v7280_v21 = vld [vmem:[#allocation2 + $0x158] sm:$0xf0]  ;;  %v7251_v9 = vld [vmem:[#allocation2 + $0x70] sm:$0xf0]  ;;  %v6837_v22 = vld [vmem:[#allocation2 + $0x168] sm:$0xf] }
 0x47b   : > { %5201 = vmatmul.bf16.vlgmr.msra.gmra.mxu1 %v6690_v58  ;;  %v7279_v58 = vld [vmem:[#allocation2 + $0x154] sm:$0xf] }
 0x47d   : > { %v4434_v32 = vpop.f32.mrf.mxu2 }
 0x47e   : > { %v9177_v56 = vadd.f32 %v4434_v32, %v9085_v39  ;;  %v9619_v32 = vld [vmem:[#allocation53_spill] sm:$0xff] }
 0x480   : > { %v4375_v30 = vpop.f32.mrf.mxu1  ;;  %v5036_v0 = vpop.f32.mrf.mxu3 }
 0x481   : > { %v9180_v29 = vadd.f32 %v4375_v30, %v9034_v25  ;;  %v9182_v11 = vadd.f32 %v5125_v46, %v5036_v0  ;;  %v6702_v25 = vor.u32 %v7248_v15, %v6701_v63  ;;  %v6830_v46 = vor.u32 %v7279_v58, %v6827_v45  ;;  %v9620_v15 = vld [vmem:[#allocation34_spill] sm:$0xff]  ;;  %v6851_v45 = vld [vmem:[#allocation2 + $0x18c] sm:$0xf0]  ;;  %v7285_v58 = vld [vmem:[#allocation2 + $0x184] sm:$0xf] }
 0x482   : > { %4476 = vmatmul.bf16.gmra.mxu2 %v9618_v1  ;;  %5167 = vmatmul.bf16.gmra.mxu0 %v6818_v62 }
 0x485   : > { %5078 = vmatmul.bf16.gmra.mxu3 %v6814_v35  ;;  %v4437_v47 = vpop.f32.mrf.mxu2  ;;  %v7282_v35 = vld [vmem:[#allocation2 + $0x16c] sm:$0xf] }
 0x486   : > { %v9186_v38 = vadd.f32 %v4437_v47, %v9092_v51  ;;  %v6826_v51 = vor.u32 %v7280_v21, %v6825_v3  ;;  %v6842_v1 = vor.u32 %v7282_v35, %v6839_v18  ;;  %v6725_v47 = vld [vmem:[#allocation2 + $0x80] sm:$0xf] }
 0x487   : > { %v6849_v3 = vld [vmem:[#allocation2 + $0x180] sm:$0xf] }
 0x488   : > { %v4378_v39 = vpop.f32.mrf.mxu1 }
 0x489   : > { %v9189_v2 = vadd.f32 %v4378_v39, %v9040_v36  ;;  %v6713_v36 = vld [vmem:[#allocation2 + $0x68] sm:$0xf]  ;;  %v7254_v39 = vld [vmem:[#allocation2 + $0x88] sm:$0xf0] }
 0x48b   : > { %5206 = vmatmul.bf16.gmra.mxu1 %v6702_v25 }
 0x48d   : > { %v4439_v59 = vpop.f32.mrf.mxu2 }
 0x48e   : > { %v9192_v61 = vadd.f32 %v4439_v59, %v9099_v49  ;;  %v6714_v49 = vor.u32 %v7251_v9, %v6713_v36  ;;  %v6726_v59 = vor.u32 %v7254_v39, %v6725_v47  ;;  %v6737_v36 = vld [vmem:[#allocation2 + $0x98] sm:$0xf]  ;;  %v7257_v9 = vld [vmem:[#allocation2 + $0xa0] sm:$0xf0]  ;;  %v6761_v47 = vld [vmem:[#allocation2 + $0xc8] sm:$0xf] }
 0x48f   : > { %v7263_v39 = vld [vmem:[#allocation2 + $0xd0] sm:$0xf0] }
 0x490   : > { %v4380_v54 = vpop.f32.mrf.mxu1 }
 0x491   : > { %v9195_v57 = vadd.f32 %v4380_v54, %v9046_v27  ;;  %v7283_v27 = vld [vmem:[#allocation2 + $0x170] sm:$0xf0] }
 0x492   : > { %4481 = vmatmul.bf16.gmra.mxu2 %v9619_v32  ;;  %5172 = vmatmul.bf16.gmra.mxu0 %v6830_v46  ;;  %v6838_v63 = vor.u32 %v7283_v27, %v6837_v22  ;;  %v6854_v46 = vor.u32 %v7285_v58, %v6851_v45  ;;  %v9621_v32 = vld [vmem:[#allocation33_spill] sm:$0xff]  ;;  %v7260_v27 = vld [vmem:[#allocation2 + $0xb8] sm:$0xf0] }
 0x493   : > { %v6749_v22 = vld [vmem:[#allocation2 + $0xb0] sm:$0xf] }
 0x495   : > { %5083 = vmatmul.bf16.gmra.mxu3 %v6826_v51 }
 0x498   : > { %v4383_v30 = vpop.f32.mrf.mxu1 }
 0x499   : > { %v9199_v0 = vadd.f32 %v4383_v30, %v9053_v26 }
 0x49b   : > { %5211 = vmatmul.bf16.gmra.mxu1 %v6714_v49  ;;  %v6738_v49 = vor.u32 %v7257_v9, %v6737_v36  ;;  %v6785_v36 = vld [vmem:[#allocation2 + $0xf8] sm:$0xf]  ;;  %v7269_v9 = vld [vmem:[#allocation2 + $0x100] sm:$0xf0] }
 0x4a0   : > { %v4385_v10 = vpop.f32.mrf.mxu1 }
 0x4a1   : > { %v9202_v62 = vadd.f32 %v4385_v10, %v9060_v8  ;;  %v7286_v8 = vld [vmem:[#allocation2 + $0x188] sm:$0xf0] }
 0x4a2   : > { %4486 = vmatmul.bf16.gmra.mxu2 %v9620_v15  ;;  %5177 = vmatmul.bf16.gmra.mxu0 %v6842_v1  ;;  %v6850_v51 = vor.u32 %v7286_v8, %v6849_v3  ;;  %v7266_v3 = vld [vmem:[#allocation2 + $0xe8] sm:$0xf0] }
 0x4a5   : > { %5088 = vmatmul.bf16.gmra.mxu3 %v6838_v63  ;;  %v6750_v63 = vor.u32 %v7260_v27, %v6749_v22 }
 0x4a8   : > { %v4388_v26 = vpop.f32.mrf.mxu1 }
 0x4a9   : > { %v9206_v25 = vadd.f32 %v4388_v26, %v9067_v17 }
 0x4ab   : > { %5216 = vmatmul.bf16.gmra.mxu1 %v6726_v59  ;;  %v6762_v59 = vor.u32 %v7263_v39, %v6761_v47  ;;  %v6797_v47 = vld [vmem:[#allocation2 + $0x110] sm:$0xf]  ;;  %v7272_v39 = vld [vmem:[#allocation2 + $0x118] sm:$0xf0] }
 0x4b0   : > { %v4390_v54 = vpop.f32.mrf.mxu1 }
 0x4b1   : > { %v9209_v21 = vadd.f32 %v4390_v54, %v9074_v7  ;;  %v9622_v7 = vld [vmem:[#allocation39_spill] sm:$0xff] }
 0x4b2   : > { %4491 = vmatmul.bf16.gmra.mxu2 %v9621_v32  ;;  %5182 = vmatmul.bf16.gmra.mxu0 %v6854_v46  ;;  %v9239_v32 = vpop.f32.mrf.mxu3 }
 0x4b5   : > { %5093 = vmatmul.bf16.gmra.mxu3 %v6850_v51 }
 0x4b8   : > { %v4393_v17 = vpop.f32.mrf.mxu1 }
 0x4b9   : > { %v9213_v30 = vadd.f32 %v4393_v17, %v9081_v34 }
 0x4bb   : > { %5221 = vmatmul.bf16.gmra.mxu1 %v6738_v49  ;;  %v6786_v49 = vor.u32 %v7269_v9, %v6785_v36 }
 0x4c0   : > { %v4395_v18 = vpop.f32.mrf.mxu1 }
 0x4c1   : > { %v9216_v10 = vadd.f32 %v4395_v18, %v9088_v23 }
 0x4c2   : > { %4496 = vmatmul.bf16.gmra.mxu2 %v9622_v7  ;;  %v9250_v7 = vpop.f32.mrf.mxu3 }
 0x4c8   : > { %v4398_v35 = vpop.f32.mrf.mxu1 }
 0x4c9   : > { %v9220_v1 = vadd.f32 %v4398_v35, %v9095_v6  ;;  %v6773_v6 = vld [vmem:[#allocation2 + $0xe0] sm:$0xf] }
 0x4cb   : > { %5226 = vmatmul.bf16.gmra.mxu1 %v6750_v63  ;;  %v9623_v63 = vld [vmem:[#allocation13_spill] sm:$0xff] }
 0x4d0   : > { %v4400_v15 = vpop.f32.mrf.mxu1 }
 0x4d1   : > { %v9223_v34 = vadd.f32 %v4400_v15, %v9102_v50  ;;  %v6774_v50 = vor.u32 %v7266_v3, %v6773_v6  ;;  %v9262_v3 = vpop.f32.mrf.mxu3 }
 0x4d8   : > { %v4403_v26 = vpop.f32.mrf.mxu1 }
 0x4d9   : > { %v9226_v23 = vadd.f32 %v4403_v26, %v9109_v43  ;;  %v9237_v43 = vpop.f32.mrf.mxu0 }
 0x4db   : > { %5231 = vmatmul.bf16.gmra.mxu1 %v6762_v59  ;;  %v9259_v59 = vpop.f32.mrf.mxu2 }
 0x4e0   : > { %v4405_v45 = vpop.f32.mrf.mxu1 }
 0x4e1   : > { %v9229_v54 = vadd.f32 %v4405_v45, %v9116_v42  ;;  %v9624_v45 = vld [vmem:[#allocation14_spill] sm:$0xff] }
 0x4e8   : > { %v4408_v8 = vpop.f32.mrf.mxu1 }
 0x4e9   : > { %v9232_v58 = vadd.f32 %v4408_v8, %v9123_v20  ;;  %v9243_v20 = vpop.f32.mrf.mxu0 }
 0x4eb   : > { %5236 = vmatmul.bf16.gmra.mxu1 %v6774_v50 }
 0x4f0   : > { %v4410_v46 = vpop.f32.mrf.mxu1 }
 0x4f1   : > { %v9235_v51 = vadd.f32 %v4410_v46, %v9130_v33  ;;  %v9248_v33 = vld [vmem:[%s9474_s4] ss:$0 sm:$0xff]  ;;  %v9257_v26 = vpop.f32.mrf.mxu0  ;;  %v6798_v46 = vor.u32 %v7272_v39, %v6797_v47 }
 0x4f8   : > { %v5202_v42 = vpop.f32.mrf.mxu1 }
 0x4f9   : > { %v5203_v17 = vadd.f32 %v5202_v42, %v9138_v52 }
 0x4fb   : > { %v5282_v18 = vadd.f32 %v5203_v17, %v9133_v37  ;;  %5241 = vmatmul.bf16.gmra.mxu1 %v6786_v49  ;;  %v9271_v17 = vpop.f32.mrf.mxu0  ;;  %v9273_v49 = vpop.f32.mrf.mxu2 }
 0x4fd   : > { %v5318_v27 = vadd.f32 %v9248_v33, %v5282_v18 }
 0x4ff   : > { %v5350_v15 = vadd.f32 %v5318_v27, %v9623_v63  ;;  %v6809_v63 = vld [vmem:[#allocation2 + $0x128] sm:$0xf] }
 0x500   : > { %v5204_v22 = vpop.f32.mrf.mxu1 }
 0x501   : > { %v5205_v35 = vadd.f32 %v5204_v22, %v9147_v5  ;;  %v5382_v50 = vmax.f32 %v5350_v15, 0.0  ;;  %v7275_v15 = vld [vmem:[#allocation2 + $0x130] sm:$0xf0] }
 0x503   : > { %v5283_v52 = vadd.f32 %v5205_v35, %v9142_v19 }
 0x505   : > { %v5319_v37 = vadd.f32 %v9248_v33, %v5283_v52 }
 0x507   : > { %v5351_v6 = vadd.f32 %v5319_v37, %v9624_v45  ;;  %v9626_v37 = vld [vmem:[#allocation18_spill] sm:$0xff] }
 0x508   : > { %v5207_v8 = vpop.f32.mrf.mxu1 }
 0x509   : > { %v5383_v5 = vmax.f32 %v5351_v6, 0.0  ;;  %v5208_v19 = vadd.f32 %v5207_v8, %v9156_v44  ;;  %v9277_v44 = vpop.f32.mrf.mxu3 }
 0x50b   : > { %v7319_v36 = vpack.c.bf16 %v5383_v5, %v5382_v50  ;;  %v5284_v9 = vadd.f32 %v5208_v19, %v9151_v13  ;;  %5246 = vmatmul.bf16.gmra.mxu1 %v6798_v46  ;;  %v9625_v13 = vld [vmem:[#allocation17_spill] sm:$0xff]  ;;  %v6810_v50 = vor.u32 %v7275_v15, %v6809_v63  ;;  %v9286_v5 = vpop.f32.mrf.mxu2  ;;  %v7278_v63 = vld [vmem:[#allocation2 + $0x148] sm:$0xf0]  ;;  %v5129_v15 = vadd.f32 %v9237_v43, %v9239_v32 }
 0x50d   : > { %7320 = vst [vmem:[%s9268_s15] sm:$0xff] %v7319_v36   ;;  %v5320_v18 = vadd.f32 %v9248_v33, %v5284_v9 }
 0x50f   : > { %v5352_v35 = vadd.f32 %v5320_v18, %v9625_v13 }
 0x510   : > { %v5209_v42 = vpop.f32.mrf.mxu1 }
 0x511   : > { %v5210_v22 = vadd.f32 %v5209_v42, %v9165_v53  ;;  %v5384_v45 = vmax.f32 %v5352_v35, 0.0  ;;  %v9284_v53 = vpop.f32.mrf.mxu0  ;;  %v9289_v46 = vpop.f32.mrf.mxu3 }
 0x513   : > { %v5285_v27 = vadd.f32 %v5210_v22, %v9160_v16  ;;  %v9297_v22 = vpop.f32.mrf.mxu2 }
 0x515   : > { %v5321_v52 = vadd.f32 %v9248_v33, %v5285_v27  ;;  %v9627_v27 = vld [vmem:[#allocation21_spill] sm:$0xff] }
 0x517   : > { %v5353_v47 = vadd.f32 %v5321_v52, %v9626_v37  ;;  %v6821_v52 = vld [vmem:[#allocation2 + $0x140] sm:$0xf]  ;;  %v9628_v37 = vld [vmem:[#allocation22_spill] sm:$0xff] }
 0x518   : > { %v5212_v39 = vpop.f32.mrf.mxu1 }
 0x519   : > { %v5385_v6 = vmax.f32 %v5353_v47, 0.0  ;;  %v5213_v8 = vadd.f32 %v5212_v39, %v9174_v55  ;;  %v9295_v55 = vpop.f32.mrf.mxu0  ;;  %v9301_v35 = vpop.f32.mrf.mxu3 }
 0x51b   : > { %v7324_v16 = vpack.c.bf16 %v5385_v6, %v5384_v45  ;;  %v5286_v19 = vadd.f32 %v5213_v8, %v9169_v28  ;;  %5251 = vmatmul.bf16.gmra.mxu1 %v6810_v50  ;;  %v6822_v6 = vor.u32 %v7278_v63, %v6821_v52  ;;  %v7281_v52 = vld [vmem:[#allocation2 + $0x160] sm:$0xf0] }
 0x51d   : > { %7396 = vst [vmem:[%s9268_s15 + $0x8] sm:$0xff] %v7324_v16   ;;  %v5322_v9 = vadd.f32 %v9248_v33, %v5286_v19  ;;  %v5131_v16 = vadd.f32 %v9243_v20, %v9250_v7  ;;  %v5134_v20 = vadd.f32 %v9257_v26, %v9262_v3  ;;  %v9630_v7 = vld [vmem:[#allocation26_spill] sm:$0xff]  ;;  %v5136_v3 = vadd.f32 %v9271_v17, %v9277_v44 }
 0x51e   : > { %v7288_v44 = vld [vmem:[#allocation2 + $0x19c] sm:$0xf] }
 0x51f   : > { %v5354_v13 = vadd.f32 %v5322_v9, %v9627_v27  ;;  %v9629_v27 = vld [vmem:[#allocation25_spill] sm:$0xff] }
 0x520   : > { %v5214_v36 = vpop.f32.mrf.mxu1 }
 0x521   : > { %v5215_v42 = vadd.f32 %v5214_v36, %v9182_v11  ;;  %v9310_v19 = vpop.f32.mrf.mxu0  ;;  %v9312_v36 = vpop.f32.mrf.mxu2 }
 0x522   : > { %v9314_v43 = vpop.f32.mrf.mxu3 }
 0x523   : > { %v5287_v18 = vadd.f32 %v5215_v42, %v9177_v56  ;;  %v5386_v56 = vmax.f32 %v5354_v13, 0.0 }
 0x525   : > { %v5323_v28 = vadd.f32 %v9248_v33, %v5287_v18 }
 0x527   : > { %v5355_v11 = vadd.f32 %v5323_v28, %v9628_v37 }
 0x528   : > { %v5217_v47 = vpop.f32.mrf.mxu1 }
 0x529   : > { %v5387_v39 = vmax.f32 %v5355_v11, 0.0  ;;  %v5218_v45 = vadd.f32 %v5217_v47, %v5129_v15  ;;  %v9323_v37 = vpop.f32.mrf.mxu0  ;;  %v9325_v11 = vpop.f32.mrf.mxu2 }
 0x52b   : > { %v7329_v8 = vpack.c.bf16 %v5387_v39, %v5386_v56  ;;  %5256 = vmatmul.bf16.gmra.mxu1 %v6822_v6  ;;  %v5288_v50 = vadd.f32 %v5218_v45, %v9186_v38  ;;  %v6833_v38 = vld [vmem:[#allocation2 + $0x158] sm:$0xf]  ;;  %v9327_v45 = vpop.f32.mrf.mxu3  ;;  %v4443_v6 = vadd.f32 %v9259_v59, %v9106_v12 }
 0x52c   : > { %v6834_v39 = vor.u32 %v7281_v52, %v6833_v38  ;;  %v9631_v38 = vld [vmem:[#allocation29_spill] sm:$0xff] }
 0x52d   : > { %7397 = vst [vmem:[%s9268_s15 + $0x10] sm:$0xff] %v7329_v8   ;;  %v5324_v9 = vadd.f32 %v9248_v33, %v5288_v50  ;;  %v6861_v50 = vld [vmem:[#allocation2 + $0x198] sm:$0xf] }
 0x52f   : > { %v5356_v13 = vadd.f32 %v5324_v9, %v9629_v27 }
 0x530   : > { %v5219_v32 = vpop.f32.mrf.mxu1 }
 0x531   : > { %v5220_v42 = vadd.f32 %v5219_v32, %v5131_v16  ;;  %v5388_v47 = vmax.f32 %v5356_v13, 0.0  ;;  %v7289_v16 = vld [vmem:[#allocation2 + $0x1a0] sm:$0xf0]  ;;  %v9337_v13 = vpop.f32.mrf.mxu0  ;;  %v9339_v12 = vpop.f32.mrf.mxu2 }
 0x532   : > { %v6862_v9 = vor.u32 %v7289_v16, %v6861_v50 }
 0x533   : > { %v5289_v18 = vadd.f32 %v5220_v42, %v9192_v61  ;;  %v4445_v42 = vadd.f32 %v9273_v49, %v9113_v40  ;;  %v5139_v49 = vadd.f32 %v9284_v53, %v9289_v46  ;;  %v5141_v53 = vadd.f32 %v9295_v55, %v9301_v35  ;;  %v9634_v35 = vld [vmem:[#allocation36_spill] sm:$0xff] }
 0x534   : > { %5098 = vmatmul.bf16.gmra.mxu3 %v6862_v9 }
 0x535   : > { %v5325_v28 = vadd.f32 %v9248_v33, %v5289_v18 }
 0x537   : > { %v5357_v63 = vadd.f32 %v5325_v28, %v9630_v7  ;;  %v5059_v28 = vpop.f32.mrf.mxu3  ;;  %v6845_v7 = vld [vmem:[#allocation2 + $0x170] sm:$0xf] }
 0x538   : > { %v5222_v15 = vpop.f32.mrf.mxu1 }
 0x539   : > { %v5389_v56 = vmax.f32 %v5357_v63, 0.0  ;;  %v5223_v61 = vadd.f32 %v5222_v15, %v5134_v20  ;;  %v6863_v20 = vld [vmem:[#allocation2 + $0x1a4] sm:$0xf0]  ;;  %v7284_v63 = vld [vmem:[#allocation2 + $0x178] sm:$0xf0]  ;;  %v5150_v50 = vpop.f32.mrf.mxu0  ;;  %v4459_v16 = vpop.f32.mrf.mxu2 }
 0x53a   : > { %v6866_v40 = vor.u32 %v7288_v44, %v6863_v20  ;;  %v9632_v15 = vld [vmem:[#allocation30_spill] sm:$0xff]  ;;  %v5144_v44 = vadd.f32 %v9310_v19, %v9314_v43  ;;  %v5146_v19 = vadd.f32 %v9323_v37, %v9327_v45  ;;  %v5149_v37 = vadd.f32 %v9337_v13, %v5059_v28 }
 0x53b   : > { %v7334_v8 = vpack.c.bf16 %v5389_v56, %v5388_v47  ;;  %5261 = vmatmul.bf16.gmra.mxu1 %v6834_v39  ;;  %v5290_v26 = vadd.f32 %v5223_v61, %v4443_v6  ;;  %v9636_v45 = vld [vmem:[#allocation42_spill] sm:$0xff]  ;;  %v4460_v13 = vadd.f32 %v4459_v16, %v9163_v4 }
 0x53c   : > { %5187 = vmatmul.bf16.gmra.mxu0 %v6866_v40 }
 0x53d   : > { %7398 = vst [vmem:[%s9268_s15 + $0x18] sm:$0xff] %v7334_v8   ;;  %v5326_v18 = vadd.f32 %v9248_v33, %v5290_v26  ;;  %v6846_v8 = vor.u32 %v7284_v63, %v6845_v7  ;;  %v4448_v26 = vadd.f32 %v9286_v5, %v9120_v60 }
 0x53f   : > { %v5358_v52 = vadd.f32 %v5326_v18, %v9631_v38  ;;  %v5061_v9 = vpop.f32.mrf.mxu3  ;;  %v9633_v38 = vld [vmem:[#allocation35_spill] sm:$0xff] }
 0x540   : > { %v5224_v32 = vpop.f32.mrf.mxu1 }
 0x541   : > { %v5225_v27 = vadd.f32 %v5224_v32, %v5136_v3  ;;  %v5390_v61 = vmax.f32 %v5358_v52, 0.0  ;;  %v6857_v52 = vld [vmem:[#allocation2 + $0x188] sm:$0xf]  ;;  %v5153_v20 = vpop.f32.mrf.mxu0  ;;  %v4462_v55 = vpop.f32.mrf.mxu2 }
 0x542   : > { %v4463_v4 = vadd.f32 %v4462_v55, %v9172_v14  ;;  %v9640_v55 = vld [vmem:[#allocation16_spill] sm:$0xff] }
 0x543   : > { %v5291_v59 = vadd.f32 %v5225_v27, %v4445_v42  ;;  %v4450_v42 = vadd.f32 %v9297_v22, %v9127_v48 }
 0x545   : > { %v5327_v17 = vadd.f32 %v9248_v33, %v5291_v59 }
 0x547   : > { %v5359_v47 = vadd.f32 %v5327_v17, %v9632_v15  ;;  %v7287_v17 = vld [vmem:[#allocation2 + $0x190] sm:$0xf0]  ;;  %v5064_v63 = vpop.f32.mrf.mxu3 }
 0x548   : > { %v5227_v56 = vpop.f32.mrf.mxu1  ;;  %v6858_v15 = vor.u32 %v7287_v17, %v6857_v52 }
 0x549   : > { %v5391_v39 = vmax.f32 %v5359_v47, 0.0  ;;  %v5228_v6 = vadd.f32 %v5227_v56, %v5139_v49  ;;  %v4453_v47 = vadd.f32 %v9312_v36, %v9136_v31  ;;  %v7290_v31 = vld [vmem:[#allocation2 + $0x1a8] sm:$0xf0]  ;;  %v9635_v36 = vld [vmem:[#allocation41_spill] sm:$0xff] }
 0x54b   : > { %v7339_v3 = vpack.c.bf16 %v5391_v39, %v5390_v61  ;;  %5266 = vmatmul.bf16.gmra.mxu1 %v6846_v8  ;;  %v5292_v32 = vadd.f32 %v5228_v6, %v4448_v26  ;;  %v4455_v39 = vadd.f32 %v9325_v11, %v9145_v24  ;;  %v5155_v6 = vpop.f32.mrf.mxu0  ;;  %v4464_v8 = vpop.f32.mrf.mxu2 }
 0x54d   : > { %7399 = vst [vmem:[%s9268_s15 + $0x20] sm:$0xff] %v7339_v3   ;;  %v5328_v18 = vadd.f32 %v9248_v33, %v5292_v32 }
 0x54f   : > { %v5360_v60 = vadd.f32 %v5328_v18, %v9633_v38  ;;  %v5066_v32 = vpop.f32.mrf.mxu3 }
 0x550   : > { %v5229_v46 = vpop.f32.mrf.mxu1 }
 0x551   : > { %v5230_v27 = vadd.f32 %v5229_v46, %v5141_v53  ;;  %v5392_v22 = vmax.f32 %v5360_v60, 0.0  ;;  %v6869_v46 = vld [vmem:[#allocation2 + $0x1a0] sm:$0xf] }
 0x553   : > { %v5293_v59 = vadd.f32 %v5230_v27, %v4450_v42  ;;  %v5158_v52 = vpop.f32.mrf.mxu0  ;;  %v4467_v17 = vpop.f32.mrf.mxu2 }
 0x555   : > { %v5329_v5 = vadd.f32 %v9248_v33, %v5293_v59  ;;  %v6870_v59 = vor.u32 %v7290_v31, %v6869_v46  ;;  %v5156_v46 = vadd.f32 %v5155_v6, %v5066_v32 }
 0x557   : > { %v5361_v7 = vadd.f32 %v5329_v5, %v9634_v35  ;;  %v4458_v5 = vadd.f32 %v9339_v12, %v9154_v41  ;;  %v5069_v35 = vpop.f32.mrf.mxu3 }
 0x558   : > { %v5232_v48 = vpop.f32.mrf.mxu1  ;;  %v5159_v14 = vadd.f32 %v5158_v52, %v5069_v35 }
 0x559   : > { %v5393_v40 = vmax.f32 %v5361_v7, 0.0  ;;  %v5233_v49 = vadd.f32 %v5232_v48, %v5144_v44  ;;  %v5151_v48 = vadd.f32 %v5150_v50, %v5061_v9 }
 0x55b   : > { %v7344_v56 = vpack.c.bf16 %v5393_v40, %v5392_v22  ;;  %5271 = vmatmul.bf16.gmra.mxu1 %v6858_v15  ;;  %v5294_v61 = vadd.f32 %v5233_v49, %v4453_v47  ;;  %v5160_v15 = vpop.f32.mrf.mxu0  ;;  %v4469_v47 = vpop.f32.mrf.mxu2 }
 0x55d   : > { %7400 = vst [vmem:[%s9268_s15 + $0x28] sm:$0xff] %v7344_v56   ;;  %v5330_v26 = vadd.f32 %v9248_v33, %v5294_v61  ;;  %v9637_v56 = vld [vmem:[#allocation47_spill] sm:$0xff] }
 0x55f   : > { %v5362_v42 = vadd.f32 %v5330_v26, %v9635_v36  ;;  %v5071_v61 = vpop.f32.mrf.mxu3 }
 0x560   : > { %v5234_v43 = vpop.f32.mrf.mxu1 }
 0x561   : > { %v5235_v3 = vadd.f32 %v5234_v43, %v5146_v19  ;;  %v5394_v11 = vmax.f32 %v5362_v42, 0.0  ;;  %v5154_v19 = vadd.f32 %v5153_v20, %v5064_v63  ;;  %v9638_v43 = vld [vmem:[#allocation48_spill] sm:$0xff] }
 0x563   : > { %v5295_v53 = vadd.f32 %v5235_v3, %v4455_v39  ;;  %v5163_v31 = vpop.f32.mrf.mxu0  ;;  %v4472_v36 = vpop.f32.mrf.mxu2 }
 0x565   : > { %v5331_v18 = vadd.f32 %v9248_v33, %v5295_v53 }
 0x567   : > { %v5363_v27 = vadd.f32 %v5331_v18, %v9636_v45  ;;  %v5074_v42 = vpop.f32.mrf.mxu3 }
 0x568   : > { %v5237_v24 = vpop.f32.mrf.mxu1 }
 0x569   : > { %v5395_v38 = vmax.f32 %v5363_v27, 0.0  ;;  %v5238_v60 = vadd.f32 %v5237_v24, %v5149_v37  ;;  %v4465_v37 = vadd.f32 %v4464_v8, %v9180_v29  ;;  %v9639_v27 = vld [vmem:[#allocation15_spill] sm:$0xff]  ;;  %v4468_v29 = vadd.f32 %v4467_v17, %v9189_v2  ;;  %v9642_v17 = vld [vmem:[#allocation20_spill] sm:$0xff] }
 0x56a   : > { %v5164_v2 = vadd.f32 %v5163_v31, %v5074_v42 }
 0x56b   : > { %v7349_v44 = vpack.c.bf16 %v5395_v38, %v5394_v11  ;;  %5276 = vmatmul.bf16.gmra.mxu1 %v6870_v59  ;;  %v5296_v7 = vadd.f32 %v5238_v60, %v4458_v5  ;;  %v5165_v6 = vpop.f32.mrf.mxu0  ;;  %v4474_v32 = vpop.f32.mrf.mxu2 }
 0x56d   : > { %7401 = vst [vmem:[%s9268_s15 + $0x30] sm:$0xff] %v7349_v44   ;;  %v5332_v28 = vadd.f32 %v9248_v33, %v5296_v7 }
 0x56f   : > { %v5364_v41 = vadd.f32 %v5332_v28, %v9637_v56  ;;  %v5076_v7 = vpop.f32.mrf.mxu3  ;;  %v4470_v28 = vadd.f32 %v4469_v47, %v9195_v57  ;;  %v4473_v57 = vadd.f32 %v4472_v36, %v9199_v0 }
 0x570   : > { %v5239_v22 = vpop.f32.mrf.mxu1 }
 0x571   : > { %v5240_v40 = vadd.f32 %v5239_v22, %v5151_v48  ;;  %v5396_v50 = vmax.f32 %v5364_v41, 0.0  ;;  %v5161_v22 = vadd.f32 %v5160_v15, %v5071_v61 }
 0x573   : > { %v5297_v49 = vadd.f32 %v5240_v40, %v4460_v13  ;;  %v5168_v40 = vpop.f32.mrf.mxu0 }
 0x575   : > { %v5333_v12 = vadd.f32 %v9248_v33, %v5297_v49  ;;  %v4477_v49 = vpop.f32.mrf.mxu2 }
 0x577   : > { %v5365_v39 = vadd.f32 %v5333_v12, %v9638_v43  ;;  %v5079_v41 = vpop.f32.mrf.mxu3  ;;  %v9641_v12 = vld [vmem:[#allocation19_spill] sm:$0xff] }
 0x578   : > { %v5242_v26 = vpop.f32.mrf.mxu1  ;;  %v5169_v0 = vadd.f32 %v5168_v40, %v5079_v41 }
 0x579   : > { %v5397_v9 = vmax.f32 %v5365_v39, 0.0  ;;  %v5243_v3 = vadd.f32 %v5242_v26, %v5154_v19 }
 0x57b   : > { %v7354_v16 = vpack.c.bf16 %v5397_v9, %v5396_v50  ;;  %v5298_v53 = vadd.f32 %v5243_v3, %v4463_v4  ;;  %v5170_v9 = vpop.f32.mrf.mxu0 }
 0x57d   : > { %7402 = vst [vmem:[%s9268_s15 + $0x38] sm:$0xff] %v7354_v16   ;;  %v5334_v20 = vadd.f32 %v9248_v33, %v5298_v53  ;;  %v4479_v3 = vpop.f32.mrf.mxu2  ;;  %v5166_v53 = vadd.f32 %v5165_v6, %v5076_v7 }
 0x57e   : > { %v4480_v7 = vadd.f32 %v4479_v3, %v9209_v21 }
 0x57f   : > { %v5366_v59 = vadd.f32 %v5334_v20, %v9639_v27  ;;  %v5081_v16 = vpop.f32.mrf.mxu3  ;;  %v9643_v20 = vld [vmem:[#allocation23_spill] sm:$0xff] }
 0x580   : > { %v5244_v18 = vpop.f32.mrf.mxu1 }
 0x581   : > { %v5245_v63 = vadd.f32 %v5244_v18, %v5156_v46  ;;  %v5398_v60 = vmax.f32 %v5366_v59, 0.0  ;;  %v4475_v18 = vadd.f32 %v4474_v32, %v9202_v62  ;;  %v9644_v59 = vld [vmem:[#allocation24_spill] sm:$0xff]  ;;  %v4478_v62 = vadd.f32 %v4477_v49, %v9206_v25 }
 0x582   : > { %v9646_v49 = vld [vmem:[#allocation28_spill] sm:$0xff] }
 0x583   : > { %v5299_v45 = vadd.f32 %v5245_v63, %v4465_v37  ;;  %v5173_v36 = vpop.f32.mrf.mxu0 }
 0x585   : > { %v5335_v24 = vadd.f32 %v9248_v33, %v5299_v45  ;;  %v4482_v27 = vpop.f32.mrf.mxu2 }
 0x586   : > { %v4483_v21 = vadd.f32 %v4482_v27, %v9213_v30 }
 0x587   : > { %v5367_v11 = vadd.f32 %v5335_v24, %v9640_v55 }
 0x588   : > { %v5247_v38 = vpop.f32.mrf.mxu1 }
 0x589   : > { %v5399_v5 = vmax.f32 %v5367_v11, 0.0  ;;  %v5248_v44 = vadd.f32 %v5247_v38, %v5159_v14  ;;  %v5084_v14 = vpop.f32.mrf.mxu3 }
 0x58a   : > { %v5174_v25 = vadd.f32 %v5173_v36, %v5084_v14 }
 0x58b   : > { %v7359_v8 = vpack.c.bf16 %v5399_v5, %v5398_v60  ;;  %v5300_v48 = vadd.f32 %v5248_v44, %v4468_v29  ;;  %v5171_v5 = vadd.f32 %v5170_v9, %v5081_v16  ;;  %v5175_v29 = vpop.f32.mrf.mxu0 }
 0x58d   : > { %7403 = vst [vmem:[%s9268_s15 + $0x40] sm:$0xff] %v7359_v8   ;;  %v5336_v52 = vadd.f32 %v9248_v33, %v5300_v48  ;;  %v4484_v8 = vpop.f32.mrf.mxu2 }
 0x58f   : > { %v5368_v19 = vadd.f32 %v5336_v52, %v9641_v12  ;;  %v9645_v52 = vld [vmem:[#allocation27_spill] sm:$0xff] }
 0x590   : > { %v5249_v13 = vpop.f32.mrf.mxu1 }
 0x591   : > { %v5250_v35 = vadd.f32 %v5249_v13, %v5161_v22  ;;  %v5400_v15 = vmax.f32 %v5368_v19, 0.0  ;;  %v5086_v13 = vpop.f32.mrf.mxu3 }
 0x593   : > { %v5301_v56 = vadd.f32 %v5250_v35, %v4470_v28 }
 0x595   : > { %v5337_v43 = vadd.f32 %v9248_v33, %v5301_v56 }
 0x597   : > { %v5369_v39 = vadd.f32 %v5337_v43, %v9642_v17  ;;  %v4487_v17 = vpop.f32.mrf.mxu2 }
 0x598   : > { %v5252_v26 = vpop.f32.mrf.mxu1 }
 0x599   : > { %v5401_v61 = vmax.f32 %v5369_v39, 0.0  ;;  %v5253_v50 = vadd.f32 %v5252_v26, %v5164_v2  ;;  %v5178_v2 = vpop.f32.mrf.mxu0  ;;  %v5089_v26 = vpop.f32.mrf.mxu3 }
 0x59b   : > { %v7364_v47 = vpack.c.bf16 %v5401_v61, %v5400_v15  ;;  %v5302_v4 = vadd.f32 %v5253_v50, %v4473_v57  ;;  %v5176_v61 = vadd.f32 %v5175_v29, %v5086_v13  ;;  %v4485_v57 = vadd.f32 %v4484_v8, %v9216_v10 }
 0x59c   : > { %v4488_v10 = vadd.f32 %v4487_v17, %v9220_v1 }
 0x59d   : > { %7404 = vst [vmem:[%s9268_s15 + $0x48] sm:$0xff] %v7364_v47   ;;  %v5338_v31 = vadd.f32 %v9248_v33, %v5302_v4 }
 0x59f   : > { %v5370_v63 = vadd.f32 %v5338_v31, %v9643_v20  ;;  %v4489_v16 = vpop.f32.mrf.mxu2  ;;  %v5179_v31 = vadd.f32 %v5178_v2, %v5089_v26 }
 0x5a0   : > { %v5254_v46 = vpop.f32.mrf.mxu1 }
 0x5a1   : > { %v5255_v42 = vadd.f32 %v5254_v46, %v5166_v53  ;;  %v5402_v11 = vmax.f32 %v5370_v63, 0.0  ;;  %v5180_v4 = vpop.f32.mrf.mxu0  ;;  %v9647_v53 = vld [vmem:[#allocation31_spill] sm:$0xff] }
 0x5a3   : > { %v5303_v37 = vadd.f32 %v5255_v42, %v4475_v18  ;;  %v5091_v18 = vpop.f32.mrf.mxu3  ;;  %v9648_v42 = vld [vmem:[#allocation32_spill] sm:$0xff] }
 0x5a5   : > { %v5339_v45 = vadd.f32 %v9248_v33, %v5303_v37 }
 0x5a7   : > { %v5371_v24 = vadd.f32 %v5339_v45, %v9644_v59  ;;  %v5181_v59 = vadd.f32 %v5180_v4, %v5091_v18  ;;  %v4492_v14 = vpop.f32.mrf.mxu2 }
 0x5a8   : > { %v5257_v55 = vpop.f32.mrf.mxu1 }
 0x5a9   : > { %v5403_v38 = vmax.f32 %v5371_v24, 0.0  ;;  %v5258_v6 = vadd.f32 %v5257_v55, %v5169_v0  ;;  %v5183_v24 = vpop.f32.mrf.mxu0 }
 0x5ab   : > { %v7369_v32 = vpack.c.bf16 %v5403_v38, %v5402_v11  ;;  %v5304_v60 = vadd.f32 %v5258_v6, %v4478_v62  ;;  %v5094_v55 = vpop.f32.mrf.mxu3  ;;  %v4490_v38 = vadd.f32 %v4489_v16, %v9223_v34  ;;  %v4493_v34 = vadd.f32 %v4492_v14, %v9226_v23 }
 0x5ac   : > { %v5184_v1 = vadd.f32 %v5183_v24, %v5094_v55 }
 0x5ad   : > { %7405 = vst [vmem:[%s9268_s15 + $0x50] sm:$0xff] %v7369_v32   ;;  %v5340_v48 = vadd.f32 %v9248_v33, %v5304_v60  ;;  %v9649_v60 = vld [vmem:[#allocation37_spill] sm:$0xff] }
 0x5af   : > { %v5372_v35 = vadd.f32 %v5340_v48, %v9645_v52  ;;  %v4494_v52 = vpop.f32.mrf.mxu2 }
 0x5b0   : > { %v5259_v44 = vpop.f32.mrf.mxu1 }
 0x5b1   : > { %v5260_v22 = vadd.f32 %v5259_v44, %v5171_v5  ;;  %v5404_v12 = vmax.f32 %v5372_v35, 0.0  ;;  %v5185_v48 = vpop.f32.mrf.mxu0 }
 0x5b3   : > { %v5305_v28 = vadd.f32 %v5260_v22, %v4480_v7  ;;  %v9650_v7 = vld [vmem:[#allocation38_spill] sm:$0xff]  ;;  %v5096_v35 = vpop.f32.mrf.mxu3 }
 0x5b5   : > { %v5341_v40 = vadd.f32 %v9248_v33, %v5305_v28 }
 0x5b7   : > { %v5373_v56 = vadd.f32 %v5341_v40, %v9646_v49  ;;  %v5186_v49 = vadd.f32 %v5185_v48, %v5096_v35  ;;  %v4497_v17 = vpop.f32.mrf.mxu2 }
 0x5b8   : > { %v5262_v41 = vpop.f32.mrf.mxu1 }
 0x5b9   : > { %v5405_v19 = vmax.f32 %v5373_v56, 0.0  ;;  %v5263_v43 = vadd.f32 %v5262_v41, %v5174_v25  ;;  %v4495_v41 = vadd.f32 %v4494_v52, %v9229_v54 }
 0x5bb   : > { %v7374_v39 = vpack.c.bf16 %v5405_v19, %v5404_v12  ;;  %v5306_v15 = vadd.f32 %v5263_v43, %v4483_v21  ;;  %v5099_v43 = vpop.f32.mrf.mxu3  ;;  %v5188_v21 = vpop.f32.mrf.mxu0 }
 0x5bd   : > { %7406 = vst [vmem:[%s9268_s15 + $0x58] sm:$0xff] %v7374_v39   ;;  %v5342_v47 = vadd.f32 %v9248_v33, %v5306_v15  ;;  %v9651_v39 = vld [vmem:[#allocation43_spill] sm:$0xff]  ;;  %v5189_v15 = vadd.f32 %v5188_v21, %v5099_v43 }
 0x5bf   : > { %v5374_v46 = vadd.f32 %v5342_v47, %v9647_v53 }
 0x5c0   : > { %v5264_v50 = vpop.f32.mrf.mxu1 }
 0x5c1   : > { %v5265_v9 = vadd.f32 %v5264_v50, %v5176_v61  ;;  %v5406_v63 = vmax.f32 %v5374_v46, 0.0  ;;  %v9652_v61 = vld [vmem:[#allocation44_spill] sm:$0xff] }
 0x5c3   : > { %v5307_v3 = vadd.f32 %v5265_v9, %v4485_v57  ;;  %v5101_v16 = vpop.f32.mrf.mxu3  ;;  %v5190_v53 = vpop.f32.mrf.mxu0 }
 0x5c4   : > { %v5191_v18 = vadd.f32 %v5190_v53, %v5101_v16 }
 0x5c5   : > { %v5343_v30 = vadd.f32 %v9248_v33, %v5307_v3  ;;  %v4498_v3 = vadd.f32 %v4497_v17, %v9232_v58  ;;  %v9653_v58 = vld [vmem:[#allocation49_spill] sm:$0xff] }
 0x5c7   : > { %v5375_v37 = vadd.f32 %v5343_v30, %v9648_v42  ;;  %v4499_v30 = vpop.f32.mrf.mxu2 }
 0x5c8   : > { %v5267_v20 = vpop.f32.mrf.mxu1  ;;  %v4500_v42 = vadd.f32 %v4499_v30, %v9235_v51 }
 0x5c9   : > { %v5407_v45 = vmax.f32 %v5375_v37, 0.0  ;;  %v5268_v0 = vadd.f32 %v5267_v20, %v5179_v31 }
 0x5cb   : > { %v7379_v36 = vpack.c.bf16 %v5407_v45, %v5406_v63  ;;  %v5308_v27 = vadd.f32 %v5268_v0, %v4488_v10  ;;  %v9654_v10 = vld [vmem:[#allocation50_spill] sm:$0xff] }
 0x5cd   : > { %7407 = vst [vmem:[%s9268_s15 + $0x60] sm:$0xff] %v7379_v36   ;;  %v5344_v6 = vadd.f32 %v9248_v33, %v5308_v27 }
 0x5cf   : > { %v5376_v5 = vadd.f32 %v5344_v6, %v9649_v60 }
 0x5d0   : > { %v5269_v11 = vpop.f32.mrf.mxu1 }
 0x5d1   : > { %v5270_v62 = vadd.f32 %v5269_v11, %v5181_v59  ;;  %v5408_v22 = vmax.f32 %v5376_v5, 0.0 }
 0x5d3   : > { %v5309_v32 = vadd.f32 %v5270_v62, %v4490_v38 }
 0x5d5   : > { %v5345_v44 = vadd.f32 %v9248_v33, %v5309_v32 }
 0x5d7   : > { %v5377_v29 = vadd.f32 %v5345_v44, %v9650_v7 }
 0x5d8   : > { %v5272_v8 = vpop.f32.mrf.mxu1 }
 0x5d9   : > { %v5409_v13 = vmax.f32 %v5377_v29, 0.0  ;;  %v5273_v28 = vadd.f32 %v5272_v8, %v5184_v1 }
 0x5db   : > { %v7384_v40 = vpack.c.bf16 %v5409_v13, %v5408_v22  ;;  %v5310_v25 = vadd.f32 %v5273_v28, %v4493_v34 }
 0x5dd   : > { %7408 = vst [vmem:[%s9268_s15 + $0x68] sm:$0xff] %v7384_v40   ;;  %v5346_v12 = vadd.f32 %v9248_v33, %v5310_v25 }
 0x5df   : > { %v5378_v26 = vadd.f32 %v5346_v12, %v9651_v39 }
 0x5e0   : > { %v5274_v56 = vpop.f32.mrf.mxu1 }
 0x5e1   : > { %v5275_v19 = vadd.f32 %v5274_v56, %v5186_v49  ;;  %v5410_v47 = vmax.f32 %v5378_v26, 0.0 }
 0x5e3   : > { %v5311_v2 = vadd.f32 %v5275_v19, %v4495_v41 }
 0x5e5   : > { %v5347_v23 = vadd.f32 %v9248_v33, %v5311_v2 }
 0x5e7   : > { %v5379_v50 = vadd.f32 %v5347_v23, %v9652_v61 }
 0x5e8   : > { %v5277_v57 = vpop.f32.mrf.mxu1 }
 0x5e9   : > { %v5411_v9 = vmax.f32 %v5379_v50, 0.0  ;;  %v5278_v54 = vadd.f32 %v5277_v57, %v5189_v15 }
 0x5eb   : > { %v7389_v4 = vpack.c.bf16 %v5411_v9, %v5410_v47  ;;  %v5312_v46 = vadd.f32 %v5278_v54, %v4498_v3 }
 0x5ed   : > { %7409 = vst [vmem:[%s9268_s15 + $0x70] sm:$0xff] %v7389_v4   ;;  %v5348_v37 = vadd.f32 %v9248_v33, %v5312_v46 }
 0x5ef   : > { %v5380_v45 = vadd.f32 %v5348_v37, %v9653_v58 }
 0x5f0   : > { %v5279_v31 = vpop.f32.mrf.mxu1 }
 0x5f1   : > { %v5280_v20 = vadd.f32 %v5279_v31, %v5191_v18  ;;  %v5412_v51 = vmax.f32 %v5380_v45, 0.0 }
 0x5f3   : > { %v5313_v63 = vadd.f32 %v5280_v20, %v4500_v42 }
 0x5f5   : > { %v5349_v0 = vadd.f32 %v9248_v33, %v5313_v63 }
 0x5f7   : > { %v5381_v36 = vadd.f32 %v5349_v0, %v9654_v10 }
 0x5f9   : > { %v5413_v27 = vmax.f32 %v5381_v36, 0.0 }
 0x5fb   : > { %v7394_v59 = vpack.c.bf16 %v5413_v27, %v5412_v51 }
 0x5fd   : > { %7410 = vst [vmem:[%s9268_s15 + $0x78] sm:$0xff] %v7394_v59  }
 0x5fe   : > { %7619 = shalt.err (!%p7616_p10)
}
 0x5ff   : > { %s7669_s8 = smov 64   ;;  %s7670_s13 = smov 4  }
 0x600   : > { %7437 = dma.vmem_to_hbm [thread:$0]  (%p7773_p3), %s5492_s26, 2048, %s5494_s10, %s5479_s22, %s7669_s8, %s7669_s8, %s7670_s13  }
 0x601 PF: > { %s5508_s15 = sand.u32 1, %s7650_s18   ;;  %p9655_p12 = scmp.ge.s32.totalorder %s7662_s21, 2 }
 0x602   : > { %s5509_s27 = scalar_lea.sflag [#allocation5], %s5508_s15 }
 0x603   : > { %p7451_p13 = pnand %p9655_p12, %p7736_p6 }
 0x605   : > { %p7452_p0 = pneg %p7451_p13 }
 0x607   : > { %7645 = dma.done.wait (%p7452_p0), %s5509_s27, 2048  }
 0x608   : > { %7647 = vsyncadd (%p7452_p0), %s5509_s27, 4294965248  ;;  %p19_p5 = scmp.ge.s32.totalorder %s7763_s14, 4   ;;  %s9656_s18 = smov %s7654_s19 }
 0x609   : > { %s9657_s19 = smov %s7658_s20  ;;  %s9658_s20 = smov %s7779_s23 }
 0x60a   : > { %s9659_s21 = smov %s7763_s14  ;;  %21 = sbr.rel (!%p19_p5) target bundleno = 6 (0x6), region = 97 }
 0x60f   :  { %5515 = vsyncpa [#allocation4], 1 }
 0x610   :  { %5517 = vsyncpa [#allocation4 + $0x1], 1 }
 0x611   :  { %5518 = vsyncpa [#allocation7], 1 }
 0x612   :  { %5519 = vsyncpa [#allocation5], 1 }
 0x613   :  { %5521 = vsyncpa [#allocation5 + $0x1], 1 }

// kernel: tpu_custom_call.1
= control target key start
LH: loop header
LB: loop body
LE: loop exit
PB: predicated region body
PF: predicated region fallthrough
CT: control target
= control target key end

     0   :  { %10 = vsyncpa [#allocation4], 0  ;;  %s9470_s0 = inlined_call_operand.hbm [shape: bf16[2,16,16,128], index: 0, kind: input, shape index: {}]   ;;  %s9471_s1 = inlined_call_operand.hbm [shape: bf16[3,384,128], index: 1, kind: input, shape index: {}]   ;;  %s9472_s2 = inlined_call_operand.hbm [shape: bf16[3,384,128], index: 2, kind: input, shape index: {}]   ;;  %s9473_s3 = inlined_call_operand.vmem [shape: f32[1,128], index: 3, kind: input, shape index: {}]   ;;  %s9474_s4 = inlined_call_operand.vmem [shape: f32[1,128], index: 4, kind: input, shape index: {}]   ;;  %s9475_s5 = inlined_call_operand.hbm [shape: bf16[2,16,16,128], index: 5, kind: output, shape index: {}]  }
   0x1   :  { %12 = vsyncpa [#allocation4 + $0x1], 0 }
   0x2   :  { %13 = vsyncpa [#allocation7], 0 }
   0x3   :  { %14 = vsyncpa [#allocation5], 0 }
   0x4   :  { %16 = vsyncpa [#allocation5 + $0x1], 0  ;;  %s7701_s18 = smov 0   ;;  %s7703_s19 = smov 0  }
   0x5   :  { %s7705_s20 = smov 0   ;;  %s7707_s21 = smov 0  }
   0x6 LB: > { %s7722_s22 = sadd.s32 4294967295, %s7662_s21   ;;  %s5586_s23 = sadd.s32 4294967294, %s7662_s21   ;;  %s7662_s21 = sphi %s7707_s21, %s9659_s21   ;;  %s7658_s20 = sphi %s7705_s20, %s9658_s20   ;;  %s7654_s19 = sphi %s7703_s19, %s9657_s19   ;;  %s7650_s18 = sphi %s7701_s18, %s9656_s18  }
   0x7   : > { %p42_p0 = scmp.ne.s32.totalorder %s7654_s19, %s7650_s18  ;;  %p43_p1 = scmp.eq.s32.totalorder %s7722_s22, 0 }
   0x8   : > { %p150_p2 = scmp.eq.s32.totalorder %s7722_s22, 1  ;;  %p156_p3 = scmp.eq.s32.totalorder %s5586_s23, 1 }
   0x9   : > { %p7731_p4 = por %p43_p1, %p42_p0  ;;  %p5587_p5 = scmp.ge.s32.totalorder %s7662_s21, 1 }
   0xa   : > { %p7736_p6 = por %p156_p3, %p42_p0  ;;  %p163_p7 = scmp.lt.s32.totalorder %s7662_s21, 3 }
   0xb   : > { %s174_s28 = sshll.u32 %s9471_s1, 4  ;;  %s7664_s30 = smov [#allocation6]   ;;  %s175_s28 = int_to_ptr.hbm [resolvable:$true] %s174_s28 }
   0xc   : > { %p7744_p8 = pnand %p5587_p5, %p163_p7  ;;  %s176_s6 = sshll.u32 %s7664_s30, 4  ;;  %s177_s6 = int_to_ptr.vmem [resolvable:$true] %s176_s6 }
   0xd   : > { %s188_s9 = sshll.u32 %s9472_s2, 4  ;;  %s9476_s10 = smov 64   ;;  %s189_s9 = int_to_ptr.hbm [resolvable:$true] %s188_s9 }
   0xe   : > { %p7439_p9 = pneg %p7744_p8  ;;  %s7666_s11 = smov 4  }
   0xf   : > { %s7667_s12 = smov [#allocation8]   ;;  %s7763_s14 = sadd.s32 1, %s7662_s21  }
  0x10   : > { %p7440_p10 = pnand %p7439_p9, %p43_p1  ;;  %s190_s13 = sshll.u32 %s7667_s12, 4  ;;  %s191_s13 = int_to_ptr.vmem [resolvable:$true] %s190_s13 }
  0x11   : > { %s29_s15 = sadd.s32 1, %s7658_s20  ;;  %s26_s16 = ssub.s32 %s7662_s21, %s7763_s14 }
  0x12   : > { %7442 = dma.hbm_to_vmem [thread:$0]  (!%p7440_p10), %s175_s28, 9216, %s177_s6, [#allocation7], %s9476_s10, %s9476_s10, %s7666_s11  }
  0x13   : > { %7445 = dma.hbm_to_vmem [thread:$0]  (!%p7440_p10), %s189_s9, 9216, %s191_s13, [#allocation7], %s9476_s10, %s9476_s10, %s7666_s11  }
  0x14   : > { %p36_p12 = scmp.ne.s32.totalorder %s7658_s20, %s7654_s19  ;;  %p27_p13 = scmp.eq.s32.totalorder %s26_s16, 0 }
  0x15   : > { %p37_p0 = scmp.eq.s32.totalorder %s7662_s21, 0  ;;  %p7456_p5 = scmp.lt.s32.totalorder %s7662_s21, 2 }
  0x16   : > { %p7773_p3 = por %p150_p2, %p36_p12  ;;  %s210_s26 = sand.u32 1, %s7658_s20  }
  0x17   : > { %s7779_s23 = scalar_select %p27_p13, %s7658_s20, %s29_s15  }
  0x18   : > { %p38_p7 = por %p37_p0, %p36_p12  ;;  %s5591_s27 = sshll.u32 %s210_s26, 7 }
  0x19   : > { %s6972_s28 = sshll.u32 %s7662_s21, 7  ;;  %s214_s8 = scalar_lea.vmem [#allocation3], %s5591_s27 }
  0x1a   : > { %s219_s7 = scalar_lea.hbm %s9470_s0, %s6972_s28  ;;  %s222_s9 = sshll.u32 %s214_s8, 4  ;;  %s223_s9 = int_to_ptr.vmem [resolvable:$true] %s222_s9 }
  0x1b   : > { %s220_s12 = sshll.u32 %s219_s7, 4  ;;  %p7786_p2 = pnand %p7456_p5, %p38_p7  ;;  %s221_s12 = int_to_ptr.hbm [resolvable:$true] %s220_s12 }
  0x1c   : > { %s211_s15 = scalar_lea.sflag [#allocation4], %s210_s26  ;;  %s7562_s16 = sshra.s32 %s221_s12, 4  ;;  %s7563_s16 = int_to_ptr.hbm [resolvable:$true] %s7562_s16 }
  0x1d   : > { %s7564_s10 = scalar_lea.hbm %s7563_s16, 128  ;;  %p7566_p10 = pneg %p7786_p2 }
  0x1e   : > { %p7565_p9 = scmp.ne.s32.totalorder %s7563_s16, %s7564_s10  ;;  %s7569_s30 = scalar_lea.hbm %s9470_s0, 256 }
  0x1f   : > { %p7570_p0 = scmp.lt.s32.totalorder %s7563_s16, %s9470_s0  ;;  %p7571_p5 = scmp.lt.s32.totalorder %s7569_s30, %s7564_s10 }
  0x20   : > { %p7567_p12 = pnand %p7566_p10, %p7565_p9 }
  0x21   : > { %p7572_p7 = por %p7571_p5, %p7570_p0 }
  0x22   : > { %p7568_p13 = pneg %p7567_p12 }
  0x24   : > { %p7573_p11 = pnand %p7572_p7, %p7568_p13 }
  0x26   : > { %7576 = shalt.err (!%p7573_p11)
}
  0x27   : > { %s9536_s26 = smov 64   ;;  %234 = sbr.rel (%p7744_p8) target bundleno = 1537 (0x601), region = 40 }
  0x28   : > { %7449 = dma.hbm_to_vmem [thread:$0]  (!%p7786_p2), %s221_s12, 2048, %s223_s9, %s211_s15, %s9536_s26, %s9536_s26, %s7666_s11  }
  0x2c   : > { %s7806_s8 = sand.u32 1, %s7654_s19  }
  0x2d   : > { %s5595_s10 = sshll.u32 %s7806_s8, 7  ;;  %s237_s16 = scalar_lea.sflag [#allocation4], %s7806_s8 }
  0x2e   : > { %s7812_s28 = scalar_lea.vmem [#allocation3], %s5595_s10 }
  0x2f   : > { %7637 = dma.done.wait (%p7731_p4), %s237_s16, 2048  }
  0x30   : > { %7639 = vsyncadd (%p7731_p4), %s237_s16, 4294965248 }
  0x31   : > { %7641 = dma.done.wait (%p43_p1), [#allocation7], 18432  }
  0x32   : > { %7643 = vsyncadd (%p43_p1), [#allocation7], 4294948864  ;;  %v279_v0 = vlaneseq  ;;  %v7055_v1 = vld [vmem:[#allocation6 + $0xf8] sm:$0xff]  ;;  %v7054_v3 = vld [vmem:[#allocation6 + $0xf0] sm:$0xff]  ;;  %s9268_s15 = scalar_lea.vmem [#allocation9], %s5595_s10  ;;  %s7315_s27 = sshll.u32 %s7722_s22, 7 }
  0x33   : > { %v7063_v2 = vld [vmem:[#allocation6 + $0x138] sm:$0xff]  ;;  %1285 = vmatpush.bf16.msra.mxu0 %v7055_v1  ;;  %7411 = vmatpush.bf16.msra.mxu2 %v7055_v1  ;;  %v7062_v4 = vld [vmem:[#allocation6 + $0x130] sm:$0xff]  ;;  %v7053_v6 = vld [vmem:[#allocation6 + $0xe8] sm:$0xff]  ;;  %s5490_s7 = scalar_lea.hbm %s9475_s5, %s7315_s27  ;;  %s5491_s26 = sshll.u32 %s9268_s15, 4  ;;  %s5492_s26 = int_to_ptr.vmem [resolvable:$true] %s5491_s26 }
  0x34   : > { %1374 = vmatpush.bf16.msra.mxu1 %v7063_v2  ;;  %7419 = vmatpush.bf16.msra.mxu3 %v7063_v2  ;;  %v7822_v5 = vshrl.u32 %v279_v0, 7  ;;  %v294_v7 = vld [vmem:[%s7812_s28] sm:$0xf]  ;;  %v295_v8 = vld [vmem:[%s7812_s28 + $0x4] sm:$0xf]  ;;  %v7061_v13 = vld [vmem:[#allocation6 + $0x128] sm:$0xff] }
  0x35   : > { %v7826_v9 = vunpack.c.l.bf16 %v294_v7  ;;  %v7828_v10 = vunpack.c.l.bf16 %v295_v8  ;;  %624 = vst [vmem:[#allocation2 + $0x1c] sm:$0xf] %v294_v7  ;;  %v310_v11 = vld [vmem:[%s7812_s28 + $0x40] sm:$0xf]  ;;  %v311_v12 = vld [vmem:[%s7812_s28 + $0x44] sm:$0xf] }
  0x36   : > { %vm282_vm0 = vcmp.eq.s32.totalorder %v7822_v5, 0  ;;  %vm390_vm1 = vcmp.lt.s32.totalorder %v7822_v5, 1  ;;  %625 = vst [vmem:[#allocation2 + $0x28] sm:$0xf] %v295_v8  ;;  %v7834_v14 = vunpack.c.l.bf16 %v310_v11  ;;  %v7836_v15 = vunpack.c.l.bf16 %v311_v12  ;;  %v7052_v16 = vld [vmem:[#allocation6 + $0xe0] sm:$0xff]  ;;  %v7051_v42 = vld [vmem:[#allocation6 + $0xd8] sm:$0xff] }
  0x37   : > { %1286 = vmatpush.bf16.msra.mxu0 %v7054_v3  ;;  %7412 = vmatpush.bf16.msra.mxu2 %v7054_v3  ;;  %9537 = vst [vmem:[#allocation13_spill] sm:$0xff] %v7826_v9  ;;  %v358_v17 = vrot.slane %v7826_v9, 7  ;;  %v374_v18 = vrot.slane %v7828_v10, 7  ;;  %v296_v19 = vld [vmem:[%s7812_s28 + $0x8] sm:$0xf]  ;;  %v7060_v29 = vld [vmem:[#allocation6 + $0x120] sm:$0xff] }
  0x38   : > { %9538 = vst [vmem:[#allocation14_spill] sm:$0xff] %v7828_v10  ;;  %1375 = vmatpush.bf16.msra.mxu1 %v7062_v4  ;;  %7420 = vmatpush.bf16.msra.mxu3 %v7062_v4  ;;  %v366_v20 = vrot.slane %v7834_v14, 7  ;;  %v382_v21 = vrot.slane %v7836_v15, 7  ;;  %v297_v22 = vld [vmem:[%s7812_s28 + $0xc] sm:$0xf]  ;;  %v7844_v23 = vunpack.c.l.bf16 %v296_v19  ;;  %v7059_v43 = vld [vmem:[#allocation6 + $0x118] sm:$0xff] }
  0x39   : > { %9539 = vst [vmem:[#allocation15_spill] sm:$0xff] %v7834_v14  ;;  %v391_v24 = vsel %vm390_vm1, %v358_v17, %v374_v18  ;;  %v407_v25 = vsel %vm390_vm1, %v374_v18, %v358_v17  ;;  %v7850_v26 = vunpack.c.l.bf16 %v297_v22  ;;  %v312_v27 = vld [vmem:[%s7812_s28 + $0x48] sm:$0xf]  ;;  %v313_v28 = vld [vmem:[%s7812_s28 + $0x4c] sm:$0xf]  ;;  %v7050_v53 = vld [vmem:[#allocation6 + $0xd0] sm:$0xff] }
  0x3a   : > { %9540 = vst [vmem:[#allocation16_spill] sm:$0xff] %v7836_v15  ;;  %v427_v30 = vsel %vm282_vm0, 0.0, %v407_v25  ;;  %v561_v31 = vpack.c.bf16 %v391_v24, %v391_v24  ;;  %v399_v32 = vsel %vm390_vm1, %v366_v20, %v382_v21  ;;  %v415_v33 = vsel %vm390_vm1, %v382_v21, %v366_v20  ;;  %v298_v46 = vld [vmem:[%s7812_s28 + $0x10] sm:$0xf]  ;;  %v299_v57 = vld [vmem:[%s7812_s28 + $0x14] sm:$0xf] }
  0x3b   : > { %640 = vst [vmem:[#allocation2 + $0xdc] sm:$0xf] %v310_v11  ;;  %1287 = vmatpush.bf16.msra.mxu0 %v7053_v6  ;;  %7413 = vmatpush.bf16.msra.mxu2 %v7053_v6  ;;  %v560_v34 = vpack.c.bf16 %v427_v30, %v427_v30  ;;  %v443_v35 = vsel %vm282_vm0, 0.0, %v415_v33  ;;  %v577_v36 = vpack.c.bf16 %v399_v32, %v399_v32  ;;  %v359_v37 = vrot.slane %v7844_v23, 7  ;;  %v7058_v54 = vld [vmem:[#allocation6 + $0x110] sm:$0xff]  ;;  %v7049_v0 = vld [vmem:[#allocation6 + $0xc8] sm:$0xff] }
  0x3c   : > { %641 = vst [vmem:[#allocation2 + $0xe8] sm:$0xf] %v311_v12  ;;  %1376 = vmatpush.bf16.msra.mxu1 %v7061_v13  ;;  %7421 = vmatpush.bf16.msra.mxu3 %v7061_v13  ;;  %v576_v38 = vpack.c.bf16 %v443_v35, %v443_v35  ;;  %v375_v39 = vrot.slane %v7850_v26, 7  ;;  %v7864_v40 = vunpack.c.l.bf16 %v312_v27  ;;  %v7866_v41 = vunpack.c.l.bf16 %v313_v28  ;;  %v314_v63 = vld [vmem:[%s7812_s28 + $0x50] sm:$0xf]  ;;  %v7057_v3 = vld [vmem:[#allocation6 + $0x108] sm:$0xff] }
  0x3d   : > { %9541 = vst [vmem:[#allocation17_spill] sm:$0xff] %v7844_v23  ;;  %v7876_v50 = vunpack.c.l.bf16 %v298_v46  ;;  %v7886_v60 = vunpack.c.l.bf16 %v299_v57  ;;  %v7891_v2 = vunpack.c.l.bf16 %v314_v63  ;;  %v315_v4 = vld [vmem:[%s7812_s28 + $0x54] sm:$0xf]  ;;  %v7048_v6 = vld [vmem:[#allocation6 + $0xc0] sm:$0xff]  ;;  %v6976_v17 = vld [vmem:[#allocation2 + $0x1c] sm:$0xf] }
  0x3e   : > { %9542 = vst [vmem:[#allocation18_spill] sm:$0xff] %v7850_v26  ;;  %v392_v44 = vsel %vm390_vm1, %v359_v37, %v375_v39  ;;  %v408_v45 = vsel %vm390_vm1, %v375_v39, %v359_v37  ;;  %v367_v49 = vrot.slane %v7864_v40, 7  ;;  %v383_v52 = vrot.slane %v7866_v41, 7  ;;  %v5603_v18 = vld [vmem:[#allocation2 + $0x24] sm:$0xf0]  ;;  %s5493_s10 = sshll.u32 %s5490_s7, 4  ;;  %s5494_s10 = int_to_ptr.hbm [resolvable:$true] %s5493_s10 }
  0x3f   : > { %626 = vst [vmem:[#allocation2 + $0x34] sm:$0xf] %v296_v19  ;;  %1288 = vmatpush.bf16.msra.mxu0 %v7052_v16  ;;  %7414 = vmatpush.bf16.msra.mxu2 %v7052_v16  ;;  %v429_v47 = vsel %vm282_vm0, 0.0, %v408_v45  ;;  %v563_v48 = vpack.c.bf16 %v392_v44, %v392_v44  ;;  %v360_v61 = vrot.slane %v7876_v50, 7  ;;  %v376_v1 = vrot.slane %v7886_v60, 7  ;;  %v7071_v30 = vld [vmem:[#allocation6 + $0x178] sm:$0xff] }
  0x40   : > { %627 = vst [vmem:[#allocation2 + $0x40] sm:$0xf] %v297_v22  ;;  %1377 = vmatpush.bf16.msra.mxu1 %v7060_v29  ;;  %7422 = vmatpush.bf16.msra.mxu3 %v7060_v29  ;;  %v562_v51 = vpack.c.bf16 %v429_v47, %v429_v47  ;;  %v400_v55 = vsel %vm390_vm1, %v367_v49, %v383_v52  ;;  %v7898_v13 = vunpack.c.l.bf16 %v315_v4  ;;  %v368_v21 = vrot.slane %v7891_v2, 7  ;;  %v7056_v22 = vld [vmem:[#allocation6 + $0x100] sm:$0xff]  ;;  %v7070_v44 = vld [vmem:[#allocation6 + $0x170] sm:$0xff]  ;;  %s5479_s22 = scalar_lea.sflag [#allocation5], %s7806_s8 }
  0x41   : > { %593 = vst [vmem:[#allocation2 + $0x24] sm:$0xf] %v561_v31  ;;  %v416_v56 = vsel %vm390_vm1, %v383_v52, %v367_v49  ;;  %v579_v59 = vpack.c.bf16 %v400_v55, %v400_v55  ;;  %v393_v11 = vsel %vm390_vm1, %v360_v61, %v376_v1  ;;  %v409_v12 = vsel %vm390_vm1, %v376_v1, %v360_v61  ;;  %v7028_v31 = vld [vmem:[#allocation6 + $0x38] sm:$0xff]  ;;  %v7027_v45 = vld [vmem:[#allocation6 + $0x30] sm:$0xff]  ;;  %v7069_v52 = vld [vmem:[#allocation6 + $0x168] sm:$0xff]  ;;  %s7606_s16 = sshra.s32 %s5494_s10, 4  ;;  %s7607_s16 = int_to_ptr.hbm [resolvable:$true] %s7606_s16 }
  0x42   : > { %9543 = vst [vmem:[#allocation19_spill] sm:$0xff] %v7864_v40  ;;  %v445_v58 = vsel %vm282_vm0, 0.0, %v416_v56  ;;  %v431_v19 = vsel %vm282_vm0, 0.0, %v409_v12  ;;  %v565_v20 = vpack.c.bf16 %v393_v11, %v393_v11  ;;  %v301_v47 = vld [vmem:[%s7812_s28 + $0x1c] sm:$0xf]  ;;  %v7026_v55 = vld [vmem:[#allocation6 + $0x28] sm:$0xff]  ;;  %p7613_p11 = scmp.lt.s32.totalorder %s7607_s16, %s9475_s5 }
  0x43   : > { %9544 = vst [vmem:[#allocation20_spill] sm:$0xff] %v7866_v41  ;;  %1289 = vmatpush.bf16.msra.mxu0 %v7051_v42  ;;  %7415 = vmatpush.bf16.msra.mxu2 %v7051_v42  ;;  %v578_v62 = vpack.c.bf16 %v445_v58, %v445_v58  ;;  %v564_v25 = vpack.c.bf16 %v431_v19, %v431_v19  ;;  %v5699_v29 = vld [vmem:[#allocation2 + $0xe4] sm:$0xf0]  ;;  %v7926_v49 = vunpack.c.l.bf16 %v301_v47  ;;  %vm491_vm2 = vcmp.lt.s32.totalorder %v7822_v5, 7  ;;  %s7612_s11 = scalar_lea.hbm %s9475_s5, 256 }
  0x44   : > { %592 = vst [vmem:[#allocation2 + $0x18] sm:$0xf] %v560_v34  ;;  %1378 = vmatpush.bf16.msra.mxu1 %v7059_v43  ;;  %7423 = vmatpush.bf16.msra.mxu3 %v7059_v43  ;;  %v7036_v43 = vld [vmem:[#allocation6 + $0x78] sm:$0xff] }
  0x45   : > { %608 = vst [vmem:[#allocation2 + $0xd8] sm:$0xf] %v576_v38  ;;  %v7914_v38 = vor.u32 %v6976_v17, %v5603_v18  ;;  %v377_v56 = vrot.slane %v7926_v49, 7 }
  0x46   : > { %609 = vst [vmem:[#allocation2 + $0xe4] sm:$0xf] %v577_v36  ;;  %v6979_v12 = vld [vmem:[#allocation2 + $0x34] sm:$0xf] }
  0x47   : > { %9545 = vst [vmem:[#allocation21_spill] sm:$0xff] %v7876_v50  ;;  %1290 = vmatpush.bf16.msra.mxu0 %v7050_v53  ;;  %7416 = vmatpush.bf16.msra.mxu2 %v7050_v53 }
  0x48   : > { %642 = vst [vmem:[#allocation2 + $0xf4] sm:$0xf] %v312_v27  ;;  %1379 = vmatpush.bf16.msra.mxu1 %v7058_v54  ;;  %7424 = vmatpush.bf16.msra.mxu3 %v7058_v54  ;;  %v6977_v8 = vld [vmem:[#allocation2 + $0x20] sm:$0xf0]  ;;  %v384_v27 = vrot.slane %v7898_v13, 7 }
  0x49   : > { %595 = vst [vmem:[#allocation2 + $0x3c] sm:$0xf] %v563_v48  ;;  %v316_v54 = vld [vmem:[%s7812_s28 + $0x58] sm:$0xf] }
  0x4a   : > { %594 = vst [vmem:[#allocation2 + $0x30] sm:$0xf] %v562_v51  ;;  %v401_v32 = vsel %vm390_vm1, %v368_v21, %v384_v27  ;;  %v417_v33 = vsel %vm390_vm1, %v384_v27, %v368_v21  ;;  %v7035_v51 = vld [vmem:[#allocation6 + $0x70] sm:$0xff]  ;;  %v7932_v58 = vunpack.c.l.bf16 %v316_v54 }
  0x4b   : > { %643 = vst [vmem:[#allocation2 + $0x100] sm:$0xf] %v313_v28  ;;  %v5601_v7 = vld [vmem:[#allocation2 + $0x18] sm:$0xf]  ;;  %1291 = vmatpush.bf16.msra.mxu0 %v7049_v0  ;;  %7417 = vmatpush.bf16.msra.mxu2 %v7049_v0  ;;  %v7000_v28 = vld [vmem:[#allocation2 + $0xdc] sm:$0xf]  ;;  %v581_v37 = vpack.c.bf16 %v401_v32, %v401_v32 }
  0x4c   : > { %9546 = vst [vmem:[#allocation22_spill] sm:$0xff] %v7886_v60  ;;  %v5697_v16 = vld [vmem:[#allocation2 + $0xd8] sm:$0xf]  ;;  %1380 = vmatpush.bf16.msra.mxu1 %v7057_v3  ;;  %7425 = vmatpush.bf16.msra.mxu3 %v7057_v3  ;;  %v7908_v34 = vor.u32 %v6977_v8, %v5601_v7  ;;  %v447_v36 = vsel %vm282_vm0, 0.0, %v417_v33  ;;  %v7916_v39 = vor.u32 %v7000_v28, %v5699_v29  ;;  %v5615_v21 = vld [vmem:[#allocation2 + $0x3c] sm:$0xf0] }
  0x4d   : > { %628 = vst [vmem:[#allocation2 + $0x4c] sm:$0xf] %v298_v46  ;;  %v7001_v24 = vld [vmem:[#allocation2 + $0xe0] sm:$0xf0]  ;;  %v580_v42 = vpack.c.bf16 %v447_v36, %v447_v36  ;;  %v300_v46 = vld [vmem:[%s7812_s28 + $0x18] sm:$0xf]  ;;  %v7954_v29 = vor.u32 %v6979_v12, %v5615_v21 }
  0x4e   : > { %611 = vst [vmem:[#allocation2 + $0xfc] sm:$0xf] %v579_v59  ;;  %v7910_v35 = vor.u32 %v7001_v24, %v5697_v16  ;;  %v7922_v48 = vunpack.c.l.bf16 %v300_v46  ;;  %v7034_v0 = vld [vmem:[#allocation6 + $0x68] sm:$0xff]  ;;  %v303_v32 = vld [vmem:[%s7812_s28 + $0x24] sm:$0xf] }
  0x4f   : > { %9547 = vst [vmem:[#allocation23_spill] sm:$0xff] %v7891_v2  ;;  %1292 = vmatpush.bf16.msra.mxu0 %v7048_v6  ;;  %7418 = vmatpush.bf16.msra.mxu2 %v7048_v6  ;;  %v7068_v36 = vld [vmem:[#allocation6 + $0x160] sm:$0xff] }
  0x50   : > { %610 = vst [vmem:[#allocation2 + $0xf0] sm:$0xf] %v578_v62  ;;  %1381 = vmatpush.bf16.msra.mxu1 %v7056_v22  ;;  %7426 = vmatpush.bf16.msra.mxu3 %v7056_v22  ;;  %v361_v53 = vrot.slane %v7922_v48, 7  ;;  %v6980_v6 = vld [vmem:[#allocation2 + $0x38] sm:$0xf0] }
  0x51   : > { %629 = vst [vmem:[#allocation2 + $0x58] sm:$0xf] %v299_v57  ;;  %v317_v57 = vld [vmem:[%s7812_s28 + $0x5c] sm:$0xf]  ;;  %v5613_v8 = vld [vmem:[#allocation2 + $0x30] sm:$0xf] }
  0x52   : > { %9548 = vst [vmem:[#allocation24_spill] sm:$0xff] %v7898_v13  ;;  %1293 = vmatmul.bf16.vlgmr.msra.gmra.mxu0 %v7908_v34  ;;  %1333 = vmatmul.bf16.vlgmr.msra.gmra.mxu2 %v7910_v35  ;;  %v7934_v59 = vunpack.c.l.bf16 %v317_v57  ;;  %v394_v61 = vsel %vm390_vm1, %v361_v53, %v377_v56  ;;  %v410_v62 = vsel %vm390_vm1, %v377_v56, %v361_v53  ;;  %v7003_v22 = vld [vmem:[#allocation2 + $0xf4] sm:$0xf]  ;;  %v5711_v24 = vld [vmem:[#allocation2 + $0xfc] sm:$0xf0] }
  0x53   : > { %644 = vst [vmem:[#allocation2 + $0x10c] sm:$0xf] %v314_v63  ;;  %1463 = vmatpush.bf16.msrb.mxu2 %v7071_v30  ;;  %1382 = vmatmul.bf16.vlgmr.msra.gmra.mxu1 %v7914_v38  ;;  %v369_v63 = vrot.slane %v7932_v58, 7  ;;  %v433_v1 = vsel %vm282_vm0, 0.0, %v410_v62  ;;  %v567_v3 = vpack.c.bf16 %v394_v61, %v394_v61  ;;  %v7950_v27 = vor.u32 %v6980_v6, %v5613_v8 }
  0x54   : > { %645 = vst [vmem:[#allocation2 + $0x118] sm:$0xf] %v315_v4  ;;  %1712 = vmatpush.bf16.msrb.mxu3 %v7028_v31  ;;  %1801 = vmatpush.bf16.msrb.mxu0 %v7036_v43  ;;  %v385_v4 = vrot.slane %v7934_v59, 7  ;;  %v566_v7 = vpack.c.bf16 %v433_v1, %v433_v1  ;;  %v7956_v30 = vor.u32 %v7003_v22, %v5711_v24  ;;  %v302_v31 = vld [vmem:[%s7812_s28 + $0x20] sm:$0xf]  ;;  %v7966_v43 = vunpack.c.l.bf16 %v303_v32 }
  0x55   : > { %597 = vst [vmem:[#allocation2 + $0x54] sm:$0xf] %v565_v20  ;;  %1422 = vmatmul.bf16.vlgmr.msra.gmra.mxu3 %v7916_v39  ;;  %v7004_v11 = vld [vmem:[#allocation2 + $0xf8] sm:$0xf0]  ;;  %v7962_v33 = vunpack.c.l.bf16 %v302_v31  ;;  %v304_v24 = vld [vmem:[%s7812_s28 + $0x28] sm:$0xf] }
  0x56   : > { %596 = vst [vmem:[#allocation2 + $0x48] sm:$0xf] %v564_v25  ;;  %v402_v16 = vsel %vm390_vm1, %v369_v63, %v385_v4  ;;  %v418_v17 = vsel %vm390_vm1, %v385_v4, %v369_v63 }
  0x57   : > { %613 = vst [vmem:[#allocation2 + $0x114] sm:$0xf] %v581_v37  ;;  %1464 = vmatpush.bf16.msrb.mxu2 %v7070_v44  ;;  %v5709_v18 = vld [vmem:[#allocation2 + $0xf0] sm:$0xf]  ;;  %v449_v19 = vsel %vm282_vm0, 0.0, %v418_v17  ;;  %v583_v20 = vpack.c.bf16 %v402_v16, %v402_v16  ;;  %v362_v44 = vrot.slane %v7962_v33, 7 }
  0x58   : > { %612 = vst [vmem:[#allocation2 + $0x108] sm:$0xf] %v580_v42  ;;  %1713 = vmatpush.bf16.msrb.mxu3 %v7027_v45  ;;  %1802 = vmatpush.bf16.msrb.mxu0 %v7035_v51  ;;  %v582_v25 = vpack.c.bf16 %v449_v19, %v449_v19  ;;  %v7952_v28 = vor.u32 %v7004_v11, %v5709_v18  ;;  %v7025_v37 = vld [vmem:[#allocation6 + $0x20] sm:$0xff]  ;;  %v5627_v12 = vld [vmem:[#allocation2 + $0x54] sm:$0xf0] }
  0x59   : > { %9549 = vst [vmem:[#allocation25_spill] sm:$0xff] %v7922_v48  ;;  %v7033_v42 = vld [vmem:[#allocation6 + $0x60] sm:$0xff] }
  0x5a   : > { %630 = vst [vmem:[#allocation2 + $0x64] sm:$0xf] %v300_v46  ;;  %v318_v45 = vld [vmem:[%s7812_s28 + $0x60] sm:$0xf]  ;;  %v378_v46 = vrot.slane %v7966_v43, 7 }
  0x5b   : > { %9550 = vst [vmem:[#allocation26_spill] sm:$0xff] %v7926_v49  ;;  %1465 = vmatpush.bf16.msrb.mxu2 %v7069_v52  ;;  %v7972_v51 = vunpack.c.l.bf16 %v318_v45  ;;  %v7006_v16 = vld [vmem:[#allocation2 + $0x10c] sm:$0xf]  ;;  %v5723_v17 = vld [vmem:[#allocation2 + $0x114] sm:$0xf0] }
  0x5c   : > { %631 = vst [vmem:[#allocation2 + $0x70] sm:$0xf] %v301_v47  ;;  %1714 = vmatpush.bf16.msrb.mxu3 %v7026_v55  ;;  %1803 = vmatpush.bf16.msrb.mxu0 %v7034_v0  ;;  %v319_v47 = vld [vmem:[%s7812_s28 + $0x64] sm:$0xf]  ;;  %v395_v53 = vsel %vm390_vm1, %v362_v44, %v378_v46  ;;  %v7996_v22 = vor.u32 %v7006_v16, %v5723_v17 }
  0x5d   : > { %9551 = vst [vmem:[#allocation27_spill] sm:$0xff] %v7932_v58  ;;  %v7974_v52 = vunpack.c.l.bf16 %v319_v47  ;;  %v370_v55 = vrot.slane %v7972_v51, 7  ;;  %v6983_v62 = vld [vmem:[#allocation2 + $0x50] sm:$0xf0]  ;;  %v5625_v0 = vld [vmem:[#allocation2 + $0x48] sm:$0xf] }
  0x5e   : > { %646 = vst [vmem:[#allocation2 + $0x124] sm:$0xf] %v316_v54  ;;  %v411_v54 = vsel %vm390_vm1, %v378_v46, %v362_v44  ;;  %v7007_v1 = vld [vmem:[#allocation2 + $0x110] sm:$0xf0]  ;;  %v7990_v19 = vor.u32 %v6983_v62, %v5625_v0 }
  0x5f   : > { %9552 = vst [vmem:[#allocation28_spill] sm:$0xff] %v7934_v59  ;;  %1466 = vmatpush.bf16.msrb.mxu2 %v7068_v36  ;;  %v435_v56 = vsel %vm282_vm0, 0.0, %v411_v54  ;;  %v386_v61 = vrot.slane %v7974_v52, 7  ;;  %v7024_v36 = vld [vmem:[#allocation6 + $0x18] sm:$0xff] }
  0x60   : > { %647 = vst [vmem:[#allocation2 + $0x130] sm:$0xf] %v317_v57  ;;  %1715 = vmatpush.bf16.msrb.mxu3 %v7025_v37  ;;  %1804 = vmatpush.bf16.msrb.mxu0 %v7033_v42  ;;  %v569_v57 = vpack.c.bf16 %v395_v53, %v395_v53  ;;  %v568_v63 = vpack.c.bf16 %v435_v56, %v435_v56  ;;  %v7032_v37 = vld [vmem:[#allocation6 + $0x58] sm:$0xff] }
  0x61   : > { %599 = vst [vmem:[#allocation2 + $0x6c] sm:$0xf] %v567_v3  ;;  %v6982_v3 = vld [vmem:[#allocation2 + $0x4c] sm:$0xf]  ;;  %v403_v4 = vsel %vm390_vm1, %v370_v55, %v386_v61  ;;  %v419_v6 = vsel %vm390_vm1, %v386_v61, %v370_v55 }
  0x62   : > { %598 = vst [vmem:[#allocation2 + $0x60] sm:$0xf] %v566_v7  ;;  %1298 = vmatmul.bf16.gmra.mxu0 %v7950_v27  ;;  %1338 = vmatmul.bf16.gmra.mxu2 %v7952_v28  ;;  %v5721_v7 = vld [vmem:[#allocation2 + $0x108] sm:$0xf]  ;;  %v451_v8 = vsel %vm282_vm0, 0.0, %v419_v6  ;;  %v585_v11 = vpack.c.bf16 %v403_v4, %v403_v4  ;;  %v7994_v21 = vor.u32 %v6982_v3, %v5627_v12 }
  0x63   : > { %615 = vst [vmem:[#allocation2 + $0x12c] sm:$0xf] %v583_v20  ;;  %1387 = vmatmul.bf16.gmra.mxu1 %v7954_v29  ;;  %v584_v18 = vpack.c.bf16 %v451_v8, %v451_v8  ;;  %v7992_v20 = vor.u32 %v7007_v1, %v5721_v7  ;;  %v6985_v6 = vld [vmem:[#allocation2 + $0x64] sm:$0xf]  ;;  %v5639_v17 = vld [vmem:[#allocation2 + $0x6c] sm:$0xf0] }
  0x64   : > { %614 = vst [vmem:[#allocation2 + $0x120] sm:$0xf] %v582_v25  ;;  %v305_v25 = vld [vmem:[%s7812_s28 + $0x2c] sm:$0xf]  ;;  %1716 = vmatpush.bf16.msrb.mxu3 %v7024_v36  ;;  %1805 = vmatpush.bf16.msrb.mxu0 %v7032_v37  ;;  %v8034_v37 = vor.u32 %v6985_v6, %v5639_v17 }
  0x65   : > { %9553 = vst [vmem:[#allocation29_spill] sm:$0xff] %v7962_v33  ;;  %1427 = vmatmul.bf16.gmra.mxu3 %v7956_v30  ;;  %v8006_v42 = vunpack.c.l.bf16 %v305_v25 }
  0x66   : > { %632 = vst [vmem:[#allocation2 + $0x7c] sm:$0xf] %v302_v31  ;;  %v8002_v31 = vunpack.c.l.bf16 %v304_v24 }
  0x67   : > { %9554 = vst [vmem:[#allocation30_spill] sm:$0xff] %v7966_v43  ;;  %v379_v46 = vrot.slane %v8006_v42, 7 }
  0x68   : > { %633 = vst [vmem:[#allocation2 + $0x88] sm:$0xf] %v303_v32  ;;  %v7067_v32 = vld [vmem:[#allocation6 + $0x158] sm:$0xff]  ;;  %v363_v44 = vrot.slane %v8002_v31, 7 }
  0x69   : > { %9555 = vst [vmem:[#allocation31_spill] sm:$0xff] %v7972_v51  ;;  %1467 = vmatpush.bf16.msrb.mxu2 %v7067_v32  ;;  %v6986_v0 = vld [vmem:[#allocation2 + $0x68] sm:$0xf0]  ;;  %v5637_v3 = vld [vmem:[#allocation2 + $0x60] sm:$0xf] }
  0x6a   : > { %9556 = vst [vmem:[#allocation32_spill] sm:$0xff] %v7974_v52  ;;  %v396_v55 = vsel %vm390_vm1, %v363_v44, %v379_v46  ;;  %v412_v56 = vsel %vm390_vm1, %v379_v46, %v363_v44  ;;  %v7010_v4 = vld [vmem:[#allocation2 + $0x128] sm:$0xf0]  ;;  %v8030_v32 = vor.u32 %v6986_v0, %v5637_v3  ;;  %v307_v46 = vld [vmem:[%s7812_s28 + $0x34] sm:$0xf] }
  0x6b   : > { %648 = vst [vmem:[#allocation2 + $0x13c] sm:$0xf] %v318_v45  ;;  %v320_v45 = vld [vmem:[%s7812_s28 + $0x68] sm:$0xf]  ;;  %v437_v61 = vsel %vm282_vm0, 0.0, %v412_v56  ;;  %v571_v62 = vpack.c.bf16 %v396_v55, %v396_v55  ;;  %v7066_v55 = vld [vmem:[#allocation6 + $0x150] sm:$0xff] }
  0x6c   : > { %649 = vst [vmem:[#allocation2 + $0x148] sm:$0xf] %v319_v47  ;;  %v321_v47 = vld [vmem:[%s7812_s28 + $0x6c] sm:$0xf]  ;;  %v8012_v53 = vunpack.c.l.bf16 %v320_v45  ;;  %v570_v1 = vpack.c.bf16 %v437_v61, %v437_v61  ;;  %v7023_v56 = vld [vmem:[#allocation6 + $0x10] sm:$0xff]  ;;  %v8046_v61 = vunpack.c.l.bf16 %v307_v46 }
  0x6d   : > { %601 = vst [vmem:[#allocation2 + $0x84] sm:$0xf] %v569_v57  ;;  %v8014_v54 = vunpack.c.l.bf16 %v321_v47  ;;  %1468 = vmatpush.bf16.msrb.mxu2 %v7066_v55  ;;  %1717 = vmatpush.bf16.msrb.mxu3 %v7023_v56 }
  0x6e   : > { %600 = vst [vmem:[#allocation2 + $0x78] sm:$0xf] %v568_v63  ;;  %v371_v57 = vrot.slane %v8012_v53, 7  ;;  %v380_v0 = vrot.slane %v8046_v61, 7 }
  0x6f   : > { %617 = vst [vmem:[#allocation2 + $0x144] sm:$0xf] %v585_v11  ;;  %v387_v63 = vrot.slane %v8014_v54, 7  ;;  %v5733_v11 = vld [vmem:[#allocation2 + $0x120] sm:$0xf] }
  0x70   : > { %9557 = vst [vmem:[#allocation33_spill] sm:$0xff] %v7992_v20  ;;  %v8032_v36 = vor.u32 %v7010_v4, %v5733_v11 }
  0x71   : > { %616 = vst [vmem:[#allocation2 + $0x138] sm:$0xf] %v584_v18  ;;  %v404_v7 = vsel %vm390_vm1, %v371_v57, %v387_v63  ;;  %v420_v8 = vsel %vm390_vm1, %v387_v63, %v371_v57  ;;  %v7009_v18 = vld [vmem:[#allocation2 + $0x124] sm:$0xf]  ;;  %v322_v63 = vld [vmem:[%s7812_s28 + $0x70] sm:$0xf] }
  0x72   : > { %9558 = vst [vmem:[#allocation34_spill] sm:$0xff] %v7996_v22  ;;  %1303 = vmatmul.bf16.gmra.mxu0 %v7990_v19  ;;  %1343 = vmatmul.bf16.gmra.mxu2 %v7992_v20  ;;  %v453_v12 = vsel %vm282_vm0, 0.0, %v420_v8  ;;  %v587_v16 = vpack.c.bf16 %v404_v7, %v404_v7  ;;  %v7031_v57 = vld [vmem:[#allocation6 + $0x50] sm:$0xff]  ;;  %v8052_v3 = vunpack.c.l.bf16 %v322_v63 }
  0x73   : > { %9559 = vst [vmem:[#allocation35_spill] sm:$0xff] %v8002_v31  ;;  %1392 = vmatmul.bf16.gmra.mxu1 %v7994_v21  ;;  %1806 = vmatpush.bf16.msrb.mxu0 %v7031_v57 }
  0x74   : > { %634 = vst [vmem:[#allocation2 + $0x94] sm:$0xf] %v304_v24  ;;  %v5735_v24 = vld [vmem:[#allocation2 + $0x12c] sm:$0xf0]  ;;  %v372_v8 = vrot.slane %v8052_v3, 7 }
  0x75   : > { %1432 = vmatmul.bf16.gmra.mxu3 %v7996_v22  ;;  %9560 = vst [vmem:[#allocation36_spill] sm:$0xff] %v8006_v42  ;;  %v8036_v44 = vor.u32 %v7009_v18, %v5735_v24  ;;  %v6989_v17 = vld [vmem:[#allocation2 + $0x80] sm:$0xf0]  ;;  %v5649_v24 = vld [vmem:[#allocation2 + $0x78] sm:$0xf] }
  0x76   : > { %635 = vst [vmem:[#allocation2 + $0xa0] sm:$0xf] %v305_v25  ;;  %v586_v25 = vpack.c.bf16 %v453_v12, %v453_v12 }
  0x77   : > { %9561 = vst [vmem:[#allocation37_spill] sm:$0xff] %v8012_v53 }
  0x78   : > { %9562 = vst [vmem:[#allocation38_spill] sm:$0xff] %v8014_v54  ;;  %v5745_v56 = vld [vmem:[#allocation2 + $0x138] sm:$0xf] }
  0x79   : > { %650 = vst [vmem:[#allocation2 + $0x154] sm:$0xf] %v320_v45  ;;  %v306_v45 = vld [vmem:[%s7812_s28 + $0x30] sm:$0xf] }
  0x7a   : > { %651 = vst [vmem:[#allocation2 + $0x160] sm:$0xf] %v321_v47  ;;  %v8042_v47 = vunpack.c.l.bf16 %v306_v45 }
  0x7b   : > { %603 = vst [vmem:[#allocation2 + $0x9c] sm:$0xf] %v571_v62 }
  0x7c   : > { %602 = vst [vmem:[#allocation2 + $0x90] sm:$0xf] %v570_v1  ;;  %v364_v62 = vrot.slane %v8042_v47, 7  ;;  %v323_v1 = vld [vmem:[%s7812_s28 + $0x74] sm:$0xf] }
  0x7d   : > { %619 = vst [vmem:[#allocation2 + $0x15c] sm:$0xf] %v587_v16  ;;  %v8054_v4 = vunpack.c.l.bf16 %v323_v1 }
  0x7e   : > { %9563 = vst [vmem:[#allocation39_spill] sm:$0xff] %v8032_v36  ;;  %v397_v6 = vsel %vm390_vm1, %v364_v62, %v380_v0  ;;  %v413_v7 = vsel %vm390_vm1, %v380_v0, %v364_v62  ;;  %v7012_v0 = vld [vmem:[#allocation2 + $0x13c] sm:$0xf] }
  0x7f   : > { %618 = vst [vmem:[#allocation2 + $0x150] sm:$0xf] %v586_v25  ;;  %v439_v11 = vsel %vm282_vm0, 0.0, %v413_v7  ;;  %v573_v12 = vpack.c.bf16 %v397_v6, %v397_v6  ;;  %v388_v16 = vrot.slane %v8054_v4, 7  ;;  %v7013_v25 = vld [vmem:[#allocation2 + $0x140] sm:$0xf0]  ;;  %v8070_v7 = vor.u32 %v6989_v17, %v5649_v24 }
  0x80   : > { %9564 = vst [vmem:[#allocation40_spill] sm:$0xff] %v8036_v44  ;;  %v572_v18 = vpack.c.bf16 %v439_v11, %v439_v11  ;;  %v8072_v11 = vor.u32 %v7013_v25, %v5745_v56  ;;  %v7065_v17 = vld [vmem:[#allocation6 + $0x148] sm:$0xff] }
  0x81   : > { %9565 = vst [vmem:[#allocation41_spill] sm:$0xff] %v8042_v47  ;;  %v421_v55 = vsel %vm390_vm1, %v388_v16, %v372_v8  ;;  %v7022_v24 = vld [vmem:[#allocation6 + $0x8] sm:$0xff]  ;;  %1469 = vmatpush.bf16.msrb.mxu2 %v7065_v17 }
  0x82   : > { %1308 = vmatmul.bf16.gmra.mxu0 %v8030_v32  ;;  %1348 = vmatmul.bf16.gmra.mxu2 %v8032_v36  ;;  %636 = vst [vmem:[#allocation2 + $0xac] sm:$0xf] %v306_v45  ;;  %v6988_v45 = vld [vmem:[#allocation2 + $0x7c] sm:$0xf]  ;;  %v455_v57 = vsel %vm282_vm0, 0.0, %v421_v55  ;;  %v7044_v55 = vld [vmem:[#allocation6 + $0xb8] sm:$0xff] }
  0x83   : > { %1397 = vmatmul.bf16.gmra.mxu1 %v8034_v37  ;;  %9566 = vst [vmem:[#allocation42_spill] sm:$0xff] %v8046_v61  ;;  %v588_v6 = vpack.c.bf16 %v455_v57, %v455_v57  ;;  %v7030_v25 = vld [vmem:[#allocation6 + $0x48] sm:$0xff]  ;;  %v324_v57 = vld [vmem:[%s7812_s28 + $0x78] sm:$0xf]  ;;  %1718 = vmatpush.bf16.msrb.mxu3 %v7022_v24 }
  0x84   : > { %637 = vst [vmem:[#allocation2 + $0xb8] sm:$0xf] %v307_v46  ;;  %v405_v46 = vsel %vm390_vm1, %v372_v8, %v388_v16  ;;  %v308_v16 = vld [vmem:[%s7812_s28 + $0x38] sm:$0xf]  ;;  %1807 = vmatpush.bf16.msrb.mxu0 %v7030_v25  ;;  %1890 = vmatpush.bf16.msrb.mxu1 %v7044_v55  ;;  %v6992_v25 = vld [vmem:[#allocation2 + $0x98] sm:$0xf0] }
  0x85   : > { %1437 = vmatmul.bf16.gmra.mxu3 %v8036_v44  ;;  %9567 = vst [vmem:[#allocation43_spill] sm:$0xff] %v8052_v3  ;;  %v589_v62 = vpack.c.bf16 %v405_v46, %v405_v46  ;;  %v8082_v46 = vunpack.c.l.bf16 %v308_v16  ;;  %v7016_v36 = vld [vmem:[#allocation2 + $0x158] sm:$0xf0] }
  0x86   : > { %9568 = vst [vmem:[#allocation44_spill] sm:$0xff] %v8054_v4 }
  0x87   : > { %652 = vst [vmem:[#allocation2 + $0x16c] sm:$0xf] %v322_v63  ;;  %v5651_v63 = vld [vmem:[#allocation2 + $0x84] sm:$0xf0]  ;;  %v365_v56 = vrot.slane %v8082_v46, 7 }
  0x88   : > { %653 = vst [vmem:[#allocation2 + $0x178] sm:$0xf] %v323_v1  ;;  %v5747_v1 = vld [vmem:[#allocation2 + $0x144] sm:$0xf0] }
  0x89   : > { %605 = vst [vmem:[#allocation2 + $0xb4] sm:$0xf] %v573_v12  ;;  %v8074_v12 = vor.u32 %v6988_v45, %v5651_v63  ;;  %v8076_v8 = vor.u32 %v7012_v0, %v5747_v1  ;;  %v325_v63 = vld [vmem:[%s7812_s28 + $0x7c] sm:$0xf]  ;;  %v8092_v0 = vunpack.c.l.bf16 %v324_v57 }
  0x8a   : > { %604 = vst [vmem:[#allocation2 + $0xa8] sm:$0xf] %v572_v18  ;;  %v309_v18 = vld [vmem:[%s7812_s28 + $0x3c] sm:$0xf]  ;;  %v8094_v1 = vunpack.c.l.bf16 %v325_v63  ;;  %s7608_s28 = scalar_lea.hbm %s7607_s16, 128 }
  0x8b   : > { %621 = vst [vmem:[#allocation2 + $0x174] sm:$0xf] %v589_v62  ;;  %v8086_v45 = vunpack.c.l.bf16 %v309_v18  ;;  %p7609_p1 = scmp.ne.s32.totalorder %s7607_s16, %s7608_s28  ;;  %p7614_p2 = scmp.lt.s32.totalorder %s7612_s11, %s7608_s28 }
  0x8c   : > { %9569 = vst [vmem:[#allocation45_spill] sm:$0xff] %v8072_v11 }
  0x8d   : > { %620 = vst [vmem:[#allocation2 + $0x168] sm:$0xf] %v588_v6  ;;  %v381_v62 = vrot.slane %v8086_v45, 7  ;;  %p7610_p4 = pnand %p7609_p1, %p7773_p3  ;;  %p7615_p9 = por %p7614_p2, %p7613_p11 }
  0x8e   : > { %9570 = vst [vmem:[#allocation46_spill] sm:$0xff] %v8076_v8 }
  0x8f   : > { %9571 = vst [vmem:[#allocation47_spill] sm:$0xff] %v8082_v46  ;;  %v398_v6 = vsel %vm390_vm1, %v365_v56, %v381_v62  ;;  %p7611_p8 = pneg %p7610_p4 }
  0x90   : > { %638 = vst [vmem:[#allocation2 + $0xc4] sm:$0xf] %v308_v16  ;;  %v414_v16 = vsel %vm390_vm1, %v381_v62, %v365_v56  ;;  %v575_v24 = vpack.c.bf16 %v398_v6, %v398_v6  ;;  %v5757_v62 = vld [vmem:[#allocation2 + $0x150] sm:$0xf] }
  0x91   : > { %9572 = vst [vmem:[#allocation48_spill] sm:$0xff] %v8086_v45  ;;  %v441_v17 = vsel %vm282_vm0, 0.0, %v414_v16  ;;  %v5663_v16 = vld [vmem:[#allocation2 + $0x9c] sm:$0xf0]  ;;  %p7616_p10 = pnand %p7615_p9, %p7611_p8 }
  0x92   : > { %1313 = vmatmul.bf16.gmra.mxu0 %v8070_v7  ;;  %1353 = vmatmul.bf16.gmra.mxu2 %v8072_v11  ;;  %639 = vst [vmem:[#allocation2 + $0xd0] sm:$0xf] %v309_v18  ;;  %v373_v18 = vrot.slane %v8092_v0, 7  ;;  %v389_v11 = vrot.slane %v8094_v1, 7  ;;  %v574_v55 = vpack.c.bf16 %v441_v17, %v441_v17 }
  0x93   : > { %1402 = vmatmul.bf16.gmra.mxu1 %v8074_v12  ;;  %9573 = vst [vmem:[#allocation49_spill] sm:$0xff] %v8092_v0  ;;  %v5759_v0 = vld [vmem:[#allocation2 + $0x15c] sm:$0xf0] }
  0x94   : > { %9574 = vst [vmem:[#allocation50_spill] sm:$0xff] %v8094_v1  ;;  %v406_v44 = vsel %vm390_vm1, %v373_v18, %v389_v11  ;;  %v422_v56 = vsel %vm390_vm1, %v389_v11, %v373_v18  ;;  %v7015_v1 = vld [vmem:[#allocation2 + $0x154] sm:$0xf]  ;;  %v459_v18 = vrot.slane %v7826_v9, 1  ;;  %v7668_v9 = vmov 0  }
  0x95   : > { %1442 = vmatmul.bf16.gmra.mxu3 %v8076_v8  ;;  %654 = vst [vmem:[#allocation2 + $0x184] sm:$0xf] %v324_v57  ;;  %v5661_v8 = vld [vmem:[#allocation2 + $0x90] sm:$0xf]  ;;  %v6991_v57 = vld [vmem:[#allocation2 + $0x94] sm:$0xf]  ;;  %v591_v6 = vpack.c.bf16 %v406_v44, %v406_v44  ;;  %v8116_v20 = vor.u32 %v7015_v1, %v5759_v0 }
  0x96   : > { %655 = vst [vmem:[#allocation2 + $0x190] sm:$0xf] %v325_v63  ;;  %v457_v63 = vsel %vm282_vm0, 0.0, %v422_v56  ;;  %v8110_v4 = vor.u32 %v6992_v25, %v5661_v8  ;;  %v8114_v3 = vor.u32 %v6991_v57, %v5663_v16  ;;  %v7043_v44 = vld [vmem:[#allocation6 + $0xb0] sm:$0xff]  ;;  %v7064_v11 = vld [vmem:[#allocation6 + $0x140] sm:$0xff]  ;;  %v475_v0 = vrot.slane %v7828_v10, 1 }
  0x97   : > { %607 = vst [vmem:[#allocation2 + $0xcc] sm:$0xf] %v575_v24  ;;  %v590_v17 = vpack.c.bf16 %v457_v63, %v457_v63  ;;  %v8112_v24 = vor.u32 %v7016_v36, %v5757_v62  ;;  %v7021_v8 = vld [vmem:[#allocation6] sm:$0xff]  ;;  %v8124_v36 = vadd.s32 8, %v7822_v5  ;;  %1891 = vmatpush.bf16.msrb.mxu1 %v7043_v44  ;;  %v7042_v1 = vld [vmem:[#allocation6 + $0xa8] sm:$0xff]  ;;  %1470 = vmatpush.bf16.msrb.mxu2 %v7064_v11 }
  0x98   : > { %606 = vst [vmem:[#allocation2 + $0xc0] sm:$0xf] %v574_v55  ;;  %v7029_v25 = vld [vmem:[#allocation6 + $0x40] sm:$0xff]  ;;  %1719 = vmatpush.bf16.msrb.mxu3 %v7021_v8  ;;  %v508_v55 = vsel %vm491_vm2, %v475_v0, %v459_v18  ;;  %v492_v57 = vsel %vm491_vm2, %v459_v18, %v475_v0  ;;  %v5673_v16 = vld [vmem:[#allocation2 + $0xa8] sm:$0xf] }
  0x99   : > { %623 = vst [vmem:[#allocation2 + $0x18c] sm:$0xf] %v591_v6  ;;  %vm285_vm3 = vcmp.eq.s32.totalorder %v8124_v36, 15  ;;  %1808 = vmatpush.bf16.msrb.mxu0 %v7029_v25  ;;  %v656_v62 = vpack.c.bf16 %v492_v57, %v492_v57  ;;  %v7041_v6 = vld [vmem:[#allocation6 + $0xa0] sm:$0xff]  ;;  %v6994_v44 = vld [vmem:[#allocation2 + $0xac] sm:$0xf] }
  0x9a   : > { %9575 = vst [vmem:[#allocation51_spill] sm:$0xff] %v8112_v24  ;;  %v529_v56 = vsel %vm285_vm3, 0.0, %v508_v55  ;;  %v5675_v11 = vld [vmem:[#allocation2 + $0xb4] sm:$0xf0]  ;;  %v5769_v8 = vld [vmem:[#allocation2 + $0x168] sm:$0xf] }
  0x9b   : > { %622 = vst [vmem:[#allocation2 + $0x180] sm:$0xf] %v590_v17  ;;  %v657_v63 = vpack.c.bf16 %v529_v56, %v529_v56  ;;  %1892 = vmatpush.bf16.msrb.mxu1 %v7042_v1  ;;  %v6995_v17 = vld [vmem:[#allocation2 + $0xb0] sm:$0xf0]  ;;  %v7018_v25 = vld [vmem:[#allocation2 + $0x16c] sm:$0xf]  ;;  %v8139_v55 = vor.u32 %v6994_v44, %v5675_v11 }
  0x9c   : > { %9576 = vst [vmem:[#allocation52_spill] sm:$0xff] %v8116_v20  ;;  %v7019_v10 = vld [vmem:[#allocation2 + $0x170] sm:$0xf0]  ;;  %v8135_v18 = vor.u32 %v6995_v17, %v5673_v16  ;;  %v7040_v1 = vld [vmem:[#allocation6 + $0x98] sm:$0xff]  ;;  %v460_v56 = vrot.slane %v7844_v23, 1 }
  0x9d   : > { %688 = vst [vmem:[#allocation2 + $0x20] sm:$0xf] %v656_v62  ;;  %v8137_v0 = vor.u32 %v7019_v10, %v5769_v8  ;;  %v7127_v10 = vld [vmem:[#allocation6 + $0x1b8] sm:$0xff]  ;;  %v5687_v23 = vld [vmem:[#allocation2 + $0xcc] sm:$0xf0] }
  0x9e   : > { %689 = vst [vmem:[#allocation2 + $0x2c] sm:$0xf] %v657_v63  ;;  %v7135_v62 = vld [vmem:[#allocation6 + $0x1f8] sm:$0xff]  ;;  %v7039_v63 = vld [vmem:[#allocation6 + $0x90] sm:$0xff]  ;;  %2492 = vmatpush.bf16.msra.mxu2 %v7127_v10  ;;  %v7037_v10 = vld [vmem:[#allocation6 + $0x80] sm:$0xff] }
  0x9f   : > { %286 = vst [vmem:[#allocation2] sm:$0xff] %v7668_v9  ;;  %1893 = vmatpush.bf16.msrb.mxu1 %v7041_v6  ;;  %2581 = vmatpush.bf16.msra.mxu3 %v7135_v62  ;;  %v7038_v6 = vld [vmem:[#allocation6 + $0x88] sm:$0xff]  ;;  %v7143_v8 = vld [vmem:[#allocation6 + $0x238] sm:$0xff]  ;;  %v5685_v62 = vld [vmem:[#allocation2 + $0xc0] sm:$0xf] }
  0xa0   : > { %288 = vst [vmem:[#allocation2 + $0xc] sm:$0xff] %v7668_v9  ;;  %2670 = vmatpush.bf16.msra.mxu0 %v7143_v8 }
  0xa1   : > { %287 = vst [vmem:[#allocation2 + $0x8] sm:$0xf] %v7668_v9 }
  0xa2   : > { %1318 = vmatmul.bf16.gmra.mxu0 %v8110_v4  ;;  %1358 = vmatmul.bf16.gmra.mxu2 %v8112_v24  ;;  %v5771_v24 = vld [vmem:[#allocation2 + $0x174] sm:$0xf0]  ;;  %9577 = vst [vmem:[#allocation53_spill] sm:$0xff] %v8137_v0 }
  0xa3   : > { %1407 = vmatmul.bf16.gmra.mxu1 %v8114_v3  ;;  %289 = vst [vmem:[#allocation2 + $0x14] sm:$0xf] %v7668_v9  ;;  %v8141_v57 = vor.u32 %v7018_v25, %v5771_v24  ;;  %v476_v24 = vrot.slane %v7850_v26, 1  ;;  %v6998_v25 = vld [vmem:[#allocation2 + $0xc8] sm:$0xf0] }
  0xa4   : > { %290 = vst [vmem:[#allocation2 + $0x198] sm:$0xff] %v7668_v9  ;;  %1894 = vmatpush.bf16.msrb.mxu1 %v7040_v1  ;;  %v6997_v1 = vld [vmem:[#allocation2 + $0xc4] sm:$0xf]  ;;  %v7046_v26 = vld [vmem:[#allocation2 + $0x188] sm:$0xf0] }
  0xa5   : > { %1447 = vmatmul.bf16.gmra.mxu3 %v8116_v20  ;;  %9578 = vst [vmem:[#allocation54_spill] sm:$0xff] %v8141_v57  ;;  %v493_v16 = vsel %vm491_vm2, %v460_v56, %v476_v24  ;;  %v6978_v8 = vld [vmem:[#allocation2 + $0x28] sm:$0xf0] }
  0xa6   : > { %291 = vst [vmem:[#allocation2 + $0x1a0] sm:$0xf] %v7668_v9  ;;  %v658_v44 = vpack.c.bf16 %v493_v16, %v493_v16  ;;  %v8157_v16 = vor.u32 %v6997_v1, %v5687_v23  ;;  %v6973_v1 = vld [vmem:[#allocation2 + $0x4] sm:$0xf] }
  0xa7   : > { %292 = vst [vmem:[#allocation2 + $0x1a4] sm:$0xff] %v7668_v9 }
  0xa8   : > { %293 = vst [vmem:[#allocation2 + $0x1ac] sm:$0xf] %v7668_v9  ;;  %1895 = vmatpush.bf16.msrb.mxu1 %v7039_v63  ;;  %v509_v9 = vsel %vm491_vm2, %v476_v24, %v460_v56  ;;  %v5781_v63 = vld [vmem:[#allocation2 + $0x180] sm:$0xf]  ;;  %v8155_v56 = vor.u32 %v6998_v25, %v5685_v62  ;;  %v6974_v62 = vld [vmem:[#allocation2 + $0x8] sm:$0xf0] }
  0xa9   : > { %v531_v17 = vsel %vm285_vm3, 0.0, %v509_v9  ;;  %690 = vst [vmem:[#allocation2 + $0x38] sm:$0xf] %v658_v44  ;;  %v5782_v24 = vor.u32 %v7046_v26, %v5781_v63  ;;  %v5889_v25 = vld [vmem:[#allocation2] sm:$0xf] }
  0xaa   : > { %v659_v11 = vpack.c.bf16 %v531_v17, %v531_v17  ;;  %v477_v17 = vrot.slane %v7886_v60, 1  ;;  %v5897_v63 = vld [vmem:[#allocation2 + $0x8] sm:$0xf]  ;;  %v5890_v20 = vor.u32 %v6974_v62, %v5889_v25 }
  0xac   : > { %1896 = vmatpush.bf16.msrb.mxu1 %v7038_v6  ;;  %691 = vst [vmem:[#allocation2 + $0x44] sm:$0xf] %v659_v11  ;;  %v461_v6 = vrot.slane %v7876_v50, 1  ;;  %v5609_v11 = vld [vmem:[#allocation2 + $0x20] sm:$0xf] }
  0xae   : > { %v510_v44 = vsel %vm491_vm2, %v477_v17, %v461_v6  ;;  %v494_v26 = vsel %vm491_vm2, %v461_v6, %v477_v17 }
  0xaf   : > { %v533_v23 = vsel %vm285_vm3, 0.0, %v510_v44  ;;  %v7126_v44 = vld [vmem:[#allocation6 + $0x1b0] sm:$0xff] }
  0xb0   : > { %1897 = vmatpush.bf16.msrb.mxu1 %v7037_v10  ;;  %v5891_v10 = vld [vmem:[#allocation2 + $0xc] sm:$0xf0]  ;;  %2493 = vmatpush.bf16.msra.mxu2 %v7126_v44 }
  0xb1   : > { %v5894_v60 = vor.u32 %v6973_v1, %v5891_v10 }
  0xb2   : > { %1323 = vmatmul.bf16.gmra.mxu0 %v8135_v18  ;;  %1363 = vmatmul.bf16.gmra.mxu2 %v8137_v0  ;;  %v7045_v0 = vld [vmem:[#allocation2 + $0x184] sm:$0xf] }
  0xb3   : > { %1412 = vmatmul.bf16.gmra.mxu1 %v8139_v55 }
  0xb5   : > { %1452 = vmatmul.bf16.gmra.mxu3 %v8141_v57  ;;  %v5783_v57 = vld [vmem:[#allocation2 + $0x18c] sm:$0xf0] }
  0xb6   : > { %v5786_v9 = vor.u32 %v7045_v0, %v5783_v57  ;;  %v660_v0 = vpack.c.bf16 %v494_v26, %v494_v26  ;;  %v661_v57 = vpack.c.bf16 %v533_v23, %v533_v23  ;;  %v7134_v26 = vld [vmem:[#allocation6 + $0x1f0] sm:$0xff]  ;;  %v462_v23 = vrot.slane %v7922_v48, 1 }
  0xb7   : > { %2582 = vmatpush.bf16.msra.mxu3 %v7134_v26 }
  0xb8   : > { %692 = vst [vmem:[#allocation2 + $0x50] sm:$0xf] %v660_v0  ;;  %v478_v0 = vrot.slane %v7926_v49, 1 }
  0xb9   : > { %693 = vst [vmem:[#allocation2 + $0x5c] sm:$0xf] %v661_v57 }
  0xc2   : > { %1328 = vmatmul.bf16.gmra.mxu0 %v8155_v56  ;;  %1368 = vmatmul.bf16.gmra.mxu2 %v5782_v24  ;;  %v6975_v24 = vld [vmem:[#allocation2 + $0x10] sm:$0xf0] }
  0xc3   : > { %1417 = vmatmul.bf16.gmra.mxu1 %v8157_v16  ;;  %v5898_v6 = vor.u32 %v6975_v24, %v5897_v63  ;;  %v7142_v24 = vld [vmem:[#allocation6 + $0x230] sm:$0xff] }
  0xc4   : > { %2671 = vmatpush.bf16.msra.mxu0 %v7142_v24 }
  0xc5   : > { %1457 = vmatmul.bf16.gmra.mxu3 %v5786_v9  ;;  %v5610_v9 = vor.u32 %v6978_v8, %v5609_v11  ;;  %v511_v11 = vsel %vm491_vm2, %v478_v0, %v462_v23 }
  0xcf   : > { %v1294_v50 = vpop.f32.mrf.mxu0 }
  0xd0   : > { %v1383_v17 = vpop.f32.mrf.mxu1 }
  0xd1   : > { %v8169_v22 = vadd.f32 %v1383_v17, %v1294_v50  ;;  %v495_v50 = vsel %vm491_vm2, %v462_v23, %v478_v0  ;;  %v6981_v17 = vld [vmem:[#allocation2 + $0x40] sm:$0xf0] }
  0xd2   : > { %1471 = vmatmul.bf16.vlgmr.msrb.gmra.mxu2 %v5610_v9  ;;  %1809 = vmatmul.bf16.vlgmr.msrb.gmra.mxu0 %v5894_v60  ;;  %v535_v60 = vsel %vm285_vm3, 0.0, %v511_v11  ;;  %v662_v1 = vpack.c.bf16 %v495_v50, %v495_v50  ;;  %v463_v50 = vrot.slane %v7962_v33, 1 }
  0xd3   : > { %1898 = vmatmul.bf16.vlgmr.msrb.gmra.mxu1 %v5898_v6  ;;  %v663_v10 = vpack.c.bf16 %v535_v60, %v535_v60  ;;  %v5621_v6 = vld [vmem:[#allocation2 + $0x38] sm:$0xf]  ;;  %v479_v60 = vrot.slane %v7966_v43, 1 }
  0xd4   : > { %694 = vst [vmem:[#allocation2 + $0x68] sm:$0xf] %v662_v1  ;;  %v5622_v23 = vor.u32 %v6981_v17, %v5621_v6 }
  0xd5   : > { %1720 = vmatmul.bf16.vlgmr.msrb.gmra.mxu3 %v5890_v20  ;;  %v1334_v57 = vpop.f32.mrf.mxu2  ;;  %695 = vst [vmem:[#allocation2 + $0x74] sm:$0xf] %v663_v10  ;;  %v512_v1 = vsel %vm491_vm2, %v479_v60, %v463_v50 }
  0xd6   : > { %v537_v24 = vsel %vm285_vm3, 0.0, %v512_v1 }
  0xd7   : > { %v1296_v25 = vpop.f32.mrf.mxu0 }
  0xd8   : > { %v1423_v8 = vpop.f32.mrf.mxu3  ;;  %v1385_v62 = vpop.f32.mrf.mxu1 }
  0xd9   : > { %v8179_v20 = vadd.f32 %v1423_v8, %v1334_v57  ;;  %v8181_v63 = vadd.f32 %v1385_v62, %v1296_v25  ;;  %v496_v62 = vsel %vm491_vm2, %v463_v50, %v479_v60 }
  0xdd   : > { %v1336_v44 = vpop.f32.mrf.mxu2 }
  0xdf   : > { %v1299_v11 = vpop.f32.mrf.mxu0 }
  0xe0   : > { %v1425_v26 = vpop.f32.mrf.mxu3  ;;  %v1388_v57 = vpop.f32.mrf.mxu1 }
  0xe1   : > { %v8183_v0 = vadd.f32 %v1425_v26, %v1336_v44  ;;  %v8185_v8 = vadd.f32 %v1388_v57, %v1299_v11  ;;  %v5633_v26 = vld [vmem:[#allocation2 + $0x50] sm:$0xf]  ;;  %v6984_v11 = vld [vmem:[#allocation2 + $0x58] sm:$0xf0] }
  0xe2   : > { %1476 = vmatmul.bf16.gmra.mxu2 %v5622_v23  ;;  %1814 = vmatmul.bf16.gmra.mxu0 %v7914_v38  ;;  %v5634_v33 = vor.u32 %v6984_v11, %v5633_v26 }
  0xe3   : > { %1903 = vmatmul.bf16.gmra.mxu1 %v5610_v9  ;;  %v665_v9 = vpack.c.bf16 %v537_v24, %v537_v24  ;;  %v480_v24 = vrot.slane %v8006_v42, 1 }
  0xe5   : > { %1725 = vmatmul.bf16.gmra.mxu3 %v7908_v34  ;;  %v1339_v25 = vpop.f32.mrf.mxu2  ;;  %v664_v34 = vpack.c.bf16 %v496_v62, %v496_v62  ;;  %697 = vst [vmem:[#allocation2 + $0x8c] sm:$0xf] %v665_v9  ;;  %v464_v62 = vrot.slane %v8002_v31, 1 }
  0xe7   : > { %v1301_v38 = vpop.f32.mrf.mxu0  ;;  %696 = vst [vmem:[#allocation2 + $0x80] sm:$0xf] %v664_v34  ;;  %v497_v9 = vsel %vm491_vm2, %v464_v62, %v480_v24 }
  0xe8   : > { %v1428_v10 = vpop.f32.mrf.mxu3  ;;  %v1390_v17 = vpop.f32.mrf.mxu1 }
  0xe9   : > { %v8197_v6 = vadd.f32 %v1428_v10, %v1339_v25  ;;  %v8199_v44 = vadd.f32 %v1390_v17, %v1301_v38  ;;  %v7125_v25 = vld [vmem:[#allocation6 + $0x1a8] sm:$0xff]  ;;  %v666_v17 = vpack.c.bf16 %v497_v9, %v497_v9  ;;  %v465_v9 = vrot.slane %v8042_v47, 1 }
  0xea   : > { %v7133_v10 = vld [vmem:[#allocation6 + $0x1e8] sm:$0xff]  ;;  %2494 = vmatpush.bf16.msra.mxu2 %v7125_v25  ;;  %v6987_v25 = vld [vmem:[#allocation2 + $0x70] sm:$0xf0] }
  0xeb   : > { %2583 = vmatpush.bf16.msra.mxu3 %v7133_v10  ;;  %698 = vst [vmem:[#allocation2 + $0x98] sm:$0xf] %v666_v17 }
  0xed   : > { %v1341_v57 = vpop.f32.mrf.mxu2 }
  0xef   : > { %v1304_v50 = vpop.f32.mrf.mxu0 }
  0xf0   : > { %v1430_v43 = vpop.f32.mrf.mxu3  ;;  %v1393_v60 = vpop.f32.mrf.mxu1 }
  0xf1   : > { %v8201_v49 = vadd.f32 %v1430_v43, %v1341_v57  ;;  %v8203_v1 = vadd.f32 %v1393_v60, %v1304_v50  ;;  %v513_v43 = vsel %vm491_vm2, %v480_v24, %v464_v62  ;;  %v7141_v50 = vld [vmem:[#allocation6 + $0x228] sm:$0xff]  ;;  %v5645_v60 = vld [vmem:[#allocation2 + $0x68] sm:$0xf] }
  0xf2   : > { %1481 = vmatmul.bf16.gmra.mxu2 %v5634_v33  ;;  %1819 = vmatmul.bf16.gmra.mxu0 %v7954_v29  ;;  %v5646_v62 = vor.u32 %v6987_v25, %v5645_v60 }
  0xf3   : > { %1908 = vmatmul.bf16.gmra.mxu1 %v5622_v23  ;;  %2672 = vmatpush.bf16.msra.mxu0 %v7141_v50 }
  0xf5   : > { %1730 = vmatmul.bf16.gmra.mxu3 %v7950_v27  ;;  %v1344_v38 = vpop.f32.mrf.mxu2  ;;  %v539_v27 = vsel %vm285_vm3, 0.0, %v513_v43 }
  0xf6   : > { %v667_v26 = vpack.c.bf16 %v539_v27, %v539_v27  ;;  %v481_v27 = vrot.slane %v8046_v61, 1 }
  0xf7   : > { %v1306_v23 = vpop.f32.mrf.mxu0 }
  0xf8   : > { %v1433_v34 = vpop.f32.mrf.mxu3  ;;  %v1395_v11 = vpop.f32.mrf.mxu1  ;;  %699 = vst [vmem:[#allocation2 + $0xa4] sm:$0xf] %v667_v26  ;;  %v514_v17 = vsel %vm491_vm2, %v481_v27, %v465_v9  ;;  %v498_v26 = vsel %vm491_vm2, %v465_v9, %v481_v27 }
  0xf9   : > { %v8215_v29 = vadd.f32 %v1433_v34, %v1344_v38  ;;  %v8217_v57 = vadd.f32 %v1395_v11, %v1306_v23  ;;  %v541_v11 = vsel %vm285_vm3, 0.0, %v514_v17 }
  0xfd   : > { %v1346_v10 = vpop.f32.mrf.mxu2 }
  0xff   : > { %v1309_v43 = vpop.f32.mrf.mxu0 }
 0x100   : > { %v1435_v42 = vpop.f32.mrf.mxu3  ;;  %v1398_v38 = vpop.f32.mrf.mxu1 }
 0x101   : > { %v8219_v24 = vadd.f32 %v1435_v42, %v1346_v10  ;;  %v8221_v34 = vadd.f32 %v1398_v38, %v1309_v43  ;;  %v5657_v10 = vld [vmem:[#allocation2 + $0x80] sm:$0xf]  ;;  %v6990_v43 = vld [vmem:[#allocation2 + $0x88] sm:$0xf0] }
 0x102   : > { %1486 = vmatmul.bf16.gmra.mxu2 %v5646_v62  ;;  %1824 = vmatmul.bf16.gmra.mxu0 %v7994_v21  ;;  %v5658_v47 = vor.u32 %v6990_v43, %v5657_v10 }
 0x103   : > { %1913 = vmatmul.bf16.gmra.mxu1 %v5634_v33  ;;  %v669_v33 = vpack.c.bf16 %v541_v11, %v541_v11  ;;  %v482_v11 = vrot.slane %v8086_v45, 1 }
 0x105   : > { %1735 = vmatmul.bf16.gmra.mxu3 %v7990_v19  ;;  %v1349_v23 = vpop.f32.mrf.mxu2  ;;  %v668_v19 = vpack.c.bf16 %v498_v26, %v498_v26  ;;  %701 = vst [vmem:[#allocation2 + $0xbc] sm:$0xf] %v669_v33  ;;  %v466_v26 = vrot.slane %v8082_v46, 1 }
 0x107   : > { %v1311_v21 = vpop.f32.mrf.mxu0  ;;  %700 = vst [vmem:[#allocation2 + $0xb0] sm:$0xf] %v668_v19  ;;  %v499_v33 = vsel %vm491_vm2, %v466_v26, %v482_v11 }
 0x108   : > { %v1438_v42 = vpop.f32.mrf.mxu3  ;;  %v1400_v60 = vpop.f32.mrf.mxu1 }
 0x109   : > { %v8233_v50 = vadd.f32 %v1438_v42, %v1349_v23  ;;  %v8235_v25 = vadd.f32 %v1400_v60, %v1311_v21  ;;  %v7124_v23 = vld [vmem:[#allocation6 + $0x1a0] sm:$0xff]  ;;  %v670_v60 = vpack.c.bf16 %v499_v33, %v499_v33  ;;  %v467_v33 = vrot.slane %v7834_v14, 1 }
 0x10a   : > { %v7132_v42 = vld [vmem:[#allocation6 + $0x1e0] sm:$0xff]  ;;  %2495 = vmatpush.bf16.msra.mxu2 %v7124_v23  ;;  %v6993_v23 = vld [vmem:[#allocation2 + $0xa0] sm:$0xf0] }
 0x10b   : > { %2584 = vmatpush.bf16.msra.mxu3 %v7132_v42  ;;  %702 = vst [vmem:[#allocation2 + $0xc8] sm:$0xf] %v670_v60 }
 0x10d   : > { %v1351_v38 = vpop.f32.mrf.mxu2 }
 0x10f   : > { %v1314_v9 = vpop.f32.mrf.mxu0 }
 0x110   : > { %v1440_v61 = vpop.f32.mrf.mxu3  ;;  %v1403_v27 = vpop.f32.mrf.mxu1 }
 0x111   : > { %v8237_v31 = vadd.f32 %v1440_v61, %v1351_v38  ;;  %v8239_v17 = vadd.f32 %v1403_v27, %v1314_v9  ;;  %v515_v61 = vsel %vm491_vm2, %v482_v11, %v466_v26  ;;  %v7140_v9 = vld [vmem:[#allocation6 + $0x220] sm:$0xff]  ;;  %v5669_v27 = vld [vmem:[#allocation2 + $0x98] sm:$0xf] }
 0x112   : > { %1491 = vmatmul.bf16.gmra.mxu2 %v5658_v47  ;;  %1829 = vmatmul.bf16.gmra.mxu0 %v8034_v37  ;;  %v5670_v26 = vor.u32 %v6993_v23, %v5669_v27 }
 0x113   : > { %1918 = vmatmul.bf16.gmra.mxu1 %v5646_v62  ;;  %2673 = vmatpush.bf16.msra.mxu0 %v7140_v9 }
 0x115   : > { %1740 = vmatmul.bf16.gmra.mxu3 %v8030_v32  ;;  %v1354_v21 = vpop.f32.mrf.mxu2  ;;  %v543_v32 = vsel %vm285_vm3, 0.0, %v515_v61 }
 0x116   : > { %v671_v10 = vpack.c.bf16 %v543_v32, %v543_v32  ;;  %v483_v32 = vrot.slane %v7836_v15, 1 }
 0x117   : > { %v1316_v62 = vpop.f32.mrf.mxu0 }
 0x118   : > { %v1443_v19 = vpop.f32.mrf.mxu3  ;;  %v1405_v43 = vpop.f32.mrf.mxu1  ;;  %703 = vst [vmem:[#allocation2 + $0xd4] sm:$0xf] %v671_v10  ;;  %v516_v60 = vsel %vm491_vm2, %v483_v32, %v467_v33  ;;  %v500_v10 = vsel %vm491_vm2, %v467_v33, %v483_v32 }
 0x119   : > { %v8251_v37 = vadd.f32 %v1443_v19, %v1354_v21  ;;  %v8253_v38 = vadd.f32 %v1405_v43, %v1316_v62  ;;  %v545_v43 = vsel %vm285_vm3, 0.0, %v516_v60 }
 0x11d   : > { %v1356_v42 = vpop.f32.mrf.mxu2 }
 0x11f   : > { %v1319_v61 = vpop.f32.mrf.mxu0 }
 0x120   : > { %v1445_v45 = vpop.f32.mrf.mxu3  ;;  %v1408_v21 = vpop.f32.mrf.mxu1 }
 0x121   : > { %v8255_v11 = vadd.f32 %v1445_v45, %v1356_v42  ;;  %v8257_v19 = vadd.f32 %v1408_v21, %v1319_v61  ;;  %v5681_v42 = vld [vmem:[#allocation2 + $0xb0] sm:$0xf]  ;;  %v6996_v61 = vld [vmem:[#allocation2 + $0xb8] sm:$0xf0] }
 0x122   : > { %1496 = vmatmul.bf16.gmra.mxu2 %v5670_v26  ;;  %1834 = vmatmul.bf16.gmra.mxu0 %v8074_v12  ;;  %v5682_v14 = vor.u32 %v6996_v61, %v5681_v42 }
 0x123   : > { %1923 = vmatmul.bf16.gmra.mxu1 %v5658_v47  ;;  %v673_v47 = vpack.c.bf16 %v545_v43, %v545_v43  ;;  %v484_v43 = vrot.slane %v7866_v41, 1 }
 0x125   : > { %1745 = vmatmul.bf16.gmra.mxu3 %v8070_v7  ;;  %v1359_v62 = vpop.f32.mrf.mxu2  ;;  %v672_v7 = vpack.c.bf16 %v500_v10, %v500_v10  ;;  %705 = vst [vmem:[#allocation2 + $0xec] sm:$0xf] %v673_v47  ;;  %v468_v10 = vrot.slane %v7864_v40, 1 }
 0x127   : > { %v1321_v12 = vpop.f32.mrf.mxu0  ;;  %704 = vst [vmem:[#allocation2 + $0xe0] sm:$0xf] %v672_v7  ;;  %v501_v47 = vsel %vm491_vm2, %v468_v10, %v484_v43 }
 0x128   : > { %v1448_v45 = vpop.f32.mrf.mxu3  ;;  %v1410_v27 = vpop.f32.mrf.mxu1 }
 0x129   : > { %v8269_v9 = vadd.f32 %v1448_v45, %v1359_v62  ;;  %v8271_v23 = vadd.f32 %v1410_v27, %v1321_v12  ;;  %v7123_v62 = vld [vmem:[#allocation6 + $0x198] sm:$0xff]  ;;  %v674_v27 = vpack.c.bf16 %v501_v47, %v501_v47  ;;  %v469_v47 = vrot.slane %v7891_v2, 1 }
 0x12a   : > { %v7131_v45 = vld [vmem:[#allocation6 + $0x1d8] sm:$0xff]  ;;  %2496 = vmatpush.bf16.msra.mxu2 %v7123_v62  ;;  %v6999_v62 = vld [vmem:[#allocation2 + $0xd0] sm:$0xf0] }
 0x12b   : > { %2585 = vmatpush.bf16.msra.mxu3 %v7131_v45  ;;  %706 = vst [vmem:[#allocation2 + $0xf8] sm:$0xf] %v674_v27 }
 0x12d   : > { %v1361_v21 = vpop.f32.mrf.mxu2 }
 0x12f   : > { %v1324_v33 = vpop.f32.mrf.mxu0 }
 0x130   : > { %v1450_v15 = vpop.f32.mrf.mxu3  ;;  %v1413_v32 = vpop.f32.mrf.mxu1 }
 0x131   : > { %v8273_v46 = vadd.f32 %v1450_v15, %v1361_v21  ;;  %v8275_v60 = vadd.f32 %v1413_v32, %v1324_v33  ;;  %v517_v15 = vsel %vm491_vm2, %v484_v43, %v468_v10  ;;  %v7139_v21 = vld [vmem:[#allocation6 + $0x218] sm:$0xff] }
 0x132   : > { %1501 = vmatmul.bf16.gmra.mxu2 %v5682_v14  ;;  %1839 = vmatmul.bf16.gmra.mxu0 %v8114_v3  ;;  %v547_v3 = vsel %vm285_vm3, 0.0, %v517_v15  ;;  %v5693_v32 = vld [vmem:[#allocation2 + $0xc8] sm:$0xf] }
 0x133   : > { %1928 = vmatmul.bf16.gmra.mxu1 %v5670_v26  ;;  %v675_v42 = vpack.c.bf16 %v547_v3, %v547_v3  ;;  %2674 = vmatpush.bf16.msra.mxu0 %v7139_v21  ;;  %v5694_v10 = vor.u32 %v6999_v62, %v5693_v32  ;;  %v485_v3 = vrot.slane %v7898_v13, 1 }
 0x135   : > { %1750 = vmatmul.bf16.gmra.mxu3 %v8110_v4  ;;  %v1364_v12 = vpop.f32.mrf.mxu2  ;;  %707 = vst [vmem:[#allocation2 + $0x104] sm:$0xf] %v675_v42  ;;  %v518_v27 = vsel %vm491_vm2, %v485_v3, %v469_v47  ;;  %v502_v42 = vsel %vm491_vm2, %v469_v47, %v485_v3 }
 0x137   : > { %v1326_v26 = vpop.f32.mrf.mxu0 }
 0x138   : > { %v1453_v7 = vpop.f32.mrf.mxu3  ;;  %v1415_v61 = vpop.f32.mrf.mxu1 }
 0x139   : > { %v8287_v4 = vadd.f32 %v1453_v7, %v1364_v12  ;;  %v8289_v33 = vadd.f32 %v1415_v61, %v1326_v26  ;;  %v549_v61 = vsel %vm285_vm3, 0.0, %v518_v27  ;;  %v7130_v27 = vld [vmem:[#allocation6 + $0x1d0] sm:$0xff] }
 0x13a   : > { %2586 = vmatpush.bf16.msra.mxu3 %v7130_v27 }
 0x13d   : > { %v1366_v45 = vpop.f32.mrf.mxu2 }
 0x13f   : > { %v1329_v15 = vpop.f32.mrf.mxu0 }
 0x140   : > { %v1455_v41 = vpop.f32.mrf.mxu3  ;;  %v1418_v12 = vpop.f32.mrf.mxu1 }
 0x141   : > { %v8291_v43 = vadd.f32 %v1455_v41, %v1366_v45  ;;  %v8293_v7 = vadd.f32 %v1418_v12, %v1329_v15  ;;  %v5705_v45 = vld [vmem:[#allocation2 + $0xe0] sm:$0xf]  ;;  %v7002_v15 = vld [vmem:[#allocation2 + $0xe8] sm:$0xf0] }
 0x142   : > { %1506 = vmatmul.bf16.gmra.mxu2 %v5694_v10  ;;  %1844 = vmatmul.bf16.gmra.mxu0 %v8139_v55  ;;  %v5706_v2 = vor.u32 %v7002_v15, %v5705_v45 }
 0x143   : > { %1933 = vmatmul.bf16.gmra.mxu1 %v5682_v14  ;;  %v677_v14 = vpack.c.bf16 %v549_v61, %v549_v61 }
 0x145   : > { %1755 = vmatmul.bf16.gmra.mxu3 %v8135_v18  ;;  %v1369_v26 = vpop.f32.mrf.mxu2  ;;  %v676_v18 = vpack.c.bf16 %v502_v42, %v502_v42  ;;  %709 = vst [vmem:[#allocation2 + $0x11c] sm:$0xf] %v677_v14  ;;  %v486_v42 = vrot.slane %v7934_v59, 1 }
 0x147   : > { %v1331_v55 = vpop.f32.mrf.mxu0  ;;  %708 = vst [vmem:[#allocation2 + $0x110] sm:$0xf] %v676_v18 }
 0x148   : > { %v1458_v41 = vpop.f32.mrf.mxu3  ;;  %v1420_v32 = vpop.f32.mrf.mxu1 }
 0x149   : > { %v8305_v21 = vadd.f32 %v1458_v41, %v1369_v26  ;;  %v8307_v62 = vadd.f32 %v1420_v32, %v1331_v55  ;;  %v7122_v26 = vld [vmem:[#allocation6 + $0x190] sm:$0xff]  ;;  %v470_v41 = vrot.slane %v7932_v58, 1 }
 0x14a   : > { %2497 = vmatpush.bf16.msra.mxu2 %v7122_v26  ;;  %v7138_v26 = vld [vmem:[#allocation6 + $0x210] sm:$0xff] }
 0x14b   : > { %2675 = vmatpush.bf16.msra.mxu0 %v7138_v26 }
 0x14d   : > { %v1371_v12 = vpop.f32.mrf.mxu2 }
 0x14f   : > { %v1810_v47 = vpop.f32.mrf.mxu0 }
 0x150   : > { %v1460_v13 = vpop.f32.mrf.mxu3  ;;  %v1899_v3 = vpop.f32.mrf.mxu1 }
 0x151   : > { %v8309_v40 = vadd.f32 %v1460_v13, %v1371_v12  ;;  %v519_v13 = vsel %vm491_vm2, %v486_v42, %v470_v41  ;;  %v7226_v12 = vld [vmem:[#allocation8 + $0xf8] sm:$0xff] }
 0x152   : > { %1511 = vmatmul.bf16.gmra.mxu2 %v5706_v2  ;;  %1849 = vmatmul.bf16.gmra.mxu0 %v8157_v16  ;;  %v503_v16 = vsel %vm491_vm2, %v470_v41, %v486_v42 }
 0x153   : > { %1938 = vmatmul.bf16.gmra.mxu1 %v5694_v10  ;;  %v678_v14 = vpack.c.bf16 %v503_v16, %v503_v16 }
 0x154   : > { %3808 = vmatpush.bf16.msra.mxu1 %v7226_v12 }
 0x155   : > { %1760 = vmatmul.bf16.gmra.mxu3 %v8155_v56  ;;  %v1472_v61 = vpop.f32.mrf.mxu2  ;;  %v551_v56 = vsel %vm285_vm3, 0.0, %v519_v13  ;;  %710 = vst [vmem:[#allocation2 + $0x128] sm:$0xf] %v678_v14 }
 0x156   : > { %v1473_v55 = vadd.f32 %v1472_v61, %v8169_v22  ;;  %v679_v32 = vpack.c.bf16 %v551_v56, %v551_v56  ;;  %v5717_v22 = vld [vmem:[#allocation2 + $0xf8] sm:$0xf]  ;;  %v7005_v61 = vld [vmem:[#allocation2 + $0x100] sm:$0xf0] }
 0x157   : > { %v1812_v10 = vpop.f32.mrf.mxu0  ;;  %v5718_v58 = vor.u32 %v7005_v61, %v5717_v22  ;;  %v5729_v61 = vld [vmem:[#allocation2 + $0x110] sm:$0xf] }
 0x158   : > { %v1721_v18 = vpop.f32.mrf.mxu3  ;;  %v1901_v15 = vpop.f32.mrf.mxu1  ;;  %711 = vst [vmem:[#allocation2 + $0x134] sm:$0xf] %v679_v32 }
 0x159   : > { %v1722_v45 = vadd.f32 %v1721_v18, %v1473_v55 }
 0x15b   : > { %v1811_v27 = vadd.f32 %v1810_v47, %v1722_v45  ;;  %v471_v47 = vrot.slane %v7972_v51, 1 }
 0x15d   : > { %v8322_v59 = vadd.f32 %v1899_v3, %v1811_v27  ;;  %v1474_v41 = vpop.f32.mrf.mxu2  ;;  %v487_v3 = vrot.slane %v7974_v52, 1 }
 0x15e   : > { %v1475_v42 = vadd.f32 %v1474_v41, %v8181_v63  ;;  %v7008_v41 = vld [vmem:[#allocation2 + $0x118] sm:$0xf0] }
 0x15f   : > { %v1815_v16 = vpop.f32.mrf.mxu0  ;;  %v520_v63 = vsel %vm491_vm2, %v487_v3, %v471_v47 }
 0x160   : > { %v1723_v13 = vpop.f32.mrf.mxu3  ;;  %v1904_v55 = vpop.f32.mrf.mxu1 }
 0x161   : > { %v1724_v56 = vadd.f32 %v1723_v13, %v1475_v42 }
 0x162   : > { %1516 = vmatmul.bf16.gmra.mxu2 %v5718_v58  ;;  %1854 = vmatmul.bf16.gmra.mxu0 %v7916_v39  ;;  %v504_v39 = vsel %vm491_vm2, %v471_v47, %v487_v3 }
 0x163   : > { %v1813_v18 = vadd.f32 %v1812_v10, %v1724_v56  ;;  %1943 = vmatmul.bf16.gmra.mxu1 %v5706_v2  ;;  %v680_v10 = vpack.c.bf16 %v504_v39, %v504_v39 }
 0x165   : > { %1765 = vmatmul.bf16.gmra.mxu3 %v7910_v35  ;;  %v8329_v14 = vadd.f32 %v1901_v15, %v1813_v18  ;;  %v1477_v32 = vpop.f32.mrf.mxu2  ;;  %v553_v35 = vsel %vm285_vm3, 0.0, %v520_v63  ;;  %712 = vst [vmem:[#allocation2 + $0x140] sm:$0xf] %v680_v10  ;;  %v5730_v18 = vor.u32 %v7008_v41, %v5729_v61  ;;  %v7225_v61 = vld [vmem:[#allocation8 + $0xf0] sm:$0xff]  ;;  %v7137_v41 = vld [vmem:[#allocation6 + $0x208] sm:$0xff] }
 0x166   : > { %v1478_v45 = vadd.f32 %v1477_v32, %v8185_v8  ;;  %v681_v26 = vpack.c.bf16 %v553_v35, %v553_v35  ;;  %3809 = vmatpush.bf16.msra.mxu1 %v7225_v61  ;;  %2676 = vmatpush.bf16.msra.mxu0 %v7137_v41 }
 0x167   : > { %v1817_v2 = vpop.f32.mrf.mxu0 }
 0x168   : > { %v1726_v12 = vpop.f32.mrf.mxu3  ;;  %v1906_v22 = vpop.f32.mrf.mxu1  ;;  %713 = vst [vmem:[#allocation2 + $0x14c] sm:$0xf] %v681_v26 }
 0x169   : > { %v1727_v27 = vadd.f32 %v1726_v12, %v1478_v45  ;;  %v7129_v45 = vld [vmem:[#allocation6 + $0x1c8] sm:$0xff]  ;;  %v488_v12 = vrot.slane %v8014_v54, 1 }
 0x16a   : > { %2587 = vmatpush.bf16.msra.mxu3 %v7129_v45 }
 0x16b   : > { %v1816_v15 = vadd.f32 %v1815_v16, %v1727_v27  ;;  %v7121_v16 = vld [vmem:[#allocation6 + $0x188] sm:$0xff] }
 0x16c   : > { %2498 = vmatpush.bf16.msra.mxu2 %v7121_v16 }
 0x16d   : > { %v8338_v42 = vadd.f32 %v1904_v55, %v1816_v15  ;;  %v1479_v8 = vpop.f32.mrf.mxu2  ;;  %v472_v55 = vrot.slane %v8012_v53, 1 }
 0x16e   : > { %v1480_v13 = vadd.f32 %v1479_v8, %v8199_v44 }
 0x16f   : > { %v1820_v47 = vpop.f32.mrf.mxu0  ;;  %v521_v35 = vsel %vm491_vm2, %v488_v12, %v472_v55 }
 0x170   : > { %v1728_v56 = vpop.f32.mrf.mxu3  ;;  %v1909_v32 = vpop.f32.mrf.mxu1 }
 0x171   : > { %v1729_v3 = vadd.f32 %v1728_v56, %v1480_v13  ;;  %v7011_v13 = vld [vmem:[#allocation2 + $0x130] sm:$0xf0] }
 0x172   : > { %1521 = vmatmul.bf16.gmra.mxu2 %v5730_v18  ;;  %1859 = vmatmul.bf16.gmra.mxu0 %v7956_v30 }
 0x173   : > { %v1818_v63 = vadd.f32 %v1817_v2, %v1729_v3  ;;  %1948 = vmatmul.bf16.gmra.mxu1 %v5718_v58  ;;  %v505_v58 = vsel %vm491_vm2, %v472_v55, %v488_v12 }
 0x174   : > { %v682_v26 = vpack.c.bf16 %v505_v58, %v505_v58 }
 0x175   : > { %1770 = vmatmul.bf16.gmra.mxu3 %v7952_v28  ;;  %v8345_v39 = vadd.f32 %v1906_v22, %v1818_v63  ;;  %v1482_v44 = vpop.f32.mrf.mxu2  ;;  %v555_v28 = vsel %vm285_vm3, 0.0, %v521_v35  ;;  %v9579_v35 = vld [vmem:[#allocation34_spill] sm:$0xff] }
 0x176   : > { %v1483_v30 = vadd.f32 %v1482_v44, %v8203_v1  ;;  %v683_v27 = vpack.c.bf16 %v555_v28, %v555_v28  ;;  %714 = vst [vmem:[#allocation2 + $0x158] sm:$0xf] %v682_v26  ;;  %v5741_v1 = vld [vmem:[#allocation2 + $0x128] sm:$0xf] }
 0x177   : > { %v1822_v10 = vpop.f32.mrf.mxu0  ;;  %v5742_v45 = vor.u32 %v7011_v13, %v5741_v1  ;;  %v9582_v28 = vld [vmem:[#allocation44_spill] sm:$0xff] }
 0x178   : > { %v1731_v2 = vpop.f32.mrf.mxu3  ;;  %v1911_v15 = vpop.f32.mrf.mxu1  ;;  %715 = vst [vmem:[#allocation2 + $0x164] sm:$0xf] %v683_v27 }
 0x179   : > { %v1732_v22 = vadd.f32 %v1731_v2, %v1483_v30  ;;  %v9581_v2 = vld [vmem:[#allocation43_spill] sm:$0xff] }
 0x17a   : > { %v473_v58 = vrot.slane %v9581_v2, 1 }
 0x17b   : > { %v1821_v8 = vadd.f32 %v1820_v47, %v1732_v22  ;;  %v9580_v47 = vld [vmem:[#allocation33_spill] sm:$0xff] }
 0x17d   : > { %v8354_v56 = vadd.f32 %v1909_v32, %v1821_v8  ;;  %v1484_v3 = vpop.f32.mrf.mxu2  ;;  %v489_v32 = vrot.slane %v9582_v28, 1 }
 0x17e   : > { %v1485_v63 = vadd.f32 %v1484_v3, %v8217_v57 }
 0x17f   : > { %v1825_v55 = vpop.f32.mrf.mxu0  ;;  %v522_v57 = vsel %vm491_vm2, %v489_v32, %v473_v58  ;;  %v506_v41 = vsel %vm491_vm2, %v473_v58, %v489_v32 }
 0x180   : > { %v1733_v16 = vpop.f32.mrf.mxu3  ;;  %v1914_v44 = vpop.f32.mrf.mxu1  ;;  %v684_v8 = vpack.c.bf16 %v506_v41, %v506_v41  ;;  %v7128_v41 = vld [vmem:[#allocation6 + $0x1c0] sm:$0xff] }
 0x181   : > { %v1734_v12 = vadd.f32 %v1733_v16, %v1485_v63  ;;  %v5753_v63 = vld [vmem:[#allocation2 + $0x140] sm:$0xf]  ;;  %v7014_v16 = vld [vmem:[#allocation2 + $0x148] sm:$0xf0]  ;;  %2588 = vmatpush.bf16.msra.mxu3 %v7128_v41 }
 0x182   : > { %1526 = vmatmul.bf16.gmra.mxu2 %v5742_v45  ;;  %1864 = vmatmul.bf16.gmra.mxu0 %v9579_v35  ;;  %716 = vst [vmem:[#allocation2 + $0x170] sm:$0xf] %v684_v8  ;;  %v9586_v8 = vld [vmem:[#allocation50_spill] sm:$0xff] }
 0x183   : > { %v1823_v30 = vadd.f32 %v1822_v10, %v1734_v12  ;;  %1953 = vmatmul.bf16.gmra.mxu1 %v5730_v18  ;;  %v557_v10 = vsel %vm285_vm3, 0.0, %v522_v57  ;;  %v9583_v57 = vld [vmem:[#allocation40_spill] sm:$0xff] }
 0x184   : > { %v685_v1 = vpack.c.bf16 %v557_v10, %v557_v10  ;;  %v9585_v10 = vld [vmem:[#allocation49_spill] sm:$0xff] }
 0x185   : > { %1775 = vmatmul.bf16.gmra.mxu3 %v9580_v47  ;;  %v8361_v26 = vadd.f32 %v1911_v15, %v1823_v30  ;;  %v1487_v27 = vpop.f32.mrf.mxu2  ;;  %v5754_v47 = vor.u32 %v7014_v16, %v5753_v63 }
 0x186   : > { %v1488_v22 = vadd.f32 %v1487_v27, %v8221_v34  ;;  %717 = vst [vmem:[#allocation2 + $0x17c] sm:$0xf] %v685_v1  ;;  %v490_v1 = vrot.slane %v9586_v8, 1 }
 0x187   : > { %v1827_v18 = vpop.f32.mrf.mxu0 }
 0x188   : > { %v1736_v61 = vpop.f32.mrf.mxu3  ;;  %v1916_v3 = vpop.f32.mrf.mxu1 }
 0x189   : > { %v1737_v13 = vadd.f32 %v1736_v61, %v1488_v22  ;;  %v9584_v61 = vld [vmem:[#allocation39_spill] sm:$0xff] }
 0x18b   : > { %v1826_v15 = vadd.f32 %v1825_v55, %v1737_v13  ;;  %v7120_v55 = vld [vmem:[#allocation6 + $0x180] sm:$0xff] }
 0x18c   : > { %2499 = vmatpush.bf16.msra.mxu2 %v7120_v55  ;;  %v7017_v55 = vld [vmem:[#allocation2 + $0x160] sm:$0xf0] }
 0x18d   : > { %v8370_v12 = vadd.f32 %v1914_v44, %v1826_v15  ;;  %v1489_v34 = vpop.f32.mrf.mxu2  ;;  %v474_v44 = vrot.slane %v9585_v10, 1 }
 0x18e   : > { %v1490_v35 = vadd.f32 %v1489_v34, %v8235_v25 }
 0x18f   : > { %v1830_v58 = vpop.f32.mrf.mxu0  ;;  %v523_v15 = vsel %vm491_vm2, %v490_v1, %v474_v44 }
 0x190   : > { %v1738_v30 = vpop.f32.mrf.mxu3  ;;  %v1919_v27 = vpop.f32.mrf.mxu1  ;;  %v559_v16 = vsel %vm285_vm3, 0.0, %v523_v15 }
 0x191   : > { %v1739_v32 = vadd.f32 %v1738_v30, %v1490_v35  ;;  %v687_v30 = vpack.c.bf16 %v559_v16, %v559_v16  ;;  %v9587_v16 = vld [vmem:[#allocation46_spill] sm:$0xff] }
 0x192   : > { %1531 = vmatmul.bf16.gmra.mxu2 %v5754_v47  ;;  %1869 = vmatmul.bf16.gmra.mxu0 %v9583_v57  ;;  %v7224_v57 = vld [vmem:[#allocation8 + $0xe8] sm:$0xff] }
 0x193   : > { %v1828_v22 = vadd.f32 %v1827_v18, %v1739_v32  ;;  %1958 = vmatmul.bf16.gmra.mxu1 %v5742_v45  ;;  %v507_v45 = vsel %vm491_vm2, %v474_v44, %v490_v1  ;;  %719 = vst [vmem:[#allocation2 + $0x194] sm:$0xf] %v687_v30 }
 0x194   : > { %v686_v35 = vpack.c.bf16 %v507_v45, %v507_v45  ;;  %3810 = vmatpush.bf16.msra.mxu1 %v7224_v57 }
 0x195   : > { %1780 = vmatmul.bf16.gmra.mxu3 %v9584_v61  ;;  %v8377_v13 = vadd.f32 %v1916_v3, %v1828_v22  ;;  %v1492_v25 = vpop.f32.mrf.mxu2  ;;  %v7136_v22 = vld [vmem:[#allocation6 + $0x200] sm:$0xff] }
 0x196   : > { %v1493_v63 = vadd.f32 %v1492_v25, %v8239_v17  ;;  %718 = vst [vmem:[#allocation2 + $0x188] sm:$0xf] %v686_v35  ;;  %2677 = vmatpush.bf16.msra.mxu0 %v7136_v22  ;;  %v5765_v17 = vld [vmem:[#allocation2 + $0x158] sm:$0xf] }
 0x197   : > { %v1832_v34 = vpop.f32.mrf.mxu0  ;;  %v5766_v15 = vor.u32 %v7017_v55, %v5765_v17  ;;  %v5777_v17 = vld [vmem:[#allocation2 + $0x170] sm:$0xf]  ;;  %v7020_v55 = vld [vmem:[#allocation2 + $0x178] sm:$0xf0] }
 0x198   : > { %v1741_v18 = vpop.f32.mrf.mxu3  ;;  %v8386_v32 = vpop.f32.mrf.mxu1 }
 0x199   : > { %v1742_v3 = vadd.f32 %v1741_v18, %v1493_v63 }
 0x19b   : > { %v1831_v61 = vadd.f32 %v1830_v58, %v1742_v3  ;;  %v9588_v58 = vld [vmem:[#allocation45_spill] sm:$0xff] }
 0x19d   : > { %v8388_v41 = vadd.f32 %v1919_v27, %v1831_v61  ;;  %v1494_v44 = vpop.f32.mrf.mxu2 }
 0x19e   : > { %v1495_v1 = vadd.f32 %v1494_v44, %v8253_v38 }
 0x19f   : > { %v1835_v45 = vpop.f32.mrf.mxu0 }
 0x1a0   : > { %v1743_v25 = vpop.f32.mrf.mxu3  ;;  %v1924_v18 = vpop.f32.mrf.mxu1 }
 0x1a1   : > { %v1744_v63 = vadd.f32 %v1743_v25, %v1495_v1 }
 0x1a2   : > { %1536 = vmatmul.bf16.gmra.mxu2 %v5766_v15  ;;  %1874 = vmatmul.bf16.gmra.mxu0 %v9587_v16 }
 0x1a3   : > { %v8392_v35 = vadd.f32 %v1832_v34, %v1744_v63  ;;  %1963 = vmatmul.bf16.gmra.mxu1 %v5754_v47  ;;  %v5778_v63 = vor.u32 %v7020_v55, %v5777_v17  ;;  %v7223_v17 = vld [vmem:[#allocation8 + $0xe0] sm:$0xff] }
 0x1a4   : > { %3811 = vmatpush.bf16.msra.mxu1 %v7223_v17 }
 0x1a5   : > { %1785 = vmatmul.bf16.gmra.mxu3 %v9588_v58  ;;  %v1497_v30 = vpop.f32.mrf.mxu2 }
 0x1a6   : > { %v1498_v27 = vadd.f32 %v1497_v30, %v8257_v19  ;;  %v9589_v19 = vld [vmem:[#allocation52_spill] sm:$0xff] }
 0x1a7   : > { %v1837_v57 = vpop.f32.mrf.mxu0 }
 0x1a8   : > { %v1746_v3 = vpop.f32.mrf.mxu3  ;;  %v8396_v38 = vpop.f32.mrf.mxu1 }
 0x1a9   : > { %v1747_v22 = vadd.f32 %v1746_v3, %v1498_v27  ;;  %v9590_v27 = vld [vmem:[#allocation51_spill] sm:$0xff] }
 0x1ab   : > { %v1836_v61 = vadd.f32 %v1835_v45, %v1747_v22 }
 0x1ad   : > { %v8398_v44 = vadd.f32 %v1924_v18, %v1836_v61  ;;  %v1499_v1 = vpop.f32.mrf.mxu2 }
 0x1ae   : > { %v1500_v34 = vadd.f32 %v1499_v1, %v8271_v23  ;;  %v5789_v1 = vld [vmem:[#allocation2 + $0x188] sm:$0xf] }
 0x1af   : > { %v1840_v16 = vpop.f32.mrf.mxu0 }
 0x1b0   : > { %v1748_v25 = vpop.f32.mrf.mxu3  ;;  %v1929_v58 = vpop.f32.mrf.mxu1 }
 0x1b1   : > { %v1749_v47 = vadd.f32 %v1748_v25, %v1500_v34  ;;  %v7047_v34 = vld [vmem:[#allocation2 + $0x190] sm:$0xf0] }
 0x1b2   : > { %1541 = vmatmul.bf16.gmra.mxu2 %v5778_v63  ;;  %1879 = vmatmul.bf16.gmra.mxu0 %v9589_v19 }
 0x1b3   : > { %v8402_v30 = vadd.f32 %v1837_v57, %v1749_v47  ;;  %1968 = vmatmul.bf16.gmra.mxu1 %v5766_v15  ;;  %v5790_v15 = vor.u32 %v7047_v34, %v5789_v1  ;;  %v5997_v34 = vld [vmem:[#allocation2 + $0x30] sm:$0xf] }
 0x1b5   : > { %1790 = vmatmul.bf16.gmra.mxu3 %v9590_v27  ;;  %v1502_v45 = vpop.f32.mrf.mxu2 }
 0x1b6   : > { %v1503_v18 = vadd.f32 %v1502_v45, %v8275_v60  ;;  %v9591_v45 = vld [vmem:[#allocation54_spill] sm:$0xff] }
 0x1b7   : > { %v1842_v22 = vpop.f32.mrf.mxu0 }
 0x1b8   : > { %v1751_v3 = vpop.f32.mrf.mxu3  ;;  %v8406_v23 = vpop.f32.mrf.mxu1 }
 0x1b9   : > { %v1752_v61 = vadd.f32 %v1751_v3, %v1503_v18  ;;  %v9592_v3 = vld [vmem:[#allocation53_spill] sm:$0xff] }
 0x1bb   : > { %v1841_v55 = vadd.f32 %v1840_v16, %v1752_v61 }
 0x1bd   : > { %v8408_v25 = vadd.f32 %v1929_v58, %v1841_v55  ;;  %v1504_v57 = vpop.f32.mrf.mxu2 }
 0x1be   : > { %v1505_v47 = vadd.f32 %v1504_v57, %v8289_v33  ;;  %v7073_v57 = vld [vmem:[#allocation2 + $0x38] sm:$0xf0] }
 0x1bf   : > { %v1845_v27 = vpop.f32.mrf.mxu0  ;;  %v5998_v10 = vor.u32 %v7073_v57, %v5997_v34  ;;  %v6009_v57 = vld [vmem:[#allocation2 + $0x48] sm:$0xf] }
 0x1c0   : > { %v1753_v19 = vpop.f32.mrf.mxu3  ;;  %v1934_v60 = vpop.f32.mrf.mxu1 }
 0x1c1   : > { %v1754_v8 = vadd.f32 %v1753_v19, %v1505_v47  ;;  %v6005_v47 = vld [vmem:[#allocation2 + $0x38] sm:$0xf]  ;;  %v7074_v19 = vld [vmem:[#allocation2 + $0x40] sm:$0xf0] }
 0x1c2   : > { %1546 = vmatmul.bf16.gmra.mxu2 %v5790_v15  ;;  %1884 = vmatmul.bf16.gmra.mxu0 %v9591_v45 }
 0x1c3   : > { %v8412_v18 = vadd.f32 %v1842_v22, %v1754_v8  ;;  %1973 = vmatmul.bf16.gmra.mxu1 %v5778_v63  ;;  %v7072_v8 = vld [vmem:[#allocation2 + $0x34] sm:$0xf]  ;;  %v5999_v22 = vld [vmem:[#allocation2 + $0x3c] sm:$0xf0] }
 0x1c4   : > { %v6002_v28 = vor.u32 %v7072_v8, %v5999_v22  ;;  %v7077_v8 = vld [vmem:[#allocation2 + $0x58] sm:$0xf0]  ;;  %v6011_v22 = vld [vmem:[#allocation2 + $0x54] sm:$0xf0] }
 0x1c5   : > { %1795 = vmatmul.bf16.gmra.mxu3 %v9592_v3  ;;  %v1507_v16 = vpop.f32.mrf.mxu2 }
 0x1c6   : > { %v1508_v58 = vadd.f32 %v1507_v16, %v8293_v7  ;;  %v6006_v7 = vor.u32 %v7074_v19, %v6005_v47  ;;  %v7076_v47 = vld [vmem:[#allocation2 + $0x50] sm:$0xf0]  ;;  %v6017_v19 = vld [vmem:[#allocation2 + $0x50] sm:$0xf] }
 0x1c7   : > { %v1847_v17 = vpop.f32.mrf.mxu0 }
 0x1c8   : > { %v1756_v61 = vpop.f32.mrf.mxu3  ;;  %v8416_v33 = vpop.f32.mrf.mxu1 }
 0x1c9   : > { %v1757_v55 = vadd.f32 %v1756_v61, %v1508_v58 }
 0x1cb   : > { %v1846_v1 = vadd.f32 %v1845_v27, %v1757_v55 }
 0x1cd   : > { %v8418_v15 = vadd.f32 %v1934_v60, %v1846_v1  ;;  %v1509_v45 = vpop.f32.mrf.mxu2 }
 0x1ce   : > { %v1510_v63 = vadd.f32 %v1509_v45, %v8307_v62  ;;  %v7222_v62 = vld [vmem:[#allocation8 + $0xd8] sm:$0xff] }
 0x1cf   : > { %v1850_v16 = vpop.f32.mrf.mxu0  ;;  %3812 = vmatpush.bf16.msra.mxu1 %v7222_v62 }
 0x1d0   : > { %v1758_v3 = vpop.f32.mrf.mxu3  ;;  %v1939_v61 = vpop.f32.mrf.mxu1 }
 0x1d1   : > { %v1759_v58 = vadd.f32 %v1758_v3, %v1510_v63  ;;  %v6010_v63 = vor.u32 %v7076_v47, %v6009_v57  ;;  %v6018_v3 = vor.u32 %v7077_v8, %v6017_v19  ;;  %v6021_v57 = vld [vmem:[#allocation2 + $0x60] sm:$0xf]  ;;  %v7079_v47 = vld [vmem:[#allocation2 + $0x68] sm:$0xf0]  ;;  %v6029_v19 = vld [vmem:[#allocation2 + $0x68] sm:$0xf] }
 0x1d2   : > { %2500 = vmatmul.bf16.vlgmr.msra.gmra.mxu2 %v5998_v10  ;;  %2678 = vmatmul.bf16.vlgmr.msra.gmra.mxu0 %v6006_v7  ;;  %v7080_v8 = vld [vmem:[#allocation2 + $0x70] sm:$0xf0] }
 0x1d3   : > { %v8421_v27 = vadd.f32 %v1847_v17, %v1759_v58  ;;  %v7075_v17 = vld [vmem:[#allocation2 + $0x4c] sm:$0xf] }
 0x1d4   : > { %v6014_v58 = vor.u32 %v7075_v17, %v6011_v22  ;;  %v7078_v22 = vld [vmem:[#allocation2 + $0x64] sm:$0xf] }
 0x1d5   : > { %2589 = vmatmul.bf16.vlgmr.msra.gmra.mxu3 %v6002_v28  ;;  %v1512_v55 = vpop.f32.mrf.mxu2 }
 0x1d6   : > { %v1513_v60 = vadd.f32 %v1512_v55, %v8179_v20 }
 0x1d7   : > { %v1852_v2 = vpop.f32.mrf.mxu0 }
 0x1d8   : > { %v1761_v1 = vpop.f32.mrf.mxu3  ;;  %v8424_v53 = vpop.f32.mrf.mxu1 }
 0x1d9   : > { %v1762_v54 = vadd.f32 %v1761_v1, %v1513_v60 }
 0x1db   : > { %v1851_v34 = vadd.f32 %v1850_v16, %v1762_v54 }
 0x1dd   : > { %v8426_v10 = vadd.f32 %v1939_v61, %v1851_v34  ;;  %v1514_v28 = vpop.f32.mrf.mxu2 }
 0x1de   : > { %v1515_v45 = vadd.f32 %v1514_v28, %v8183_v0  ;;  %v6023_v28 = vld [vmem:[#allocation2 + $0x6c] sm:$0xf0] }
 0x1df   : > { %v1855_v7 = vpop.f32.mrf.mxu0 }
 0x1e0   : > { %v1763_v20 = vpop.f32.mrf.mxu3  ;;  %v1944_v60 = vpop.f32.mrf.mxu1 }
 0x1e1   : > { %v1764_v55 = vadd.f32 %v1763_v20, %v1515_v45 }
 0x1e2   : > { %2505 = vmatmul.bf16.gmra.mxu2 %v6010_v63  ;;  %2683 = vmatmul.bf16.gmra.mxu0 %v6018_v3  ;;  %v6022_v63 = vor.u32 %v7079_v47, %v6021_v57  ;;  %v6033_v47 = vld [vmem:[#allocation2 + $0x78] sm:$0xf] }
 0x1e3   : > { %v8429_v54 = vadd.f32 %v1852_v2, %v1764_v55 }
 0x1e5   : > { %2594 = vmatmul.bf16.gmra.mxu3 %v6014_v58  ;;  %v1517_v16 = vpop.f32.mrf.mxu2  ;;  %v6026_v58 = vor.u32 %v7078_v22, %v6023_v28  ;;  %v7083_v22 = vld [vmem:[#allocation2 + $0x88] sm:$0xf0] }
 0x1e6   : > { %v1518_v61 = vadd.f32 %v1517_v16, %v8197_v6  ;;  %v6030_v6 = vor.u32 %v7080_v8, %v6029_v19  ;;  %v7082_v19 = vld [vmem:[#allocation2 + $0x80] sm:$0xf0]  ;;  %v6041_v8 = vld [vmem:[#allocation2 + $0x80] sm:$0xf] }
 0x1e7   : > { %v1857_v62 = vpop.f32.mrf.mxu0 }
 0x1e8   : > { %v1766_v1 = vpop.f32.mrf.mxu3  ;;  %v8432_v52 = vpop.f32.mrf.mxu1 }
 0x1e9   : > { %v1767_v34 = vadd.f32 %v1766_v1, %v1518_v61 }
 0x1eb   : > { %v1856_v0 = vadd.f32 %v1855_v7, %v1767_v34 }
 0x1ed   : > { %v8434_v17 = vadd.f32 %v1944_v60, %v1856_v0  ;;  %v1519_v2 = vpop.f32.mrf.mxu2 }
 0x1ee   : > { %v1520_v45 = vadd.f32 %v1519_v2, %v8201_v49  ;;  %v7221_v49 = vld [vmem:[#allocation8 + $0xd0] sm:$0xff]  ;;  %v6035_v2 = vld [vmem:[#allocation2 + $0x84] sm:$0xf0] }
 0x1ef   : > { %v1860_v3 = vpop.f32.mrf.mxu0  ;;  %3813 = vmatpush.bf16.msra.mxu1 %v7221_v49 }
 0x1f0   : > { %v1768_v20 = vpop.f32.mrf.mxu3  ;;  %v1949_v16 = vpop.f32.mrf.mxu1 }
 0x1f1   : > { %v1769_v55 = vadd.f32 %v1768_v20, %v1520_v45 }
 0x1f2   : > { %2510 = vmatmul.bf16.gmra.mxu2 %v6022_v63  ;;  %2688 = vmatmul.bf16.gmra.mxu0 %v6030_v6  ;;  %v6034_v63 = vor.u32 %v7082_v19, %v6033_v47  ;;  %v6042_v6 = vor.u32 %v7083_v22, %v6041_v8  ;;  %v6045_v47 = vld [vmem:[#allocation2 + $0x90] sm:$0xf]  ;;  %v7085_v19 = vld [vmem:[#allocation2 + $0x98] sm:$0xf0]  ;;  %v6053_v8 = vld [vmem:[#allocation2 + $0x98] sm:$0xf] }
 0x1f3   : > { %v8437_v7 = vadd.f32 %v1857_v62, %v1769_v55  ;;  %v7081_v62 = vld [vmem:[#allocation2 + $0x7c] sm:$0xf]  ;;  %v7086_v22 = vld [vmem:[#allocation2 + $0xa0] sm:$0xf0] }
 0x1f4   : > { %v6038_v55 = vor.u32 %v7081_v62, %v6035_v2  ;;  %v7084_v2 = vld [vmem:[#allocation2 + $0x94] sm:$0xf] }
 0x1f5   : > { %2599 = vmatmul.bf16.gmra.mxu3 %v6026_v58  ;;  %v1522_v61 = vpop.f32.mrf.mxu2 }
 0x1f6   : > { %v1523_v60 = vadd.f32 %v1522_v61, %v8215_v29 }
 0x1f7   : > { %v1862_v34 = vpop.f32.mrf.mxu0 }
 0x1f8   : > { %v1771_v1 = vpop.f32.mrf.mxu3  ;;  %v8440_v51 = vpop.f32.mrf.mxu1 }
 0x1f9   : > { %v1772_v0 = vadd.f32 %v1771_v1, %v1523_v60 }
 0x1fb   : > { %v1861_v57 = vadd.f32 %v1860_v3, %v1772_v0 }
 0x1fd   : > { %v8442_v28 = vadd.f32 %v1949_v16, %v1861_v57  ;;  %v1524_v45 = vpop.f32.mrf.mxu2 }
 0x1fe   : > { %v1525_v20 = vadd.f32 %v1524_v45, %v8219_v24  ;;  %v6047_v45 = vld [vmem:[#allocation2 + $0x9c] sm:$0xf0] }
 0x1ff   : > { %v1865_v58 = vpop.f32.mrf.mxu0 }
 0x200   : > { %v1773_v29 = vpop.f32.mrf.mxu3  ;;  %v1954_v60 = vpop.f32.mrf.mxu1 }
 0x201   : > { %v1774_v61 = vadd.f32 %v1773_v29, %v1525_v20 }
 0x202   : > { %2515 = vmatmul.bf16.gmra.mxu2 %v6034_v63  ;;  %2693 = vmatmul.bf16.gmra.mxu0 %v6042_v6  ;;  %v6046_v63 = vor.u32 %v7085_v19, %v6045_v47  ;;  %v6057_v19 = vld [vmem:[#allocation2 + $0xa8] sm:$0xf] }
 0x203   : > { %v8445_v3 = vadd.f32 %v1862_v34, %v1774_v61 }
 0x205   : > { %2604 = vmatmul.bf16.gmra.mxu3 %v6038_v55  ;;  %v1527_v1 = vpop.f32.mrf.mxu2  ;;  %v6050_v55 = vor.u32 %v7084_v2, %v6047_v45  ;;  %v7089_v2 = vld [vmem:[#allocation2 + $0xb8] sm:$0xf0] }
 0x206   : > { %v1528_v16 = vadd.f32 %v1527_v1, %v8233_v50  ;;  %v6054_v50 = vor.u32 %v7086_v22, %v6053_v8  ;;  %v7088_v8 = vld [vmem:[#allocation2 + $0xb0] sm:$0xf0]  ;;  %v6065_v22 = vld [vmem:[#allocation2 + $0xb0] sm:$0xf] }
 0x207   : > { %v1867_v49 = vpop.f32.mrf.mxu0 }
 0x208   : > { %v1776_v0 = vpop.f32.mrf.mxu3  ;;  %v8448_v48 = vpop.f32.mrf.mxu1 }
 0x209   : > { %v1777_v57 = vadd.f32 %v1776_v0, %v1528_v16  ;;  %9593 = vst [vmem:[#allocation34_spill] sm:$0xff] %v8448_v48 }
 0x20b   : > { %v1866_v24 = vadd.f32 %v1865_v58, %v1777_v57 }
 0x20d   : > { %v8450_v62 = vadd.f32 %v1954_v60, %v1866_v24  ;;  %v1529_v34 = vpop.f32.mrf.mxu2 }
 0x20e   : > { %v1530_v20 = vadd.f32 %v1529_v34, %v8237_v31  ;;  %v7220_v31 = vld [vmem:[#allocation8 + $0xc8] sm:$0xff] }
 0x20f   : > { %v1870_v6 = vpop.f32.mrf.mxu0  ;;  %3814 = vmatpush.bf16.msra.mxu1 %v7220_v31  ;;  %v6059_v34 = vld [vmem:[#allocation2 + $0xb4] sm:$0xf0] }
 0x210   : > { %v1778_v29 = vpop.f32.mrf.mxu3  ;;  %v1959_v1 = vpop.f32.mrf.mxu1 }
 0x211   : > { %v1779_v61 = vadd.f32 %v1778_v29, %v1530_v20 }
 0x212   : > { %2520 = vmatmul.bf16.gmra.mxu2 %v6046_v63  ;;  %2698 = vmatmul.bf16.gmra.mxu0 %v6054_v50  ;;  %v6058_v63 = vor.u32 %v7088_v8, %v6057_v19  ;;  %v6066_v50 = vor.u32 %v7089_v2, %v6065_v22  ;;  %v6077_v19 = vld [vmem:[#allocation2 + $0xc8] sm:$0xf]  ;;  %v7092_v8 = vld [vmem:[#allocation2 + $0xd0] sm:$0xf0] }
 0x213   : > { %v8453_v58 = vadd.f32 %v1867_v49, %v1779_v61  ;;  %v7087_v49 = vld [vmem:[#allocation2 + $0xac] sm:$0xf] }
 0x214   : > { %v6062_v61 = vor.u32 %v7087_v49, %v6059_v34  ;;  %v7090_v49 = vld [vmem:[#allocation2 + $0xc4] sm:$0xf]  ;;  %v6071_v34 = vld [vmem:[#allocation2 + $0xcc] sm:$0xf0] }
 0x215   : > { %2609 = vmatmul.bf16.gmra.mxu3 %v6050_v55  ;;  %v1532_v16 = vpop.f32.mrf.mxu2 }
 0x216   : > { %v1533_v60 = vadd.f32 %v1532_v16, %v8251_v37 }
 0x217   : > { %v1872_v57 = vpop.f32.mrf.mxu0 }
 0x218   : > { %v1781_v0 = vpop.f32.mrf.mxu3  ;;  %v8456_v48 = vpop.f32.mrf.mxu1 }
 0x219   : > { %v1782_v24 = vadd.f32 %v1781_v0, %v1533_v60  ;;  %9594 = vst [vmem:[#allocation33_spill] sm:$0xff] %v8456_v48 }
 0x21b   : > { %v1871_v47 = vadd.f32 %v1870_v6, %v1782_v24 }
 0x21d   : > { %v8458_v45 = vadd.f32 %v1959_v1, %v1871_v47  ;;  %v1534_v20 = vpop.f32.mrf.mxu2 }
 0x21e   : > { %v1535_v29 = vadd.f32 %v1534_v20, %v8255_v11  ;;  %v6069_v11 = vld [vmem:[#allocation2 + $0xc0] sm:$0xf]  ;;  %v7091_v20 = vld [vmem:[#allocation2 + $0xc8] sm:$0xf0] }
 0x21f   : > { %v1875_v55 = vpop.f32.mrf.mxu0 }
 0x220   : > { %v1783_v37 = vpop.f32.mrf.mxu3  ;;  %v1964_v60 = vpop.f32.mrf.mxu1 }
 0x221   : > { %v1784_v16 = vadd.f32 %v1783_v37, %v1535_v29 }
 0x222   : > { %2525 = vmatmul.bf16.gmra.mxu2 %v6058_v63  ;;  %2703 = vmatmul.bf16.gmra.mxu0 %v6066_v50  ;;  %v6070_v63 = vor.u32 %v7091_v20, %v6069_v11  ;;  %v6089_v11 = vld [vmem:[#allocation2 + $0xe0] sm:$0xf]  ;;  %v7095_v20 = vld [vmem:[#allocation2 + $0xe8] sm:$0xf0] }
 0x223   : > { %v8461_v6 = vadd.f32 %v1872_v57, %v1784_v16 }
 0x225   : > { %2614 = vmatmul.bf16.gmra.mxu3 %v6062_v61  ;;  %v1537_v0 = vpop.f32.mrf.mxu2  ;;  %v6074_v61 = vor.u32 %v7090_v49, %v6071_v34  ;;  %v6083_v49 = vld [vmem:[#allocation2 + $0xe4] sm:$0xf0] }
 0x226   : > { %v1538_v1 = vadd.f32 %v1537_v0, %v8269_v9  ;;  %v6078_v9 = vor.u32 %v7092_v8, %v6077_v19  ;;  %v7093_v8 = vld [vmem:[#allocation2 + $0xdc] sm:$0xf] }
 0x227   : > { %v1877_v31 = vpop.f32.mrf.mxu0 }
 0x228   : > { %v1786_v24 = vpop.f32.mrf.mxu3  ;;  %v8464_v22 = vpop.f32.mrf.mxu1 }
 0x229   : > { %v1787_v47 = vadd.f32 %v1786_v24, %v1538_v1  ;;  %9595 = vst [vmem:[#allocation40_spill] sm:$0xff] %v8464_v22 }
 0x22b   : > { %v1876_v48 = vadd.f32 %v1875_v55, %v1787_v47 }
 0x22d   : > { %v8466_v2 = vadd.f32 %v1964_v60, %v1876_v48  ;;  %v1539_v57 = vpop.f32.mrf.mxu2 }
 0x22e   : > { %v1540_v29 = vadd.f32 %v1539_v57, %v8273_v46  ;;  %v6081_v46 = vld [vmem:[#allocation2 + $0xd8] sm:$0xf]  ;;  %v7094_v57 = vld [vmem:[#allocation2 + $0xe0] sm:$0xf0] }
 0x22f   : > { %v1880_v50 = vpop.f32.mrf.mxu0 }
 0x230   : > { %v1788_v37 = vpop.f32.mrf.mxu3  ;;  %v1969_v1 = vpop.f32.mrf.mxu1 }
 0x231   : > { %v1789_v16 = vadd.f32 %v1788_v37, %v1540_v29  ;;  %v6082_v37 = vor.u32 %v7094_v57, %v6081_v46  ;;  %v6093_v57 = vld [vmem:[#allocation2 + $0xf0] sm:$0xf] }
 0x232   : > { %2530 = vmatmul.bf16.gmra.mxu2 %v6070_v63  ;;  %2708 = vmatmul.bf16.gmra.mxu0 %v6078_v9  ;;  %v6090_v63 = vor.u32 %v7095_v20, %v6089_v11  ;;  %v7097_v11 = vld [vmem:[#allocation2 + $0xf8] sm:$0xf0]  ;;  %v6101_v20 = vld [vmem:[#allocation2 + $0xf8] sm:$0xf] }
 0x233   : > { %v8469_v55 = vadd.f32 %v1877_v31, %v1789_v16 }
 0x235   : > { %2619 = vmatmul.bf16.gmra.mxu3 %v6074_v61  ;;  %v1542_v0 = vpop.f32.mrf.mxu2 }
 0x236   : > { %v1543_v48 = vadd.f32 %v1542_v0, %v8287_v4  ;;  %v6086_v4 = vor.u32 %v7093_v8, %v6083_v49  ;;  %v7098_v8 = vld [vmem:[#allocation2 + $0x100] sm:$0xf0] }
 0x237   : > { %v1882_v24 = vpop.f32.mrf.mxu0 }
 0x238   : > { %v1791_v60 = vpop.f32.mrf.mxu3  ;;  %v8475_v61 = vpop.f32.mrf.mxu1 }
 0x239   : > { %v1792_v47 = vadd.f32 %v1791_v60, %v1543_v48  ;;  %9596 = vst [vmem:[#allocation39_spill] sm:$0xff] %v8475_v61 }
 0x23b   : > { %v1881_v22 = vadd.f32 %v1880_v50, %v1792_v47 }
 0x23d   : > { %v8472_v19 = vadd.f32 %v1969_v1, %v1881_v22  ;;  %v1544_v34 = vpop.f32.mrf.mxu2  ;;  %v7219_v22 = vld [vmem:[#allocation8 + $0xc0] sm:$0xff] }
 0x23e   : > { %v1545_v31 = vadd.f32 %v1544_v34, %v8291_v43  ;;  %3815 = vmatpush.bf16.msra.mxu1 %v7219_v22  ;;  %v7096_v34 = vld [vmem:[#allocation2 + $0xf4] sm:$0xf] }
 0x23f   : > { %v1885_v9 = vpop.f32.mrf.mxu0 }
 0x240   : > { %v1793_v29 = vpop.f32.mrf.mxu3  ;;  %v1974_v47 = vpop.f32.mrf.mxu1 }
 0x241   : > { %v1794_v16 = vadd.f32 %v1793_v29, %v1545_v31 }
 0x242   : > { %2535 = vmatmul.bf16.gmra.mxu2 %v6082_v37  ;;  %2713 = vmatmul.bf16.gmra.mxu0 %v6090_v63  ;;  %v6094_v63 = vor.u32 %v7097_v11, %v6093_v57  ;;  %v7100_v11 = vld [vmem:[#allocation2 + $0x110] sm:$0xf0] }
 0x243   : > { %v8477_v50 = vadd.f32 %v1882_v24, %v1794_v16  ;;  %v6095_v24 = vld [vmem:[#allocation2 + $0xfc] sm:$0xf0] }
 0x244   : > { %v6098_v16 = vor.u32 %v7096_v34, %v6095_v24  ;;  %v7099_v34 = vld [vmem:[#allocation2 + $0x10c] sm:$0xf] }
 0x245   : > { %2624 = vmatmul.bf16.gmra.mxu3 %v6086_v4  ;;  %v1547_v0 = vpop.f32.mrf.mxu2  ;;  %v6102_v4 = vor.u32 %v7098_v8, %v6101_v20  ;;  %v6113_v20 = vld [vmem:[#allocation2 + $0x110] sm:$0xf]  ;;  %v7101_v8 = vld [vmem:[#allocation2 + $0x118] sm:$0xf0] }
 0x246   : > { %v1548_v1 = vadd.f32 %v1547_v0, %v8305_v21 }
 0x247   : > { %v1887_v43 = vpop.f32.mrf.mxu0 }
 0x248   : > { %v1796_v48 = vpop.f32.mrf.mxu3 }
 0x249   : > { %v1797_v60 = vadd.f32 %v1796_v48, %v1548_v1 }
 0x24b   : > { %v1886_v46 = vadd.f32 %v1885_v9, %v1797_v60 }
 0x24d   : > { %v8480_v49 = vadd.f32 %v1974_v47, %v1886_v46  ;;  %v1549_v31 = vpop.f32.mrf.mxu2  ;;  %v6105_v46 = vld [vmem:[#allocation2 + $0x108] sm:$0xf] }
 0x24e   : > { %v1550_v29 = vadd.f32 %v1549_v31, %v8309_v40  ;;  %v8488_v40 = vld [vmem:[%s9473_s3] ss:$0 sm:$0xff] }
 0x24f   : > { %9597 = vst [vmem:[#allocation46_spill] sm:$0xff] %v8480_v49  ;;  %v2679_v21 = vpop.f32.mrf.mxu0 }
 0x250   : > { %v1798_v37 = vpop.f32.mrf.mxu3 }
 0x251   : > { %v1799_v22 = vadd.f32 %v1798_v37, %v1550_v29  ;;  %v6106_v37 = vor.u32 %v7100_v11, %v6105_v46  ;;  %v7207_v11 = vld [vmem:[#allocation8 + $0x78] sm:$0xff] }
 0x252   : > { %2540 = vmatmul.bf16.gmra.mxu2 %v6094_v63  ;;  %2718 = vmatmul.bf16.gmra.mxu0 %v6102_v4  ;;  %v6114_v63 = vor.u32 %v7101_v8, %v6113_v20 }
 0x253   : > { %v8483_v9 = vadd.f32 %v1887_v43, %v1799_v22  ;;  %v6107_v43 = vld [vmem:[#allocation2 + $0x114] sm:$0xf0]  ;;  %4324 = vmatpush.bf16.msrb.mxu1 %v7207_v11  ;;  %v6119_v11 = vld [vmem:[#allocation2 + $0x12c] sm:$0xf0] }
 0x254   : > { %v6110_v22 = vor.u32 %v7099_v34, %v6107_v43 }
 0x255   : > { %9598 = vst [vmem:[#allocation45_spill] sm:$0xff] %v8483_v9  ;;  %2629 = vmatmul.bf16.gmra.mxu3 %v6098_v16  ;;  %v2501_v0 = vpop.f32.mrf.mxu2  ;;  %v7234_v9 = vld [vmem:[#allocation8 + $0x138] sm:$0xff] }
 0x256   : > { %3897 = vmatpush.bf16.msrb.mxu2 %v7234_v9  ;;  %v7103_v9 = vld [vmem:[#allocation2 + $0x128] sm:$0xf0] }
 0x257   : > { %v2681_v60 = vpop.f32.mrf.mxu0 }
 0x258   : > { %v2590_v1 = vpop.f32.mrf.mxu3 }
 0x259   : > { %v2591_v48 = vadd.f32 %v2590_v1, %v2501_v0 }
 0x25b   : > { %v2680_v47 = vadd.f32 %v2679_v21, %v2591_v48  ;;  %v7242_v48 = vld [vmem:[#allocation8 + $0x178] sm:$0xff] }
 0x25c   : > { %3986 = vmatpush.bf16.msrb.mxu3 %v7242_v48  ;;  %v7104_v48 = vld [vmem:[#allocation2 + $0x130] sm:$0xf0] }
 0x25d   : > { %v2759_v57 = vadd.f32 %v2680_v47, %v8322_v59  ;;  %v2503_v31 = vpop.f32.mrf.mxu2 }
 0x25f   : > { %v2795_v24 = vadd.f32 %v8488_v40, %v2759_v57  ;;  %v2684_v16 = vpop.f32.mrf.mxu0  ;;  %v7199_v57 = vld [vmem:[#allocation8 + $0x38] sm:$0xff] }
 0x260   : > { %v2592_v29 = vpop.f32.mrf.mxu3  ;;  %4235 = vmatpush.bf16.msrb.mxu0 %v7199_v57  ;;  %v7102_v57 = vld [vmem:[#allocation2 + $0x124] sm:$0xf] }
 0x261   : > { %v2827_v4 = vmax.f32 %v2795_v24, 0.0  ;;  %v2593_v21 = vadd.f32 %v2592_v29, %v2503_v31  ;;  %v6122_v61 = vor.u32 %v7102_v57, %v6119_v11 }
 0x262   : > { %2545 = vmatmul.bf16.gmra.mxu2 %v6106_v37  ;;  %2723 = vmatmul.bf16.gmra.mxu0 %v6114_v63  ;;  %v6117_v63 = vld [vmem:[#allocation2 + $0x120] sm:$0xf] }
 0x263   : > { %v2859_v0 = vpack.c.bf16 %v2827_v4, %v2827_v4  ;;  %v2682_v1 = vadd.f32 %v2681_v60, %v2593_v21  ;;  %v2891_v60 = vrot.slane %v2827_v4, 7  ;;  %v2987_v24 = vrot.slane %v2827_v4, 1  ;;  %v6125_v4 = vld [vmem:[#allocation2 + $0x128] sm:$0xf] }
 0x265   : > { %3147 = vst [vmem:[#allocation2 + $0x1c] sm:$0xf] %v2859_v0  ;;  %v2760_v59 = vadd.f32 %v2682_v1, %v8329_v14  ;;  %2634 = vmatmul.bf16.gmra.mxu3 %v6110_v22  ;;  %v2506_v46 = vpop.f32.mrf.mxu2 }
 0x267   : > { %v2796_v47 = vadd.f32 %v8488_v40, %v2760_v59  ;;  %v2686_v43 = vpop.f32.mrf.mxu0 }
 0x268   : > { %v2595_v20 = vpop.f32.mrf.mxu3 }
 0x269   : > { %v2828_v8 = vmax.f32 %v2796_v47, 0.0  ;;  %v2596_v34 = vadd.f32 %v2595_v20, %v2506_v46 }
 0x26b   : > { %v2860_v31 = vpack.c.bf16 %v2828_v8, %v2828_v8  ;;  %v2907_v29 = vrot.slane %v2828_v8, 7  ;;  %v3003_v37 = vrot.slane %v2828_v8, 1  ;;  %v2685_v14 = vadd.f32 %v2684_v16, %v2596_v34 }
 0x26d   : > { %v2923_v21 = vsel %vm390_vm1, %v2891_v60, %v2907_v29  ;;  %v2939_v22 = vsel %vm390_vm1, %v2907_v29, %v2891_v60  ;;  %v3019_v0 = vsel %vm491_vm2, %v2987_v24, %v3003_v37  ;;  %v3035_v1 = vsel %vm491_vm2, %v3003_v37, %v2987_v24  ;;  %3148 = vst [vmem:[#allocation2 + $0x28] sm:$0xf] %v2860_v31  ;;  %v2508_v60 = vpop.f32.mrf.mxu2 }
 0x26e   : > { %v2955_v16 = vsel %vm282_vm0, 0.0, %v2939_v22  ;;  %v3052_v59 = vsel %vm285_vm3, 0.0, %v3035_v1  ;;  %v3084_v47 = vpack.c.bf16 %v2923_v21, %v2923_v21  ;;  %v3179_v46 = vpack.c.bf16 %v3019_v0, %v3019_v0 }
 0x26f   : > { %v3083_v20 = vpack.c.bf16 %v2955_v16, %v2955_v16  ;;  %v3180_v8 = vpack.c.bf16 %v3052_v59, %v3052_v59  ;;  %v2761_v34 = vadd.f32 %v2685_v14, %v8338_v42  ;;  %v6118_v31 = vor.u32 %v7103_v9, %v6117_v63  ;;  %v2689_v49 = vpop.f32.mrf.mxu0 }
 0x270   : > { %3116 = vst [vmem:[#allocation2 + $0x24] sm:$0xf] %v3084_v47  ;;  %v2597_v24 = vpop.f32.mrf.mxu3  ;;  %v6126_v29 = vor.u32 %v7104_v48, %v6125_v4 }
 0x271   : > { %3115 = vst [vmem:[#allocation2 + $0x18] sm:$0xf] %v3083_v20  ;;  %v2797_v37 = vadd.f32 %v8488_v40, %v2761_v34  ;;  %v2598_v22 = vadd.f32 %v2597_v24, %v2508_v60 }
 0x272   : > { %3211 = vst [vmem:[#allocation2 + $0x20] sm:$0xf] %v3179_v46  ;;  %2550 = vmatmul.bf16.gmra.mxu2 %v6118_v31  ;;  %2728 = vmatmul.bf16.gmra.mxu0 %v6126_v29 }
 0x273   : > { %3212 = vst [vmem:[#allocation2 + $0x2c] sm:$0xf] %v3180_v8  ;;  %v2829_v21 = vmax.f32 %v2797_v37, 0.0  ;;  %v2687_v0 = vadd.f32 %v2686_v43, %v2598_v22  ;;  %v6137_v37 = vld [vmem:[#allocation2 + $0x140] sm:$0xf] }
 0x274   : > { %v7107_v22 = vld [vmem:[#allocation2 + $0x148] sm:$0xf0] }
 0x275   : > { %v2861_v1 = vpack.c.bf16 %v2829_v21, %v2829_v21  ;;  %v2762_v42 = vadd.f32 %v2687_v0, %v8345_v39  ;;  %2639 = vmatmul.bf16.gmra.mxu3 %v6122_v61  ;;  %v2511_v63 = vpop.f32.mrf.mxu2  ;;  %v2892_v57 = vrot.slane %v2829_v21, 7  ;;  %v2988_v43 = vrot.slane %v2829_v21, 1  ;;  %v6129_v39 = vld [vmem:[#allocation2 + $0x138] sm:$0xf]  ;;  %v7106_v61 = vld [vmem:[#allocation2 + $0x140] sm:$0xf0] }
 0x277   : > { %3149 = vst [vmem:[#allocation2 + $0x34] sm:$0xf] %v2861_v1  ;;  %v2798_v14 = vadd.f32 %v8488_v40, %v2762_v42  ;;  %v7148_v9 = vld [vmem:[#allocation2 + $0x20] sm:$0xf0]  ;;  %v2691_v47 = vpop.f32.mrf.mxu0  ;;  %v7105_v42 = vld [vmem:[#allocation2 + $0x13c] sm:$0xf] }
 0x278   : > { %v2600_v4 = vpop.f32.mrf.mxu3  ;;  %v6285_v48 = vld [vmem:[#allocation2 + $0x18] sm:$0xf] }
 0x279   : > { %v2830_v16 = vmax.f32 %v2798_v14, 0.0  ;;  %v2601_v59 = vadd.f32 %v2600_v4, %v2511_v63  ;;  %v8510_v46 = vor.u32 %v7148_v9, %v6285_v48  ;;  %v6131_v14 = vld [vmem:[#allocation2 + $0x144] sm:$0xf0] }
 0x27b   : > { %v2862_v11 = vpack.c.bf16 %v2830_v16, %v2830_v16  ;;  %v2908_v20 = vrot.slane %v2830_v16, 7  ;;  %v3004_v8 = vrot.slane %v2830_v16, 1  ;;  %v2690_v34 = vadd.f32 %v2689_v49, %v2601_v59  ;;  %3816 = vmatmul.bf16.vlgmr.msra.gmra.mxu1 %v8510_v46 }
 0x27c   : > { %v6130_v59 = vor.u32 %v7106_v61, %v6129_v39 }
 0x27d   : > { %v2924_v60 = vsel %vm390_vm1, %v2892_v57, %v2908_v20  ;;  %v2940_v24 = vsel %vm390_vm1, %v2908_v20, %v2892_v57  ;;  %v3020_v31 = vsel %vm491_vm2, %v2988_v43, %v3004_v8  ;;  %v3036_v29 = vsel %vm491_vm2, %v3004_v8, %v2988_v43  ;;  %3150 = vst [vmem:[#allocation2 + $0x40] sm:$0xf] %v2862_v11  ;;  %v2513_v48 = vpop.f32.mrf.mxu2 }
 0x27e   : > { %v2957_v49 = vsel %vm282_vm0, 0.0, %v2940_v24  ;;  %v3054_v21 = vsel %vm285_vm3, 0.0, %v3036_v29  ;;  %v3086_v0 = vpack.c.bf16 %v2924_v60, %v2924_v60  ;;  %v3181_v1 = vpack.c.bf16 %v3020_v31, %v3020_v31  ;;  %v7241_v31 = vld [vmem:[#allocation8 + $0x170] sm:$0xff] }
 0x27f   : > { %v3085_v63 = vpack.c.bf16 %v2957_v49, %v2957_v49  ;;  %v3182_v9 = vpack.c.bf16 %v3054_v21, %v3054_v21  ;;  %v2763_v4 = vadd.f32 %v2690_v34, %v8354_v56  ;;  %v6138_v57 = vor.u32 %v7107_v22, %v6137_v37  ;;  %v2694_v20 = vpop.f32.mrf.mxu0  ;;  %v7233_v29 = vld [vmem:[#allocation8 + $0x130] sm:$0xff]  ;;  %3987 = vmatpush.bf16.msrb.mxu3 %v7241_v31 }
 0x280   : > { %3118 = vst [vmem:[#allocation2 + $0x3c] sm:$0xf] %v3086_v0  ;;  %v2602_v16 = vpop.f32.mrf.mxu3  ;;  %v6134_v8 = vor.u32 %v7105_v42, %v6131_v14  ;;  %3898 = vmatpush.bf16.msrb.mxu2 %v7233_v29  ;;  %v7198_v22 = vld [vmem:[#allocation8 + $0x30] sm:$0xff] }
 0x281   : > { %3117 = vst [vmem:[#allocation2 + $0x30] sm:$0xf] %v3085_v63  ;;  %v2799_v43 = vadd.f32 %v8488_v40, %v2763_v4  ;;  %v2603_v11 = vadd.f32 %v2602_v16, %v2513_v48  ;;  %v7206_v49 = vld [vmem:[#allocation8 + $0x70] sm:$0xff]  ;;  %4236 = vmatpush.bf16.msrb.mxu0 %v7198_v22 }
 0x282   : > { %3213 = vst [vmem:[#allocation2 + $0x38] sm:$0xf] %v3181_v1  ;;  %2555 = vmatmul.bf16.gmra.mxu2 %v6130_v59  ;;  %2733 = vmatmul.bf16.gmra.mxu0 %v6138_v57  ;;  %v6141_v59 = vld [vmem:[#allocation2 + $0x150] sm:$0xf]  ;;  %v7109_v57 = vld [vmem:[#allocation2 + $0x158] sm:$0xf0] }
 0x283   : > { %3214 = vst [vmem:[#allocation2 + $0x44] sm:$0xf] %v3182_v9  ;;  %v2831_v60 = vmax.f32 %v2799_v43, 0.0  ;;  %v2692_v24 = vadd.f32 %v2691_v47, %v2603_v11  ;;  %4325 = vmatpush.bf16.msrb.mxu1 %v7206_v49  ;;  %v7110_v31 = vld [vmem:[#allocation2 + $0x160] sm:$0xf0] }
 0x285   : > { %v2863_v56 = vpack.c.bf16 %v2831_v60, %v2831_v60  ;;  %v2764_v34 = vadd.f32 %v2692_v24, %v8361_v26  ;;  %2644 = vmatmul.bf16.gmra.mxu3 %v6134_v8  ;;  %v2516_v61 = vpop.f32.mrf.mxu2  ;;  %v2893_v26 = vrot.slane %v2831_v60, 7  ;;  %v2989_v63 = vrot.slane %v2831_v60, 1  ;;  %v6149_v24 = vld [vmem:[#allocation2 + $0x158] sm:$0xf] }
 0x287   : > { %3151 = vst [vmem:[#allocation2 + $0x4c] sm:$0xf] %v2863_v56  ;;  %v2800_v39 = vadd.f32 %v8488_v40, %v2764_v34  ;;  %v7151_v37 = vld [vmem:[#allocation2 + $0x38] sm:$0xf0]  ;;  %v2696_v42 = vpop.f32.mrf.mxu0 }
 0x288   : > { %v2605_v21 = vpop.f32.mrf.mxu3  ;;  %v6297_v0 = vld [vmem:[#allocation2 + $0x30] sm:$0xf] }
 0x289   : > { %v2832_v47 = vmax.f32 %v2800_v39, 0.0  ;;  %v2606_v1 = vadd.f32 %v2605_v21, %v2516_v61  ;;  %v8529_v14 = vor.u32 %v7151_v37, %v6297_v0  ;;  %v7108_v39 = vld [vmem:[#allocation2 + $0x154] sm:$0xf]  ;;  %v6143_v61 = vld [vmem:[#allocation2 + $0x15c] sm:$0xf0] }
 0x28b   : > { %v2864_v9 = vpack.c.bf16 %v2832_v47, %v2832_v47  ;;  %v2909_v4 = vrot.slane %v2832_v47, 7  ;;  %v3005_v48 = vrot.slane %v2832_v47, 1  ;;  %v2695_v16 = vadd.f32 %v2694_v20, %v2606_v1  ;;  %3821 = vmatmul.bf16.gmra.mxu1 %v8529_v14 }
 0x28c   : > { %v6142_v47 = vor.u32 %v7109_v57, %v6141_v59  ;;  %v6150_v1 = vor.u32 %v7110_v31, %v6149_v24 }
 0x28d   : > { %v2925_v43 = vsel %vm390_vm1, %v2893_v26, %v2909_v4  ;;  %v2941_v11 = vsel %vm390_vm1, %v2909_v4, %v2893_v26  ;;  %v3021_v8 = vsel %vm491_vm2, %v2989_v63, %v3005_v48  ;;  %v3037_v60 = vsel %vm491_vm2, %v3005_v48, %v2989_v63  ;;  %3152 = vst [vmem:[#allocation2 + $0x58] sm:$0xf] %v2864_v9  ;;  %v2518_v21 = vpop.f32.mrf.mxu2 }
 0x28e   : > { %v2959_v20 = vsel %vm282_vm0, 0.0, %v2941_v11  ;;  %v3056_v29 = vsel %vm285_vm3, 0.0, %v3037_v60  ;;  %v3088_v56 = vpack.c.bf16 %v2925_v43, %v2925_v43  ;;  %v3183_v34 = vpack.c.bf16 %v3021_v8, %v3021_v8 }
 0x28f   : > { %v3087_v37 = vpack.c.bf16 %v2959_v20, %v2959_v20  ;;  %v3184_v22 = vpack.c.bf16 %v3056_v29, %v3056_v29  ;;  %v2765_v49 = vadd.f32 %v2695_v16, %v8370_v12  ;;  %v2699_v9 = vpop.f32.mrf.mxu0  ;;  %v6146_v4 = vor.u32 %v7108_v39, %v6143_v61 }
 0x290   : > { %3120 = vst [vmem:[#allocation2 + $0x54] sm:$0xf] %v3088_v56  ;;  %v2607_v0 = vpop.f32.mrf.mxu3 }
 0x291   : > { %3119 = vst [vmem:[#allocation2 + $0x48] sm:$0xf] %v3087_v37  ;;  %v2801_v26 = vadd.f32 %v8488_v40, %v2765_v49  ;;  %v2608_v63 = vadd.f32 %v2607_v0, %v2518_v21  ;;  %v7111_v49 = vld [vmem:[#allocation2 + $0x16c] sm:$0xf]  ;;  %v6155_v21 = vld [vmem:[#allocation2 + $0x174] sm:$0xf0] }
 0x292   : > { %3215 = vst [vmem:[#allocation2 + $0x50] sm:$0xf] %v3183_v34  ;;  %2560 = vmatmul.bf16.gmra.mxu2 %v6142_v47  ;;  %2738 = vmatmul.bf16.gmra.mxu0 %v6150_v1 }
 0x293   : > { %3216 = vst [vmem:[#allocation2 + $0x5c] sm:$0xf] %v3184_v22  ;;  %v2833_v48 = vmax.f32 %v2801_v26, 0.0  ;;  %v2697_v43 = vadd.f32 %v2696_v42, %v2608_v63  ;;  %v7112_v22 = vld [vmem:[#allocation2 + $0x170] sm:$0xf0] }
 0x294   : > { %v6161_v63 = vld [vmem:[#allocation2 + $0x170] sm:$0xf] }
 0x295   : > { %v2865_v11 = vpack.c.bf16 %v2833_v48, %v2833_v48  ;;  %v2766_v12 = vadd.f32 %v2697_v43, %v8377_v13  ;;  %2649 = vmatmul.bf16.gmra.mxu3 %v6146_v4  ;;  %v2521_v59 = vpop.f32.mrf.mxu2  ;;  %v2894_v56 = vrot.slane %v2833_v48, 7  ;;  %v2990_v42 = vrot.slane %v2833_v48, 1  ;;  %v6153_v13 = vld [vmem:[#allocation2 + $0x168] sm:$0xf] }
 0x297   : > { %3153 = vst [vmem:[#allocation2 + $0x64] sm:$0xf] %v2865_v11  ;;  %v2802_v16 = vadd.f32 %v8488_v40, %v2766_v12  ;;  %v7154_v57 = vld [vmem:[#allocation2 + $0x50] sm:$0xf0]  ;;  %v2701_v20 = vpop.f32.mrf.mxu0  ;;  %v7240_v12 = vld [vmem:[#allocation8 + $0x168] sm:$0xff] }
 0x298   : > { %v2610_v8 = vpop.f32.mrf.mxu3  ;;  %v6309_v60 = vld [vmem:[#allocation2 + $0x48] sm:$0xf]  ;;  %3988 = vmatpush.bf16.msrb.mxu3 %v7240_v12 }
 0x299   : > { %v2834_v24 = vmax.f32 %v2802_v16, 0.0  ;;  %v2611_v31 = vadd.f32 %v2610_v8, %v2521_v59  ;;  %v8548_v29 = vor.u32 %v7154_v57, %v6309_v60  ;;  %v7232_v16 = vld [vmem:[#allocation8 + $0x128] sm:$0xff] }
 0x29a   : > { %v7197_v59 = vld [vmem:[#allocation8 + $0x28] sm:$0xff]  ;;  %3899 = vmatpush.bf16.msrb.mxu2 %v7232_v16 }
 0x29b   : > { %v2866_v34 = vpack.c.bf16 %v2834_v24, %v2834_v24  ;;  %v2910_v39 = vrot.slane %v2834_v24, 7  ;;  %v3006_v61 = vrot.slane %v2834_v24, 1  ;;  %v2700_v37 = vadd.f32 %v2699_v9, %v2611_v31  ;;  %3826 = vmatmul.bf16.gmra.mxu1 %v8548_v29  ;;  %v7113_v9 = vld [vmem:[#allocation2 + $0x178] sm:$0xf0]  ;;  %4237 = vmatpush.bf16.msrb.mxu0 %v7197_v59 }
 0x29d   : > { %v2926_v0 = vsel %vm390_vm1, %v2894_v56, %v2910_v39  ;;  %v2942_v47 = vsel %vm390_vm1, %v2910_v39, %v2894_v56  ;;  %v3022_v1 = vsel %vm491_vm2, %v2990_v42, %v3006_v61  ;;  %v3038_v26 = vsel %vm491_vm2, %v3006_v61, %v2990_v42  ;;  %3154 = vst [vmem:[#allocation2 + $0x70] sm:$0xf] %v2866_v34  ;;  %v2523_v24 = vpop.f32.mrf.mxu2 }
 0x29e   : > { %v2961_v4 = vsel %vm282_vm0, 0.0, %v2942_v47  ;;  %v3058_v48 = vsel %vm285_vm3, 0.0, %v3038_v26  ;;  %v3090_v43 = vpack.c.bf16 %v2926_v0, %v2926_v0  ;;  %v3185_v11 = vpack.c.bf16 %v3022_v1, %v3022_v1  ;;  %v7231_v47 = vld [vmem:[#allocation8 + $0x120] sm:$0xff] }
 0x29f   : > { %v3089_v57 = vpack.c.bf16 %v2961_v4, %v2961_v4  ;;  %v3186_v8 = vpack.c.bf16 %v3058_v48, %v3058_v48  ;;  %v2767_v60 = vadd.f32 %v2700_v37, %v8388_v41  ;;  %v6154_v56 = vor.u32 %v7112_v22, %v6153_v13  ;;  %v2704_v61 = vpop.f32.mrf.mxu0  ;;  %v7239_v1 = vld [vmem:[#allocation8 + $0x160] sm:$0xff]  ;;  %3900 = vmatpush.bf16.msrb.mxu2 %v7231_v47  ;;  %v7115_v47 = vld [vmem:[#allocation2 + $0x188] sm:$0xf0] }
 0x2a0   : > { %3122 = vst [vmem:[#allocation2 + $0x6c] sm:$0xf] %v3090_v43  ;;  %v2612_v31 = vpop.f32.mrf.mxu3  ;;  %v6162_v42 = vor.u32 %v7113_v9, %v6161_v63  ;;  %v6158_v0 = vor.u32 %v7111_v49, %v6155_v21  ;;  %v7196_v26 = vld [vmem:[#allocation8 + $0x20] sm:$0xff]  ;;  %v1922_v41 = vadd.f32 %v8386_v32, %v8392_v35  ;;  %3989 = vmatpush.bf16.msrb.mxu3 %v7239_v1  ;;  %v7230_v49 = vld [vmem:[#allocation8 + $0x118] sm:$0xff]  ;;  %v7205_v43 = vld [vmem:[#allocation8 + $0x68] sm:$0xff] }
 0x2a1   : > { %3121 = vst [vmem:[#allocation2 + $0x60] sm:$0xf] %v3089_v57  ;;  %v2803_v34 = vadd.f32 %v8488_v40, %v2767_v60  ;;  %v2613_v39 = vadd.f32 %v2612_v31, %v2523_v24  ;;  %4238 = vmatpush.bf16.msrb.mxu0 %v7196_v26  ;;  %v7238_v21 = vld [vmem:[#allocation8 + $0x158] sm:$0xff]  ;;  %4326 = vmatpush.bf16.msrb.mxu1 %v7205_v43  ;;  %v7229_v60 = vld [vmem:[#allocation8 + $0x110] sm:$0xff]  ;;  %v7236_v43 = vld [vmem:[#allocation8 + $0x148] sm:$0xff] }
 0x2a2   : > { %3217 = vst [vmem:[#allocation2 + $0x68] sm:$0xf] %v3185_v11  ;;  %2565 = vmatmul.bf16.gmra.mxu2 %v6154_v56  ;;  %2743 = vmatmul.bf16.gmra.mxu0 %v6162_v42  ;;  %v7195_v32 = vld [vmem:[#allocation8 + $0x18] sm:$0xff]  ;;  %v7237_v24 = vld [vmem:[#allocation8 + $0x150] sm:$0xff] }
 0x2a3   : > { %3218 = vst [vmem:[#allocation2 + $0x74] sm:$0xf] %v3186_v8  ;;  %v2835_v37 = vmax.f32 %v2803_v34, 0.0  ;;  %v2702_v13 = vadd.f32 %v2701_v20, %v2613_v39  ;;  %3901 = vmatpush.bf16.msrb.mxu2 %v7230_v49  ;;  %v7194_v39 = vld [vmem:[#allocation8 + $0x10] sm:$0xff] }
 0x2a4   : > { %3990 = vmatpush.bf16.msrb.mxu3 %v7238_v21  ;;  %v7114_v1 = vld [vmem:[#allocation2 + $0x184] sm:$0xf] }
 0x2a5   : > { %v2867_v22 = vpack.c.bf16 %v2835_v37, %v2835_v37  ;;  %v2768_v63 = vadd.f32 %v2702_v13, %v1922_v41  ;;  %2654 = vmatmul.bf16.gmra.mxu3 %v6158_v0  ;;  %v2526_v4 = vpop.f32.mrf.mxu2  ;;  %v2895_v57 = vrot.slane %v2835_v37, 7  ;;  %v2991_v8 = vrot.slane %v2835_v37, 1  ;;  %4239 = vmatpush.bf16.msrb.mxu0 %v7195_v32  ;;  %v6165_v0 = vld [vmem:[#allocation2 + $0x180] sm:$0xf] }
 0x2a7   : > { %3155 = vst [vmem:[#allocation2 + $0x7c] sm:$0xf] %v2867_v22  ;;  %v2804_v9 = vadd.f32 %v8488_v40, %v2768_v63  ;;  %v7157_v48 = vld [vmem:[#allocation2 + $0x68] sm:$0xf0]  ;;  %v2706_v16 = vpop.f32.mrf.mxu0  ;;  %v7116_v22 = vld [vmem:[#allocation2 + $0x190] sm:$0xf0]  ;;  %3902 = vmatpush.bf16.msrb.mxu2 %v7229_v60 }
 0x2a8   : > { %v2615_v35 = vpop.f32.mrf.mxu3  ;;  %v6321_v11 = vld [vmem:[#allocation2 + $0x60] sm:$0xf]  ;;  %3991 = vmatpush.bf16.msrb.mxu3 %v7237_v24  ;;  %v7227_v24 = vld [vmem:[#allocation8 + $0x100] sm:$0xff] }
 0x2a9   : > { %v2836_v20 = vmax.f32 %v2804_v9, 0.0  ;;  %v2616_v12 = vadd.f32 %v2615_v35, %v2526_v4  ;;  %v8568_v59 = vor.u32 %v7157_v48, %v6321_v11  ;;  %v6167_v4 = vld [vmem:[#allocation2 + $0x18c] sm:$0xf0]  ;;  %v7228_v48 = vld [vmem:[#allocation8 + $0x108] sm:$0xff]  ;;  %4240 = vmatpush.bf16.msrb.mxu0 %v7194_v39 }
 0x2aa   : > { %v6170_v60 = vor.u32 %v7114_v1, %v6167_v4 }
 0x2ab   : > { %v2868_v31 = vpack.c.bf16 %v2836_v20, %v2836_v20  ;;  %v2911_v56 = vrot.slane %v2836_v20, 7  ;;  %v3007_v42 = vrot.slane %v2836_v20, 1  ;;  %v2705_v34 = vadd.f32 %v2704_v61, %v2616_v12  ;;  %3831 = vmatmul.bf16.gmra.mxu1 %v8568_v59  ;;  %v6173_v61 = vld [vmem:[#allocation2 + $0x188] sm:$0xf]  ;;  %v7193_v12 = vld [vmem:[#allocation8 + $0x8] sm:$0xff]  ;;  %3903 = vmatpush.bf16.msrb.mxu2 %v7228_v48 }
 0x2ac   : > { %3992 = vmatpush.bf16.msrb.mxu3 %v7236_v43 }
 0x2ad   : > { %v2927_v26 = vsel %vm390_vm1, %v2895_v57, %v2911_v56  ;;  %v2943_v41 = vsel %vm390_vm1, %v2911_v56, %v2895_v57  ;;  %v3023_v37 = vsel %vm491_vm2, %v2991_v8, %v3007_v42  ;;  %v3039_v13 = vsel %vm491_vm2, %v3007_v42, %v2991_v8  ;;  %3156 = vst [vmem:[#allocation2 + $0x88] sm:$0xf] %v2868_v31  ;;  %v2528_v20 = vpop.f32.mrf.mxu2 }
 0x2ae   : > { %v2963_v63 = vsel %vm282_vm0, 0.0, %v2943_v41  ;;  %v3060_v49 = vsel %vm285_vm3, 0.0, %v3039_v13  ;;  %v3092_v21 = vpack.c.bf16 %v2927_v26, %v2927_v26  ;;  %v3187_v9 = vpack.c.bf16 %v3023_v37, %v3023_v37  ;;  %v7235_v41 = vld [vmem:[#allocation8 + $0x140] sm:$0xff]  ;;  %4241 = vmatpush.bf16.msrb.mxu0 %v7193_v12 }
 0x2af   : > { %v3091_v32 = vpack.c.bf16 %v2963_v63, %v2963_v63  ;;  %v3188_v35 = vpack.c.bf16 %v3060_v49, %v3060_v49  ;;  %v2769_v11 = vadd.f32 %v2705_v34, %v8398_v44  ;;  %v6166_v8 = vor.u32 %v7115_v47, %v6165_v0  ;;  %v2709_v26 = vpop.f32.mrf.mxu0  ;;  %v7192_v0 = vld [vmem:[#allocation8] sm:$0xff]  ;;  %3904 = vmatpush.bf16.msrb.mxu2 %v7227_v24 }
 0x2b0   : > { %3124 = vst [vmem:[#allocation2 + $0x84] sm:$0xf] %v3092_v21  ;;  %v2617_v57 = vpop.f32.mrf.mxu3  ;;  %v6174_v31 = vor.u32 %v7116_v22, %v6173_v61  ;;  %v1927_v44 = vadd.f32 %v8396_v38, %v8402_v30  ;;  %3993 = vmatpush.bf16.msrb.mxu3 %v7235_v41  ;;  %v7117_v41 = vld [vmem:[#allocation2 + $0x19c] sm:$0xf] }
 0x2b1   : > { %3123 = vst [vmem:[#allocation2 + $0x78] sm:$0xf] %v3091_v32  ;;  %v2805_v56 = vadd.f32 %v8488_v40, %v2769_v11  ;;  %v2618_v42 = vadd.f32 %v2617_v57, %v2528_v20  ;;  %v7118_v11 = vld [vmem:[#allocation2 + $0x1a0] sm:$0xf0] }
 0x2b2   : > { %3219 = vst [vmem:[#allocation2 + $0x80] sm:$0xf] %v3187_v9  ;;  %2570 = vmatmul.bf16.gmra.mxu2 %v6166_v8  ;;  %2748 = vmatmul.bf16.gmra.mxu0 %v6174_v31  ;;  %v6185_v31 = vld [vmem:[#allocation2 + $0x1a0] sm:$0xf] }
 0x2b3   : > { %3220 = vst [vmem:[#allocation2 + $0x8c] sm:$0xf] %v3188_v35  ;;  %v2837_v34 = vmax.f32 %v2805_v56, 0.0  ;;  %v2707_v39 = vadd.f32 %v2706_v16, %v2618_v42  ;;  %4242 = vmatpush.bf16.msrb.mxu0 %v7192_v0  ;;  %v6177_v35 = vld [vmem:[#allocation2 + $0x198] sm:$0xf] }
 0x2b4   : > { %v7119_v56 = vld [vmem:[#allocation2 + $0x1a8] sm:$0xf0] }
 0x2b5   : > { %v2869_v47 = vpack.c.bf16 %v2837_v34, %v2837_v34  ;;  %v2770_v37 = vadd.f32 %v2707_v39, %v1927_v44  ;;  %2659 = vmatmul.bf16.gmra.mxu3 %v6170_v60  ;;  %v2531_v13 = vpop.f32.mrf.mxu2  ;;  %v2896_v21 = vrot.slane %v2837_v34, 7  ;;  %v2992_v9 = vrot.slane %v2837_v34, 1  ;;  %v6179_v44 = vld [vmem:[#allocation2 + $0x1a4] sm:$0xf0] }
 0x2b7   : > { %3157 = vst [vmem:[#allocation2 + $0x94] sm:$0xf] %v2869_v47  ;;  %v2806_v1 = vadd.f32 %v8488_v40, %v2770_v37  ;;  %v7160_v61 = vld [vmem:[#allocation2 + $0x80] sm:$0xf0]  ;;  %v2711_v16 = vpop.f32.mrf.mxu0 }
 0x2b8   : > { %v2620_v22 = vpop.f32.mrf.mxu3  ;;  %v6333_v38 = vld [vmem:[#allocation2 + $0x78] sm:$0xf] }
 0x2b9   : > { %v2838_v30 = vmax.f32 %v2806_v1, 0.0  ;;  %v2621_v63 = vadd.f32 %v2620_v22, %v2531_v13  ;;  %v8588_v49 = vor.u32 %v7160_v61, %v6333_v38  ;;  %v6178_v1 = vor.u32 %v7118_v11, %v6177_v35  ;;  %v7204_v35 = vld [vmem:[#allocation8 + $0x60] sm:$0xff] }
 0x2ba   : > { %v6186_v13 = vor.u32 %v7119_v56, %v6185_v31  ;;  %4327 = vmatpush.bf16.msrb.mxu1 %v7204_v35 }
 0x2bb   : > { %v2870_v4 = vpack.c.bf16 %v2838_v30, %v2838_v30  ;;  %v2912_v48 = vrot.slane %v2838_v30, 7  ;;  %v3008_v43 = vrot.slane %v2838_v30, 1  ;;  %v2710_v32 = vadd.f32 %v2709_v26, %v2621_v63  ;;  %3836 = vmatmul.bf16.gmra.mxu1 %v8588_v49 }
 0x2bc   : > { %v6182_v30 = vor.u32 %v7117_v41, %v6179_v44  ;;  %v1932_v63 = vadd.f32 %v8406_v23, %v8412_v18 }
 0x2bd   : > { %v2928_v20 = vsel %vm390_vm1, %v2896_v21, %v2912_v48  ;;  %v2944_v12 = vsel %vm390_vm1, %v2912_v48, %v2896_v21  ;;  %v3024_v57 = vsel %vm491_vm2, %v2992_v9, %v3008_v43  ;;  %v3040_v8 = vsel %vm491_vm2, %v3008_v43, %v2992_v9  ;;  %3158 = vst [vmem:[#allocation2 + $0xa0] sm:$0xf] %v2870_v4  ;;  %v2533_v47 = vpop.f32.mrf.mxu2 }
 0x2be   : > { %v2965_v42 = vsel %vm282_vm0, 0.0, %v2944_v12  ;;  %v3062_v26 = vsel %vm285_vm3, 0.0, %v3040_v8  ;;  %v3094_v60 = vpack.c.bf16 %v2928_v20, %v2928_v20  ;;  %v3189_v24 = vpack.c.bf16 %v3024_v57, %v3024_v57 }
 0x2bf   : > { %v3093_v34 = vpack.c.bf16 %v2965_v42, %v2965_v42  ;;  %v3190_v39 = vpack.c.bf16 %v3062_v26, %v3062_v26  ;;  %v2771_v0 = vadd.f32 %v2710_v32, %v8408_v25  ;;  %v2714_v38 = vpop.f32.mrf.mxu0 }
 0x2c0   : > { %3126 = vst [vmem:[#allocation2 + $0x9c] sm:$0xf] %v3094_v60  ;;  %v2622_v37 = vpop.f32.mrf.mxu3 }
 0x2c1   : > { %3125 = vst [vmem:[#allocation2 + $0x90] sm:$0xf] %v3093_v34  ;;  %v2807_v61 = vadd.f32 %v8488_v40, %v2771_v0  ;;  %v2623_v22 = vadd.f32 %v2622_v37, %v2533_v47  ;;  %v6573_v34 = vld [vmem:[#allocation2] sm:$0xf] }
 0x2c2   : > { %3221 = vst [vmem:[#allocation2 + $0x98] sm:$0xf] %v3189_v24  ;;  %2575 = vmatmul.bf16.gmra.mxu2 %v6178_v1  ;;  %2753 = vmatmul.bf16.gmra.mxu0 %v6186_v13 }
 0x2c3   : > { %3222 = vst [vmem:[#allocation2 + $0xa4] sm:$0xf] %v3190_v39  ;;  %v2839_v21 = vmax.f32 %v2807_v61, 0.0  ;;  %v2712_v9 = vadd.f32 %v2711_v16, %v2623_v22  ;;  %v7145_v39 = vld [vmem:[#allocation2 + $0x8] sm:$0xf0] }
 0x2c5   : > { %v2871_v25 = vpack.c.bf16 %v2839_v21, %v2839_v21  ;;  %v2772_v4 = vadd.f32 %v2712_v9, %v1932_v63  ;;  %2664 = vmatmul.bf16.gmra.mxu3 %v6182_v30  ;;  %v2536_v43 = vpop.f32.mrf.mxu2  ;;  %v2897_v18 = vrot.slane %v2839_v21, 7  ;;  %v2993_v16 = vrot.slane %v2839_v21, 1  ;;  %v6287_v30 = vld [vmem:[#allocation2 + $0x24] sm:$0xf0]  ;;  %v6293_v21 = vld [vmem:[#allocation2 + $0x20] sm:$0xf] }
 0x2c6   : > { %v7149_v9 = vld [vmem:[#allocation2 + $0x28] sm:$0xf0] }
 0x2c7   : > { %3159 = vst [vmem:[#allocation2 + $0xac] sm:$0xf] %v2871_v25  ;;  %v2808_v48 = vadd.f32 %v8488_v40, %v2772_v4  ;;  %v7163_v32 = vld [vmem:[#allocation2 + $0x98] sm:$0xf0]  ;;  %v2716_v8 = vpop.f32.mrf.mxu0  ;;  %v6574_v25 = vor.u32 %v7145_v39, %v6573_v34 }
 0x2c8   : > { %v2625_v11 = vpop.f32.mrf.mxu3  ;;  %v6345_v20 = vld [vmem:[#allocation2 + $0x90] sm:$0xf] }
 0x2c9   : > { %v2840_v12 = vmax.f32 %v2808_v48, 0.0  ;;  %v2626_v57 = vadd.f32 %v2625_v11, %v2536_v43  ;;  %v8608_v23 = vor.u32 %v7163_v32, %v6345_v20  ;;  %v7147_v32 = vld [vmem:[#allocation2 + $0x1c] sm:$0xf]  ;;  %v1937_v11 = vadd.f32 %v8416_v33, %v8421_v27 }
 0x2ca   : > { %v8625_v35 = vor.u32 %v7147_v32, %v6287_v30  ;;  %v7152_v32 = vld [vmem:[#allocation2 + $0x40] sm:$0xf0] }
 0x2cb   : > { %v2872_v31 = vpack.c.bf16 %v2840_v12, %v2840_v12  ;;  %v2913_v56 = vrot.slane %v2840_v12, 7  ;;  %v3009_v42 = vrot.slane %v2840_v12, 1  ;;  %v2715_v26 = vadd.f32 %v2714_v38, %v2626_v57  ;;  %3841 = vmatmul.bf16.gmra.mxu1 %v8608_v23 }
 0x2cc   : > { %v8629_v12 = vor.u32 %v7149_v9, %v6293_v21 }
 0x2cd   : > { %v2929_v60 = vsel %vm390_vm1, %v2897_v18, %v2913_v56  ;;  %v2945_v24 = vsel %vm390_vm1, %v2913_v56, %v2897_v18  ;;  %v3025_v41 = vsel %vm491_vm2, %v2993_v16, %v3009_v42  ;;  %v3041_v44 = vsel %vm491_vm2, %v3009_v42, %v2993_v16  ;;  %3160 = vst [vmem:[#allocation2 + $0xb8] sm:$0xf] %v2872_v31  ;;  %v2538_v38 = vpop.f32.mrf.mxu2 }
 0x2ce   : > { %v2967_v0 = vsel %vm282_vm0, 0.0, %v2945_v24  ;;  %v3064_v47 = vsel %vm285_vm3, 0.0, %v3041_v44  ;;  %v3096_v37 = vpack.c.bf16 %v2929_v60, %v2929_v60  ;;  %v3191_v1 = vpack.c.bf16 %v3025_v41, %v3025_v41 }
 0x2cf   : > { %v3095_v13 = vpack.c.bf16 %v2967_v0, %v2967_v0  ;;  %v3192_v61 = vpack.c.bf16 %v3064_v47, %v3064_v47  ;;  %v2773_v22 = vadd.f32 %v2715_v26, %v8418_v15  ;;  %v2719_v43 = vpop.f32.mrf.mxu0 }
 0x2d0   : > { %3128 = vst [vmem:[#allocation2 + $0xb4] sm:$0xf] %v3096_v37  ;;  %v2627_v63 = vpop.f32.mrf.mxu3 }
 0x2d1   : > { %3127 = vst [vmem:[#allocation2 + $0xa8] sm:$0xf] %v3095_v13  ;;  %v2809_v4 = vadd.f32 %v8488_v40, %v2773_v22  ;;  %v2628_v48 = vadd.f32 %v2627_v63, %v2538_v38 }
 0x2d2   : > { %3223 = vst [vmem:[#allocation2 + $0xb0] sm:$0xf] %v3191_v1  ;;  %3905 = vmatmul.bf16.vlgmr.msrb.gmra.mxu2 %v8625_v35  ;;  %4243 = vmatmul.bf16.vlgmr.msrb.gmra.mxu0 %v6574_v25 }
 0x2d3   : > { %3224 = vst [vmem:[#allocation2 + $0xbc] sm:$0xf] %v3192_v61  ;;  %v2841_v15 = vmax.f32 %v2809_v4, 0.0  ;;  %v2717_v20 = vadd.f32 %v2716_v8, %v2628_v48  ;;  %v6299_v4 = vld [vmem:[#allocation2 + $0x3c] sm:$0xf0] }
 0x2d5   : > { %v2873_v57 = vpack.c.bf16 %v2841_v15, %v2841_v15  ;;  %v2774_v18 = vadd.f32 %v2717_v20, %v1937_v11  ;;  %3994 = vmatmul.bf16.vlgmr.msrb.gmra.mxu3 %v8629_v12  ;;  %v2541_v31 = vpop.f32.mrf.mxu2  ;;  %v2898_v24 = vrot.slane %v2841_v15, 7  ;;  %v2994_v41 = vrot.slane %v2841_v15, 1 }
 0x2d7   : > { %3161 = vst [vmem:[#allocation2 + $0xc4] sm:$0xf] %v2873_v57  ;;  %v2810_v16 = vadd.f32 %v8488_v40, %v2774_v18  ;;  %v7166_v56 = vld [vmem:[#allocation2 + $0xb0] sm:$0xf0]  ;;  %v2721_v60 = vpop.f32.mrf.mxu0 }
 0x2d8   : > { %v2630_v42 = vpop.f32.mrf.mxu3  ;;  %v6357_v26 = vld [vmem:[#allocation2 + $0xa8] sm:$0xf]  ;;  %v7150_v57 = vld [vmem:[#allocation2 + $0x34] sm:$0xf] }
 0x2d9   : > { %v2842_v33 = vmax.f32 %v2810_v16, 0.0  ;;  %v2631_v27 = vadd.f32 %v2630_v42, %v2541_v31  ;;  %v8634_v8 = vor.u32 %v7166_v56, %v6357_v26  ;;  %v8651_v18 = vor.u32 %v7150_v57, %v6299_v4  ;;  %v7155_v57 = vld [vmem:[#allocation2 + $0x58] sm:$0xf0] }
 0x2da   : > { %v1942_v16 = vadd.f32 %v8424_v53, %v8429_v54 }
 0x2db   : > { %v2874_v44 = vpack.c.bf16 %v2842_v33, %v2842_v33  ;;  %v2914_v34 = vrot.slane %v2842_v33, 7  ;;  %v3010_v39 = vrot.slane %v2842_v33, 1  ;;  %v2720_v0 = vadd.f32 %v2719_v43, %v2631_v27  ;;  %3846 = vmatmul.bf16.gmra.mxu1 %v8634_v8  ;;  %v6305_v43 = vld [vmem:[#allocation2 + $0x38] sm:$0xf] }
 0x2dc   : > { %v8655_v56 = vor.u32 %v7152_v32, %v6305_v43  ;;  %v6311_v32 = vld [vmem:[#allocation2 + $0x54] sm:$0xf0] }
 0x2dd   : > { %v2930_v47 = vsel %vm390_vm1, %v2898_v24, %v2914_v34  ;;  %v2946_v37 = vsel %vm390_vm1, %v2914_v34, %v2898_v24  ;;  %v3026_v1 = vsel %vm491_vm2, %v2994_v41, %v3010_v39  ;;  %v3042_v13 = vsel %vm491_vm2, %v3010_v39, %v2994_v41  ;;  %3162 = vst [vmem:[#allocation2 + $0xd0] sm:$0xf] %v2874_v44  ;;  %v2543_v25 = vpop.f32.mrf.mxu2  ;;  %v7203_v41 = vld [vmem:[#allocation8 + $0x58] sm:$0xff] }
 0x2de   : > { %v2969_v61 = vsel %vm282_vm0, 0.0, %v2946_v37  ;;  %v3066_v22 = vsel %vm285_vm3, 0.0, %v3042_v13  ;;  %v3098_v38 = vpack.c.bf16 %v2930_v47, %v2930_v47  ;;  %v3193_v30 = vpack.c.bf16 %v3026_v1, %v3026_v1  ;;  %4328 = vmatpush.bf16.msrb.mxu1 %v7203_v41 }
 0x2df   : > { %v3097_v63 = vpack.c.bf16 %v2969_v61, %v2969_v61  ;;  %v3194_v21 = vpack.c.bf16 %v3066_v22, %v3066_v22  ;;  %v2775_v9 = vadd.f32 %v2720_v0, %v8426_v10  ;;  %v2724_v20 = vpop.f32.mrf.mxu0 }
 0x2e0   : > { %3130 = vst [vmem:[#allocation2 + $0xcc] sm:$0xf] %v3098_v38  ;;  %v2632_v48 = vpop.f32.mrf.mxu3 }
 0x2e1   : > { %3129 = vst [vmem:[#allocation2 + $0xc0] sm:$0xf] %v3097_v63  ;;  %v2811_v11 = vadd.f32 %v8488_v40, %v2775_v9  ;;  %v2633_v15 = vadd.f32 %v2632_v48, %v2543_v25 }
 0x2e2   : > { %3225 = vst [vmem:[#allocation2 + $0xc8] sm:$0xf] %v3193_v30  ;;  %3910 = vmatmul.bf16.gmra.mxu2 %v8651_v18  ;;  %4248 = vmatmul.bf16.gmra.mxu0 %v8510_v46 }
 0x2e3   : > { %3226 = vst [vmem:[#allocation2 + $0xd4] sm:$0xf] %v3194_v21  ;;  %v2843_v10 = vmax.f32 %v2811_v11, 0.0  ;;  %v2722_v31 = vadd.f32 %v2721_v60, %v2633_v15  ;;  %v8677_v11 = vpop.f32.mrf.mxu1 }
 0x2e5   : > { %v2875_v42 = vpack.c.bf16 %v2843_v10, %v2843_v10  ;;  %v2776_v26 = vadd.f32 %v2722_v31, %v1942_v16  ;;  %3999 = vmatmul.bf16.gmra.mxu3 %v8655_v56  ;;  %v2546_v27 = vpop.f32.mrf.mxu2  ;;  %v2899_v0 = vrot.slane %v2843_v10, 7  ;;  %v2995_v46 = vrot.slane %v2843_v10, 1  ;;  %v8682_v16 = vld [vmem:[%s9473_s3] ss:$0 sm:$0xff] }
 0x2e7   : > { %3163 = vst [vmem:[#allocation2 + $0xdc] sm:$0xf] %v2875_v42  ;;  %v2812_v33 = vadd.f32 %v8488_v40, %v2776_v26  ;;  %v7169_v24 = vld [vmem:[#allocation2 + $0xc8] sm:$0xf0]  ;;  %v2726_v34 = vpop.f32.mrf.mxu0 }
 0x2e8   : > { %v2635_v53 = vpop.f32.mrf.mxu3  ;;  %v6369_v54 = vld [vmem:[#allocation2 + $0xc0] sm:$0xf]  ;;  %v7153_v26 = vld [vmem:[#allocation2 + $0x4c] sm:$0xf] }
 0x2e9   : > { %v2844_v44 = vmax.f32 %v2812_v33, 0.0  ;;  %v2636_v60 = vadd.f32 %v2635_v53, %v2546_v27  ;;  %v8661_v39 = vor.u32 %v7169_v24, %v6369_v54  ;;  %v1947_v33 = vadd.f32 %v8432_v52, %v8437_v7 }
 0x2eb   : > { %v2876_v47 = vpack.c.bf16 %v2844_v44, %v2844_v44  ;;  %v2915_v37 = vrot.slane %v2844_v44, 7  ;;  %v3011_v1 = vrot.slane %v2844_v44, 1  ;;  %v2725_v13 = vadd.f32 %v2724_v20, %v2636_v60  ;;  %3851 = vmatmul.bf16.gmra.mxu1 %v8661_v39  ;;  %v6317_v20 = vld [vmem:[#allocation2 + $0x50] sm:$0xf] }
 0x2ec   : > { %v8689_v41 = vor.u32 %v7155_v57, %v6317_v20 }
 0x2ed   : > { %v2931_v40 = vsel %vm390_vm1, %v2899_v0, %v2915_v37  ;;  %v2947_v61 = vsel %vm390_vm1, %v2915_v37, %v2899_v0  ;;  %v3027_v22 = vsel %vm491_vm2, %v2995_v46, %v3011_v1  ;;  %v3043_v38 = vsel %vm491_vm2, %v3011_v1, %v2995_v46  ;;  %3164 = vst [vmem:[#allocation2 + $0xe8] sm:$0xf] %v2876_v47  ;;  %v2548_v43 = vpop.f32.mrf.mxu2 }
 0x2ee   : > { %v2971_v30 = vsel %vm282_vm0, 0.0, %v2947_v61  ;;  %v3068_v63 = vsel %vm285_vm3, 0.0, %v3043_v38  ;;  %v3100_v21 = vpack.c.bf16 %v2931_v40, %v2931_v40  ;;  %v3195_v9 = vpack.c.bf16 %v3027_v22, %v3027_v22 }
 0x2ef   : > { %v3099_v25 = vpack.c.bf16 %v2971_v30, %v2971_v30  ;;  %v3196_v4 = vpack.c.bf16 %v3068_v63, %v3068_v63  ;;  %v2777_v48 = vadd.f32 %v2725_v13, %v8434_v17  ;;  %v2729_v42 = vpop.f32.mrf.mxu0  ;;  %v8685_v17 = vor.u32 %v7153_v26, %v6311_v32  ;;  %v6329_v26 = vld [vmem:[#allocation2 + $0x68] sm:$0xf] }
 0x2f0   : > { %3132 = vst [vmem:[#allocation2 + $0xe4] sm:$0xf] %v3100_v21  ;;  %v2637_v15 = vpop.f32.mrf.mxu3 }
 0x2f1   : > { %3131 = vst [vmem:[#allocation2 + $0xd8] sm:$0xf] %v3099_v25  ;;  %v2813_v10 = vadd.f32 %v8682_v16, %v2777_v48  ;;  %v2638_v31 = vadd.f32 %v2637_v15, %v2548_v43 }
 0x2f2   : > { %3227 = vst [vmem:[#allocation2 + $0xe0] sm:$0xf] %v3195_v9  ;;  %3915 = vmatmul.bf16.gmra.mxu2 %v8685_v17  ;;  %4253 = vmatmul.bf16.gmra.mxu0 %v8529_v14 }
 0x2f3   : > { %3228 = vst [vmem:[#allocation2 + $0xec] sm:$0xf] %v3196_v4  ;;  %v2845_v27 = vmax.f32 %v2813_v10, 0.0  ;;  %v2727_v24 = vadd.f32 %v2726_v34, %v2638_v31  ;;  %v6323_v10 = vld [vmem:[#allocation2 + $0x6c] sm:$0xf0] }
 0x2f5   : > { %v2877_v53 = vpack.c.bf16 %v2845_v27, %v2845_v27  ;;  %v2778_v54 = vadd.f32 %v2727_v24, %v1947_v33  ;;  %4004 = vmatmul.bf16.gmra.mxu3 %v8689_v41  ;;  %v2551_v60 = vpop.f32.mrf.mxu2  ;;  %v2900_v13 = vrot.slane %v2845_v27, 7  ;;  %v2996_v14 = vrot.slane %v2845_v27, 1  ;;  %v7158_v33 = vld [vmem:[#allocation2 + $0x70] sm:$0xf0] }
 0x2f7   : > { %3165 = vst [vmem:[#allocation2 + $0xf4] sm:$0xf] %v2877_v53  ;;  %v2814_v44 = vadd.f32 %v8682_v16, %v2778_v54  ;;  %v7172_v0 = vld [vmem:[#allocation2 + $0xe0] sm:$0xf0]  ;;  %v2731_v37 = vpop.f32.mrf.mxu0 }
 0x2f8   : > { %v2640_v46 = vpop.f32.mrf.mxu3  ;;  %v8695_v52 = vpop.f32.mrf.mxu1  ;;  %v6381_v7 = vld [vmem:[#allocation2 + $0xd8] sm:$0xf]  ;;  %v7156_v54 = vld [vmem:[#allocation2 + $0x64] sm:$0xf] }
 0x2f9   : > { %v2846_v34 = vmax.f32 %v2814_v44, 0.0  ;;  %v2641_v47 = vadd.f32 %v2640_v46, %v2551_v60  ;;  %v8697_v1 = vor.u32 %v7172_v0, %v6381_v7  ;;  %v8716_v44 = vor.u32 %v7156_v54, %v6323_v10 }
 0x2fa   : > { %v8720_v46 = vor.u32 %v7158_v33, %v6329_v26 }
 0x2fb   : > { %v2878_v40 = vpack.c.bf16 %v2846_v34, %v2846_v34  ;;  %v2916_v61 = vrot.slane %v2846_v34, 7  ;;  %v3012_v22 = vrot.slane %v2846_v34, 1  ;;  %v2730_v38 = vadd.f32 %v2729_v42, %v2641_v47  ;;  %3856 = vmatmul.bf16.gmra.mxu1 %v8697_v1 }
 0x2fd   : > { %v2932_v30 = vsel %vm390_vm1, %v2900_v13, %v2916_v61  ;;  %v2948_v63 = vsel %vm390_vm1, %v2916_v61, %v2900_v13  ;;  %v3028_v21 = vsel %vm491_vm2, %v2996_v14, %v3012_v22  ;;  %v3044_v9 = vsel %vm491_vm2, %v3012_v22, %v2996_v14  ;;  %3166 = vst [vmem:[#allocation2 + $0x100] sm:$0xf] %v2878_v40  ;;  %v2553_v57 = vpop.f32.mrf.mxu2  ;;  %v7202_v40 = vld [vmem:[#allocation8 + $0x50] sm:$0xff] }
 0x2fe   : > { %v2973_v25 = vsel %vm282_vm0, 0.0, %v2948_v63  ;;  %v3070_v4 = vsel %vm285_vm3, 0.0, %v3044_v9  ;;  %v3102_v48 = vpack.c.bf16 %v2932_v30, %v2932_v30  ;;  %v3197_v43 = vpack.c.bf16 %v3028_v21, %v3028_v21  ;;  %4329 = vmatpush.bf16.msrb.mxu1 %v7202_v40  ;;  %v9599_v40 = vld [vmem:[#allocation34_spill] sm:$0xff] }
 0x2ff   : > { %v3101_v32 = vpack.c.bf16 %v2973_v25, %v2973_v25  ;;  %v3198_v15 = vpack.c.bf16 %v3070_v4, %v3070_v4  ;;  %v2779_v20 = vadd.f32 %v2730_v38, %v8442_v28  ;;  %v2734_v53 = vpop.f32.mrf.mxu0  ;;  %v1952_v28 = vadd.f32 %v8440_v51, %v8445_v3 }
 0x300   : > { %3134 = vst [vmem:[#allocation2 + $0xfc] sm:$0xf] %v3102_v48  ;;  %v2642_v31 = vpop.f32.mrf.mxu3  ;;  %v8713_v42 = vpop.f32.mrf.mxu1 }
 0x301   : > { %3133 = vst [vmem:[#allocation2 + $0xf0] sm:$0xf] %v3101_v32  ;;  %v2815_v27 = vadd.f32 %v8682_v16, %v2779_v20  ;;  %v2643_v24 = vadd.f32 %v2642_v31, %v2553_v57 }
 0x302   : > { %3229 = vst [vmem:[#allocation2 + $0xf8] sm:$0xf] %v3197_v43  ;;  %3920 = vmatmul.bf16.gmra.mxu2 %v8716_v44  ;;  %4258 = vmatmul.bf16.gmra.mxu0 %v8548_v29 }
 0x303   : > { %3230 = vst [vmem:[#allocation2 + $0x104] sm:$0xf] %v3198_v15  ;;  %v2847_v60 = vmax.f32 %v2815_v27, 0.0  ;;  %v2732_v0 = vadd.f32 %v2731_v37, %v2643_v24 }
 0x305   : > { %v2879_v7 = vpack.c.bf16 %v2847_v60, %v2847_v60  ;;  %v2780_v34 = vadd.f32 %v2732_v0, %v1952_v28  ;;  %4009 = vmatmul.bf16.gmra.mxu3 %v8720_v46  ;;  %v2556_v13 = vpop.f32.mrf.mxu2  ;;  %v2901_v29 = vrot.slane %v2847_v60, 7  ;;  %v2997_v63 = vrot.slane %v2847_v60, 1  ;;  %v6341_v60 = vld [vmem:[#allocation2 + $0x80] sm:$0xf]  ;;  %v7161_v0 = vld [vmem:[#allocation2 + $0x88] sm:$0xf0] }
 0x307   : > { %3167 = vst [vmem:[#allocation2 + $0x10c] sm:$0xf] %v2879_v7  ;;  %v2816_v47 = vadd.f32 %v8682_v16, %v2780_v34  ;;  %v7175_v14 = vld [vmem:[#allocation2 + $0xf8] sm:$0xf0]  ;;  %v2736_v38 = vpop.f32.mrf.mxu0 }
 0x308   : > { %v2645_v51 = vpop.f32.mrf.mxu3  ;;  %v8726_v3 = vpop.f32.mrf.mxu1  ;;  %v6393_v37 = vld [vmem:[#allocation2 + $0xf0] sm:$0xf] }
 0x309   : > { %v2848_v61 = vmax.f32 %v2816_v47, 0.0  ;;  %v2646_v22 = vadd.f32 %v2645_v51, %v2556_v13  ;;  %v8728_v30 = vor.u32 %v7175_v14, %v6393_v37  ;;  %v7159_v13 = vld [vmem:[#allocation2 + $0x7c] sm:$0xf] }
 0x30b   : > { %v2880_v21 = vpack.c.bf16 %v2848_v61, %v2848_v61  ;;  %v2917_v9 = vrot.slane %v2848_v61, 7  ;;  %v3013_v25 = vrot.slane %v2848_v61, 1  ;;  %v2735_v4 = vadd.f32 %v2734_v53, %v2646_v22  ;;  %3861 = vmatmul.bf16.gmra.mxu1 %v8728_v30  ;;  %v6335_v53 = vld [vmem:[#allocation2 + $0x84] sm:$0xf0] }
 0x30c   : > { %v8747_v14 = vor.u32 %v7159_v13, %v6335_v53  ;;  %v8751_v61 = vor.u32 %v7161_v0, %v6341_v60 }
 0x30d   : > { %v2933_v48 = vsel %vm390_vm1, %v2901_v29, %v2917_v9  ;;  %v2949_v43 = vsel %vm390_vm1, %v2917_v9, %v2901_v29  ;;  %v3029_v32 = vsel %vm491_vm2, %v2997_v63, %v3013_v25  ;;  %v3045_v15 = vsel %vm491_vm2, %v3013_v25, %v2997_v63  ;;  %3168 = vst [vmem:[#allocation2 + $0x118] sm:$0xf] %v2880_v21  ;;  %v2558_v24 = vpop.f32.mrf.mxu2 }
 0x30e   : > { %v2975_v20 = vsel %vm282_vm0, 0.0, %v2949_v43  ;;  %v3072_v57 = vsel %vm285_vm3, 0.0, %v3045_v15  ;;  %v3104_v10 = vpack.c.bf16 %v2933_v48, %v2933_v48  ;;  %v3199_v31 = vpack.c.bf16 %v3029_v32, %v3029_v32 }
 0x30f   : > { %v3103_v26 = vpack.c.bf16 %v2975_v20, %v2975_v20  ;;  %v3200_v33 = vpack.c.bf16 %v3072_v57, %v3072_v57  ;;  %v2781_v27 = vadd.f32 %v2735_v4, %v8450_v62  ;;  %v2739_v47 = vpop.f32.mrf.mxu0  ;;  %v1957_v62 = vadd.f32 %v9599_v40, %v8453_v58  ;;  %v6347_v40 = vld [vmem:[#allocation2 + $0x9c] sm:$0xf0] }
 0x310   : > { %3136 = vst [vmem:[#allocation2 + $0x114] sm:$0xf] %v3104_v10  ;;  %v2647_v54 = vpop.f32.mrf.mxu3  ;;  %v8744_v28 = vpop.f32.mrf.mxu1 }
 0x311   : > { %3135 = vst [vmem:[#allocation2 + $0x108] sm:$0xf] %v3103_v26  ;;  %v2817_v7 = vadd.f32 %v8682_v16, %v2781_v27  ;;  %v2648_v34 = vadd.f32 %v2647_v54, %v2558_v24 }
 0x312   : > { %3231 = vst [vmem:[#allocation2 + $0x110] sm:$0xf] %v3199_v31  ;;  %3925 = vmatmul.bf16.gmra.mxu2 %v8747_v14  ;;  %4263 = vmatmul.bf16.gmra.mxu0 %v8568_v59 }
 0x313   : > { %3232 = vst [vmem:[#allocation2 + $0x11c] sm:$0xf] %v3200_v33  ;;  %v2849_v51 = vmax.f32 %v2817_v7, 0.0  ;;  %v2737_v37 = vadd.f32 %v2736_v38, %v2648_v34 }
 0x315   : > { %v2881_v22 = vpack.c.bf16 %v2849_v51, %v2849_v51  ;;  %v2782_v29 = vadd.f32 %v2737_v37, %v1957_v62  ;;  %4014 = vmatmul.bf16.gmra.mxu3 %v8751_v61  ;;  %v2561_v21 = vpop.f32.mrf.mxu2  ;;  %v2902_v15 = vrot.slane %v2849_v51, 7  ;;  %v2998_v59 = vrot.slane %v2849_v51, 1  ;;  %v6353_v37 = vld [vmem:[#allocation2 + $0x98] sm:$0xf] }
 0x317   : > { %3169 = vst [vmem:[#allocation2 + $0x124] sm:$0xf] %v2881_v22  ;;  %v2818_v63 = vadd.f32 %v8682_v16, %v2782_v29  ;;  %v7178_v9 = vld [vmem:[#allocation2 + $0x110] sm:$0xf0]  ;;  %v2741_v43 = vpop.f32.mrf.mxu0  ;;  %v7164_v22 = vld [vmem:[#allocation2 + $0xa0] sm:$0xf0] }
 0x318   : > { %v2650_v25 = vpop.f32.mrf.mxu3  ;;  %v8757_v58 = vpop.f32.mrf.mxu1  ;;  %v6405_v4 = vld [vmem:[#allocation2 + $0x108] sm:$0xf] }
 0x319   : > { %v2850_v38 = vmax.f32 %v2818_v63, 0.0  ;;  %v2651_v48 = vadd.f32 %v2650_v25, %v2561_v21  ;;  %v8759_v32 = vor.u32 %v7178_v9, %v6405_v4  ;;  %v7162_v9 = vld [vmem:[#allocation2 + $0x94] sm:$0xf] }
 0x31a   : > { %v8778_v25 = vor.u32 %v7162_v9, %v6347_v40  ;;  %v9600_v4 = vld [vmem:[#allocation33_spill] sm:$0xff] }
 0x31b   : > { %v2882_v20 = vpack.c.bf16 %v2850_v38, %v2850_v38  ;;  %v2918_v57 = vrot.slane %v2850_v38, 7  ;;  %v3014_v10 = vrot.slane %v2850_v38, 1  ;;  %v2740_v31 = vadd.f32 %v2739_v47, %v2651_v48  ;;  %3866 = vmatmul.bf16.gmra.mxu1 %v8759_v32 }
 0x31d   : > { %v2934_v26 = vsel %vm390_vm1, %v2902_v15, %v2918_v57  ;;  %v2950_v33 = vsel %vm390_vm1, %v2918_v57, %v2902_v15  ;;  %v3030_v27 = vsel %vm491_vm2, %v2998_v59, %v3014_v10  ;;  %v3046_v24 = vsel %vm491_vm2, %v3014_v10, %v2998_v59  ;;  %3170 = vst [vmem:[#allocation2 + $0x130] sm:$0xf] %v2882_v20  ;;  %v2563_v13 = vpop.f32.mrf.mxu2 }
 0x31e   : > { %v2977_v53 = vsel %vm282_vm0, 0.0, %v2950_v33  ;;  %v3074_v54 = vsel %vm285_vm3, 0.0, %v3046_v24  ;;  %v3106_v60 = vpack.c.bf16 %v2934_v26, %v2934_v26  ;;  %v3201_v0 = vpack.c.bf16 %v3030_v27, %v3030_v27  ;;  %v7201_v26 = vld [vmem:[#allocation8 + $0x48] sm:$0xff] }
 0x31f   : > { %v3105_v7 = vpack.c.bf16 %v2977_v53, %v2977_v53  ;;  %v3202_v34 = vpack.c.bf16 %v3074_v54, %v3074_v54  ;;  %v2783_v47 = vadd.f32 %v2740_v31, %v8458_v45  ;;  %v2744_v21 = vpop.f32.mrf.mxu0  ;;  %v1962_v45 = vadd.f32 %v9600_v4, %v8461_v6  ;;  %4330 = vmatpush.bf16.msrb.mxu1 %v7201_v26 }
 0x320   : > { %3138 = vst [vmem:[#allocation2 + $0x12c] sm:$0xf] %v3106_v60  ;;  %v2652_v62 = vpop.f32.mrf.mxu3  ;;  %v8775_v51 = vpop.f32.mrf.mxu1  ;;  %v8782_v15 = vor.u32 %v7164_v22, %v6353_v37 }
 0x321   : > { %3137 = vst [vmem:[#allocation2 + $0x120] sm:$0xf] %v3105_v7  ;;  %v2819_v29 = vadd.f32 %v8682_v16, %v2783_v47  ;;  %v2653_v63 = vadd.f32 %v2652_v62, %v2563_v13 }
 0x322   : > { %3233 = vst [vmem:[#allocation2 + $0x128] sm:$0xf] %v3201_v0  ;;  %3930 = vmatmul.bf16.gmra.mxu2 %v8778_v25  ;;  %4268 = vmatmul.bf16.gmra.mxu0 %v8588_v49 }
 0x323   : > { %3234 = vst [vmem:[#allocation2 + $0x134] sm:$0xf] %v3202_v34  ;;  %v2851_v38 = vmax.f32 %v2819_v29, 0.0  ;;  %v2742_v48 = vadd.f32 %v2741_v43, %v2653_v63 }
 0x325   : > { %v2883_v59 = vpack.c.bf16 %v2851_v38, %v2851_v38  ;;  %v2784_v20 = vadd.f32 %v2742_v48, %v1962_v45  ;;  %4019 = vmatmul.bf16.gmra.mxu3 %v8782_v15  ;;  %v2566_v10 = vpop.f32.mrf.mxu2  ;;  %v2903_v49 = vrot.slane %v2851_v38, 7  ;;  %v2999_v60 = vrot.slane %v2851_v38, 1  ;;  %v6359_v48 = vld [vmem:[#allocation2 + $0xb4] sm:$0xf0] }
 0x327   : > { %3171 = vst [vmem:[#allocation2 + $0x13c] sm:$0xf] %v2883_v59  ;;  %v2820_v57 = vadd.f32 %v8682_v16, %v2784_v20  ;;  %v7181_v31 = vld [vmem:[#allocation2 + $0x128] sm:$0xf0]  ;;  %v2746_v53 = vpop.f32.mrf.mxu0 }
 0x328   : > { %v2655_v6 = vpop.f32.mrf.mxu3  ;;  %v8788_v33 = vpop.f32.mrf.mxu1  ;;  %v6417_v43 = vld [vmem:[#allocation2 + $0x120] sm:$0xf] }
 0x329   : > { %v2852_v27 = vmax.f32 %v2820_v57, 0.0  ;;  %v2656_v24 = vadd.f32 %v2655_v6, %v2566_v10  ;;  %v8790_v54 = vor.u32 %v7181_v31, %v6417_v43  ;;  %v6365_v57 = vld [vmem:[#allocation2 + $0xb0] sm:$0xf]  ;;  %v7167_v10 = vld [vmem:[#allocation2 + $0xb8] sm:$0xf0] }
 0x32a   : > { %v7165_v43 = vld [vmem:[#allocation2 + $0xac] sm:$0xf] }
 0x32b   : > { %v2884_v0 = vpack.c.bf16 %v2852_v27, %v2852_v27  ;;  %v2919_v7 = vrot.slane %v2852_v27, 7  ;;  %v3015_v34 = vrot.slane %v2852_v27, 1  ;;  %v2745_v47 = vadd.f32 %v2744_v21, %v2656_v24  ;;  %3871 = vmatmul.bf16.gmra.mxu1 %v8790_v54  ;;  %v9601_v24 = vld [vmem:[#allocation40_spill] sm:$0xff] }
 0x32c   : > { %v8809_v27 = vor.u32 %v7165_v43, %v6359_v48 }
 0x32d   : > { %v2935_v13 = vsel %vm390_vm1, %v2903_v49, %v2919_v7  ;;  %v2951_v40 = vsel %vm390_vm1, %v2919_v7, %v2903_v49  ;;  %v3031_v62 = vsel %vm491_vm2, %v2999_v60, %v3015_v34  ;;  %v3047_v37 = vsel %vm491_vm2, %v3015_v34, %v2999_v60  ;;  %3172 = vst [vmem:[#allocation2 + $0x148] sm:$0xf] %v2884_v0  ;;  %v2568_v38 = vpop.f32.mrf.mxu2 }
 0x32e   : > { %v2979_v22 = vsel %vm282_vm0, 0.0, %v2951_v40  ;;  %v3076_v29 = vsel %vm285_vm3, 0.0, %v3047_v37  ;;  %v3108_v63 = vpack.c.bf16 %v2935_v13, %v2935_v13  ;;  %v3203_v21 = vpack.c.bf16 %v3031_v62, %v3031_v62 }
 0x32f   : > { %v3107_v9 = vpack.c.bf16 %v2979_v22, %v2979_v22  ;;  %v3204_v4 = vpack.c.bf16 %v3076_v29, %v3076_v29  ;;  %v2785_v45 = vadd.f32 %v2745_v47, %v8466_v2  ;;  %v2749_v6 = vpop.f32.mrf.mxu0  ;;  %v1967_v2 = vadd.f32 %v9601_v24, %v8469_v55 }
 0x330   : > { %3140 = vst [vmem:[#allocation2 + $0x144] sm:$0xf] %v3108_v63  ;;  %v2657_v59 = vpop.f32.mrf.mxu3  ;;  %v8806_v20 = vpop.f32.mrf.mxu1  ;;  %v8813_v0 = vor.u32 %v7167_v10, %v6365_v57 }
 0x331   : > { %3139 = vst [vmem:[#allocation2 + $0x138] sm:$0xf] %v3107_v9  ;;  %v2821_v31 = vadd.f32 %v8682_v16, %v2785_v45  ;;  %v2658_v26 = vadd.f32 %v2657_v59, %v2568_v38 }
 0x332   : > { %3235 = vst [vmem:[#allocation2 + $0x140] sm:$0xf] %v3203_v21  ;;  %3935 = vmatmul.bf16.gmra.mxu2 %v8809_v27  ;;  %4273 = vmatmul.bf16.gmra.mxu0 %v8608_v23 }
 0x333   : > { %3236 = vst [vmem:[#allocation2 + $0x14c] sm:$0xf] %v3204_v4  ;;  %v2853_v49 = vmax.f32 %v2821_v31, 0.0  ;;  %v2747_v60 = vadd.f32 %v2746_v53, %v2658_v26 }
 0x335   : > { %v2885_v7 = vpack.c.bf16 %v2853_v49, %v2853_v49  ;;  %v2786_v34 = vadd.f32 %v2747_v60, %v1967_v2  ;;  %4024 = vmatmul.bf16.gmra.mxu3 %v8813_v0  ;;  %v2571_v13 = vpop.f32.mrf.mxu2  ;;  %v2904_v21 = vrot.slane %v2853_v49, 7  ;;  %v3000_v23 = vrot.slane %v2853_v49, 1 }
 0x337   : > { %3173 = vst [vmem:[#allocation2 + $0x154] sm:$0xf] %v2885_v7  ;;  %v2822_v47 = vadd.f32 %v8682_v16, %v2786_v34  ;;  %v7184_v40 = vld [vmem:[#allocation2 + $0x140] sm:$0xf0]  ;;  %v2751_v29 = vpop.f32.mrf.mxu0  ;;  %v6371_v7 = vld [vmem:[#allocation2 + $0xcc] sm:$0xf0] }
 0x338   : > { %v2660_v62 = vpop.f32.mrf.mxu3  ;;  %v8819_v55 = vpop.f32.mrf.mxu1  ;;  %v6429_v37 = vld [vmem:[#allocation2 + $0x138] sm:$0xf] }
 0x339   : > { %v2854_v53 = vmax.f32 %v2822_v47, 0.0  ;;  %v2661_v22 = vadd.f32 %v2660_v62, %v2571_v13  ;;  %v8821_v63 = vor.u32 %v7184_v40, %v6429_v37  ;;  %v6377_v13 = vld [vmem:[#allocation2 + $0xc8] sm:$0xf]  ;;  %v7170_v40 = vld [vmem:[#allocation2 + $0xd0] sm:$0xf0] }
 0x33b   : > { %v2886_v9 = vpack.c.bf16 %v2854_v53, %v2854_v53  ;;  %v2920_v4 = vrot.slane %v2854_v53, 7  ;;  %v3016_v45 = vrot.slane %v2854_v53, 1  ;;  %v2750_v38 = vadd.f32 %v2749_v6, %v2661_v22  ;;  %3876 = vmatmul.bf16.gmra.mxu1 %v8821_v63  ;;  %v7168_v22 = vld [vmem:[#allocation2 + $0xc4] sm:$0xf] }
 0x33d   : > { %v2936_v48 = vsel %vm390_vm1, %v2904_v21, %v2920_v4  ;;  %v2952_v59 = vsel %vm390_vm1, %v2920_v4, %v2904_v21  ;;  %v3032_v57 = vsel %vm491_vm2, %v3000_v23, %v3016_v45  ;;  %v3048_v10 = vsel %vm491_vm2, %v3016_v45, %v3000_v23  ;;  %3174 = vst [vmem:[#allocation2 + $0x160] sm:$0xf] %v2886_v9  ;;  %v2573_v60 = vpop.f32.mrf.mxu2  ;;  %v9602_v23 = vld [vmem:[#allocation39_spill] sm:$0xff] }
 0x33e   : > { %v2981_v31 = vsel %vm282_vm0, 0.0, %v2952_v59  ;;  %v3078_v26 = vsel %vm285_vm3, 0.0, %v3048_v10  ;;  %v3110_v6 = vpack.c.bf16 %v2936_v48, %v2936_v48  ;;  %v3205_v43 = vpack.c.bf16 %v3032_v57, %v3032_v57 }
 0x33f   : > { %v3109_v24 = vpack.c.bf16 %v2981_v31, %v2981_v31  ;;  %v3206_v2 = vpack.c.bf16 %v3078_v26, %v3078_v26  ;;  %v2787_v49 = vadd.f32 %v2750_v38, %v8472_v19  ;;  %v2754_v53 = vpop.f32.mrf.mxu0  ;;  %v8840_v21 = vor.u32 %v7168_v22, %v6371_v7  ;;  %v7200_v38 = vld [vmem:[#allocation8 + $0x40] sm:$0xff] }
 0x340   : > { %3142 = vst [vmem:[#allocation2 + $0x15c] sm:$0xf] %v3110_v6  ;;  %v2662_v34 = vpop.f32.mrf.mxu3  ;;  %v8837_v47 = vpop.f32.mrf.mxu1  ;;  %v1972_v19 = vadd.f32 %v9602_v23, %v8477_v50  ;;  %v8844_v45 = vor.u32 %v7170_v40, %v6377_v13  ;;  %4331 = vmatpush.bf16.msrb.mxu1 %v7200_v38 }
 0x341   : > { %3141 = vst [vmem:[#allocation2 + $0x150] sm:$0xf] %v3109_v24  ;;  %v2823_v62 = vadd.f32 %v8682_v16, %v2787_v49  ;;  %v2663_v37 = vadd.f32 %v2662_v34, %v2573_v60 }
 0x342   : > { %3237 = vst [vmem:[#allocation2 + $0x158] sm:$0xf] %v3205_v43  ;;  %3940 = vmatmul.bf16.gmra.mxu2 %v8840_v21  ;;  %4278 = vmatmul.bf16.gmra.mxu0 %v8634_v8 }
 0x343   : > { %3238 = vst [vmem:[#allocation2 + $0x164] sm:$0xf] %v3206_v2  ;;  %v2855_v9 = vmax.f32 %v2823_v62, 0.0  ;;  %v2752_v4 = vadd.f32 %v2751_v29, %v2663_v37 }
 0x345   : > { %v2887_v48 = vpack.c.bf16 %v2855_v9, %v2855_v9  ;;  %v2788_v59 = vadd.f32 %v2752_v4, %v1972_v19  ;;  %4029 = vmatmul.bf16.gmra.mxu3 %v8844_v45  ;;  %v2576_v10 = vpop.f32.mrf.mxu2  ;;  %v2905_v8 = vrot.slane %v2855_v9, 7  ;;  %v3001_v49 = vrot.slane %v2855_v9, 1 }
 0x347   : > { %3175 = vst [vmem:[#allocation2 + $0x16c] sm:$0xf] %v2887_v48  ;;  %v2824_v57 = vadd.f32 %v8682_v16, %v2788_v59  ;;  %v7187_v50 = vld [vmem:[#allocation2 + $0x158] sm:$0xf0]  ;;  %v2756_v24 = vpop.f32.mrf.mxu0 }
 0x348   : > { %v2665_v31 = vpop.f32.mrf.mxu3  ;;  %v8850_v26 = vpop.f32.mrf.mxu1  ;;  %v6441_v29 = vld [vmem:[#allocation2 + $0x150] sm:$0xf]  ;;  %v9603_v48 = vld [vmem:[#allocation46_spill] sm:$0xff] }
 0x349   : > { %v2856_v6 = vmax.f32 %v2824_v57, 0.0  ;;  %v2666_v43 = vadd.f32 %v2665_v31, %v2576_v10  ;;  %v8852_v2 = vor.u32 %v7187_v50, %v6441_v29  ;;  %v6383_v10 = vld [vmem:[#allocation2 + $0xe4] sm:$0xf0]  ;;  %v6389_v29 = vld [vmem:[#allocation2 + $0xe0] sm:$0xf] }
 0x34b   : > { %v2888_v60 = vpack.c.bf16 %v2856_v6, %v2856_v6  ;;  %v2921_v7 = vrot.slane %v2856_v6, 7  ;;  %v3017_v34 = vrot.slane %v2856_v6, 1  ;;  %v2755_v13 = vadd.f32 %v2754_v53, %v2666_v43  ;;  %3881 = vmatmul.bf16.gmra.mxu1 %v8852_v2  ;;  %v7173_v6 = vld [vmem:[#allocation2 + $0xe8] sm:$0xf0] }
 0x34d   : > { %v2937_v40 = vsel %vm390_vm1, %v2905_v8, %v2921_v7  ;;  %v2953_v62 = vsel %vm390_vm1, %v2921_v7, %v2905_v8  ;;  %v3033_v37 = vsel %vm491_vm2, %v3001_v49, %v3017_v34  ;;  %v3049_v22 = vsel %vm491_vm2, %v3017_v34, %v3001_v49  ;;  %3176 = vst [vmem:[#allocation2 + $0x178] sm:$0xf] %v2888_v60  ;;  %v2578_v57 = vpop.f32.mrf.mxu2  ;;  %v7171_v60 = vld [vmem:[#allocation2 + $0xdc] sm:$0xf]  ;;  %v7298_v34 = vld [vmem:[#allocation8 + $0x1b8] sm:$0xff] }
 0x34e   : > { %v2983_v23 = vsel %vm282_vm0, 0.0, %v2953_v62  ;;  %v3080_v53 = vsel %vm285_vm3, 0.0, %v3049_v22  ;;  %v3112_v19 = vpack.c.bf16 %v2937_v40, %v2937_v40  ;;  %v3207_v9 = vpack.c.bf16 %v3033_v37, %v3033_v37  ;;  %v9604_v40 = vld [vmem:[#allocation45_spill] sm:$0xff]  ;;  %5015 = vmatpush.bf16.msra.mxu3 %v7298_v34  ;;  %v7314_v34 = vld [vmem:[#allocation8 + $0x238] sm:$0xff] }
 0x34f   : > { %v3111_v4 = vpack.c.bf16 %v2983_v23, %v2983_v23  ;;  %v3208_v38 = vpack.c.bf16 %v3080_v53, %v3080_v53  ;;  %v2789_v59 = vadd.f32 %v2755_v13, %v9603_v48  ;;  %v4244_v49 = vpop.f32.mrf.mxu0  ;;  %v8871_v7 = vor.u32 %v7171_v60, %v6383_v10  ;;  %5193 = vmatpush.bf16.msra.mxu1 %v7314_v34 }
 0x350   : > { %3144 = vst [vmem:[#allocation2 + $0x174] sm:$0xf] %v3112_v19  ;;  %v2667_v50 = vpop.f32.mrf.mxu3  ;;  %v8868_v31 = vpop.f32.mrf.mxu1  ;;  %v1977_v13 = vadd.f32 %v8677_v11, %v9604_v40  ;;  %v8875_v22 = vor.u32 %v7173_v6, %v6389_v29  ;;  %v7215_v19 = vld [vmem:[#allocation8 + $0xb8] sm:$0xff] }
 0x351   : > { %3143 = vst [vmem:[#allocation2 + $0x168] sm:$0xf] %v3111_v4  ;;  %v2825_v43 = vadd.f32 %v8682_v16, %v2789_v59  ;;  %v2668_v8 = vadd.f32 %v2667_v50, %v2578_v57  ;;  %4413 = vmatpush.bf16.msra.mxu2 %v7215_v19  ;;  %v7306_v6 = vld [vmem:[#allocation8 + $0x1f8] sm:$0xff] }
 0x352   : > { %3239 = vst [vmem:[#allocation2 + $0x170] sm:$0xf] %v3207_v9  ;;  %3945 = vmatmul.bf16.gmra.mxu2 %v8871_v7  ;;  %4283 = vmatmul.bf16.gmra.mxu0 %v8661_v39 }
 0x353   : > { %3240 = vst [vmem:[#allocation2 + $0x17c] sm:$0xf] %v3208_v38  ;;  %v2857_v62 = vmax.f32 %v2825_v43, 0.0  ;;  %v2757_v37 = vadd.f32 %v2756_v24, %v2668_v8  ;;  %5104 = vmatpush.bf16.msra.mxu0 %v7306_v6  ;;  %v7174_v6 = vld [vmem:[#allocation2 + $0xf4] sm:$0xf] }
 0x354   : > { %9605 = vst [vmem:[#allocation52_spill] sm:$0xff] %v8875_v22 }
 0x355   : > { %v2889_v23 = vpack.c.bf16 %v2857_v62, %v2857_v62  ;;  %v2790_v53 = vadd.f32 %v2757_v37, %v1977_v13  ;;  %4034 = vmatmul.bf16.gmra.mxu3 %v8875_v22  ;;  %v3906_v4 = vpop.f32.mrf.mxu2  ;;  %v2906_v50 = vrot.slane %v2857_v62, 7  ;;  %v3002_v43 = vrot.slane %v2857_v62, 1 }
 0x356   : > { %v3907_v24 = vadd.f32 %v3906_v4, %v8695_v52 }
 0x357   : > { %3177 = vst [vmem:[#allocation2 + $0x184] sm:$0xf] %v2889_v23  ;;  %v2826_v9 = vadd.f32 %v8682_v16, %v2790_v53  ;;  %v7190_v11 = vld [vmem:[#allocation2 + $0x170] sm:$0xf0]  ;;  %v4246_v39 = vpop.f32.mrf.mxu0 }
 0x358   : > { %v8881_v38 = vpop.f32.mrf.mxu1  ;;  %v3995_v48 = vpop.f32.mrf.mxu3  ;;  %v6453_v59 = vld [vmem:[#allocation2 + $0x168] sm:$0xf] }
 0x359   : > { %v2858_v57 = vmax.f32 %v2826_v9, 0.0  ;;  %v8884_v10 = vor.u32 %v7190_v11, %v6453_v59  ;;  %v3996_v29 = vadd.f32 %v3995_v48, %v3907_v24  ;;  %v6395_v24 = vld [vmem:[#allocation2 + $0xfc] sm:$0xf0] }
 0x35b   : > { %v2890_v8 = vpack.c.bf16 %v2858_v57, %v2858_v57  ;;  %v2922_v60 = vrot.slane %v2858_v57, 7  ;;  %v3018_v16 = vrot.slane %v2858_v57, 1  ;;  %3886 = vmatmul.bf16.gmra.mxu1 %v8884_v10  ;;  %v8887_v40 = vadd.f32 %v4244_v49, %v3996_v29  ;;  %v7176_v29 = vld [vmem:[#allocation2 + $0x100] sm:$0xf0] }
 0x35d   : > { %v2938_v52 = vsel %vm390_vm1, %v2906_v50, %v2922_v60  ;;  %v2954_v13 = vsel %vm390_vm1, %v2922_v60, %v2906_v50  ;;  %v3034_v37 = vsel %vm491_vm2, %v3002_v43, %v3018_v16  ;;  %v3050_v62 = vsel %vm491_vm2, %v3018_v16, %v3002_v43  ;;  %3178 = vst [vmem:[#allocation2 + $0x190] sm:$0xf] %v2890_v8  ;;  %v3908_v11 = vpop.f32.mrf.mxu2  ;;  %v6401_v50 = vld [vmem:[#allocation2 + $0xf8] sm:$0xf] }
 0x35e   : > { %v2985_v23 = vsel %vm282_vm0, 0.0, %v2954_v13  ;;  %v3082_v49 = vsel %vm285_vm3, 0.0, %v3050_v62  ;;  %v3114_v53 = vpack.c.bf16 %v2938_v52, %v2938_v52  ;;  %v3209_v19 = vpack.c.bf16 %v3034_v37, %v3034_v37 }
 0x35f   : > { %v3113_v9 = vpack.c.bf16 %v2985_v23, %v2985_v23  ;;  %v3210_v4 = vpack.c.bf16 %v3082_v49, %v3082_v49  ;;  %v3909_v59 = vadd.f32 %v3908_v11, %v8713_v42  ;;  %v4249_v5 = vpop.f32.mrf.mxu0  ;;  %v8904_v43 = vor.u32 %v7174_v6, %v6395_v24  ;;  %v6413_v11 = vld [vmem:[#allocation2 + $0x110] sm:$0xf]  ;;  %v7179_v24 = vld [vmem:[#allocation2 + $0x118] sm:$0xf0] }
 0x360   : > { %3146 = vst [vmem:[#allocation2 + $0x18c] sm:$0xf] %v3114_v53  ;;  %v8901_v48 = vpop.f32.mrf.mxu1  ;;  %v3997_v57 = vpop.f32.mrf.mxu3  ;;  %v8906_v8 = vor.u32 %v7176_v29, %v6401_v50  ;;  %v7297_v29 = vld [vmem:[#allocation8 + $0x1b0] sm:$0xff]  ;;  %v8923_v6 = vor.u32 %v7179_v24, %v6413_v11 }
 0x361   : > { %3145 = vst [vmem:[#allocation2 + $0x180] sm:$0xf] %v3113_v9  ;;  %v3998_v36 = vadd.f32 %v3997_v57, %v3909_v59  ;;  %v7177_v57 = vld [vmem:[#allocation2 + $0x10c] sm:$0xf]  ;;  %5016 = vmatpush.bf16.msra.mxu3 %v7297_v29  ;;  %v7182_v29 = vld [vmem:[#allocation2 + $0x130] sm:$0xf0] }
 0x362   : > { %3241 = vst [vmem:[#allocation2 + $0x188] sm:$0xf] %v3209_v19  ;;  %3950 = vmatmul.bf16.gmra.mxu2 %v8904_v43  ;;  %4288 = vmatmul.bf16.gmra.mxu0 %v8697_v1  ;;  %v6407_v1 = vld [vmem:[#allocation2 + $0x114] sm:$0xf0] }
 0x363   : > { %3242 = vst [vmem:[#allocation2 + $0x194] sm:$0xf] %v3210_v4  ;;  %v8910_v60 = vadd.f32 %v4246_v39, %v3998_v36  ;;  %v8921_v50 = vor.u32 %v7177_v57, %v6407_v1  ;;  %v6575_v36 = vld [vmem:[#allocation2 + $0xc] sm:$0xf0]  ;;  %v7305_v1 = vld [vmem:[#allocation8 + $0x1f0] sm:$0xff] }
 0x364   : > { %9606 = vst [vmem:[#allocation51_spill] sm:$0xff] %v8906_v8  ;;  %5105 = vmatpush.bf16.msra.mxu0 %v7305_v1 }
 0x365   : > { %4039 = vmatmul.bf16.gmra.mxu3 %v8906_v8  ;;  %v3911_v42 = vpop.f32.mrf.mxu2  ;;  %9607 = vst [vmem:[#allocation54_spill] sm:$0xff] %v8923_v6  ;;  %v7189_v8 = vld [vmem:[#allocation2 + $0x16c] sm:$0xf] }
 0x366   : > { %v3912_v52 = vadd.f32 %v3911_v42, %v8726_v3 }
 0x367   : > { %v7217_v16 = vld [vmem:[#allocation2 + $0x188] sm:$0xf0]  ;;  %v4251_v62 = vpop.f32.mrf.mxu0 }
 0x368   : > { %v8913_v34 = vpop.f32.mrf.mxu1  ;;  %v4000_v13 = vpop.f32.mrf.mxu3  ;;  %v6465_v37 = vld [vmem:[#allocation2 + $0x180] sm:$0xf] }
 0x369   : > { %v6466_v23 = vor.u32 %v7217_v16, %v6465_v37  ;;  %v4001_v49 = vadd.f32 %v4000_v13, %v3912_v52 }
 0x36b   : > { %3891 = vmatmul.bf16.gmra.mxu1 %v6466_v23  ;;  %v8916_v53 = vadd.f32 %v4249_v5, %v4001_v49  ;;  %v7144_v5 = vld [vmem:[#allocation2 + $0x4] sm:$0xf] }
 0x36c   : > { %v6578_v52 = vor.u32 %v7144_v5, %v6575_v36  ;;  %v7180_v5 = vld [vmem:[#allocation2 + $0x124] sm:$0xf] }
 0x36d   : > { %v3913_v19 = vpop.f32.mrf.mxu2 }
 0x36e   : > { %v3914_v9 = vadd.f32 %v3913_v19, %v8744_v28  ;;  %v7214_v28 = vld [vmem:[#allocation8 + $0xb0] sm:$0xff] }
 0x36f   : > { %v4254_v59 = vpop.f32.mrf.mxu0  ;;  %4414 = vmatpush.bf16.msra.mxu2 %v7214_v28 }
 0x370   : > { %v8918_v39 = vpop.f32.mrf.mxu1  ;;  %v4002_v4 = vpop.f32.mrf.mxu3 }
 0x371   : > { %v4003_v3 = vadd.f32 %v4002_v4, %v3914_v9  ;;  %v6419_v4 = vld [vmem:[#allocation2 + $0x12c] sm:$0xf0] }
 0x372   : > { %3955 = vmatmul.bf16.gmra.mxu2 %v8921_v50  ;;  %4293 = vmatmul.bf16.gmra.mxu0 %v8728_v30  ;;  %v7313_v30 = vld [vmem:[#allocation8 + $0x230] sm:$0xff]  ;;  %v8938_v28 = vor.u32 %v7180_v5, %v6419_v4  ;;  %v6431_v4 = vld [vmem:[#allocation2 + $0x144] sm:$0xf0]  ;;  %v7183_v5 = vld [vmem:[#allocation2 + $0x13c] sm:$0xf] }
 0x373   : > { %v8927_v42 = vadd.f32 %v4251_v62, %v4003_v3  ;;  %5194 = vmatpush.bf16.msra.mxu1 %v7313_v30  ;;  %v6425_v3 = vld [vmem:[#allocation2 + $0x128] sm:$0xf] }
 0x375   : > { %4044 = vmatmul.bf16.gmra.mxu3 %v8923_v6  ;;  %v3916_v16 = vpop.f32.mrf.mxu2 }
 0x376   : > { %v3917_v37 = vadd.f32 %v3916_v16, %v8757_v58  ;;  %v8940_v16 = vor.u32 %v7182_v29, %v6425_v3  ;;  %v7185_v3 = vld [vmem:[#allocation2 + $0x148] sm:$0xf0] }
 0x377   : > { %v4256_v49 = vpop.f32.mrf.mxu0 }
 0x378   : > { %v8930_v13 = vpop.f32.mrf.mxu1  ;;  %v4005_v23 = vpop.f32.mrf.mxu3  ;;  %9608 = vst [vmem:[#allocation53_spill] sm:$0xff] %v8940_v16 }
 0x379   : > { %v4006_v19 = vadd.f32 %v4005_v23, %v3917_v37 }
 0x37b   : > { %4332 = vmatmul.bf16.vlgmr.msrb.gmra.mxu1 %v6578_v52  ;;  %v8933_v62 = vadd.f32 %v4254_v59, %v4006_v19 }
 0x37d   : > { %v3918_v9 = vpop.f32.mrf.mxu2 }
 0x37e   : > { %v3919_v24 = vadd.f32 %v3918_v9, %v8775_v51 }
 0x37f   : > { %v4259_v58 = vpop.f32.mrf.mxu0 }
 0x380   : > { %v8935_v11 = vpop.f32.mrf.mxu1  ;;  %v4007_v57 = vpop.f32.mrf.mxu3 }
 0x381   : > { %v4008_v36 = vadd.f32 %v4007_v57, %v3919_v24  ;;  %v6437_v57 = vld [vmem:[#allocation2 + $0x140] sm:$0xf] }
 0x382   : > { %3960 = vmatmul.bf16.gmra.mxu2 %v8938_v28  ;;  %4298 = vmatmul.bf16.gmra.mxu0 %v8759_v32 }
 0x383   : > { %v8944_v59 = vadd.f32 %v4256_v49, %v4008_v36 }
 0x385   : > { %4049 = vmatmul.bf16.gmra.mxu3 %v8940_v16  ;;  %v3921_v52 = vpop.f32.mrf.mxu2  ;;  %v7295_v16 = vld [vmem:[#allocation8 + $0x1a0] sm:$0xff] }
 0x386   : > { %v3922_v37 = vadd.f32 %v3921_v52, %v8788_v33  ;;  %v8956_v33 = vor.u32 %v7183_v5, %v6431_v4  ;;  %v7296_v52 = vld [vmem:[#allocation8 + $0x1a8] sm:$0xff] }
 0x387   : > { %v4261_v19 = vpop.f32.mrf.mxu0  ;;  %5017 = vmatpush.bf16.msra.mxu3 %v7296_v52 }
 0x388   : > { %v8947_v51 = vpop.f32.mrf.mxu1  ;;  %v4010_v23 = vpop.f32.mrf.mxu3 }
 0x389   : > { %v4011_v1 = vadd.f32 %v4010_v23, %v3922_v37  ;;  %v8958_v37 = vor.u32 %v7185_v3, %v6437_v57  ;;  %v7312_v57 = vld [vmem:[#allocation8 + $0x228] sm:$0xff]  ;;  %v6443_v3 = vld [vmem:[#allocation2 + $0x15c] sm:$0xf0] }
 0x38a   : > { %5195 = vmatpush.bf16.msra.mxu1 %v7312_v57  ;;  %v7294_v57 = vld [vmem:[#allocation8 + $0x198] sm:$0xff] }
 0x38b   : > { %4337 = vmatmul.bf16.gmra.mxu1 %v8625_v35  ;;  %v8951_v30 = vadd.f32 %v4259_v58, %v4011_v1  ;;  %9609 = vst [vmem:[#allocation34_spill] sm:$0xff] %v8958_v37  ;;  %5018 = vmatpush.bf16.msra.mxu3 %v7295_v16 }
 0x38d   : > { %v3923_v9 = vpop.f32.mrf.mxu2 }
 0x38e   : > { %v3924_v32 = vadd.f32 %v3923_v9, %v8806_v20  ;;  %v7213_v20 = vld [vmem:[#allocation8 + $0xa8] sm:$0xff] }
 0x38f   : > { %v4264_v29 = vpop.f32.mrf.mxu0  ;;  %4415 = vmatpush.bf16.msra.mxu2 %v7213_v20  ;;  %v6449_v20 = vld [vmem:[#allocation2 + $0x158] sm:$0xf]  ;;  %5019 = vmatpush.bf16.msra.mxu3 %v7294_v57 }
 0x390   : > { %v8953_v24 = vpop.f32.mrf.mxu1  ;;  %v4012_v49 = vpop.f32.mrf.mxu3 }
 0x391   : > { %v4013_v36 = vadd.f32 %v4012_v49, %v3924_v32  ;;  %v7304_v49 = vld [vmem:[#allocation8 + $0x1e8] sm:$0xff] }
 0x392   : > { %3965 = vmatmul.bf16.gmra.mxu2 %v8956_v33  ;;  %4303 = vmatmul.bf16.gmra.mxu0 %v8790_v54 }
 0x393   : > { %v8962_v35 = vadd.f32 %v4261_v19, %v4013_v36  ;;  %5106 = vmatpush.bf16.msra.mxu0 %v7304_v49  ;;  %v7303_v49 = vld [vmem:[#allocation8 + $0x1e0] sm:$0xff] }
 0x395   : > { %4054 = vmatmul.bf16.gmra.mxu3 %v8958_v37  ;;  %v3926_v58 = vpop.f32.mrf.mxu2  ;;  %v7186_v37 = vld [vmem:[#allocation2 + $0x154] sm:$0xf] }
 0x396   : > { %v3927_v1 = vadd.f32 %v3926_v58, %v8819_v55  ;;  %v7188_v55 = vld [vmem:[#allocation2 + $0x160] sm:$0xf0] }
 0x397   : > { %v4266_v4 = vpop.f32.mrf.mxu0  ;;  %5107 = vmatpush.bf16.msra.mxu0 %v7303_v49  ;;  %v7292_v49 = vld [vmem:[#allocation8 + $0x188] sm:$0xff] }
 0x398   : > { %v8965_v23 = vpop.f32.mrf.mxu1  ;;  %v4015_v9 = vpop.f32.mrf.mxu3 }
 0x399   : > { %v4016_v32 = vadd.f32 %v4015_v9, %v3927_v1  ;;  %v8974_v9 = vor.u32 %v7186_v37, %v6443_v3  ;;  %v7302_v37 = vld [vmem:[#allocation8 + $0x1d8] sm:$0xff] }
 0x39b   : > { %4342 = vmatmul.bf16.gmra.mxu1 %v8651_v18  ;;  %v8969_v54 = vadd.f32 %v4264_v29, %v4016_v32  ;;  %v7212_v18 = vld [vmem:[#allocation8 + $0xa0] sm:$0xff]  ;;  %v8976_v29 = vor.u32 %v7188_v55, %v6449_v20  ;;  %5108 = vmatpush.bf16.msra.mxu0 %v7302_v37 }
 0x39c   : > { %4416 = vmatpush.bf16.msra.mxu2 %v7212_v18  ;;  %v7209_v18 = vld [vmem:[#allocation8 + $0x88] sm:$0xff]  ;;  %v6461_v37 = vld [vmem:[#allocation2 + $0x170] sm:$0xf] }
 0x39d   : > { %v3928_v19 = vpop.f32.mrf.mxu2  ;;  %9610 = vst [vmem:[#allocation33_spill] sm:$0xff] %v8976_v29 }
 0x39e   : > { %v3929_v36 = vadd.f32 %v3928_v19, %v8837_v47  ;;  %v7211_v47 = vld [vmem:[#allocation8 + $0x98] sm:$0xff] }
 0x39f   : > { %v4269_v58 = vpop.f32.mrf.mxu0 }
 0x3a0   : > { %v8971_v5 = vpop.f32.mrf.mxu1  ;;  %v4017_v52 = vpop.f32.mrf.mxu3  ;;  %4417 = vmatpush.bf16.msra.mxu2 %v7211_v47 }
 0x3a1   : > { %v4018_v1 = vadd.f32 %v4017_v52, %v3929_v36 }
 0x3a2   : > { %3970 = vmatmul.bf16.gmra.mxu2 %v8974_v9  ;;  %4308 = vmatmul.bf16.gmra.mxu0 %v8821_v63  ;;  %v7210_v63 = vld [vmem:[#allocation8 + $0x90] sm:$0xff] }
 0x3a3   : > { %v8980_v32 = vadd.f32 %v4266_v4, %v4018_v1  ;;  %v7293_v4 = vld [vmem:[#allocation8 + $0x190] sm:$0xff] }
 0x3a4   : > { %v7301_v1 = vld [vmem:[#allocation8 + $0x1d0] sm:$0xff]  ;;  %4418 = vmatpush.bf16.msra.mxu2 %v7210_v63  ;;  %5020 = vmatpush.bf16.msra.mxu3 %v7293_v4  ;;  %v7291_v63 = vld [vmem:[#allocation8 + $0x180] sm:$0xff] }
 0x3a5   : > { %4059 = vmatmul.bf16.gmra.mxu3 %v8976_v29  ;;  %v3931_v19 = vpop.f32.mrf.mxu2  ;;  %5109 = vmatpush.bf16.msra.mxu0 %v7301_v1  ;;  %v7300_v29 = vld [vmem:[#allocation8 + $0x1c8] sm:$0xff]  ;;  %v7299_v4 = vld [vmem:[#allocation8 + $0x1c0] sm:$0xff] }
 0x3a6   : > { %v3932_v36 = vadd.f32 %v3931_v19, %v8850_v26  ;;  %v6455_v19 = vld [vmem:[#allocation2 + $0x174] sm:$0xf0] }
 0x3a7   : > { %v4271_v20 = vpop.f32.mrf.mxu0 }
 0x3a8   : > { %v8983_v3 = vpop.f32.mrf.mxu1  ;;  %v4020_v52 = vpop.f32.mrf.mxu3  ;;  %4419 = vmatpush.bf16.msra.mxu2 %v7209_v18  ;;  %5021 = vmatpush.bf16.msra.mxu3 %v7292_v49 }
 0x3a9   : > { %v4021_v55 = vadd.f32 %v4020_v52, %v3932_v36  ;;  %v7191_v36 = vld [vmem:[#allocation2 + $0x178] sm:$0xf0]  ;;  %5110 = vmatpush.bf16.msra.mxu0 %v7300_v29 }
 0x3aa   : > { %v8994_v1 = vor.u32 %v7191_v36, %v6461_v37 }
 0x3ab   : > { %4347 = vmatmul.bf16.gmra.mxu1 %v8685_v17  ;;  %v8987_v16 = vadd.f32 %v4269_v58, %v4021_v55  ;;  %v8992_v58 = vor.u32 %v7189_v8, %v6455_v19  ;;  %v7208_v55 = vld [vmem:[#allocation8 + $0x80] sm:$0xff] }
 0x3ac   : > { %9612 = vst [vmem:[#allocation39_spill] sm:$0xff] %v8994_v1  ;;  %4420 = vmatpush.bf16.msra.mxu2 %v7208_v55  ;;  %5022 = vmatpush.bf16.msra.mxu3 %v7291_v63  ;;  %v6473_v55 = vld [vmem:[#allocation2 + $0x188] sm:$0xf]  ;;  %v7218_v63 = vld [vmem:[#allocation2 + $0x190] sm:$0xf0] }
 0x3ad   : > { %v3933_v26 = vpop.f32.mrf.mxu2  ;;  %9611 = vst [vmem:[#allocation40_spill] sm:$0xff] %v8992_v58  ;;  %5111 = vmatpush.bf16.msra.mxu0 %v7299_v4 }
 0x3ae   : > { %v3934_v47 = vadd.f32 %v3933_v26, %v8868_v31 }
 0x3af   : > { %v4274_v52 = vpop.f32.mrf.mxu0 }
 0x3b0   : > { %v8989_v6 = vpop.f32.mrf.mxu1  ;;  %v4022_v57 = vpop.f32.mrf.mxu3 }
 0x3b1   : > { %v4023_v17 = vadd.f32 %v4022_v57, %v3934_v47  ;;  %v7311_v47 = vld [vmem:[#allocation8 + $0x220] sm:$0xff] }
 0x3b2   : > { %3975 = vmatmul.bf16.gmra.mxu2 %v8992_v58  ;;  %4313 = vmatmul.bf16.gmra.mxu0 %v8852_v2 }
 0x3b3   : > { %v8998_v31 = vadd.f32 %v4271_v20, %v4023_v17  ;;  %5196 = vmatpush.bf16.msra.mxu1 %v7311_v47  ;;  %v6467_v20 = vld [vmem:[#allocation2 + $0x18c] sm:$0xf0] }
 0x3b5   : > { %4064 = vmatmul.bf16.gmra.mxu3 %v8994_v1  ;;  %v3936_v8 = vpop.f32.mrf.mxu2 }
 0x3b6   : > { %v3937_v29 = vadd.f32 %v3936_v8, %v8881_v38  ;;  %v7216_v38 = vld [vmem:[#allocation2 + $0x184] sm:$0xf] }
 0x3b7   : > { %v4276_v26 = vpop.f32.mrf.mxu0  ;;  %v6470_v1 = vor.u32 %v7216_v38, %v6467_v20  ;;  %v6581_v20 = vld [vmem:[#allocation2 + $0x8] sm:$0xf]  ;;  %v6681_v38 = vld [vmem:[#allocation2 + $0x30] sm:$0xf] }
 0x3b8   : > { %v9001_v18 = vpop.f32.mrf.mxu1  ;;  %v4025_v49 = vpop.f32.mrf.mxu3 }
 0x3b9   : > { %v4026_v19 = vadd.f32 %v4025_v49, %v3937_v29  ;;  %v6474_v29 = vor.u32 %v7218_v63, %v6473_v55 }
 0x3bb   : > { %4352 = vmatmul.bf16.gmra.mxu1 %v8716_v44  ;;  %v9005_v57 = vadd.f32 %v4274_v52, %v4026_v19 }
 0x3bd   : > { %v3938_v2 = vpop.f32.mrf.mxu2 }
 0x3be   : > { %v3939_v36 = vadd.f32 %v3938_v2, %v8901_v48 }
 0x3bf   : > { %v4279_v4 = vpop.f32.mrf.mxu0 }
 0x3c0   : > { %v9007_v37 = vpop.f32.mrf.mxu1  ;;  %v4027_v17 = vpop.f32.mrf.mxu3 }
 0x3c1   : > { %v4028_v8 = vadd.f32 %v4027_v17, %v3939_v36  ;;  %v7146_v36 = vld [vmem:[#allocation2 + $0x10] sm:$0xf0]  ;;  %v6683_v17 = vld [vmem:[#allocation2 + $0x3c] sm:$0xf0] }
 0x3c2   : > { %3980 = vmatmul.bf16.gmra.mxu2 %v6470_v1  ;;  %4318 = vmatmul.bf16.gmra.mxu0 %v8884_v10  ;;  %v6582_v63 = vor.u32 %v7146_v36, %v6581_v20  ;;  %v7310_v36 = vld [vmem:[#allocation8 + $0x218] sm:$0xff] }
 0x3c3   : > { %v9011_v44 = vadd.f32 %v4276_v26, %v4028_v8  ;;  %v7244_v8 = vld [vmem:[#allocation2 + $0x38] sm:$0xf0]  ;;  %5197 = vmatpush.bf16.msra.mxu1 %v7310_v36 }
 0x3c5   : > { %4069 = vmatmul.bf16.gmra.mxu3 %v6474_v29  ;;  %v3941_v52 = vpop.f32.mrf.mxu2  ;;  %v7243_v29 = vld [vmem:[#allocation2 + $0x34] sm:$0xf] }
 0x3c6   : > { %v3942_v19 = vadd.f32 %v3941_v52, %v8913_v34 }
 0x3c7   : > { %v4281_v47 = vpop.f32.mrf.mxu0 }
 0x3c8   : > { %v9013_v49 = vpop.f32.mrf.mxu1  ;;  %v4030_v48 = vpop.f32.mrf.mxu3 }
 0x3c9   : > { %v4031_v2 = vadd.f32 %v4030_v48, %v3942_v19  ;;  %v6686_v19 = vor.u32 %v7243_v29, %v6683_v17  ;;  %v6682_v48 = vor.u32 %v7244_v8, %v6681_v38  ;;  %v6693_v38 = vld [vmem:[#allocation2 + $0x48] sm:$0xf]  ;;  %v7247_v8 = vld [vmem:[#allocation2 + $0x50] sm:$0xf0] }
 0x3cb   : > { %4357 = vmatmul.bf16.gmra.mxu1 %v8747_v14  ;;  %v9017_v58 = vadd.f32 %v4279_v4, %v4031_v2 }
 0x3cd   : > { %9613 = vst [vmem:[#allocation46_spill] sm:$0xff] %v9017_v58  ;;  %v3943_v1 = vpop.f32.mrf.mxu2 }
 0x3ce   : > { %v3944_v26 = vadd.f32 %v3943_v1, %v8918_v39 }
 0x3cf   : > { %v4284_v34 = vpop.f32.mrf.mxu0 }
 0x3d0   : > { %v9019_v10 = vpop.f32.mrf.mxu1  ;;  %v4032_v55 = vpop.f32.mrf.mxu3 }
 0x3d1   : > { %v4033_v52 = vadd.f32 %v4032_v55, %v3944_v26  ;;  %v6695_v26 = vld [vmem:[#allocation2 + $0x54] sm:$0xf0] }
 0x3d2   : > { %4421 = vmatmul.bf16.vlgmr.msra.gmra.mxu2 %v6582_v63  ;;  %5112 = vmatmul.bf16.vlgmr.msra.gmra.mxu0 %v6686_v19 }
 0x3d3   : > { %v9022_v14 = vadd.f32 %v4281_v47, %v4033_v52 }
 0x3d5   : > { %5023 = vmatmul.bf16.vlgmr.msra.gmra.mxu3 %v6682_v48  ;;  %v3946_v4 = vpop.f32.mrf.mxu2 }
 0x3d6   : > { %v3947_v58 = vadd.f32 %v3946_v4, %v8930_v13  ;;  %v7246_v13 = vld [vmem:[#allocation2 + $0x4c] sm:$0xf] }
 0x3d7   : > { %v4286_v1 = vpop.f32.mrf.mxu0  ;;  %v6698_v19 = vor.u32 %v7246_v13, %v6695_v26  ;;  %v6707_v26 = vld [vmem:[#allocation2 + $0x6c] sm:$0xf0]  ;;  %v7249_v13 = vld [vmem:[#allocation2 + $0x64] sm:$0xf] }
 0x3d8   : > { %v9024_v2 = vpop.f32.mrf.mxu1  ;;  %v4035_v39 = vpop.f32.mrf.mxu3 }
 0x3d9   : > { %v4036_v20 = vadd.f32 %v4035_v39, %v3947_v58  ;;  %v6694_v58 = vor.u32 %v7247_v8, %v6693_v38  ;;  %v7250_v38 = vld [vmem:[#allocation2 + $0x68] sm:$0xf0] }
 0x3db   : > { %4362 = vmatmul.bf16.gmra.mxu1 %v8778_v25  ;;  %v9028_v22 = vadd.f32 %v4284_v34, %v4036_v20 }
 0x3dd   : > { %v3948_v17 = vpop.f32.mrf.mxu2 }
 0x3de   : > { %v3949_v47 = vadd.f32 %v3948_v17, %v8935_v11 }
 0x3df   : > { %v4289_v29 = vpop.f32.mrf.mxu0 }
 0x3e0   : > { %v9030_v55 = vpop.f32.mrf.mxu1  ;;  %v4037_v63 = vpop.f32.mrf.mxu3 }
 0x3e1   : > { %v4038_v52 = vadd.f32 %v4037_v63, %v3949_v47  ;;  %v6705_v63 = vld [vmem:[#allocation2 + $0x60] sm:$0xf] }
 0x3e2   : > { %4426 = vmatmul.bf16.gmra.mxu2 %v8629_v12  ;;  %5117 = vmatmul.bf16.gmra.mxu0 %v6698_v19  ;;  %v6706_v19 = vor.u32 %v7250_v38, %v6705_v63  ;;  %v7253_v38 = vld [vmem:[#allocation2 + $0x80] sm:$0xf0] }
 0x3e3   : > { %v9034_v25 = vadd.f32 %v4286_v1, %v4038_v52 }
 0x3e5   : > { %5028 = vmatmul.bf16.gmra.mxu3 %v6694_v58  ;;  %v3951_v34 = vpop.f32.mrf.mxu2 }
 0x3e6   : > { %v3952_v4 = vadd.f32 %v3951_v34, %v8947_v51  ;;  %v6710_v51 = vor.u32 %v7249_v13, %v6707_v26 }
 0x3e7   : > { %v4291_v39 = vpop.f32.mrf.mxu0 }
 0x3e8   : > { %v9036_v48 = vpop.f32.mrf.mxu1  ;;  %v4040_v11 = vpop.f32.mrf.mxu3 }
 0x3e9   : > { %v4041_v20 = vadd.f32 %v4040_v11, %v3952_v4 }
 0x3eb   : > { %4367 = vmatmul.bf16.gmra.mxu1 %v8809_v27  ;;  %v9040_v36 = vadd.f32 %v4289_v29, %v4041_v20 }
 0x3ed   : > { %v3953_v17 = vpop.f32.mrf.mxu2 }
 0x3ee   : > { %v3954_v12 = vadd.f32 %v3953_v17, %v8953_v24  ;;  %v7309_v17 = vld [vmem:[#allocation8 + $0x210] sm:$0xff] }
 0x3ef   : > { %v4294_v8 = vpop.f32.mrf.mxu0  ;;  %5198 = vmatpush.bf16.msra.mxu1 %v7309_v17 }
 0x3f0   : > { %v9042_v47 = vpop.f32.mrf.mxu1  ;;  %v4042_v1 = vpop.f32.mrf.mxu3 }
 0x3f1   : > { %v4043_v52 = vadd.f32 %v4042_v1, %v3954_v12 }
 0x3f2   : > { %4431 = vmatmul.bf16.gmra.mxu2 %v8655_v56  ;;  %5122 = vmatmul.bf16.gmra.mxu0 %v6710_v51 }
 0x3f3   : > { %v9046_v27 = vadd.f32 %v4291_v39, %v4043_v52  ;;  %v6719_v39 = vld [vmem:[#allocation2 + $0x84] sm:$0xf0]  ;;  %v7252_v52 = vld [vmem:[#allocation2 + $0x7c] sm:$0xf] }
 0x3f5   : > { %5033 = vmatmul.bf16.gmra.mxu3 %v6706_v19  ;;  %v3956_v29 = vpop.f32.mrf.mxu2  ;;  %v6722_v19 = vor.u32 %v7252_v52, %v6719_v39 }
 0x3f6   : > { %v3957_v58 = vadd.f32 %v3956_v29, %v8965_v23  ;;  %v6717_v23 = vld [vmem:[#allocation2 + $0x78] sm:$0xf] }
 0x3f7   : > { %v4296_v11 = vpop.f32.mrf.mxu0 }
 0x3f8   : > { %v4045_v34 = vpop.f32.mrf.mxu3  ;;  %v4333_v4 = vpop.f32.mrf.mxu1 }
 0x3f9   : > { %v9050_v24 = vadd.f32 %v4333_v4, %v8887_v40  ;;  %v4046_v20 = vadd.f32 %v4045_v34, %v3957_v58 }
 0x3fb   : > { %4372 = vmatmul.bf16.gmra.mxu1 %v8840_v21  ;;  %v9053_v26 = vadd.f32 %v4294_v8, %v4046_v20  ;;  %v6718_v21 = vor.u32 %v7253_v38, %v6717_v23 }
 0x3fd   : > { %v3958_v56 = vpop.f32.mrf.mxu2 }
 0x3fe   : > { %v3959_v12 = vadd.f32 %v3958_v56, %v8971_v5 }
 0x3ff   : > { %v4299_v40 = vpop.f32.mrf.mxu0 }
 0x400   : > { %v4047_v1 = vpop.f32.mrf.mxu3  ;;  %v4335_v63 = vpop.f32.mrf.mxu1 }
 0x401   : > { %v9057_v13 = vadd.f32 %v4335_v63, %v8910_v60  ;;  %v4048_v51 = vadd.f32 %v4047_v1, %v3959_v12  ;;  %v6729_v1 = vld [vmem:[#allocation2 + $0x90] sm:$0xf]  ;;  %v7256_v63 = vld [vmem:[#allocation2 + $0x98] sm:$0xf0] }
 0x402   : > { %4436 = vmatmul.bf16.gmra.mxu2 %v8689_v41  ;;  %5127 = vmatmul.bf16.gmra.mxu0 %v6722_v19  ;;  %v6731_v41 = vld [vmem:[#allocation2 + $0x9c] sm:$0xf0] }
 0x403   : > { %v9060_v8 = vadd.f32 %v4296_v11, %v4048_v51  ;;  %v6730_v51 = vor.u32 %v7256_v63, %v6729_v1 }
 0x405   : > { %5038 = vmatmul.bf16.gmra.mxu3 %v6718_v21  ;;  %v3961_v29 = vpop.f32.mrf.mxu2 }
 0x406   : > { %v3962_v5 = vadd.f32 %v3961_v29, %v8983_v3 }
 0x407   : > { %v4301_v60 = vpop.f32.mrf.mxu0 }
 0x408   : > { %v4050_v58 = vpop.f32.mrf.mxu3  ;;  %v4338_v34 = vpop.f32.mrf.mxu1 }
 0x409   : > { %v9064_v4 = vadd.f32 %v4338_v34, %v8916_v53  ;;  %v4051_v20 = vadd.f32 %v4050_v58, %v3962_v5  ;;  %v7255_v53 = vld [vmem:[#allocation2 + $0x94] sm:$0xf]  ;;  %v7308_v58 = vld [vmem:[#allocation8 + $0x208] sm:$0xff] }
 0x40a   : > { %v6734_v52 = vor.u32 %v7255_v53, %v6731_v41  ;;  %5199 = vmatpush.bf16.msra.mxu1 %v7308_v58  ;;  %v6753_v58 = vld [vmem:[#allocation2 + $0xc0] sm:$0xf] }
 0x40b   : > { %4377 = vmatmul.bf16.gmra.mxu1 %v8871_v7  ;;  %v9067_v17 = vadd.f32 %v4299_v40, %v4051_v20 }
 0x40d   : > { %v3963_v56 = vpop.f32.mrf.mxu2 }
 0x40e   : > { %v3964_v11 = vadd.f32 %v3963_v56, %v8989_v6 }
 0x40f   : > { %v4304_v23 = vpop.f32.mrf.mxu0 }
 0x410   : > { %v4052_v39 = vpop.f32.mrf.mxu3  ;;  %v4340_v12 = vpop.f32.mrf.mxu1 }
 0x411   : > { %v9071_v3 = vadd.f32 %v4340_v12, %v8927_v42  ;;  %v4053_v38 = vadd.f32 %v4052_v39, %v3964_v11  ;;  %v7259_v11 = vld [vmem:[#allocation2 + $0xb0] sm:$0xf0]  ;;  %v7258_v12 = vld [vmem:[#allocation2 + $0xac] sm:$0xf] }
 0x412   : > { %4441 = vmatmul.bf16.gmra.mxu2 %v8720_v46  ;;  %5132 = vmatmul.bf16.gmra.mxu0 %v6734_v52 }
 0x413   : > { %v9074_v7 = vadd.f32 %v4301_v60, %v4053_v38  ;;  %v6743_v60 = vld [vmem:[#allocation2 + $0xb4] sm:$0xf0] }
 0x414   : > { %v6746_v63 = vor.u32 %v7258_v12, %v6743_v60 }
 0x415   : > { %5043 = vmatmul.bf16.gmra.mxu3 %v6730_v51  ;;  %v3966_v40 = vpop.f32.mrf.mxu2 }
 0x416   : > { %v3967_v6 = vadd.f32 %v3966_v40, %v9001_v18  ;;  %v6741_v18 = vld [vmem:[#allocation2 + $0xa8] sm:$0xf] }
 0x417   : > { %v4306_v42 = vpop.f32.mrf.mxu0 }
 0x418   : > { %v4055_v19 = vpop.f32.mrf.mxu3  ;;  %v4343_v21 = vpop.f32.mrf.mxu1 }
 0x419   : > { %v9078_v29 = vadd.f32 %v4343_v21, %v8933_v62  ;;  %v4056_v5 = vadd.f32 %v4055_v19, %v3967_v6 }
 0x41b   : > { %4382 = vmatmul.bf16.gmra.mxu1 %v8904_v43  ;;  %v9081_v34 = vadd.f32 %v4304_v23, %v4056_v5  ;;  %v6742_v43 = vor.u32 %v7259_v11, %v6741_v18 }
 0x41d   : > { %v3968_v46 = vpop.f32.mrf.mxu2 }
 0x41e   : > { %v3969_v20 = vadd.f32 %v3968_v46, %v9007_v37  ;;  %v7262_v46 = vld [vmem:[#allocation2 + $0xc8] sm:$0xf0] }
 0x41f   : > { %v4309_v62 = vpop.f32.mrf.mxu0 }
 0x420   : > { %v4057_v56 = vpop.f32.mrf.mxu3  ;;  %v4345_v41 = vpop.f32.mrf.mxu1 }
 0x421   : > { %v9085_v39 = vadd.f32 %v4345_v41, %v8944_v59  ;;  %v4058_v1 = vadd.f32 %v4057_v56, %v3969_v20  ;;  %v6754_v41 = vor.u32 %v7262_v46, %v6753_v58 }
 0x422   : > { %4446 = vmatmul.bf16.gmra.mxu2 %v8751_v61  ;;  %5137 = vmatmul.bf16.gmra.mxu0 %v6746_v63  ;;  %v6755_v61 = vld [vmem:[#allocation2 + $0xcc] sm:$0xf0] }
 0x423   : > { %v9088_v23 = vadd.f32 %v4306_v42, %v4058_v1  ;;  %v7307_v63 = vld [vmem:[#allocation8 + $0x200] sm:$0xff] }
 0x424   : > { %5200 = vmatpush.bf16.msra.mxu1 %v7307_v63 }
 0x425   : > { %5048 = vmatmul.bf16.gmra.mxu3 %v6742_v43  ;;  %v3971_v53 = vpop.f32.mrf.mxu2 }
 0x426   : > { %v3972_v37 = vadd.f32 %v3971_v53, %v9013_v49  ;;  %v6767_v53 = vld [vmem:[#allocation2 + $0xe4] sm:$0xf0] }
 0x427   : > { %v4311_v59 = vpop.f32.mrf.mxu0 }
 0x428   : > { %v4060_v38 = vpop.f32.mrf.mxu3  ;;  %v4348_v52 = vpop.f32.mrf.mxu1 }
 0x429   : > { %v9092_v51 = vadd.f32 %v4348_v52, %v8951_v30  ;;  %v4061_v40 = vadd.f32 %v4060_v38, %v3972_v37  ;;  %v7261_v30 = vld [vmem:[#allocation2 + $0xc4] sm:$0xf] }
 0x42a   : > { %v6758_v56 = vor.u32 %v7261_v30, %v6755_v61 }
 0x42b   : > { %4387 = vmatmul.bf16.gmra.mxu1 %v8921_v50  ;;  %v9095_v6 = vadd.f32 %v4309_v62, %v4061_v40 }
 0x42d   : > { %v3973_v19 = vpop.f32.mrf.mxu2 }
 0x42e   : > { %v3974_v21 = vadd.f32 %v3973_v19, %v9019_v10  ;;  %v7264_v19 = vld [vmem:[#allocation2 + $0xdc] sm:$0xf] }
 0x42f   : > { %v4314_v60 = vpop.f32.mrf.mxu0 }
 0x430   : > { %v4062_v42 = vpop.f32.mrf.mxu3  ;;  %v4350_v5 = vpop.f32.mrf.mxu1 }
 0x431   : > { %v9099_v49 = vadd.f32 %v4350_v5, %v8962_v35  ;;  %v4063_v20 = vadd.f32 %v4062_v42, %v3974_v21  ;;  %v6770_v21 = vor.u32 %v7264_v19, %v6767_v53 }
 0x432   : > { %4451 = vmatmul.bf16.gmra.mxu2 %v8782_v15  ;;  %5142 = vmatmul.bf16.gmra.mxu0 %v6758_v56 }
 0x433   : > { %v9102_v50 = vadd.f32 %v4311_v59, %v4063_v20  ;;  %v7265_v59 = vld [vmem:[#allocation2 + $0xe0] sm:$0xf0] }
 0x435   : > { %5053 = vmatmul.bf16.gmra.mxu3 %v6754_v41  ;;  %v3976_v18 = vpop.f32.mrf.mxu2 }
 0x436   : > { %v3977_v10 = vadd.f32 %v3976_v18, %v9024_v2  ;;  %v6765_v2 = vld [vmem:[#allocation2 + $0xd8] sm:$0xf] }
 0x437   : > { %v4316_v35 = vpop.f32.mrf.mxu0 }
 0x438   : > { %v4065_v11 = vpop.f32.mrf.mxu3  ;;  %v4353_v62 = vpop.f32.mrf.mxu1 }
 0x439   : > { %v9106_v12 = vadd.f32 %v4353_v62, %v8969_v54  ;;  %v4066_v1 = vadd.f32 %v4065_v11, %v3977_v10  ;;  %v6777_v11 = vld [vmem:[#allocation2 + $0xf0] sm:$0xf]  ;;  %v7268_v62 = vld [vmem:[#allocation2 + $0xf8] sm:$0xf0] }
 0x43b   : > { %4392 = vmatmul.bf16.gmra.mxu1 %v8938_v28  ;;  %v9109_v43 = vadd.f32 %v4314_v60, %v4066_v1  ;;  %v6766_v28 = vor.u32 %v7265_v59, %v6765_v2 }
 0x43d   : > { %v3978_v15 = vpop.f32.mrf.mxu2 }
 0x43e   : > { %v3979_v37 = vadd.f32 %v3978_v15, %v9030_v55  ;;  %v6778_v15 = vor.u32 %v7268_v62, %v6777_v11  ;;  %v6803_v62 = vld [vmem:[#allocation2 + $0x12c] sm:$0xf0] }
 0x43f   : > { %v4319_v54 = vpop.f32.mrf.mxu0 }
 0x440   : > { %v4067_v38 = vpop.f32.mrf.mxu3  ;;  %v4355_v52 = vpop.f32.mrf.mxu1 }
 0x441   : > { %v9113_v40 = vadd.f32 %v4355_v52, %v8980_v32  ;;  %v4068_v61 = vadd.f32 %v4067_v38, %v3979_v37 }
 0x442   : > { %4456 = vmatmul.bf16.gmra.mxu2 %v8813_v0  ;;  %5147 = vmatmul.bf16.gmra.mxu0 %v6770_v21  ;;  %v6779_v0 = vld [vmem:[#allocation2 + $0xfc] sm:$0xf0]  ;;  %v6789_v21 = vld [vmem:[#allocation2 + $0x108] sm:$0xf] }
 0x443   : > { %v9116_v42 = vadd.f32 %v4316_v35, %v4068_v61 }
 0x445   : > { %5058 = vmatmul.bf16.gmra.mxu3 %v6766_v28  ;;  %v3981_v5 = vpop.f32.mrf.mxu2  ;;  %v7271_v28 = vld [vmem:[#allocation2 + $0x110] sm:$0xf0] }
 0x446   : > { %v3982_v55 = vadd.f32 %v3981_v5, %v9036_v48 }
 0x447   : > { %v4321_v32 = vpop.f32.mrf.mxu0 }
 0x448   : > { %v4070_v58 = vpop.f32.mrf.mxu3  ;;  %v4358_v46 = vpop.f32.mrf.mxu1 }
 0x449   : > { %v9120_v60 = vadd.f32 %v4358_v46, %v8987_v16  ;;  %v4071_v30 = vadd.f32 %v4070_v58, %v3982_v55  ;;  %v7267_v16 = vld [vmem:[#allocation2 + $0xf4] sm:$0xf]  ;;  %v7270_v55 = vld [vmem:[#allocation2 + $0x10c] sm:$0xf]  ;;  %v6790_v46 = vor.u32 %v7271_v28, %v6789_v21 }
 0x44a   : > { %v6782_v63 = vor.u32 %v7267_v16, %v6779_v0  ;;  %v9615_v0 = vld [vmem:[#allocation46_spill] sm:$0xff] }
 0x44b   : > { %4397 = vmatmul.bf16.gmra.mxu1 %v8956_v33  ;;  %v9123_v20 = vadd.f32 %v4319_v54, %v4071_v30 }
 0x44d   : > { %v3983_v56 = vpop.f32.mrf.mxu2 }
 0x44e   : > { %v3984_v41 = vadd.f32 %v3983_v56, %v9042_v47 }
 0x44f   : > { %v5113_v35 = vpop.f32.mrf.mxu0 }
 0x450   : > { %v4072_v18 = vpop.f32.mrf.mxu3  ;;  %v4360_v10 = vpop.f32.mrf.mxu1 }
 0x451   : > { %v9127_v48 = vadd.f32 %v4360_v10, %v8998_v31  ;;  %v4073_v1 = vadd.f32 %v4072_v18, %v3984_v41  ;;  %v9616_v10 = vld [vmem:[#allocation40_spill] sm:$0xff] }
 0x452   : > { %4461 = vmatmul.bf16.gmra.mxu2 %v8844_v45  ;;  %5152 = vmatmul.bf16.gmra.mxu0 %v6782_v63  ;;  %v6791_v45 = vld [vmem:[#allocation2 + $0x114] sm:$0xf0]  ;;  %v6801_v63 = vld [vmem:[#allocation2 + $0x120] sm:$0xf] }
 0x453   : > { %v9130_v33 = vadd.f32 %v4321_v32, %v4073_v1  ;;  %v6794_v58 = vor.u32 %v7270_v55, %v6791_v45  ;;  %v9614_v32 = vld [vmem:[#allocation52_spill] sm:$0xff] }
 0x455   : > { %5063 = vmatmul.bf16.gmra.mxu3 %v6778_v15  ;;  %v4422_v53 = vpop.f32.mrf.mxu2  ;;  %v7274_v15 = vld [vmem:[#allocation2 + $0x128] sm:$0xf0] }
 0x456   : > { %v9133_v37 = vadd.f32 %v4422_v53, %v9050_v24 }
 0x457   : > { %v5115_v2 = vpop.f32.mrf.mxu0 }
 0x458   : > { %v4363_v47 = vpop.f32.mrf.mxu1  ;;  %v5024_v38 = vpop.f32.mrf.mxu3 }
 0x459   : > { %v9136_v31 = vadd.f32 %v4363_v47, %v9005_v57  ;;  %v9138_v52 = vadd.f32 %v5113_v35, %v5024_v38  ;;  %v7273_v47 = vld [vmem:[#allocation2 + $0x124] sm:$0xf] }
 0x45a   : > { %v6806_v38 = vor.u32 %v7273_v47, %v6803_v62 }
 0x45b   : > { %4402 = vmatmul.bf16.gmra.mxu1 %v8974_v9 }
 0x45d   : > { %v4424_v59 = vpop.f32.mrf.mxu2 }
 0x45e   : > { %v9142_v19 = vadd.f32 %v4424_v59, %v9057_v13  ;;  %v9617_v59 = vld [vmem:[#allocation51_spill] sm:$0xff] }
 0x45f   : > { %v5118_v57 = vpop.f32.mrf.mxu0 }
 0x460   : > { %v4365_v54 = vpop.f32.mrf.mxu1  ;;  %v5026_v61 = vpop.f32.mrf.mxu3 }
 0x461   : > { %v9145_v24 = vadd.f32 %v4365_v54, %v9011_v44  ;;  %v9147_v5 = vadd.f32 %v5115_v2, %v5026_v61  ;;  %v6802_v2 = vor.u32 %v7274_v15, %v6801_v63  ;;  %v6689_v54 = vld [vmem:[#allocation2 + $0x38] sm:$0xf]  ;;  %v7245_v61 = vld [vmem:[#allocation2 + $0x40] sm:$0xf0]  ;;  %v6701_v63 = vld [vmem:[#allocation2 + $0x50] sm:$0xf] }
 0x462   : > { %4466 = vmatmul.bf16.gmra.mxu2 %v9614_v32  ;;  %5157 = vmatmul.bf16.gmra.mxu0 %v6794_v58  ;;  %v6690_v58 = vor.u32 %v7245_v61, %v6689_v54  ;;  %v7248_v15 = vld [vmem:[#allocation2 + $0x58] sm:$0xf0] }
 0x465   : > { %5068 = vmatmul.bf16.gmra.mxu3 %v6790_v46  ;;  %v4427_v9 = vpop.f32.mrf.mxu2 }
 0x466   : > { %v9151_v13 = vadd.f32 %v4427_v9, %v9064_v4  ;;  %v6815_v9 = vld [vmem:[#allocation2 + $0x144] sm:$0xf0] }
 0x467   : > { %v5120_v18 = vpop.f32.mrf.mxu0 }
 0x468   : > { %v4368_v30 = vpop.f32.mrf.mxu1  ;;  %v5029_v56 = vpop.f32.mrf.mxu3 }
 0x469   : > { %v9154_v41 = vadd.f32 %v4368_v30, %v9615_v0  ;;  %v9156_v44 = vadd.f32 %v5118_v57, %v5029_v56 }
 0x46b   : > { %4407 = vmatmul.bf16.gmra.mxu1 %v9616_v10  ;;  %v7277_v10 = vld [vmem:[#allocation2 + $0x140] sm:$0xf0] }
 0x46d   : > { %v4429_v11 = vpop.f32.mrf.mxu2 }
 0x46e   : > { %v9160_v16 = vadd.f32 %v4429_v11, %v9071_v3 }
 0x46f   : > { %v5123_v45 = vpop.f32.mrf.mxu0 }
 0x470   : > { %v4370_v35 = vpop.f32.mrf.mxu1  ;;  %v5031_v1 = vpop.f32.mrf.mxu3 }
 0x471   : > { %v9163_v4 = vadd.f32 %v4370_v35, %v9022_v14  ;;  %v9165_v53 = vadd.f32 %v5120_v18, %v5031_v1  ;;  %v6813_v18 = vld [vmem:[#allocation2 + $0x138] sm:$0xf] }
 0x472   : > { %4471 = vmatmul.bf16.gmra.mxu2 %v9617_v59  ;;  %5162 = vmatmul.bf16.gmra.mxu0 %v6806_v38  ;;  %v6814_v35 = vor.u32 %v7277_v10, %v6813_v18  ;;  %v9618_v1 = vld [vmem:[#allocation54_spill] sm:$0xff] }
 0x473   : > { %v6839_v18 = vld [vmem:[#allocation2 + $0x174] sm:$0xf0] }
 0x475   : > { %5073 = vmatmul.bf16.gmra.mxu3 %v6802_v2  ;;  %v4432_v3 = vpop.f32.mrf.mxu2 }
 0x476   : > { %v9169_v28 = vadd.f32 %v4432_v3, %v9078_v29  ;;  %v6825_v3 = vld [vmem:[#allocation2 + $0x150] sm:$0xf] }
 0x477   : > { %v5125_v46 = vpop.f32.mrf.mxu0 }
 0x478   : > { %v4373_v21 = vpop.f32.mrf.mxu1  ;;  %v5034_v57 = vpop.f32.mrf.mxu3 }
 0x479   : > { %v9172_v14 = vadd.f32 %v4373_v21, %v9028_v22  ;;  %v9174_v55 = vadd.f32 %v5123_v45, %v5034_v57  ;;  %v7276_v22 = vld [vmem:[#allocation2 + $0x13c] sm:$0xf]  ;;  %v6827_v45 = vld [vmem:[#allocation2 + $0x15c] sm:$0xf0] }
 0x47a   : > { %v6818_v62 = vor.u32 %v7276_v22, %v6815_v9  ;;  %v7280_v21 = vld [vmem:[#allocation2 + $0x158] sm:$0xf0]  ;;  %v7251_v9 = vld [vmem:[#allocation2 + $0x70] sm:$0xf0]  ;;  %v6837_v22 = vld [vmem:[#allocation2 + $0x168] sm:$0xf] }
 0x47b   : > { %5201 = vmatmul.bf16.vlgmr.msra.gmra.mxu1 %v6690_v58  ;;  %v7279_v58 = vld [vmem:[#allocation2 + $0x154] sm:$0xf] }
 0x47d   : > { %v4434_v32 = vpop.f32.mrf.mxu2 }
 0x47e   : > { %v9177_v56 = vadd.f32 %v4434_v32, %v9085_v39  ;;  %v9619_v32 = vld [vmem:[#allocation53_spill] sm:$0xff] }
 0x480   : > { %v4375_v30 = vpop.f32.mrf.mxu1  ;;  %v5036_v0 = vpop.f32.mrf.mxu3 }
 0x481   : > { %v9180_v29 = vadd.f32 %v4375_v30, %v9034_v25  ;;  %v9182_v11 = vadd.f32 %v5125_v46, %v5036_v0  ;;  %v6702_v25 = vor.u32 %v7248_v15, %v6701_v63  ;;  %v6830_v46 = vor.u32 %v7279_v58, %v6827_v45  ;;  %v9620_v15 = vld [vmem:[#allocation34_spill] sm:$0xff]  ;;  %v6851_v45 = vld [vmem:[#allocation2 + $0x18c] sm:$0xf0]  ;;  %v7285_v58 = vld [vmem:[#allocation2 + $0x184] sm:$0xf] }
 0x482   : > { %4476 = vmatmul.bf16.gmra.mxu2 %v9618_v1  ;;  %5167 = vmatmul.bf16.gmra.mxu0 %v6818_v62 }
 0x485   : > { %5078 = vmatmul.bf16.gmra.mxu3 %v6814_v35  ;;  %v4437_v47 = vpop.f32.mrf.mxu2  ;;  %v7282_v35 = vld [vmem:[#allocation2 + $0x16c] sm:$0xf] }
 0x486   : > { %v9186_v38 = vadd.f32 %v4437_v47, %v9092_v51  ;;  %v6826_v51 = vor.u32 %v7280_v21, %v6825_v3  ;;  %v6842_v1 = vor.u32 %v7282_v35, %v6839_v18  ;;  %v6725_v47 = vld [vmem:[#allocation2 + $0x80] sm:$0xf] }
 0x487   : > { %v6849_v3 = vld [vmem:[#allocation2 + $0x180] sm:$0xf] }
 0x488   : > { %v4378_v39 = vpop.f32.mrf.mxu1 }
 0x489   : > { %v9189_v2 = vadd.f32 %v4378_v39, %v9040_v36  ;;  %v6713_v36 = vld [vmem:[#allocation2 + $0x68] sm:$0xf]  ;;  %v7254_v39 = vld [vmem:[#allocation2 + $0x88] sm:$0xf0] }
 0x48b   : > { %5206 = vmatmul.bf16.gmra.mxu1 %v6702_v25 }
 0x48d   : > { %v4439_v59 = vpop.f32.mrf.mxu2 }
 0x48e   : > { %v9192_v61 = vadd.f32 %v4439_v59, %v9099_v49  ;;  %v6714_v49 = vor.u32 %v7251_v9, %v6713_v36  ;;  %v6726_v59 = vor.u32 %v7254_v39, %v6725_v47  ;;  %v6737_v36 = vld [vmem:[#allocation2 + $0x98] sm:$0xf]  ;;  %v7257_v9 = vld [vmem:[#allocation2 + $0xa0] sm:$0xf0]  ;;  %v6761_v47 = vld [vmem:[#allocation2 + $0xc8] sm:$0xf] }
 0x48f   : > { %v7263_v39 = vld [vmem:[#allocation2 + $0xd0] sm:$0xf0] }
 0x490   : > { %v4380_v54 = vpop.f32.mrf.mxu1 }
 0x491   : > { %v9195_v57 = vadd.f32 %v4380_v54, %v9046_v27  ;;  %v7283_v27 = vld [vmem:[#allocation2 + $0x170] sm:$0xf0] }
 0x492   : > { %4481 = vmatmul.bf16.gmra.mxu2 %v9619_v32  ;;  %5172 = vmatmul.bf16.gmra.mxu0 %v6830_v46  ;;  %v6838_v63 = vor.u32 %v7283_v27, %v6837_v22  ;;  %v6854_v46 = vor.u32 %v7285_v58, %v6851_v45  ;;  %v9621_v32 = vld [vmem:[#allocation33_spill] sm:$0xff]  ;;  %v7260_v27 = vld [vmem:[#allocation2 + $0xb8] sm:$0xf0] }
 0x493   : > { %v6749_v22 = vld [vmem:[#allocation2 + $0xb0] sm:$0xf] }
 0x495   : > { %5083 = vmatmul.bf16.gmra.mxu3 %v6826_v51 }
 0x498   : > { %v4383_v30 = vpop.f32.mrf.mxu1 }
 0x499   : > { %v9199_v0 = vadd.f32 %v4383_v30, %v9053_v26 }
 0x49b   : > { %5211 = vmatmul.bf16.gmra.mxu1 %v6714_v49  ;;  %v6738_v49 = vor.u32 %v7257_v9, %v6737_v36  ;;  %v6785_v36 = vld [vmem:[#allocation2 + $0xf8] sm:$0xf]  ;;  %v7269_v9 = vld [vmem:[#allocation2 + $0x100] sm:$0xf0] }
 0x4a0   : > { %v4385_v10 = vpop.f32.mrf.mxu1 }
 0x4a1   : > { %v9202_v62 = vadd.f32 %v4385_v10, %v9060_v8  ;;  %v7286_v8 = vld [vmem:[#allocation2 + $0x188] sm:$0xf0] }
 0x4a2   : > { %4486 = vmatmul.bf16.gmra.mxu2 %v9620_v15  ;;  %5177 = vmatmul.bf16.gmra.mxu0 %v6842_v1  ;;  %v6850_v51 = vor.u32 %v7286_v8, %v6849_v3  ;;  %v7266_v3 = vld [vmem:[#allocation2 + $0xe8] sm:$0xf0] }
 0x4a5   : > { %5088 = vmatmul.bf16.gmra.mxu3 %v6838_v63  ;;  %v6750_v63 = vor.u32 %v7260_v27, %v6749_v22 }
 0x4a8   : > { %v4388_v26 = vpop.f32.mrf.mxu1 }
 0x4a9   : > { %v9206_v25 = vadd.f32 %v4388_v26, %v9067_v17 }
 0x4ab   : > { %5216 = vmatmul.bf16.gmra.mxu1 %v6726_v59  ;;  %v6762_v59 = vor.u32 %v7263_v39, %v6761_v47  ;;  %v6797_v47 = vld [vmem:[#allocation2 + $0x110] sm:$0xf]  ;;  %v7272_v39 = vld [vmem:[#allocation2 + $0x118] sm:$0xf0] }
 0x4b0   : > { %v4390_v54 = vpop.f32.mrf.mxu1 }
 0x4b1   : > { %v9209_v21 = vadd.f32 %v4390_v54, %v9074_v7  ;;  %v9622_v7 = vld [vmem:[#allocation39_spill] sm:$0xff] }
 0x4b2   : > { %4491 = vmatmul.bf16.gmra.mxu2 %v9621_v32  ;;  %5182 = vmatmul.bf16.gmra.mxu0 %v6854_v46  ;;  %v9239_v32 = vpop.f32.mrf.mxu3 }
 0x4b5   : > { %5093 = vmatmul.bf16.gmra.mxu3 %v6850_v51 }
 0x4b8   : > { %v4393_v17 = vpop.f32.mrf.mxu1 }
 0x4b9   : > { %v9213_v30 = vadd.f32 %v4393_v17, %v9081_v34 }
 0x4bb   : > { %5221 = vmatmul.bf16.gmra.mxu1 %v6738_v49  ;;  %v6786_v49 = vor.u32 %v7269_v9, %v6785_v36 }
 0x4c0   : > { %v4395_v18 = vpop.f32.mrf.mxu1 }
 0x4c1   : > { %v9216_v10 = vadd.f32 %v4395_v18, %v9088_v23 }
 0x4c2   : > { %4496 = vmatmul.bf16.gmra.mxu2 %v9622_v7  ;;  %v9250_v7 = vpop.f32.mrf.mxu3 }
 0x4c8   : > { %v4398_v35 = vpop.f32.mrf.mxu1 }
 0x4c9   : > { %v9220_v1 = vadd.f32 %v4398_v35, %v9095_v6  ;;  %v6773_v6 = vld [vmem:[#allocation2 + $0xe0] sm:$0xf] }
 0x4cb   : > { %5226 = vmatmul.bf16.gmra.mxu1 %v6750_v63  ;;  %v9623_v63 = vld [vmem:[#allocation13_spill] sm:$0xff] }
 0x4d0   : > { %v4400_v15 = vpop.f32.mrf.mxu1 }
 0x4d1   : > { %v9223_v34 = vadd.f32 %v4400_v15, %v9102_v50  ;;  %v6774_v50 = vor.u32 %v7266_v3, %v6773_v6  ;;  %v9262_v3 = vpop.f32.mrf.mxu3 }
 0x4d8   : > { %v4403_v26 = vpop.f32.mrf.mxu1 }
 0x4d9   : > { %v9226_v23 = vadd.f32 %v4403_v26, %v9109_v43  ;;  %v9237_v43 = vpop.f32.mrf.mxu0 }
 0x4db   : > { %5231 = vmatmul.bf16.gmra.mxu1 %v6762_v59  ;;  %v9259_v59 = vpop.f32.mrf.mxu2 }
 0x4e0   : > { %v4405_v45 = vpop.f32.mrf.mxu1 }
 0x4e1   : > { %v9229_v54 = vadd.f32 %v4405_v45, %v9116_v42  ;;  %v9624_v45 = vld [vmem:[#allocation14_spill] sm:$0xff] }
 0x4e8   : > { %v4408_v8 = vpop.f32.mrf.mxu1 }
 0x4e9   : > { %v9232_v58 = vadd.f32 %v4408_v8, %v9123_v20  ;;  %v9243_v20 = vpop.f32.mrf.mxu0 }
 0x4eb   : > { %5236 = vmatmul.bf16.gmra.mxu1 %v6774_v50 }
 0x4f0   : > { %v4410_v46 = vpop.f32.mrf.mxu1 }
 0x4f1   : > { %v9235_v51 = vadd.f32 %v4410_v46, %v9130_v33  ;;  %v9248_v33 = vld [vmem:[%s9474_s4] ss:$0 sm:$0xff]  ;;  %v9257_v26 = vpop.f32.mrf.mxu0  ;;  %v6798_v46 = vor.u32 %v7272_v39, %v6797_v47 }
 0x4f8   : > { %v5202_v42 = vpop.f32.mrf.mxu1 }
 0x4f9   : > { %v5203_v17 = vadd.f32 %v5202_v42, %v9138_v52 }
 0x4fb   : > { %v5282_v18 = vadd.f32 %v5203_v17, %v9133_v37  ;;  %5241 = vmatmul.bf16.gmra.mxu1 %v6786_v49  ;;  %v9271_v17 = vpop.f32.mrf.mxu0  ;;  %v9273_v49 = vpop.f32.mrf.mxu2 }
 0x4fd   : > { %v5318_v27 = vadd.f32 %v9248_v33, %v5282_v18 }
 0x4ff   : > { %v5350_v15 = vadd.f32 %v5318_v27, %v9623_v63  ;;  %v6809_v63 = vld [vmem:[#allocation2 + $0x128] sm:$0xf] }
 0x500   : > { %v5204_v22 = vpop.f32.mrf.mxu1 }
 0x501   : > { %v5205_v35 = vadd.f32 %v5204_v22, %v9147_v5  ;;  %v5382_v50 = vmax.f32 %v5350_v15, 0.0  ;;  %v7275_v15 = vld [vmem:[#allocation2 + $0x130] sm:$0xf0] }
 0x503   : > { %v5283_v52 = vadd.f32 %v5205_v35, %v9142_v19 }
 0x505   : > { %v5319_v37 = vadd.f32 %v9248_v33, %v5283_v52 }
 0x507   : > { %v5351_v6 = vadd.f32 %v5319_v37, %v9624_v45  ;;  %v9626_v37 = vld [vmem:[#allocation18_spill] sm:$0xff] }
 0x508   : > { %v5207_v8 = vpop.f32.mrf.mxu1 }
 0x509   : > { %v5383_v5 = vmax.f32 %v5351_v6, 0.0  ;;  %v5208_v19 = vadd.f32 %v5207_v8, %v9156_v44  ;;  %v9277_v44 = vpop.f32.mrf.mxu3 }
 0x50b   : > { %v7319_v36 = vpack.c.bf16 %v5383_v5, %v5382_v50  ;;  %v5284_v9 = vadd.f32 %v5208_v19, %v9151_v13  ;;  %5246 = vmatmul.bf16.gmra.mxu1 %v6798_v46  ;;  %v9625_v13 = vld [vmem:[#allocation17_spill] sm:$0xff]  ;;  %v6810_v50 = vor.u32 %v7275_v15, %v6809_v63  ;;  %v9286_v5 = vpop.f32.mrf.mxu2  ;;  %v7278_v63 = vld [vmem:[#allocation2 + $0x148] sm:$0xf0]  ;;  %v5129_v15 = vadd.f32 %v9237_v43, %v9239_v32 }
 0x50d   : > { %7320 = vst [vmem:[%s9268_s15] sm:$0xff] %v7319_v36   ;;  %v5320_v18 = vadd.f32 %v9248_v33, %v5284_v9 }
 0x50f   : > { %v5352_v35 = vadd.f32 %v5320_v18, %v9625_v13 }
 0x510   : > { %v5209_v42 = vpop.f32.mrf.mxu1 }
 0x511   : > { %v5210_v22 = vadd.f32 %v5209_v42, %v9165_v53  ;;  %v5384_v45 = vmax.f32 %v5352_v35, 0.0  ;;  %v9284_v53 = vpop.f32.mrf.mxu0  ;;  %v9289_v46 = vpop.f32.mrf.mxu3 }
 0x513   : > { %v5285_v27 = vadd.f32 %v5210_v22, %v9160_v16  ;;  %v9297_v22 = vpop.f32.mrf.mxu2 }
 0x515   : > { %v5321_v52 = vadd.f32 %v9248_v33, %v5285_v27  ;;  %v9627_v27 = vld [vmem:[#allocation21_spill] sm:$0xff] }
 0x517   : > { %v5353_v47 = vadd.f32 %v5321_v52, %v9626_v37  ;;  %v6821_v52 = vld [vmem:[#allocation2 + $0x140] sm:$0xf]  ;;  %v9628_v37 = vld [vmem:[#allocation22_spill] sm:$0xff] }
 0x518   : > { %v5212_v39 = vpop.f32.mrf.mxu1 }
 0x519   : > { %v5385_v6 = vmax.f32 %v5353_v47, 0.0  ;;  %v5213_v8 = vadd.f32 %v5212_v39, %v9174_v55  ;;  %v9295_v55 = vpop.f32.mrf.mxu0  ;;  %v9301_v35 = vpop.f32.mrf.mxu3 }
 0x51b   : > { %v7324_v16 = vpack.c.bf16 %v5385_v6, %v5384_v45  ;;  %v5286_v19 = vadd.f32 %v5213_v8, %v9169_v28  ;;  %5251 = vmatmul.bf16.gmra.mxu1 %v6810_v50  ;;  %v6822_v6 = vor.u32 %v7278_v63, %v6821_v52  ;;  %v7281_v52 = vld [vmem:[#allocation2 + $0x160] sm:$0xf0] }
 0x51d   : > { %7396 = vst [vmem:[%s9268_s15 + $0x8] sm:$0xff] %v7324_v16   ;;  %v5322_v9 = vadd.f32 %v9248_v33, %v5286_v19  ;;  %v5131_v16 = vadd.f32 %v9243_v20, %v9250_v7  ;;  %v5134_v20 = vadd.f32 %v9257_v26, %v9262_v3  ;;  %v9630_v7 = vld [vmem:[#allocation26_spill] sm:$0xff]  ;;  %v5136_v3 = vadd.f32 %v9271_v17, %v9277_v44 }
 0x51e   : > { %v7288_v44 = vld [vmem:[#allocation2 + $0x19c] sm:$0xf] }
 0x51f   : > { %v5354_v13 = vadd.f32 %v5322_v9, %v9627_v27  ;;  %v9629_v27 = vld [vmem:[#allocation25_spill] sm:$0xff] }
 0x520   : > { %v5214_v36 = vpop.f32.mrf.mxu1 }
 0x521   : > { %v5215_v42 = vadd.f32 %v5214_v36, %v9182_v11  ;;  %v9310_v19 = vpop.f32.mrf.mxu0  ;;  %v9312_v36 = vpop.f32.mrf.mxu2 }
 0x522   : > { %v9314_v43 = vpop.f32.mrf.mxu3 }
 0x523   : > { %v5287_v18 = vadd.f32 %v5215_v42, %v9177_v56  ;;  %v5386_v56 = vmax.f32 %v5354_v13, 0.0 }
 0x525   : > { %v5323_v28 = vadd.f32 %v9248_v33, %v5287_v18 }
 0x527   : > { %v5355_v11 = vadd.f32 %v5323_v28, %v9628_v37 }
 0x528   : > { %v5217_v47 = vpop.f32.mrf.mxu1 }
 0x529   : > { %v5387_v39 = vmax.f32 %v5355_v11, 0.0  ;;  %v5218_v45 = vadd.f32 %v5217_v47, %v5129_v15  ;;  %v9323_v37 = vpop.f32.mrf.mxu0  ;;  %v9325_v11 = vpop.f32.mrf.mxu2 }
 0x52b   : > { %v7329_v8 = vpack.c.bf16 %v5387_v39, %v5386_v56  ;;  %5256 = vmatmul.bf16.gmra.mxu1 %v6822_v6  ;;  %v5288_v50 = vadd.f32 %v5218_v45, %v9186_v38  ;;  %v6833_v38 = vld [vmem:[#allocation2 + $0x158] sm:$0xf]  ;;  %v9327_v45 = vpop.f32.mrf.mxu3  ;;  %v4443_v6 = vadd.f32 %v9259_v59, %v9106_v12 }
 0x52c   : > { %v6834_v39 = vor.u32 %v7281_v52, %v6833_v38  ;;  %v9631_v38 = vld [vmem:[#allocation29_spill] sm:$0xff] }
 0x52d   : > { %7397 = vst [vmem:[%s9268_s15 + $0x10] sm:$0xff] %v7329_v8   ;;  %v5324_v9 = vadd.f32 %v9248_v33, %v5288_v50  ;;  %v6861_v50 = vld [vmem:[#allocation2 + $0x198] sm:$0xf] }
 0x52f   : > { %v5356_v13 = vadd.f32 %v5324_v9, %v9629_v27 }
 0x530   : > { %v5219_v32 = vpop.f32.mrf.mxu1 }
 0x531   : > { %v5220_v42 = vadd.f32 %v5219_v32, %v5131_v16  ;;  %v5388_v47 = vmax.f32 %v5356_v13, 0.0  ;;  %v7289_v16 = vld [vmem:[#allocation2 + $0x1a0] sm:$0xf0]  ;;  %v9337_v13 = vpop.f32.mrf.mxu0  ;;  %v9339_v12 = vpop.f32.mrf.mxu2 }
 0x532   : > { %v6862_v9 = vor.u32 %v7289_v16, %v6861_v50 }
 0x533   : > { %v5289_v18 = vadd.f32 %v5220_v42, %v9192_v61  ;;  %v4445_v42 = vadd.f32 %v9273_v49, %v9113_v40  ;;  %v5139_v49 = vadd.f32 %v9284_v53, %v9289_v46  ;;  %v5141_v53 = vadd.f32 %v9295_v55, %v9301_v35  ;;  %v9634_v35 = vld [vmem:[#allocation36_spill] sm:$0xff] }
 0x534   : > { %5098 = vmatmul.bf16.gmra.mxu3 %v6862_v9 }
 0x535   : > { %v5325_v28 = vadd.f32 %v9248_v33, %v5289_v18 }
 0x537   : > { %v5357_v63 = vadd.f32 %v5325_v28, %v9630_v7  ;;  %v5059_v28 = vpop.f32.mrf.mxu3  ;;  %v6845_v7 = vld [vmem:[#allocation2 + $0x170] sm:$0xf] }
 0x538   : > { %v5222_v15 = vpop.f32.mrf.mxu1 }
 0x539   : > { %v5389_v56 = vmax.f32 %v5357_v63, 0.0  ;;  %v5223_v61 = vadd.f32 %v5222_v15, %v5134_v20  ;;  %v6863_v20 = vld [vmem:[#allocation2 + $0x1a4] sm:$0xf0]  ;;  %v7284_v63 = vld [vmem:[#allocation2 + $0x178] sm:$0xf0]  ;;  %v5150_v50 = vpop.f32.mrf.mxu0  ;;  %v4459_v16 = vpop.f32.mrf.mxu2 }
 0x53a   : > { %v6866_v40 = vor.u32 %v7288_v44, %v6863_v20  ;;  %v9632_v15 = vld [vmem:[#allocation30_spill] sm:$0xff]  ;;  %v5144_v44 = vadd.f32 %v9310_v19, %v9314_v43  ;;  %v5146_v19 = vadd.f32 %v9323_v37, %v9327_v45  ;;  %v5149_v37 = vadd.f32 %v9337_v13, %v5059_v28 }
 0x53b   : > { %v7334_v8 = vpack.c.bf16 %v5389_v56, %v5388_v47  ;;  %5261 = vmatmul.bf16.gmra.mxu1 %v6834_v39  ;;  %v5290_v26 = vadd.f32 %v5223_v61, %v4443_v6  ;;  %v9636_v45 = vld [vmem:[#allocation42_spill] sm:$0xff]  ;;  %v4460_v13 = vadd.f32 %v4459_v16, %v9163_v4 }
 0x53c   : > { %5187 = vmatmul.bf16.gmra.mxu0 %v6866_v40 }
 0x53d   : > { %7398 = vst [vmem:[%s9268_s15 + $0x18] sm:$0xff] %v7334_v8   ;;  %v5326_v18 = vadd.f32 %v9248_v33, %v5290_v26  ;;  %v6846_v8 = vor.u32 %v7284_v63, %v6845_v7  ;;  %v4448_v26 = vadd.f32 %v9286_v5, %v9120_v60 }
 0x53f   : > { %v5358_v52 = vadd.f32 %v5326_v18, %v9631_v38  ;;  %v5061_v9 = vpop.f32.mrf.mxu3  ;;  %v9633_v38 = vld [vmem:[#allocation35_spill] sm:$0xff] }
 0x540   : > { %v5224_v32 = vpop.f32.mrf.mxu1 }
 0x541   : > { %v5225_v27 = vadd.f32 %v5224_v32, %v5136_v3  ;;  %v5390_v61 = vmax.f32 %v5358_v52, 0.0  ;;  %v6857_v52 = vld [vmem:[#allocation2 + $0x188] sm:$0xf]  ;;  %v5153_v20 = vpop.f32.mrf.mxu0  ;;  %v4462_v55 = vpop.f32.mrf.mxu2 }
 0x542   : > { %v4463_v4 = vadd.f32 %v4462_v55, %v9172_v14  ;;  %v9640_v55 = vld [vmem:[#allocation16_spill] sm:$0xff] }
 0x543   : > { %v5291_v59 = vadd.f32 %v5225_v27, %v4445_v42  ;;  %v4450_v42 = vadd.f32 %v9297_v22, %v9127_v48 }
 0x545   : > { %v5327_v17 = vadd.f32 %v9248_v33, %v5291_v59 }
 0x547   : > { %v5359_v47 = vadd.f32 %v5327_v17, %v9632_v15  ;;  %v7287_v17 = vld [vmem:[#allocation2 + $0x190] sm:$0xf0]  ;;  %v5064_v63 = vpop.f32.mrf.mxu3 }
 0x548   : > { %v5227_v56 = vpop.f32.mrf.mxu1  ;;  %v6858_v15 = vor.u32 %v7287_v17, %v6857_v52 }
 0x549   : > { %v5391_v39 = vmax.f32 %v5359_v47, 0.0  ;;  %v5228_v6 = vadd.f32 %v5227_v56, %v5139_v49  ;;  %v4453_v47 = vadd.f32 %v9312_v36, %v9136_v31  ;;  %v7290_v31 = vld [vmem:[#allocation2 + $0x1a8] sm:$0xf0]  ;;  %v9635_v36 = vld [vmem:[#allocation41_spill] sm:$0xff] }
 0x54b   : > { %v7339_v3 = vpack.c.bf16 %v5391_v39, %v5390_v61  ;;  %5266 = vmatmul.bf16.gmra.mxu1 %v6846_v8  ;;  %v5292_v32 = vadd.f32 %v5228_v6, %v4448_v26  ;;  %v4455_v39 = vadd.f32 %v9325_v11, %v9145_v24  ;;  %v5155_v6 = vpop.f32.mrf.mxu0  ;;  %v4464_v8 = vpop.f32.mrf.mxu2 }
 0x54d   : > { %7399 = vst [vmem:[%s9268_s15 + $0x20] sm:$0xff] %v7339_v3   ;;  %v5328_v18 = vadd.f32 %v9248_v33, %v5292_v32 }
 0x54f   : > { %v5360_v60 = vadd.f32 %v5328_v18, %v9633_v38  ;;  %v5066_v32 = vpop.f32.mrf.mxu3 }
 0x550   : > { %v5229_v46 = vpop.f32.mrf.mxu1 }
 0x551   : > { %v5230_v27 = vadd.f32 %v5229_v46, %v5141_v53  ;;  %v5392_v22 = vmax.f32 %v5360_v60, 0.0  ;;  %v6869_v46 = vld [vmem:[#allocation2 + $0x1a0] sm:$0xf] }
 0x553   : > { %v5293_v59 = vadd.f32 %v5230_v27, %v4450_v42  ;;  %v5158_v52 = vpop.f32.mrf.mxu0  ;;  %v4467_v17 = vpop.f32.mrf.mxu2 }
 0x555   : > { %v5329_v5 = vadd.f32 %v9248_v33, %v5293_v59  ;;  %v6870_v59 = vor.u32 %v7290_v31, %v6869_v46  ;;  %v5156_v46 = vadd.f32 %v5155_v6, %v5066_v32 }
 0x557   : > { %v5361_v7 = vadd.f32 %v5329_v5, %v9634_v35  ;;  %v4458_v5 = vadd.f32 %v9339_v12, %v9154_v41  ;;  %v5069_v35 = vpop.f32.mrf.mxu3 }
 0x558   : > { %v5232_v48 = vpop.f32.mrf.mxu1  ;;  %v5159_v14 = vadd.f32 %v5158_v52, %v5069_v35 }
 0x559   : > { %v5393_v40 = vmax.f32 %v5361_v7, 0.0  ;;  %v5233_v49 = vadd.f32 %v5232_v48, %v5144_v44  ;;  %v5151_v48 = vadd.f32 %v5150_v50, %v5061_v9 }
 0x55b   : > { %v7344_v56 = vpack.c.bf16 %v5393_v40, %v5392_v22  ;;  %5271 = vmatmul.bf16.gmra.mxu1 %v6858_v15  ;;  %v5294_v61 = vadd.f32 %v5233_v49, %v4453_v47  ;;  %v5160_v15 = vpop.f32.mrf.mxu0  ;;  %v4469_v47 = vpop.f32.mrf.mxu2 }
 0x55d   : > { %7400 = vst [vmem:[%s9268_s15 + $0x28] sm:$0xff] %v7344_v56   ;;  %v5330_v26 = vadd.f32 %v9248_v33, %v5294_v61  ;;  %v9637_v56 = vld [vmem:[#allocation47_spill] sm:$0xff] }
 0x55f   : > { %v5362_v42 = vadd.f32 %v5330_v26, %v9635_v36  ;;  %v5071_v61 = vpop.f32.mrf.mxu3 }
 0x560   : > { %v5234_v43 = vpop.f32.mrf.mxu1 }
 0x561   : > { %v5235_v3 = vadd.f32 %v5234_v43, %v5146_v19  ;;  %v5394_v11 = vmax.f32 %v5362_v42, 0.0  ;;  %v5154_v19 = vadd.f32 %v5153_v20, %v5064_v63  ;;  %v9638_v43 = vld [vmem:[#allocation48_spill] sm:$0xff] }
 0x563   : > { %v5295_v53 = vadd.f32 %v5235_v3, %v4455_v39  ;;  %v5163_v31 = vpop.f32.mrf.mxu0  ;;  %v4472_v36 = vpop.f32.mrf.mxu2 }
 0x565   : > { %v5331_v18 = vadd.f32 %v9248_v33, %v5295_v53 }
 0x567   : > { %v5363_v27 = vadd.f32 %v5331_v18, %v9636_v45  ;;  %v5074_v42 = vpop.f32.mrf.mxu3 }
 0x568   : > { %v5237_v24 = vpop.f32.mrf.mxu1 }
 0x569   : > { %v5395_v38 = vmax.f32 %v5363_v27, 0.0  ;;  %v5238_v60 = vadd.f32 %v5237_v24, %v5149_v37  ;;  %v4465_v37 = vadd.f32 %v4464_v8, %v9180_v29  ;;  %v9639_v27 = vld [vmem:[#allocation15_spill] sm:$0xff]  ;;  %v4468_v29 = vadd.f32 %v4467_v17, %v9189_v2  ;;  %v9642_v17 = vld [vmem:[#allocation20_spill] sm:$0xff] }
 0x56a   : > { %v5164_v2 = vadd.f32 %v5163_v31, %v5074_v42 }
 0x56b   : > { %v7349_v44 = vpack.c.bf16 %v5395_v38, %v5394_v11  ;;  %5276 = vmatmul.bf16.gmra.mxu1 %v6870_v59  ;;  %v5296_v7 = vadd.f32 %v5238_v60, %v4458_v5  ;;  %v5165_v6 = vpop.f32.mrf.mxu0  ;;  %v4474_v32 = vpop.f32.mrf.mxu2 }
 0x56d   : > { %7401 = vst [vmem:[%s9268_s15 + $0x30] sm:$0xff] %v7349_v44   ;;  %v5332_v28 = vadd.f32 %v9248_v33, %v5296_v7 }
 0x56f   : > { %v5364_v41 = vadd.f32 %v5332_v28, %v9637_v56  ;;  %v5076_v7 = vpop.f32.mrf.mxu3  ;;  %v4470_v28 = vadd.f32 %v4469_v47, %v9195_v57  ;;  %v4473_v57 = vadd.f32 %v4472_v36, %v9199_v0 }
 0x570   : > { %v5239_v22 = vpop.f32.mrf.mxu1 }
 0x571   : > { %v5240_v40 = vadd.f32 %v5239_v22, %v5151_v48  ;;  %v5396_v50 = vmax.f32 %v5364_v41, 0.0  ;;  %v5161_v22 = vadd.f32 %v5160_v15, %v5071_v61 }
 0x573   : > { %v5297_v49 = vadd.f32 %v5240_v40, %v4460_v13  ;;  %v5168_v40 = vpop.f32.mrf.mxu0 }
 0x575   : > { %v5333_v12 = vadd.f32 %v9248_v33, %v5297_v49  ;;  %v4477_v49 = vpop.f32.mrf.mxu2 }
 0x577   : > { %v5365_v39 = vadd.f32 %v5333_v12, %v9638_v43  ;;  %v5079_v41 = vpop.f32.mrf.mxu3  ;;  %v9641_v12 = vld [vmem:[#allocation19_spill] sm:$0xff] }
 0x578   : > { %v5242_v26 = vpop.f32.mrf.mxu1  ;;  %v5169_v0 = vadd.f32 %v5168_v40, %v5079_v41 }
 0x579   : > { %v5397_v9 = vmax.f32 %v5365_v39, 0.0  ;;  %v5243_v3 = vadd.f32 %v5242_v26, %v5154_v19 }
 0x57b   : > { %v7354_v16 = vpack.c.bf16 %v5397_v9, %v5396_v50  ;;  %v5298_v53 = vadd.f32 %v5243_v3, %v4463_v4  ;;  %v5170_v9 = vpop.f32.mrf.mxu0 }
 0x57d   : > { %7402 = vst [vmem:[%s9268_s15 + $0x38] sm:$0xff] %v7354_v16   ;;  %v5334_v20 = vadd.f32 %v9248_v33, %v5298_v53  ;;  %v4479_v3 = vpop.f32.mrf.mxu2  ;;  %v5166_v53 = vadd.f32 %v5165_v6, %v5076_v7 }
 0x57e   : > { %v4480_v7 = vadd.f32 %v4479_v3, %v9209_v21 }
 0x57f   : > { %v5366_v59 = vadd.f32 %v5334_v20, %v9639_v27  ;;  %v5081_v16 = vpop.f32.mrf.mxu3  ;;  %v9643_v20 = vld [vmem:[#allocation23_spill] sm:$0xff] }
 0x580   : > { %v5244_v18 = vpop.f32.mrf.mxu1 }
 0x581   : > { %v5245_v63 = vadd.f32 %v5244_v18, %v5156_v46  ;;  %v5398_v60 = vmax.f32 %v5366_v59, 0.0  ;;  %v4475_v18 = vadd.f32 %v4474_v32, %v9202_v62  ;;  %v9644_v59 = vld [vmem:[#allocation24_spill] sm:$0xff]  ;;  %v4478_v62 = vadd.f32 %v4477_v49, %v9206_v25 }
 0x582   : > { %v9646_v49 = vld [vmem:[#allocation28_spill] sm:$0xff] }
 0x583   : > { %v5299_v45 = vadd.f32 %v5245_v63, %v4465_v37  ;;  %v5173_v36 = vpop.f32.mrf.mxu0 }
 0x585   : > { %v5335_v24 = vadd.f32 %v9248_v33, %v5299_v45  ;;  %v4482_v27 = vpop.f32.mrf.mxu2 }
 0x586   : > { %v4483_v21 = vadd.f32 %v4482_v27, %v9213_v30 }
 0x587   : > { %v5367_v11 = vadd.f32 %v5335_v24, %v9640_v55 }
 0x588   : > { %v5247_v38 = vpop.f32.mrf.mxu1 }
 0x589   : > { %v5399_v5 = vmax.f32 %v5367_v11, 0.0  ;;  %v5248_v44 = vadd.f32 %v5247_v38, %v5159_v14  ;;  %v5084_v14 = vpop.f32.mrf.mxu3 }
 0x58a   : > { %v5174_v25 = vadd.f32 %v5173_v36, %v5084_v14 }
 0x58b   : > { %v7359_v8 = vpack.c.bf16 %v5399_v5, %v5398_v60  ;;  %v5300_v48 = vadd.f32 %v5248_v44, %v4468_v29  ;;  %v5171_v5 = vadd.f32 %v5170_v9, %v5081_v16  ;;  %v5175_v29 = vpop.f32.mrf.mxu0 }
 0x58d   : > { %7403 = vst [vmem:[%s9268_s15 + $0x40] sm:$0xff] %v7359_v8   ;;  %v5336_v52 = vadd.f32 %v9248_v33, %v5300_v48  ;;  %v4484_v8 = vpop.f32.mrf.mxu2 }
 0x58f   : > { %v5368_v19 = vadd.f32 %v5336_v52, %v9641_v12  ;;  %v9645_v52 = vld [vmem:[#allocation27_spill] sm:$0xff] }
 0x590   : > { %v5249_v13 = vpop.f32.mrf.mxu1 }
 0x591   : > { %v5250_v35 = vadd.f32 %v5249_v13, %v5161_v22  ;;  %v5400_v15 = vmax.f32 %v5368_v19, 0.0  ;;  %v5086_v13 = vpop.f32.mrf.mxu3 }
 0x593   : > { %v5301_v56 = vadd.f32 %v5250_v35, %v4470_v28 }
 0x595   : > { %v5337_v43 = vadd.f32 %v9248_v33, %v5301_v56 }
 0x597   : > { %v5369_v39 = vadd.f32 %v5337_v43, %v9642_v17  ;;  %v4487_v17 = vpop.f32.mrf.mxu2 }
 0x598   : > { %v5252_v26 = vpop.f32.mrf.mxu1 }
 0x599   : > { %v5401_v61 = vmax.f32 %v5369_v39, 0.0  ;;  %v5253_v50 = vadd.f32 %v5252_v26, %v5164_v2  ;;  %v5178_v2 = vpop.f32.mrf.mxu0  ;;  %v5089_v26 = vpop.f32.mrf.mxu3 }
 0x59b   : > { %v7364_v47 = vpack.c.bf16 %v5401_v61, %v5400_v15  ;;  %v5302_v4 = vadd.f32 %v5253_v50, %v4473_v57  ;;  %v5176_v61 = vadd.f32 %v5175_v29, %v5086_v13  ;;  %v4485_v57 = vadd.f32 %v4484_v8, %v9216_v10 }
 0x59c   : > { %v4488_v10 = vadd.f32 %v4487_v17, %v9220_v1 }
 0x59d   : > { %7404 = vst [vmem:[%s9268_s15 + $0x48] sm:$0xff] %v7364_v47   ;;  %v5338_v31 = vadd.f32 %v9248_v33, %v5302_v4 }
 0x59f   : > { %v5370_v63 = vadd.f32 %v5338_v31, %v9643_v20  ;;  %v4489_v16 = vpop.f32.mrf.mxu2  ;;  %v5179_v31 = vadd.f32 %v5178_v2, %v5089_v26 }
 0x5a0   : > { %v5254_v46 = vpop.f32.mrf.mxu1 }
 0x5a1   : > { %v5255_v42 = vadd.f32 %v5254_v46, %v5166_v53  ;;  %v5402_v11 = vmax.f32 %v5370_v63, 0.0  ;;  %v5180_v4 = vpop.f32.mrf.mxu0  ;;  %v9647_v53 = vld [vmem:[#allocation31_spill] sm:$0xff] }
 0x5a3   : > { %v5303_v37 = vadd.f32 %v5255_v42, %v4475_v18  ;;  %v5091_v18 = vpop.f32.mrf.mxu3  ;;  %v9648_v42 = vld [vmem:[#allocation32_spill] sm:$0xff] }
 0x5a5   : > { %v5339_v45 = vadd.f32 %v9248_v33, %v5303_v37 }
 0x5a7   : > { %v5371_v24 = vadd.f32 %v5339_v45, %v9644_v59  ;;  %v5181_v59 = vadd.f32 %v5180_v4, %v5091_v18  ;;  %v4492_v14 = vpop.f32.mrf.mxu2 }
 0x5a8   : > { %v5257_v55 = vpop.f32.mrf.mxu1 }
 0x5a9   : > { %v5403_v38 = vmax.f32 %v5371_v24, 0.0  ;;  %v5258_v6 = vadd.f32 %v5257_v55, %v5169_v0  ;;  %v5183_v24 = vpop.f32.mrf.mxu0 }
 0x5ab   : > { %v7369_v32 = vpack.c.bf16 %v5403_v38, %v5402_v11  ;;  %v5304_v60 = vadd.f32 %v5258_v6, %v4478_v62  ;;  %v5094_v55 = vpop.f32.mrf.mxu3  ;;  %v4490_v38 = vadd.f32 %v4489_v16, %v9223_v34  ;;  %v4493_v34 = vadd.f32 %v4492_v14, %v9226_v23 }
 0x5ac   : > { %v5184_v1 = vadd.f32 %v5183_v24, %v5094_v55 }
 0x5ad   : > { %7405 = vst [vmem:[%s9268_s15 + $0x50] sm:$0xff] %v7369_v32   ;;  %v5340_v48 = vadd.f32 %v9248_v33, %v5304_v60  ;;  %v9649_v60 = vld [vmem:[#allocation37_spill] sm:$0xff] }
 0x5af   : > { %v5372_v35 = vadd.f32 %v5340_v48, %v9645_v52  ;;  %v4494_v52 = vpop.f32.mrf.mxu2 }
 0x5b0   : > { %v5259_v44 = vpop.f32.mrf.mxu1 }
 0x5b1   : > { %v5260_v22 = vadd.f32 %v5259_v44, %v5171_v5  ;;  %v5404_v12 = vmax.f32 %v5372_v35, 0.0  ;;  %v5185_v48 = vpop.f32.mrf.mxu0 }
 0x5b3   : > { %v5305_v28 = vadd.f32 %v5260_v22, %v4480_v7  ;;  %v9650_v7 = vld [vmem:[#allocation38_spill] sm:$0xff]  ;;  %v5096_v35 = vpop.f32.mrf.mxu3 }
 0x5b5   : > { %v5341_v40 = vadd.f32 %v9248_v33, %v5305_v28 }
 0x5b7   : > { %v5373_v56 = vadd.f32 %v5341_v40, %v9646_v49  ;;  %v5186_v49 = vadd.f32 %v5185_v48, %v5096_v35  ;;  %v4497_v17 = vpop.f32.mrf.mxu2 }
 0x5b8   : > { %v5262_v41 = vpop.f32.mrf.mxu1 }
 0x5b9   : > { %v5405_v19 = vmax.f32 %v5373_v56, 0.0  ;;  %v5263_v43 = vadd.f32 %v5262_v41, %v5174_v25  ;;  %v4495_v41 = vadd.f32 %v4494_v52, %v9229_v54 }
 0x5bb   : > { %v7374_v39 = vpack.c.bf16 %v5405_v19, %v5404_v12  ;;  %v5306_v15 = vadd.f32 %v5263_v43, %v4483_v21  ;;  %v5099_v43 = vpop.f32.mrf.mxu3  ;;  %v5188_v21 = vpop.f32.mrf.mxu0 }
 0x5bd   : > { %7406 = vst [vmem:[%s9268_s15 + $0x58] sm:$0xff] %v7374_v39   ;;  %v5342_v47 = vadd.f32 %v9248_v33, %v5306_v15  ;;  %v9651_v39 = vld [vmem:[#allocation43_spill] sm:$0xff]  ;;  %v5189_v15 = vadd.f32 %v5188_v21, %v5099_v43 }
 0x5bf   : > { %v5374_v46 = vadd.f32 %v5342_v47, %v9647_v53 }
 0x5c0   : > { %v5264_v50 = vpop.f32.mrf.mxu1 }
 0x5c1   : > { %v5265_v9 = vadd.f32 %v5264_v50, %v5176_v61  ;;  %v5406_v63 = vmax.f32 %v5374_v46, 0.0  ;;  %v9652_v61 = vld [vmem:[#allocation44_spill] sm:$0xff] }
 0x5c3   : > { %v5307_v3 = vadd.f32 %v5265_v9, %v4485_v57  ;;  %v5101_v16 = vpop.f32.mrf.mxu3  ;;  %v5190_v53 = vpop.f32.mrf.mxu0 }
 0x5c4   : > { %v5191_v18 = vadd.f32 %v5190_v53, %v5101_v16 }
 0x5c5   : > { %v5343_v30 = vadd.f32 %v9248_v33, %v5307_v3  ;;  %v4498_v3 = vadd.f32 %v4497_v17, %v9232_v58  ;;  %v9653_v58 = vld [vmem:[#allocation49_spill] sm:$0xff] }
 0x5c7   : > { %v5375_v37 = vadd.f32 %v5343_v30, %v9648_v42  ;;  %v4499_v30 = vpop.f32.mrf.mxu2 }
 0x5c8   : > { %v5267_v20 = vpop.f32.mrf.mxu1  ;;  %v4500_v42 = vadd.f32 %v4499_v30, %v9235_v51 }
 0x5c9   : > { %v5407_v45 = vmax.f32 %v5375_v37, 0.0  ;;  %v5268_v0 = vadd.f32 %v5267_v20, %v5179_v31 }
 0x5cb   : > { %v7379_v36 = vpack.c.bf16 %v5407_v45, %v5406_v63  ;;  %v5308_v27 = vadd.f32 %v5268_v0, %v4488_v10  ;;  %v9654_v10 = vld [vmem:[#allocation50_spill] sm:$0xff] }
 0x5cd   : > { %7407 = vst [vmem:[%s9268_s15 + $0x60] sm:$0xff] %v7379_v36   ;;  %v5344_v6 = vadd.f32 %v9248_v33, %v5308_v27 }
 0x5cf   : > { %v5376_v5 = vadd.f32 %v5344_v6, %v9649_v60 }
 0x5d0   : > { %v5269_v11 = vpop.f32.mrf.mxu1 }
 0x5d1   : > { %v5270_v62 = vadd.f32 %v5269_v11, %v5181_v59  ;;  %v5408_v22 = vmax.f32 %v5376_v5, 0.0 }
 0x5d3   : > { %v5309_v32 = vadd.f32 %v5270_v62, %v4490_v38 }
 0x5d5   : > { %v5345_v44 = vadd.f32 %v9248_v33, %v5309_v32 }
 0x5d7   : > { %v5377_v29 = vadd.f32 %v5345_v44, %v9650_v7 }
 0x5d8   : > { %v5272_v8 = vpop.f32.mrf.mxu1 }
 0x5d9   : > { %v5409_v13 = vmax.f32 %v5377_v29, 0.0  ;;  %v5273_v28 = vadd.f32 %v5272_v8, %v5184_v1 }
 0x5db   : > { %v7384_v40 = vpack.c.bf16 %v5409_v13, %v5408_v22  ;;  %v5310_v25 = vadd.f32 %v5273_v28, %v4493_v34 }
 0x5dd   : > { %7408 = vst [vmem:[%s9268_s15 + $0x68] sm:$0xff] %v7384_v40   ;;  %v5346_v12 = vadd.f32 %v9248_v33, %v5310_v25 }
 0x5df   : > { %v5378_v26 = vadd.f32 %v5346_v12, %v9651_v39 }
 0x5e0   : > { %v5274_v56 = vpop.f32.mrf.mxu1 }
 0x5e1   : > { %v5275_v19 = vadd.f32 %v5274_v56, %v5186_v49  ;;  %v5410_v47 = vmax.f32 %v5378_v26, 0.0 }
 0x5e3   : > { %v5311_v2 = vadd.f32 %v5275_v19, %v4495_v41 }
 0x5e5   : > { %v5347_v23 = vadd.f32 %v9248_v33, %v5311_v2 }
 0x5e7   : > { %v5379_v50 = vadd.f32 %v5347_v23, %v9652_v61 }
 0x5e8   : > { %v5277_v57 = vpop.f32.mrf.mxu1 }
 0x5e9   : > { %v5411_v9 = vmax.f32 %v5379_v50, 0.0  ;;  %v5278_v54 = vadd.f32 %v5277_v57, %v5189_v15 }
 0x5eb   : > { %v7389_v4 = vpack.c.bf16 %v5411_v9, %v5410_v47  ;;  %v5312_v46 = vadd.f32 %v5278_v54, %v4498_v3 }
 0x5ed   : > { %7409 = vst [vmem:[%s9268_s15 + $0x70] sm:$0xff] %v7389_v4   ;;  %v5348_v37 = vadd.f32 %v9248_v33, %v5312_v46 }
 0x5ef   : > { %v5380_v45 = vadd.f32 %v5348_v37, %v9653_v58 }
 0x5f0   : > { %v5279_v31 = vpop.f32.mrf.mxu1 }
 0x5f1   : > { %v5280_v20 = vadd.f32 %v5279_v31, %v5191_v18  ;;  %v5412_v51 = vmax.f32 %v5380_v45, 0.0 }
 0x5f3   : > { %v5313_v63 = vadd.f32 %v5280_v20, %v4500_v42 }
 0x5f5   : > { %v5349_v0 = vadd.f32 %v9248_v33, %v5313_v63 }
 0x5f7   : > { %v5381_v36 = vadd.f32 %v5349_v0, %v9654_v10 }
 0x5f9   : > { %v5413_v27 = vmax.f32 %v5381_v36, 0.0 }
 0x5fb   : > { %v7394_v59 = vpack.c.bf16 %v5413_v27, %v5412_v51 }
 0x5fd   : > { %7410 = vst [vmem:[%s9268_s15 + $0x78] sm:$0xff] %v7394_v59  }
 0x5fe   : > { %7619 = shalt.err (!%p7616_p10)
}
 0x5ff   : > { %s7669_s8 = smov 64   ;;  %s7670_s13 = smov 4  }
 0x600   : > { %7437 = dma.vmem_to_hbm [thread:$0]  (%p7773_p3), %s5492_s26, 2048, %s5494_s10, %s5479_s22, %s7669_s8, %s7669_s8, %s7670_s13  }
 0x601 PF: > { %s5508_s15 = sand.u32 1, %s7650_s18   ;;  %p9655_p12 = scmp.ge.s32.totalorder %s7662_s21, 2 }
 0x602   : > { %s5509_s27 = scalar_lea.sflag [#allocation5], %s5508_s15 }
 0x603   : > { %p7451_p13 = pnand %p9655_p12, %p7736_p6 }
 0x605   : > { %p7452_p0 = pneg %p7451_p13 }
 0x607   : > { %7645 = dma.done.wait (%p7452_p0), %s5509_s27, 2048  }
 0x608   : > { %7647 = vsyncadd (%p7452_p0), %s5509_s27, 4294965248  ;;  %p19_p5 = scmp.ge.s32.totalorder %s7763_s14, 4   ;;  %s9656_s18 = smov %s7654_s19 }
 0x609   : > { %s9657_s19 = smov %s7658_s20  ;;  %s9658_s20 = smov %s7779_s23 }
 0x60a   : > { %s9659_s21 = smov %s7763_s14  ;;  %21 = sbr.rel (!%p19_p5) target bundleno = 6 (0x6), region = 97 }
 0x60f   :  { %5515 = vsyncpa [#allocation4], 1 }
 0x610   :  { %5517 = vsyncpa [#allocation4 + $0x1], 1 }
 0x611   :  { %5518 = vsyncpa [#allocation7], 1 }
 0x612   :  { %5519 = vsyncpa [#allocation5], 1 }
 0x613   :  { %5521 = vsyncpa [#allocation5 + $0x1], 1 }

</bundles_post_ra>
